<compile_context>
chip_gen: v6e
topology: v6e:2x2x1
jax: 0.10.0
libtpu: 0.0.40
codegen_flags: <defaults>
</compile_context>

<pallas_src>
from functools import partial

import numpy as np
import jax
import jax.numpy as jnp
from jax.experimental import pallas as pl
from jax.experimental.pallas import tpu as pltpu


# Column offset at which the image interior is stored inside the padded VMEM scratch.
# 8 keeps the interior store sublane-aligned; the 7 dx shifts are done with pltpu.roll
# (XLU) followed by an ALIGNED interior slice, so no unaligned slices are materialized.
_PADL = 8


def convnext_block_kernel(x_ref, wdw_ref, bdw_ref, nw_ref, nb_ref,
                          w1_ref, b1_ref, w2_ref, b2_ref,
                          o_ref, pad_ref, *, H, W, C, eps, compute_dtype, row_block):
    Hp = H + 6
    Wpad = W + 2 * _PADL

    # x_ref block: (1, H, W, C) — one batch element, NHWC, unpadded.
    x0 = x_ref[0].astype(jnp.float32)                     # residual + conv input

    # --- zero only the halo bands; the interior is overwritten right below -------
    # (re-done every grid step: the scratch is per-core, and with a "parallel" batch
    #  axis a one-time init under pl.when(program_id==0) would miss the second core.)
    zrow = jnp.zeros((3, Wpad, C), jnp.float32)
    pad_ref[0:3, :, :] = zrow                             # top 3 rows
    pad_ref[3 + H:Hp, :, :] = zrow                        # bottom 3 rows
    zcol = jnp.zeros((H, _PADL, C), jnp.float32)
    pad_ref[3:3 + H, 0:_PADL, :] = zcol                   # left band (sublane-aligned)
    pad_ref[3:3 + H, _PADL + W:Wpad, :] = zcol            # right band (aligned if W%8==0)
    pad_ref[3:3 + H, _PADL:_PADL + W, :] = x0             # aligned interior store

    # --- depthwise 7x7 conv: 7 sublane rolls (XLU) + MAC on the VPU ---------------
    padded = pad_ref[...]                                 # (Hp, Wpad, C) f32, one load
    wdw = wdw_ref[...].astype(compute_dtype)              # (7, 7, C)
    acc = jnp.broadcast_to(bdw_ref[0].astype(jnp.float32), (H, W, C))   # init with bias
    for dx in range(7):
        sh = (3 - dx) % Wpad
        shifted = pltpu.roll(padded, shift=sh, axis=1) if sh else padded
        # aligned interior window; zero halo makes the +/-3 column taps correct.
        win = shifted[:, _PADL:_PADL + W, :].astype(compute_dtype)      # (Hp, W, C)
        part = win[0:H] * wdw[0, dx]                      # dy offsets = free outer slices
        for dy in range(1, 7):
            part = part + win[dy:dy + H] * wdw[dy, dx]
        acc = acc + part.astype(jnp.float32)              # f32 accumulation across dx

    # --- GroupNorm(num_groups=1): centered two-pass stats, folded affine ---------
    inv_n = 1.0 / float(H * W * C)
    mean = jnp.sum(acc) * inv_n
    centered = acc - mean
    var = jnp.sum(centered * centered) * inv_n            # biased variance (PyTorch)
    rstd = jax.lax.rsqrt(var + eps)
    scale = nw_ref[0] * rstd                              # (C,)
    xn = centered * scale + nb_ref[0]                     # one FMA per element

    # --- pwconv1 -> GELU(tanh) -> pwconv2 on the MXU (bf16, f32 acc), chunked -----
    w1 = w1_ref[...]                                      # (C, 4C)  bf16
    w2 = w2_ref[...]                                      # (4C, C)  bf16 (gamma folded)
    b1 = b1_ref[0]                                        # (4C,)    f32
    b2 = b2_ref[0]                                        # (C,)     f32 (gamma folded)
    for r0 in range(0, H, row_block):
        rb = min(row_block, H - r0)
        # (rb, W, C) -> (rb*W, C) is layout-free when W % 8 == 0 (see TODO above).
        xc = xn[r0:r0 + rb].reshape(rb * W, C).astype(jnp.bfloat16)
        h = jnp.dot(xc, w1, preferred_element_type=jnp.float32) + b1
        h = jax.nn.gelu(h.astype(compute_dtype), approximate=True)      # tanh GELU (EUP)
        yc = jnp.dot(h.astype(jnp.bfloat16), w2, preferred_element_type=jnp.float32) + b2
        # residual (drop_path == 0.0 => identity); layer-scale gamma pre-folded into w2/b2.
        yc = yc.reshape(rb, W, C) + x0[r0:r0 + rb]
        o_ref[0, r0:r0 + rb] = yc.astype(o_ref.dtype)


def _compute_dtype():
    """bf16 VPU/EUP math on v6e/v7x; f32 on v5e and older (no bf16 VALU/EUP there)."""
    try:
        kind = jax.devices()[0].device_kind.lower()
    except Exception:
        return jnp.float32
    if any(tag in kind for tag in ("v2", "v3", "v4", "v5")):
        return jnp.float32
    return jnp.bfloat16


def _vmem_limit_bytes():
    """min(64 MiB, 3/4 physical VMEM): 64 MiB on v5e/v6e (128 MiB), ~48 MiB on v7x (64 MiB)."""
    cap = None
    try:
        cap = getattr(pltpu.get_tpu_info(), "vmem_capacity_bytes", None)
    except Exception:
        cap = None
    if cap:
        return min(64 * 1024 * 1024, int(cap) * 3 // 4)
    return 64 * 1024 * 1024


def convnext_block(x_nchw, params, eps=1e-6):
    """Pallas implementation of Block.forward. Input/output are NCHW (PyTorch layout)."""
    wdw, bdw, nw, nb, w1, b1, w2, b2, gamma = params
    N, C, H, W = x_nchw.shape
    Hp = H + 6
    Wpad = W + 2 * _PADL

    # NHWC so C sits on the lane axis and the 1x1 convs are plain (rows, C) matmuls.
    # TODO(synk): keep activations NHWC end-to-end in a real model so these two
    # transposes (full HBM passes) disappear entirely.
    x = jnp.transpose(x_nchw, (0, 2, 3, 1))

    # Fold layer-scale gamma into pwconv2, and cast MXU operands to bf16 (once).
    w1b = w1.astype(jnp.bfloat16)                          # (C, 4C)
    w2g = (w2 * gamma).astype(jnp.bfloat16)                # (4C, C) * (1, C)
    b2g = b2 * gamma                                       # (1, C), f32

    row_block = max(1, min(H, 512 // max(W, 1)))           # ~512 flattened rows per chunk
    kernel = partial(convnext_block_kernel, H=H, W=W, C=C, eps=eps,
                     compute_dtype=_compute_dtype(), row_block=row_block)

    out_nhwc = pl.pallas_call(
        kernel,
        out_shape=jax.ShapeDtypeStruct((N, H, W, C), x.dtype),
        grid=(N,),
        in_specs=[
            pl.BlockSpec((1, H, W, C), lambda n: (n, 0, 0, 0)),   # input (unpadded)
            pl.BlockSpec((7, 7, C), lambda n: (0, 0, 0)),         # dwconv weight (f32)
            pl.BlockSpec((1, C), lambda n: (0, 0)),               # dwconv bias
            pl.BlockSpec((1, C), lambda n: (0, 0)),               # norm weight
            pl.BlockSpec((1, C), lambda n: (0, 0)),               # norm bias
            pl.BlockSpec((C, 4 * C), lambda n: (0, 0)),           # pwconv1 weight (bf16)
            pl.BlockSpec((1, 4 * C), lambda n: (0, 0)),           # pwconv1 bias (f32)
            pl.BlockSpec((4 * C, C), lambda n: (0, 0)),           # pwconv2 weight * gamma (bf16)
            pl.BlockSpec((1, C), lambda n: (0, 0)),               # pwconv2 bias * gamma (f32)
        ],
        out_specs=pl.BlockSpec((1, H, W, C), lambda n: (n, 0, 0, 0)),
        scratch_shapes=[pltpu.VMEM((Hp, Wpad, C), jnp.float32)],  # zero-halo image
        compiler_params=pltpu.CompilerParams(
            dimension_semantics=("parallel",),
            vmem_limit_bytes=_vmem_limit_bytes(),
        ),
    )(x, wdw, bdw, nw, nb, w1b, b1, w2g, b2g)

    return jnp.transpose(out_nhwc, (0, 3, 1, 2))           # back to NCHW


def reference_block(x_nchw, params, eps=1e-6):
    """Pure-JAX reference matching the PyTorch forward (exact-erf GELU, f32)."""
    wdw, bdw, nw, nb, w1, b1, w2, b2, gamma = params
    N, C, H, W = x_nchw.shape
    wd = jnp.transpose(wdw, (2, 0, 1))[:, None, :, :]      # (C, 1, 7, 7) OIHW
    y = jax.lax.conv_general_dilated(
        x_nchw, wd, window_strides=(1, 1), padding=[(3, 3), (3, 3)],
        dimension_numbers=("NCHW", "OIHW", "NCHW"), feature_group_count=C)
    y = y + bdw[0][None, :, None, None]
    mean = jnp.mean(y, axis=(1, 2, 3), keepdims=True)
    var = jnp.mean((y - mean) ** 2, axis=(1, 2, 3), keepdims=True)
    y = (y - mean) / jnp.sqrt(var + eps)
    y = y * nw[0][None, :, None, None] + nb[0][None, :, None, None]
    t = jnp.transpose(y, (0, 2, 3, 1))
    t = t @ w1 + b1[0]
    t = jax.nn.gelu(t, approximate=False)
    t = t @ w2 + b2[0]
    t = t * gamma[0]
    return x_nchw + jnp.transpose(t, (0, 3, 1, 2))


def init_params(key, dim, layer_scale_init_value=1e-6):
    """Deterministic synthetic params with the shapes implied by Block.__init__."""
    ks = jax.random.split(key, 8)
    wdw = 0.1 * jax.random.normal(ks[0], (7, 7, dim), jnp.float32)       # dwconv weight
    bdw = 0.1 * jax.random.normal(ks[1], (1, dim), jnp.float32)          # dwconv bias
    nw = 1.0 + 0.1 * jax.random.normal(ks[2], (1, dim), jnp.float32)     # GroupNorm weight
    nb = 0.1 * jax.random.normal(ks[3], (1, dim), jnp.float32)           # GroupNorm bias
    w1 = 0.1 * jax.random.normal(ks[4], (dim, 4 * dim), jnp.float32)     # pwconv1 (1x1)
    b1 = 0.1 * jax.random.normal(ks[5], (1, 4 * dim), jnp.float32)
    w2 = 0.1 * jax.random.normal(ks[6], (4 * dim, dim), jnp.float32)     # pwconv2 (1x1)
    b2 = 0.1 * jax.random.normal(ks[7], (1, dim), jnp.float32)
    gamma = layer_scale_init_value * jnp.ones((1, dim), jnp.float32)     # layer scale
    return (wdw, bdw, nw, nb, w1, b1, w2, b2, gamma)


if __name__ == "__main__":
    N, C, H, W = 2, 4, 16, 16
    key = jax.random.PRNGKey(0)
    kx, kp = jax.random.split(key)
    x = jax.random.normal(kx, (N, C, H, W), jnp.float32)   # NCHW, like PyTorch
    # use a larger gamma init than 1e-6 so the layer-scale path is actually exercised
    params = init_params(kp, C, layer_scale_init_value=0.5)

    out = convnext_block(x, params)
    out = jax.block_until_ready(out)

    ref = reference_block(x, params)
    # tolerance covers: bf16 MXU pwconvs, tanh-GELU, and (on v6e/v7x) bf16 dwconv MACs
    np.testing.assert_allclose(np.asarray(out), np.asarray(ref), rtol=2e-2, atol=2e-2)

    print("KERNEL_OK")
</pallas_src>

<mosaic_0001>
module attributes {stable_mosaic.version = 11 : i64} {
  func.func @convnext_block_kernel(%arg0: i32, %arg1: memref<1x16x16x4xf32, #tpu.memory_space<vmem>>, %arg2: memref<7x7x4xf32, #tpu.memory_space<vmem>>, %arg3: memref<1x4xf32, #tpu.memory_space<vmem>>, %arg4: memref<1x4xf32, #tpu.memory_space<vmem>>, %arg5: memref<1x4xf32, #tpu.memory_space<vmem>>, %arg6: memref<4x16xbf16, #tpu.memory_space<vmem>>, %arg7: memref<1x16xf32, #tpu.memory_space<vmem>>, %arg8: memref<16x4xbf16, #tpu.memory_space<vmem>>, %arg9: memref<1x4xf32, #tpu.memory_space<vmem>>, %arg10: memref<1x16x16x4xf32, #tpu.memory_space<vmem>>, %arg11: memref<22x32x4xf32, #tpu.memory_space<vmem>>) attributes {dimension_semantics = [#tpu.dimension_semantics<parallel>], iteration_bounds = array<i64: 2>, scalar_prefetch = 0 : i64, scratch_operands = 1 : i64, tpu.core_type = #tpu.core_type<tc>, window_params = [{transform_indices = @transform_0, window_bounds = array<i64: 1, 16, 16, 4>}, {pipeline_mode = #tpu.pipeline_mode<synchronous>, transform_indices = @transform_1, window_bounds = array<i64: 7, 7, 4>}, {pipeline_mode = #tpu.pipeline_mode<synchronous>, transform_indices = @transform_2, window_bounds = array<i64: 1, 4>}, {pipeline_mode = #tpu.pipeline_mode<synchronous>, transform_indices = @transform_3, window_bounds = array<i64: 1, 4>}, {pipeline_mode = #tpu.pipeline_mode<synchronous>, transform_indices = @transform_4, window_bounds = array<i64: 1, 4>}, {pipeline_mode = #tpu.pipeline_mode<synchronous>, transform_indices = @transform_5, window_bounds = array<i64: 4, 16>}, {pipeline_mode = #tpu.pipeline_mode<synchronous>, transform_indices = @transform_6, window_bounds = array<i64: 1, 16>}, {pipeline_mode = #tpu.pipeline_mode<synchronous>, transform_indices = @transform_7, window_bounds = array<i64: 16, 4>}, {pipeline_mode = #tpu.pipeline_mode<synchronous>, transform_indices = @transform_8, window_bounds = array<i64: 1, 4>}, {transform_indices = @transform_9, window_bounds = array<i64: 1, 16, 16, 4>}]} {
    %c0 = arith.constant 0 : index
    %c0_0 = arith.constant 0 : index
    %c0_1 = arith.constant 0 : index
    %c0_2 = arith.constant 0 : index
    %0 = vector.load %arg1[%c0, %c0_0, %c0_1, %c0_2] : memref<1x16x16x4xf32, #tpu.memory_space<vmem>>, vector<1x16x16x4xf32>
    %1 = vector.shape_cast %0 : vector<1x16x16x4xf32> to vector<16x16x4xf32>
    %cst = arith.constant 0.000000e+00 : f32
    %2 = vector.broadcast %cst : f32 to vector<3x32x4xf32>
    %c0_3 = arith.constant 0 : index
    %c0_4 = arith.constant 0 : index
    %c0_5 = arith.constant 0 : index
    %3 = vector.load %arg11[%c0_3, %c0_4, %c0_5] : memref<22x32x4xf32, #tpu.memory_space<vmem>>, vector<3x32x4xf32>
    tpu.vector_store %arg11[%c0_3, %c0_4, %c0_5], %2 {strides = array<i32>} : memref<22x32x4xf32, #tpu.memory_space<vmem>>, vector<3x32x4xf32>,
    %c19 = arith.constant 19 : index
    %c0_6 = arith.constant 0 : index
    %c0_7 = arith.constant 0 : index
    %4 = vector.load %arg11[%c19, %c0_6, %c0_7] : memref<22x32x4xf32, #tpu.memory_space<vmem>>, vector<3x32x4xf32>
    tpu.vector_store %arg11[%c19, %c0_6, %c0_7], %2 {strides = array<i32>} : memref<22x32x4xf32, #tpu.memory_space<vmem>>, vector<3x32x4xf32>,
    %cst_8 = arith.constant 0.000000e+00 : f32
    %5 = vector.broadcast %cst_8 : f32 to vector<16x8x4xf32>
    %c3 = arith.constant 3 : index
    %c0_9 = arith.constant 0 : index
    %c0_10 = arith.constant 0 : index
    %6 = vector.load %arg11[%c3, %c0_9, %c0_10] : memref<22x32x4xf32, #tpu.memory_space<vmem>>, vector<16x8x4xf32>
    tpu.vector_store %arg11[%c3, %c0_9, %c0_10], %5 {strides = array<i32>} : memref<22x32x4xf32, #tpu.memory_space<vmem>>, vector<16x8x4xf32>,
    %c3_11 = arith.constant 3 : index
    %c24 = arith.constant 24 : index
    %c0_12 = arith.constant 0 : index
    %7 = vector.load %arg11[%c3_11, %c24, %c0_12] : memref<22x32x4xf32, #tpu.memory_space<vmem>>, vector<16x8x4xf32>
    tpu.vector_store %arg11[%c3_11, %c24, %c0_12], %5 {strides = array<i32>} : memref<22x32x4xf32, #tpu.memory_space<vmem>>, vector<16x8x4xf32>,
    %c3_13 = arith.constant 3 : index
    %c8 = arith.constant 8 : index
    %c0_14 = arith.constant 0 : index
    %8 = vector.load %arg11[%c3_13, %c8, %c0_14] : memref<22x32x4xf32, #tpu.memory_space<vmem>>, vector<16x16x4xf32>
    tpu.vector_store %arg11[%c3_13, %c8, %c0_14], %1 {strides = array<i32>} : memref<22x32x4xf32, #tpu.memory_space<vmem>>, vector<16x16x4xf32>,
    %c0_15 = arith.constant 0 : index
    %c0_16 = arith.constant 0 : index
    %c0_17 = arith.constant 0 : index
    %9 = vector.load %arg11[%c0_15, %c0_16, %c0_17] : memref<22x32x4xf32, #tpu.memory_space<vmem>>, vector<22x32x4xf32>
    %c0_18 = arith.constant 0 : index
    %c0_19 = arith.constant 0 : index
    %c0_20 = arith.constant 0 : index
    %10 = vector.load %arg2[%c0_18, %c0_19, %c0_20] : memref<7x7x4xf32, #tpu.memory_space<vmem>>, vector<7x7x4xf32>
    %11 = arith.truncf %10 : vector<7x7x4xf32> to vector<7x7x4xbf16>
    %c0_21 = arith.constant 0 : index
    %c0_22 = arith.constant 0 : index
    %12 = vector.load %arg3[%c0_21, %c0_22] : memref<1x4xf32, #tpu.memory_space<vmem>>, vector<1x4xf32>
    %13 = vector.shape_cast %12 : vector<1x4xf32> to vector<4xf32>
    %14 = vector.shape_cast %13 : vector<4xf32> to vector<1x1x4xf32>
    %15 = vector.broadcast %14 : vector<1x1x4xf32> to vector<16x16x4xf32>
    %c3_i32 = arith.constant 3 : i32
    %16 = tpu.dynamic_rotate %9 by %c3_i32 dim 1 : vector<22x32x4xf32>, i32 -> vector<22x32x4xf32>
    %17 = vector.extract_strided_slice %16 {offsets = [0, 8, 0], sizes = [22, 16, 4], strides = [1, 1, 1]} : vector<22x32x4xf32> to vector<22x16x4xf32>
    %18 = arith.truncf %17 : vector<22x16x4xf32> to vector<22x16x4xbf16>
    %19 = vector.extract_strided_slice %18 {offsets = [0, 0, 0], sizes = [16, 16, 4], strides = [1, 1, 1]} : vector<22x16x4xbf16> to vector<16x16x4xbf16>
    %20 = vector.extract_strided_slice %11 {offsets = [0, 0, 0], sizes = [1, 1, 4], strides = [1, 1, 1]} : vector<7x7x4xbf16> to vector<1x1x4xbf16>
    %21 = vector.shape_cast %20 : vector<1x1x4xbf16> to vector<4xbf16>
    %22 = vector.shape_cast %21 : vector<4xbf16> to vector<1x1x4xbf16>
    %23 = vector.broadcast %22 : vector<1x1x4xbf16> to vector<16x16x4xbf16>
    %24 = arith.mulf %19, %23 : vector<16x16x4xbf16>
    %25 = vector.extract_strided_slice %18 {offsets = [1, 0, 0], sizes = [16, 16, 4], strides = [1, 1, 1]} : vector<22x16x4xbf16> to vector<16x16x4xbf16>
    %26 = vector.extract_strided_slice %11 {offsets = [1, 0, 0], sizes = [1, 1, 4], strides = [1, 1, 1]} : vector<7x7x4xbf16> to vector<1x1x4xbf16>
    %27 = vector.shape_cast %26 : vector<1x1x4xbf16> to vector<4xbf16>
    %28 = vector.shape_cast %27 : vector<4xbf16> to vector<1x1x4xbf16>
    %29 = vector.broadcast %28 : vector<1x1x4xbf16> to vector<16x16x4xbf16>
    %30 = arith.mulf %25, %29 : vector<16x16x4xbf16>
    %31 = arith.addf %24, %30 : vector<16x16x4xbf16>
    %32 = vector.extract_strided_slice %18 {offsets = [2, 0, 0], sizes = [16, 16, 4], strides = [1, 1, 1]} : vector<22x16x4xbf16> to vector<16x16x4xbf16>
    %33 = vector.extract_strided_slice %11 {offsets = [2, 0, 0], sizes = [1, 1, 4], strides = [1, 1, 1]} : vector<7x7x4xbf16> to vector<1x1x4xbf16>
    %34 = vector.shape_cast %33 : vector<1x1x4xbf16> to vector<4xbf16>
    %35 = vector.shape_cast %34 : vector<4xbf16> to vector<1x1x4xbf16>
    %36 = vector.broadcast %35 : vector<1x1x4xbf16> to vector<16x16x4xbf16>
    %37 = arith.mulf %32, %36 : vector<16x16x4xbf16>
    %38 = arith.addf %31, %37 : vector<16x16x4xbf16>
    %39 = vector.extract_strided_slice %18 {offsets = [3, 0, 0], sizes = [16, 16, 4], strides = [1, 1, 1]} : vector<22x16x4xbf16> to vector<16x16x4xbf16>
    %40 = vector.extract_strided_slice %11 {offsets = [3, 0, 0], sizes = [1, 1, 4], strides = [1, 1, 1]} : vector<7x7x4xbf16> to vector<1x1x4xbf16>
    %41 = vector.shape_cast %40 : vector<1x1x4xbf16> to vector<4xbf16>
    %42 = vector.shape_cast %41 : vector<4xbf16> to vector<1x1x4xbf16>
    %43 = vector.broadcast %42 : vector<1x1x4xbf16> to vector<16x16x4xbf16>
    %44 = arith.mulf %39, %43 : vector<16x16x4xbf16>
    %45 = arith.addf %38, %44 : vector<16x16x4xbf16>
    %46 = vector.extract_strided_slice %18 {offsets = [4, 0, 0], sizes = [16, 16, 4], strides = [1, 1, 1]} : vector<22x16x4xbf16> to vector<16x16x4xbf16>
    %47 = vector.extract_strided_slice %11 {offsets = [4, 0, 0], sizes = [1, 1, 4], strides = [1, 1, 1]} : vector<7x7x4xbf16> to vector<1x1x4xbf16>
    %48 = vector.shape_cast %47 : vector<1x1x4xbf16> to vector<4xbf16>
    %49 = vector.shape_cast %48 : vector<4xbf16> to vector<1x1x4xbf16>
    %50 = vector.broadcast %49 : vector<1x1x4xbf16> to vector<16x16x4xbf16>
    %51 = arith.mulf %46, %50 : vector<16x16x4xbf16>
    %52 = arith.addf %45, %51 : vector<16x16x4xbf16>
    %53 = vector.extract_strided_slice %18 {offsets = [5, 0, 0], sizes = [16, 16, 4], strides = [1, 1, 1]} : vector<22x16x4xbf16> to vector<16x16x4xbf16>
    %54 = vector.extract_strided_slice %11 {offsets = [5, 0, 0], sizes = [1, 1, 4], strides = [1, 1, 1]} : vector<7x7x4xbf16> to vector<1x1x4xbf16>
    %55 = vector.shape_cast %54 : vector<1x1x4xbf16> to vector<4xbf16>
    %56 = vector.shape_cast %55 : vector<4xbf16> to vector<1x1x4xbf16>
    %57 = vector.broadcast %56 : vector<1x1x4xbf16> to vector<16x16x4xbf16>
    %58 = arith.mulf %53, %57 : vector<16x16x4xbf16>
    %59 = arith.addf %52, %58 : vector<16x16x4xbf16>
    %60 = vector.extract_strided_slice %18 {offsets = [6, 0, 0], sizes = [16, 16, 4], strides = [1, 1, 1]} : vector<22x16x4xbf16> to vector<16x16x4xbf16>
    %61 = vector.extract_strided_slice %11 {offsets = [6, 0, 0], sizes = [1, 1, 4], strides = [1, 1, 1]} : vector<7x7x4xbf16> to vector<1x1x4xbf16>
    %62 = vector.shape_cast %61 : vector<1x1x4xbf16> to vector<4xbf16>
    %63 = vector.shape_cast %62 : vector<4xbf16> to vector<1x1x4xbf16>
    %64 = vector.broadcast %63 : vector<1x1x4xbf16> to vector<16x16x4xbf16>
    %65 = arith.mulf %60, %64 : vector<16x16x4xbf16>
    %66 = arith.addf %59, %65 : vector<16x16x4xbf16>
    %67 = arith.extf %66 : vector<16x16x4xbf16> to vector<16x16x4xf32>
    %68 = arith.addf %15, %67 : vector<16x16x4xf32>
    %c2_i32 = arith.constant 2 : i32
    %69 = tpu.dynamic_rotate %9 by %c2_i32 dim 1 : vector<22x32x4xf32>, i32 -> vector<22x32x4xf32>
    %70 = vector.extract_strided_slice %69 {offsets = [0, 8, 0], sizes = [22, 16, 4], strides = [1, 1, 1]} : vector<22x32x4xf32> to vector<22x16x4xf32>
    %71 = arith.truncf %70 : vector<22x16x4xf32> to vector<22x16x4xbf16>
    %72 = vector.extract_strided_slice %71 {offsets = [0, 0, 0], sizes = [16, 16, 4], strides = [1, 1, 1]} : vector<22x16x4xbf16> to vector<16x16x4xbf16>
    %73 = vector.extract_strided_slice %11 {offsets = [0, 1, 0], sizes = [1, 1, 4], strides = [1, 1, 1]} : vector<7x7x4xbf16> to vector<1x1x4xbf16>
    %74 = vector.shape_cast %73 : vector<1x1x4xbf16> to vector<4xbf16>
    %75 = vector.shape_cast %74 : vector<4xbf16> to vector<1x1x4xbf16>
    %76 = vector.broadcast %75 : vector<1x1x4xbf16> to vector<16x16x4xbf16>
    %77 = arith.mulf %72, %76 : vector<16x16x4xbf16>
    %78 = vector.extract_strided_slice %71 {offsets = [1, 0, 0], sizes = [16, 16, 4], strides = [1, 1, 1]} : vector<22x16x4xbf16> to vector<16x16x4xbf16>
    %79 = vector.extract_strided_slice %11 {offsets = [1, 1, 0], sizes = [1, 1, 4], strides = [1, 1, 1]} : vector<7x7x4xbf16> to vector<1x1x4xbf16>
    %80 = vector.shape_cast %79 : vector<1x1x4xbf16> to vector<4xbf16>
    %81 = vector.shape_cast %80 : vector<4xbf16> to vector<1x1x4xbf16>
    %82 = vector.broadcast %81 : vector<1x1x4xbf16> to vector<16x16x4xbf16>
    %83 = arith.mulf %78, %82 : vector<16x16x4xbf16>
    %84 = arith.addf %77, %83 : vector<16x16x4xbf16>
    %85 = vector.extract_strided_slice %71 {offsets = [2, 0, 0], sizes = [16, 16, 4], strides = [1, 1, 1]} : vector<22x16x4xbf16> to vector<16x16x4xbf16>
    %86 = vector.extract_strided_slice %11 {offsets = [2, 1, 0], sizes = [1, 1, 4], strides = [1, 1, 1]} : vector<7x7x4xbf16> to vector<1x1x4xbf16>
    %87 = vector.shape_cast %86 : vector<1x1x4xbf16> to vector<4xbf16>
    %88 = vector.shape_cast %87 : vector<4xbf16> to vector<1x1x4xbf16>
    %89 = vector.broadcast %88 : vector<1x1x4xbf16> to vector<16x16x4xbf16>
    %90 = arith.mulf %85, %89 : vector<16x16x4xbf16>
    %91 = arith.addf %84, %90 : vector<16x16x4xbf16>
    %92 = vector.extract_strided_slice %71 {offsets = [3, 0, 0], sizes = [16, 16, 4], strides = [1, 1, 1]} : vector<22x16x4xbf16> to vector<16x16x4xbf16>
    %93 = vector.extract_strided_slice %11 {offsets = [3, 1, 0], sizes = [1, 1, 4], strides = [1, 1, 1]} : vector<7x7x4xbf16> to vector<1x1x4xbf16>
    %94 = vector.shape_cast %93 : vector<1x1x4xbf16> to vector<4xbf16>
    %95 = vector.shape_cast %94 : vector<4xbf16> to vector<1x1x4xbf16>
    %96 = vector.broadcast %95 : vector<1x1x4xbf16> to vector<16x16x4xbf16>
    %97 = arith.mulf %92, %96 : vector<16x16x4xbf16>
    %98 = arith.addf %91, %97 : vector<16x16x4xbf16>
    %99 = vector.extract_strided_slice %71 {offsets = [4, 0, 0], sizes = [16, 16, 4], strides = [1, 1, 1]} : vector<22x16x4xbf16> to vector<16x16x4xbf16>
    %100 = vector.extract_strided_slice %11 {offsets = [4, 1, 0], sizes = [1, 1, 4], strides = [1, 1, 1]} : vector<7x7x4xbf16> to vector<1x1x4xbf16>
    %101 = vector.shape_cast %100 : vector<1x1x4xbf16> to vector<4xbf16>
    %102 = vector.shape_cast %101 : vector<4xbf16> to vector<1x1x4xbf16>
    %103 = vector.broadcast %102 : vector<1x1x4xbf16> to vector<16x16x4xbf16>
    %104 = arith.mulf %99, %103 : vector<16x16x4xbf16>
    %105 = arith.addf %98, %104 : vector<16x16x4xbf16>
    %106 = vector.extract_strided_slice %71 {offsets = [5, 0, 0], sizes = [16, 16, 4], strides = [1, 1, 1]} : vector<22x16x4xbf16> to vector<16x16x4xbf16>
    %107 = vector.extract_strided_slice %11 {offsets = [5, 1, 0], sizes = [1, 1, 4], strides = [1, 1, 1]} : vector<7x7x4xbf16> to vector<1x1x4xbf16>
    %108 = vector.shape_cast %107 : vector<1x1x4xbf16> to vector<4xbf16>
    %109 = vector.shape_cast %108 : vector<4xbf16> to vector<1x1x4xbf16>
    %110 = vector.broadcast %109 : vector<1x1x4xbf16> to vector<16x16x4xbf16>
    %111 = arith.mulf %106, %110 : vector<16x16x4xbf16>
    %112 = arith.addf %105, %111 : vector<16x16x4xbf16>
    %113 = vector.extract_strided_slice %71 {offsets = [6, 0, 0], sizes = [16, 16, 4], strides = [1, 1, 1]} : vector<22x16x4xbf16> to vector<16x16x4xbf16>
    %114 = vector.extract_strided_slice %11 {offsets = [6, 1, 0], sizes = [1, 1, 4], strides = [1, 1, 1]} : vector<7x7x4xbf16> to vector<1x1x4xbf16>
    %115 = vector.shape_cast %114 : vector<1x1x4xbf16> to vector<4xbf16>
    %116 = vector.shape_cast %115 : vector<4xbf16> to vector<1x1x4xbf16>
    %117 = vector.broadcast %116 : vector<1x1x4xbf16> to vector<16x16x4xbf16>
    %118 = arith.mulf %113, %117 : vector<16x16x4xbf16>
    %119 = arith.addf %112, %118 : vector<16x16x4xbf16>
    %120 = arith.extf %119 : vector<16x16x4xbf16> to vector<16x16x4xf32>
    %121 = arith.addf %68, %120 : vector<16x16x4xf32>
    %c1_i32 = arith.constant 1 : i32
    %122 = tpu.dynamic_rotate %9 by %c1_i32 dim 1 : vector<22x32x4xf32>, i32 -> vector<22x32x4xf32>
    %123 = vector.extract_strided_slice %122 {offsets = [0, 8, 0], sizes = [22, 16, 4], strides = [1, 1, 1]} : vector<22x32x4xf32> to vector<22x16x4xf32>
    %124 = arith.truncf %123 : vector<22x16x4xf32> to vector<22x16x4xbf16>
    %125 = vector.extract_strided_slice %124 {offsets = [0, 0, 0], sizes = [16, 16, 4], strides = [1, 1, 1]} : vector<22x16x4xbf16> to vector<16x16x4xbf16>
    %126 = vector.extract_strided_slice %11 {offsets = [0, 2, 0], sizes = [1, 1, 4], strides = [1, 1, 1]} : vector<7x7x4xbf16> to vector<1x1x4xbf16>
    %127 = vector.shape_cast %126 : vector<1x1x4xbf16> to vector<4xbf16>
    %128 = vector.shape_cast %127 : vector<4xbf16> to vector<1x1x4xbf16>
    %129 = vector.broadcast %128 : vector<1x1x4xbf16> to vector<16x16x4xbf16>
    %130 = arith.mulf %125, %129 : vector<16x16x4xbf16>
    %131 = vector.extract_strided_slice %124 {offsets = [1, 0, 0], sizes = [16, 16, 4], strides = [1, 1, 1]} : vector<22x16x4xbf16> to vector<16x16x4xbf16>
    %132 = vector.extract_strided_slice %11 {offsets = [1, 2, 0], sizes = [1, 1, 4], strides = [1, 1, 1]} : vector<7x7x4xbf16> to vector<1x1x4xbf16>
    %133 = vector.shape_cast %132 : vector<1x1x4xbf16> to vector<4xbf16>
    %134 = vector.shape_cast %133 : vector<4xbf16> to vector<1x1x4xbf16>
    %135 = vector.broadcast %134 : vector<1x1x4xbf16> to vector<16x16x4xbf16>
    %136 = arith.mulf %131, %135 : vector<16x16x4xbf16>
    %137 = arith.addf %130, %136 : vector<16x16x4xbf16>
    %138 = vector.extract_strided_slice %124 {offsets = [2, 0, 0], sizes = [16, 16, 4], strides = [1, 1, 1]} : vector<22x16x4xbf16> to vector<16x16x4xbf16>
    %139 = vector.extract_strided_slice %11 {offsets = [2, 2, 0], sizes = [1, 1, 4], strides = [1, 1, 1]} : vector<7x7x4xbf16> to vector<1x1x4xbf16>
    %140 = vector.shape_cast %139 : vector<1x1x4xbf16> to vector<4xbf16>
    %141 = vector.shape_cast %140 : vector<4xbf16> to vector<1x1x4xbf16>
    %142 = vector.broadcast %141 : vector<1x1x4xbf16> to vector<16x16x4xbf16>
    %143 = arith.mulf %138, %142 : vector<16x16x4xbf16>
    %144 = arith.addf %137, %143 : vector<16x16x4xbf16>
    %145 = vector.extract_strided_slice %124 {offsets = [3, 0, 0], sizes = [16, 16, 4], strides = [1, 1, 1]} : vector<22x16x4xbf16> to vector<16x16x4xbf16>
    %146 = vector.extract_strided_slice %11 {offsets = [3, 2, 0], sizes = [1, 1, 4], strides = [1, 1, 1]} : vector<7x7x4xbf16> to vector<1x1x4xbf16>
    %147 = vector.shape_cast %146 : vector<1x1x4xbf16> to vector<4xbf16>
    %148 = vector.shape_cast %147 : vector<4xbf16> to vector<1x1x4xbf16>
    %149 = vector.broadcast %148 : vector<1x1x4xbf16> to vector<16x16x4xbf16>
    %150 = arith.mulf %145, %149 : vector<16x16x4xbf16>
    %151 = arith.addf %144, %150 : vector<16x16x4xbf16>
    %152 = vector.extract_strided_slice %124 {offsets = [4, 0, 0], sizes = [16, 16, 4], strides = [1, 1, 1]} : vector<22x16x4xbf16> to vector<16x16x4xbf16>
    %153 = vector.extract_strided_slice %11 {offsets = [4, 2, 0], sizes = [1, 1, 4], strides = [1, 1, 1]} : vector<7x7x4xbf16> to vector<1x1x4xbf16>
    %154 = vector.shape_cast %153 : vector<1x1x4xbf16> to vector<4xbf16>
    %155 = vector.shape_cast %154 : vector<4xbf16> to vector<1x1x4xbf16>
    %156 = vector.broadcast %155 : vector<1x1x4xbf16> to vector<16x16x4xbf16>
    %157 = arith.mulf %152, %156 : vector<16x16x4xbf16>
    %158 = arith.addf %151, %157 : vector<16x16x4xbf16>
    %159 = vector.extract_strided_slice %124 {offsets = [5, 0, 0], sizes = [16, 16, 4], strides = [1, 1, 1]} : vector<22x16x4xbf16> to vector<16x16x4xbf16>
    %160 = vector.extract_strided_slice %11 {offsets = [5, 2, 0], sizes = [1, 1, 4], strides = [1, 1, 1]} : vector<7x7x4xbf16> to vector<1x1x4xbf16>
    %161 = vector.shape_cast %160 : vector<1x1x4xbf16> to vector<4xbf16>
    %162 = vector.shape_cast %161 : vector<4xbf16> to vector<1x1x4xbf16>
    %163 = vector.broadcast %162 : vector<1x1x4xbf16> to vector<16x16x4xbf16>
    %164 = arith.mulf %159, %163 : vector<16x16x4xbf16>
    %165 = arith.addf %158, %164 : vector<16x16x4xbf16>
    %166 = vector.extract_strided_slice %124 {offsets = [6, 0, 0], sizes = [16, 16, 4], strides = [1, 1, 1]} : vector<22x16x4xbf16> to vector<16x16x4xbf16>
    %167 = vector.extract_strided_slice %11 {offsets = [6, 2, 0], sizes = [1, 1, 4], strides = [1, 1, 1]} : vector<7x7x4xbf16> to vector<1x1x4xbf16>
    %168 = vector.shape_cast %167 : vector<1x1x4xbf16> to vector<4xbf16>
    %169 = vector.shape_cast %168 : vector<4xbf16> to vector<1x1x4xbf16>
    %170 = vector.broadcast %169 : vector<1x1x4xbf16> to vector<16x16x4xbf16>
    %171 = arith.mulf %166, %170 : vector<16x16x4xbf16>
    %172 = arith.addf %165, %171 : vector<16x16x4xbf16>
    %173 = arith.extf %172 : vector<16x16x4xbf16> to vector<16x16x4xf32>
    %174 = arith.addf %121, %173 : vector<16x16x4xf32>
    %175 = vector.extract_strided_slice %9 {offsets = [0, 8, 0], sizes = [22, 16, 4], strides = [1, 1, 1]} : vector<22x32x4xf32> to vector<22x16x4xf32>
    %176 = arith.truncf %175 : vector<22x16x4xf32> to vector<22x16x4xbf16>
    %177 = vector.extract_strided_slice %176 {offsets = [0, 0, 0], sizes = [16, 16, 4], strides = [1, 1, 1]} : vector<22x16x4xbf16> to vector<16x16x4xbf16>
    %178 = vector.extract_strided_slice %11 {offsets = [0, 3, 0], sizes = [1, 1, 4], strides = [1, 1, 1]} : vector<7x7x4xbf16> to vector<1x1x4xbf16>
    %179 = vector.shape_cast %178 : vector<1x1x4xbf16> to vector<4xbf16>
    %180 = vector.shape_cast %179 : vector<4xbf16> to vector<1x1x4xbf16>
    %181 = vector.broadcast %180 : vector<1x1x4xbf16> to vector<16x16x4xbf16>
    %182 = arith.mulf %177, %181 : vector<16x16x4xbf16>
    %183 = vector.extract_strided_slice %176 {offsets = [1, 0, 0], sizes = [16, 16, 4], strides = [1, 1, 1]} : vector<22x16x4xbf16> to vector<16x16x4xbf16>
    %184 = vector.extract_strided_slice %11 {offsets = [1, 3, 0], sizes = [1, 1, 4], strides = [1, 1, 1]} : vector<7x7x4xbf16> to vector<1x1x4xbf16>
    %185 = vector.shape_cast %184 : vector<1x1x4xbf16> to vector<4xbf16>
    %186 = vector.shape_cast %185 : vector<4xbf16> to vector<1x1x4xbf16>
    %187 = vector.broadcast %186 : vector<1x1x4xbf16> to vector<16x16x4xbf16>
    %188 = arith.mulf %183, %187 : vector<16x16x4xbf16>
    %189 = arith.addf %182, %188 : vector<16x16x4xbf16>
    %190 = vector.extract_strided_slice %176 {offsets = [2, 0, 0], sizes = [16, 16, 4], strides = [1, 1, 1]} : vector<22x16x4xbf16> to vector<16x16x4xbf16>
    %191 = vector.extract_strided_slice %11 {offsets = [2, 3, 0], sizes = [1, 1, 4], strides = [1, 1, 1]} : vector<7x7x4xbf16> to vector<1x1x4xbf16>
    %192 = vector.shape_cast %191 : vector<1x1x4xbf16> to vector<4xbf16>
    %193 = vector.shape_cast %192 : vector<4xbf16> to vector<1x1x4xbf16>
    %194 = vector.broadcast %193 : vector<1x1x4xbf16> to vector<16x16x4xbf16>
    %195 = arith.mulf %190, %194 : vector<16x16x4xbf16>
    %196 = arith.addf %189, %195 : vector<16x16x4xbf16>
    %197 = vector.extract_strided_slice %176 {offsets = [3, 0, 0], sizes = [16, 16, 4], strides = [1, 1, 1]} : vector<22x16x4xbf16> to vector<16x16x4xbf16>
    %198 = vector.extract_strided_slice %11 {offsets = [3, 3, 0], sizes = [1, 1, 4], strides = [1, 1, 1]} : vector<7x7x4xbf16> to vector<1x1x4xbf16>
    %199 = vector.shape_cast %198 : vector<1x1x4xbf16> to vector<4xbf16>
    %200 = vector.shape_cast %199 : vector<4xbf16> to vector<1x1x4xbf16>
    %201 = vector.broadcast %200 : vector<1x1x4xbf16> to vector<16x16x4xbf16>
    %202 = arith.mulf %197, %201 : vector<16x16x4xbf16>
    %203 = arith.addf %196, %202 : vector<16x16x4xbf16>
    %204 = vector.extract_strided_slice %176 {offsets = [4, 0, 0], sizes = [16, 16, 4], strides = [1, 1, 1]} : vector<22x16x4xbf16> to vector<16x16x4xbf16>
    %205 = vector.extract_strided_slice %11 {offsets = [4, 3, 0], sizes = [1, 1, 4], strides = [1, 1, 1]} : vector<7x7x4xbf16> to vector<1x1x4xbf16>
    %206 = vector.shape_cast %205 : vector<1x1x4xbf16> to vector<4xbf16>
    %207 = vector.shape_cast %206 : vector<4xbf16> to vector<1x1x4xbf16>
    %208 = vector.broadcast %207 : vector<1x1x4xbf16> to vector<16x16x4xbf16>
    %209 = arith.mulf %204, %208 : vector<16x16x4xbf16>
    %210 = arith.addf %203, %209 : vector<16x16x4xbf16>
    %211 = vector.extract_strided_slice %176 {offsets = [5, 0, 0], sizes = [16, 16, 4], strides = [1, 1, 1]} : vector<22x16x4xbf16> to vector<16x16x4xbf16>
    %212 = vector.extract_strided_slice %11 {offsets = [5, 3, 0], sizes = [1, 1, 4], strides = [1, 1, 1]} : vector<7x7x4xbf16> to vector<1x1x4xbf16>
    %213 = vector.shape_cast %212 : vector<1x1x4xbf16> to vector<4xbf16>
    %214 = vector.shape_cast %213 : vector<4xbf16> to vector<1x1x4xbf16>
    %215 = vector.broadcast %214 : vector<1x1x4xbf16> to vector<16x16x4xbf16>
    %216 = arith.mulf %211, %215 : vector<16x16x4xbf16>
    %217 = arith.addf %210, %216 : vector<16x16x4xbf16>
    %218 = vector.extract_strided_slice %176 {offsets = [6, 0, 0], sizes = [16, 16, 4], strides = [1, 1, 1]} : vector<22x16x4xbf16> to vector<16x16x4xbf16>
    %219 = vector.extract_strided_slice %11 {offsets = [6, 3, 0], sizes = [1, 1, 4], strides = [1, 1, 1]} : vector<7x7x4xbf16> to vector<1x1x4xbf16>
    %220 = vector.shape_cast %219 : vector<1x1x4xbf16> to vector<4xbf16>
    %221 = vector.shape_cast %220 : vector<4xbf16> to vector<1x1x4xbf16>
    %222 = vector.broadcast %221 : vector<1x1x4xbf16> to vector<16x16x4xbf16>
    %223 = arith.mulf %218, %222 : vector<16x16x4xbf16>
    %224 = arith.addf %217, %223 : vector<16x16x4xbf16>
    %225 = arith.extf %224 : vector<16x16x4xbf16> to vector<16x16x4xf32>
    %226 = arith.addf %174, %225 : vector<16x16x4xf32>
    %c31_i32 = arith.constant 31 : i32
    %227 = tpu.dynamic_rotate %9 by %c31_i32 dim 1 : vector<22x32x4xf32>, i32 -> vector<22x32x4xf32>
    %228 = vector.extract_strided_slice %227 {offsets = [0, 8, 0], sizes = [22, 16, 4], strides = [1, 1, 1]} : vector<22x32x4xf32> to vector<22x16x4xf32>
    %229 = arith.truncf %228 : vector<22x16x4xf32> to vector<22x16x4xbf16>
    %230 = vector.extract_strided_slice %229 {offsets = [0, 0, 0], sizes = [16, 16, 4], strides = [1, 1, 1]} : vector<22x16x4xbf16> to vector<16x16x4xbf16>
    %231 = vector.extract_strided_slice %11 {offsets = [0, 4, 0], sizes = [1, 1, 4], strides = [1, 1, 1]} : vector<7x7x4xbf16> to vector<1x1x4xbf16>
    %232 = vector.shape_cast %231 : vector<1x1x4xbf16> to vector<4xbf16>
    %233 = vector.shape_cast %232 : vector<4xbf16> to vector<1x1x4xbf16>
    %234 = vector.broadcast %233 : vector<1x1x4xbf16> to vector<16x16x4xbf16>
    %235 = arith.mulf %230, %234 : vector<16x16x4xbf16>
    %236 = vector.extract_strided_slice %229 {offsets = [1, 0, 0], sizes = [16, 16, 4], strides = [1, 1, 1]} : vector<22x16x4xbf16> to vector<16x16x4xbf16>
    %237 = vector.extract_strided_slice %11 {offsets = [1, 4, 0], sizes = [1, 1, 4], strides = [1, 1, 1]} : vector<7x7x4xbf16> to vector<1x1x4xbf16>
    %238 = vector.shape_cast %237 : vector<1x1x4xbf16> to vector<4xbf16>
    %239 = vector.shape_cast %238 : vector<4xbf16> to vector<1x1x4xbf16>
    %240 = vector.broadcast %239 : vector<1x1x4xbf16> to vector<16x16x4xbf16>
    %241 = arith.mulf %236, %240 : vector<16x16x4xbf16>
    %242 = arith.addf %235, %241 : vector<16x16x4xbf16>
    %243 = vector.extract_strided_slice %229 {offsets = [2, 0, 0], sizes = [16, 16, 4], strides = [1, 1, 1]} : vector<22x16x4xbf16> to vector<16x16x4xbf16>
    %244 = vector.extract_strided_slice %11 {offsets = [2, 4, 0], sizes = [1, 1, 4], strides = [1, 1, 1]} : vector<7x7x4xbf16> to vector<1x1x4xbf16>
    %245 = vector.shape_cast %244 : vector<1x1x4xbf16> to vector<4xbf16>
    %246 = vector.shape_cast %245 : vector<4xbf16> to vector<1x1x4xbf16>
    %247 = vector.broadcast %246 : vector<1x1x4xbf16> to vector<16x16x4xbf16>
    %248 = arith.mulf %243, %247 : vector<16x16x4xbf16>
    %249 = arith.addf %242, %248 : vector<16x16x4xbf16>
    %250 = vector.extract_strided_slice %229 {offsets = [3, 0, 0], sizes = [16, 16, 4], strides = [1, 1, 1]} : vector<22x16x4xbf16> to vector<16x16x4xbf16>
    %251 = vector.extract_strided_slice %11 {offsets = [3, 4, 0], sizes = [1, 1, 4], strides = [1, 1, 1]} : vector<7x7x4xbf16> to vector<1x1x4xbf16>
    %252 = vector.shape_cast %251 : vector<1x1x4xbf16> to vector<4xbf16>
    %253 = vector.shape_cast %252 : vector<4xbf16> to vector<1x1x4xbf16>
    %254 = vector.broadcast %253 : vector<1x1x4xbf16> to vector<16x16x4xbf16>
    %255 = arith.mulf %250, %254 : vector<16x16x4xbf16>
    %256 = arith.addf %249, %255 : vector<16x16x4xbf16>
    %257 = vector.extract_strided_slice %229 {offsets = [4, 0, 0], sizes = [16, 16, 4], strides = [1, 1, 1]} : vector<22x16x4xbf16> to vector<16x16x4xbf16>
    %258 = vector.extract_strided_slice %11 {offsets = [4, 4, 0], sizes = [1, 1, 4], strides = [1, 1, 1]} : vector<7x7x4xbf16> to vector<1x1x4xbf16>
    %259 = vector.shape_cast %258 : vector<1x1x4xbf16> to vector<4xbf16>
    %260 = vector.shape_cast %259 : vector<4xbf16> to vector<1x1x4xbf16>
    %261 = vector.broadcast %260 : vector<1x1x4xbf16> to vector<16x16x4xbf16>
    %262 = arith.mulf %257, %261 : vector<16x16x4xbf16>
    %263 = arith.addf %256, %262 : vector<16x16x4xbf16>
    %264 = vector.extract_strided_slice %229 {offsets = [5, 0, 0], sizes = [16, 16, 4], strides = [1, 1, 1]} : vector<22x16x4xbf16> to vector<16x16x4xbf16>
    %265 = vector.extract_strided_slice %11 {offsets = [5, 4, 0], sizes = [1, 1, 4], strides = [1, 1, 1]} : vector<7x7x4xbf16> to vector<1x1x4xbf16>
    %266 = vector.shape_cast %265 : vector<1x1x4xbf16> to vector<4xbf16>
    %267 = vector.shape_cast %266 : vector<4xbf16> to vector<1x1x4xbf16>
    %268 = vector.broadcast %267 : vector<1x1x4xbf16> to vector<16x16x4xbf16>
    %269 = arith.mulf %264, %268 : vector<16x16x4xbf16>
    %270 = arith.addf %263, %269 : vector<16x16x4xbf16>
    %271 = vector.extract_strided_slice %229 {offsets = [6, 0, 0], sizes = [16, 16, 4], strides = [1, 1, 1]} : vector<22x16x4xbf16> to vector<16x16x4xbf16>
    %272 = vector.extract_strided_slice %11 {offsets = [6, 4, 0], sizes = [1, 1, 4], strides = [1, 1, 1]} : vector<7x7x4xbf16> to vector<1x1x4xbf16>
    %273 = vector.shape_cast %272 : vector<1x1x4xbf16> to vector<4xbf16>
    %274 = vector.shape_cast %273 : vector<4xbf16> to vector<1x1x4xbf16>
    %275 = vector.broadcast %274 : vector<1x1x4xbf16> to vector<16x16x4xbf16>
    %276 = arith.mulf %271, %275 : vector<16x16x4xbf16>
    %277 = arith.addf %270, %276 : vector<16x16x4xbf16>
    %278 = arith.extf %277 : vector<16x16x4xbf16> to vector<16x16x4xf32>
    %279 = arith.addf %226, %278 : vector<16x16x4xf32>
    %c30_i32 = arith.constant 30 : i32
    %280 = tpu.dynamic_rotate %9 by %c30_i32 dim 1 : vector<22x32x4xf32>, i32 -> vector<22x32x4xf32>
    %281 = vector.extract_strided_slice %280 {offsets = [0, 8, 0], sizes = [22, 16, 4], strides = [1, 1, 1]} : vector<22x32x4xf32> to vector<22x16x4xf32>
    %282 = arith.truncf %281 : vector<22x16x4xf32> to vector<22x16x4xbf16>
    %283 = vector.extract_strided_slice %282 {offsets = [0, 0, 0], sizes = [16, 16, 4], strides = [1, 1, 1]} : vector<22x16x4xbf16> to vector<16x16x4xbf16>
    %284 = vector.extract_strided_slice %11 {offsets = [0, 5, 0], sizes = [1, 1, 4], strides = [1, 1, 1]} : vector<7x7x4xbf16> to vector<1x1x4xbf16>
    %285 = vector.shape_cast %284 : vector<1x1x4xbf16> to vector<4xbf16>
    %286 = vector.shape_cast %285 : vector<4xbf16> to vector<1x1x4xbf16>
    %287 = vector.broadcast %286 : vector<1x1x4xbf16> to vector<16x16x4xbf16>
    %288 = arith.mulf %283, %287 : vector<16x16x4xbf16>
    %289 = vector.extract_strided_slice %282 {offsets = [1, 0, 0], sizes = [16, 16, 4], strides = [1, 1, 1]} : vector<22x16x4xbf16> to vector<16x16x4xbf16>
    %290 = vector.extract_strided_slice %11 {offsets = [1, 5, 0], sizes = [1, 1, 4], strides = [1, 1, 1]} : vector<7x7x4xbf16> to vector<1x1x4xbf16>
    %291 = vector.shape_cast %290 : vector<1x1x4xbf16> to vector<4xbf16>
    %292 = vector.shape_cast %291 : vector<4xbf16> to vector<1x1x4xbf16>
    %293 = vector.broadcast %292 : vector<1x1x4xbf16> to vector<16x16x4xbf16>
    %294 = arith.mulf %289, %293 : vector<16x16x4xbf16>
    %295 = arith.addf %288, %294 : vector<16x16x4xbf16>
    %296 = vector.extract_strided_slice %282 {offsets = [2, 0, 0], sizes = [16, 16, 4], strides = [1, 1, 1]} : vector<22x16x4xbf16> to vector<16x16x4xbf16>
    %297 = vector.extract_strided_slice %11 {offsets = [2, 5, 0], sizes = [1, 1, 4], strides = [1, 1, 1]} : vector<7x7x4xbf16> to vector<1x1x4xbf16>
    %298 = vector.shape_cast %297 : vector<1x1x4xbf16> to vector<4xbf16>
    %299 = vector.shape_cast %298 : vector<4xbf16> to vector<1x1x4xbf16>
    %300 = vector.broadcast %299 : vector<1x1x4xbf16> to vector<16x16x4xbf16>
    %301 = arith.mulf %296, %300 : vector<16x16x4xbf16>
    %302 = arith.addf %295, %301 : vector<16x16x4xbf16>
    %303 = vector.extract_strided_slice %282 {offsets = [3, 0, 0], sizes = [16, 16, 4], strides = [1, 1, 1]} : vector<22x16x4xbf16> to vector<16x16x4xbf16>
    %304 = vector.extract_strided_slice %11 {offsets = [3, 5, 0], sizes = [1, 1, 4], strides = [1, 1, 1]} : vector<7x7x4xbf16> to vector<1x1x4xbf16>
    %305 = vector.shape_cast %304 : vector<1x1x4xbf16> to vector<4xbf16>
    %306 = vector.shape_cast %305 : vector<4xbf16> to vector<1x1x4xbf16>
    %307 = vector.broadcast %306 : vector<1x1x4xbf16> to vector<16x16x4xbf16>
    %308 = arith.mulf %303, %307 : vector<16x16x4xbf16>
    %309 = arith.addf %302, %308 : vector<16x16x4xbf16>
    %310 = vector.extract_strided_slice %282 {offsets = [4, 0, 0], sizes = [16, 16, 4], strides = [1, 1, 1]} : vector<22x16x4xbf16> to vector<16x16x4xbf16>
    %311 = vector.extract_strided_slice %11 {offsets = [4, 5, 0], sizes = [1, 1, 4], strides = [1, 1, 1]} : vector<7x7x4xbf16> to vector<1x1x4xbf16>
    %312 = vector.shape_cast %311 : vector<1x1x4xbf16> to vector<4xbf16>
    %313 = vector.shape_cast %312 : vector<4xbf16> to vector<1x1x4xbf16>
    %314 = vector.broadcast %313 : vector<1x1x4xbf16> to vector<16x16x4xbf16>
    %315 = arith.mulf %310, %314 : vector<16x16x4xbf16>
    %316 = arith.addf %309, %315 : vector<16x16x4xbf16>
    %317 = vector.extract_strided_slice %282 {offsets = [5, 0, 0], sizes = [16, 16, 4], strides = [1, 1, 1]} : vector<22x16x4xbf16> to vector<16x16x4xbf16>
    %318 = vector.extract_strided_slice %11 {offsets = [5, 5, 0], sizes = [1, 1, 4], strides = [1, 1, 1]} : vector<7x7x4xbf16> to vector<1x1x4xbf16>
    %319 = vector.shape_cast %318 : vector<1x1x4xbf16> to vector<4xbf16>
    %320 = vector.shape_cast %319 : vector<4xbf16> to vector<1x1x4xbf16>
    %321 = vector.broadcast %320 : vector<1x1x4xbf16> to vector<16x16x4xbf16>
    %322 = arith.mulf %317, %321 : vector<16x16x4xbf16>
    %323 = arith.addf %316, %322 : vector<16x16x4xbf16>
    %324 = vector.extract_strided_slice %282 {offsets = [6, 0, 0], sizes = [16, 16, 4], strides = [1, 1, 1]} : vector<22x16x4xbf16> to vector<16x16x4xbf16>
    %325 = vector.extract_strided_slice %11 {offsets = [6, 5, 0], sizes = [1, 1, 4], strides = [1, 1, 1]} : vector<7x7x4xbf16> to vector<1x1x4xbf16>
    %326 = vector.shape_cast %325 : vector<1x1x4xbf16> to vector<4xbf16>
    %327 = vector.shape_cast %326 : vector<4xbf16> to vector<1x1x4xbf16>
    %328 = vector.broadcast %327 : vector<1x1x4xbf16> to vector<16x16x4xbf16>
    %329 = arith.mulf %324, %328 : vector<16x16x4xbf16>
    %330 = arith.addf %323, %329 : vector<16x16x4xbf16>
    %331 = arith.extf %330 : vector<16x16x4xbf16> to vector<16x16x4xf32>
    %332 = arith.addf %279, %331 : vector<16x16x4xf32>
    %c29_i32 = arith.constant 29 : i32
    %333 = tpu.dynamic_rotate %9 by %c29_i32 dim 1 : vector<22x32x4xf32>, i32 -> vector<22x32x4xf32>
    %334 = vector.extract_strided_slice %333 {offsets = [0, 8, 0], sizes = [22, 16, 4], strides = [1, 1, 1]} : vector<22x32x4xf32> to vector<22x16x4xf32>
    %335 = arith.truncf %334 : vector<22x16x4xf32> to vector<22x16x4xbf16>
    %336 = vector.extract_strided_slice %335 {offsets = [0, 0, 0], sizes = [16, 16, 4], strides = [1, 1, 1]} : vector<22x16x4xbf16> to vector<16x16x4xbf16>
    %337 = vector.extract_strided_slice %11 {offsets = [0, 6, 0], sizes = [1, 1, 4], strides = [1, 1, 1]} : vector<7x7x4xbf16> to vector<1x1x4xbf16>
    %338 = vector.shape_cast %337 : vector<1x1x4xbf16> to vector<4xbf16>
    %339 = vector.shape_cast %338 : vector<4xbf16> to vector<1x1x4xbf16>
    %340 = vector.broadcast %339 : vector<1x1x4xbf16> to vector<16x16x4xbf16>
    %341 = arith.mulf %336, %340 : vector<16x16x4xbf16>
    %342 = vector.extract_strided_slice %335 {offsets = [1, 0, 0], sizes = [16, 16, 4], strides = [1, 1, 1]} : vector<22x16x4xbf16> to vector<16x16x4xbf16>
    %343 = vector.extract_strided_slice %11 {offsets = [1, 6, 0], sizes = [1, 1, 4], strides = [1, 1, 1]} : vector<7x7x4xbf16> to vector<1x1x4xbf16>
    %344 = vector.shape_cast %343 : vector<1x1x4xbf16> to vector<4xbf16>
    %345 = vector.shape_cast %344 : vector<4xbf16> to vector<1x1x4xbf16>
    %346 = vector.broadcast %345 : vector<1x1x4xbf16> to vector<16x16x4xbf16>
    %347 = arith.mulf %342, %346 : vector<16x16x4xbf16>
    %348 = arith.addf %341, %347 : vector<16x16x4xbf16>
    %349 = vector.extract_strided_slice %335 {offsets = [2, 0, 0], sizes = [16, 16, 4], strides = [1, 1, 1]} : vector<22x16x4xbf16> to vector<16x16x4xbf16>
    %350 = vector.extract_strided_slice %11 {offsets = [2, 6, 0], sizes = [1, 1, 4], strides = [1, 1, 1]} : vector<7x7x4xbf16> to vector<1x1x4xbf16>
    %351 = vector.shape_cast %350 : vector<1x1x4xbf16> to vector<4xbf16>
    %352 = vector.shape_cast %351 : vector<4xbf16> to vector<1x1x4xbf16>
    %353 = vector.broadcast %352 : vector<1x1x4xbf16> to vector<16x16x4xbf16>
    %354 = arith.mulf %349, %353 : vector<16x16x4xbf16>
    %355 = arith.addf %348, %354 : vector<16x16x4xbf16>
    %356 = vector.extract_strided_slice %335 {offsets = [3, 0, 0], sizes = [16, 16, 4], strides = [1, 1, 1]} : vector<22x16x4xbf16> to vector<16x16x4xbf16>
    %357 = vector.extract_strided_slice %11 {offsets = [3, 6, 0], sizes = [1, 1, 4], strides = [1, 1, 1]} : vector<7x7x4xbf16> to vector<1x1x4xbf16>
    %358 = vector.shape_cast %357 : vector<1x1x4xbf16> to vector<4xbf16>
    %359 = vector.shape_cast %358 : vector<4xbf16> to vector<1x1x4xbf16>
    %360 = vector.broadcast %359 : vector<1x1x4xbf16> to vector<16x16x4xbf16>
    %361 = arith.mulf %356, %360 : vector<16x16x4xbf16>
    %362 = arith.addf %355, %361 : vector<16x16x4xbf16>
    %363 = vector.extract_strided_slice %335 {offsets = [4, 0, 0], sizes = [16, 16, 4], strides = [1, 1, 1]} : vector<22x16x4xbf16> to vector<16x16x4xbf16>
    %364 = vector.extract_strided_slice %11 {offsets = [4, 6, 0], sizes = [1, 1, 4], strides = [1, 1, 1]} : vector<7x7x4xbf16> to vector<1x1x4xbf16>
    %365 = vector.shape_cast %364 : vector<1x1x4xbf16> to vector<4xbf16>
    %366 = vector.shape_cast %365 : vector<4xbf16> to vector<1x1x4xbf16>
    %367 = vector.broadcast %366 : vector<1x1x4xbf16> to vector<16x16x4xbf16>
    %368 = arith.mulf %363, %367 : vector<16x16x4xbf16>
    %369 = arith.addf %362, %368 : vector<16x16x4xbf16>
    %370 = vector.extract_strided_slice %335 {offsets = [5, 0, 0], sizes = [16, 16, 4], strides = [1, 1, 1]} : vector<22x16x4xbf16> to vector<16x16x4xbf16>
    %371 = vector.extract_strided_slice %11 {offsets = [5, 6, 0], sizes = [1, 1, 4], strides = [1, 1, 1]} : vector<7x7x4xbf16> to vector<1x1x4xbf16>
    %372 = vector.shape_cast %371 : vector<1x1x4xbf16> to vector<4xbf16>
    %373 = vector.shape_cast %372 : vector<4xbf16> to vector<1x1x4xbf16>
    %374 = vector.broadcast %373 : vector<1x1x4xbf16> to vector<16x16x4xbf16>
    %375 = arith.mulf %370, %374 : vector<16x16x4xbf16>
    %376 = arith.addf %369, %375 : vector<16x16x4xbf16>
    %377 = vector.extract_strided_slice %335 {offsets = [6, 0, 0], sizes = [16, 16, 4], strides = [1, 1, 1]} : vector<22x16x4xbf16> to vector<16x16x4xbf16>
    %378 = vector.extract_strided_slice %11 {offsets = [6, 6, 0], sizes = [1, 1, 4], strides = [1, 1, 1]} : vector<7x7x4xbf16> to vector<1x1x4xbf16>
    %379 = vector.shape_cast %378 : vector<1x1x4xbf16> to vector<4xbf16>
    %380 = vector.shape_cast %379 : vector<4xbf16> to vector<1x1x4xbf16>
    %381 = vector.broadcast %380 : vector<1x1x4xbf16> to vector<16x16x4xbf16>
    %382 = arith.mulf %377, %381 : vector<16x16x4xbf16>
    %383 = arith.addf %376, %382 : vector<16x16x4xbf16>
    %384 = arith.extf %383 : vector<16x16x4xbf16> to vector<16x16x4xf32>
    %385 = arith.addf %332, %384 : vector<16x16x4xf32>
    %386 = vector.shape_cast %385 : vector<16x16x4xf32> to vector<1x16x16x4xf32>
    %cst_23 = arith.constant dense<0.000000e+00> : vector<1xf32>
    %387 = vector.multi_reduction <add>, %386, %cst_23 [1, 2, 3] : vector<1x16x16x4xf32> to vector<1xf32>
    %388 = vector.shape_cast %387 : vector<1xf32> to vector<1x1x1x1xf32>
    %389 = vector.extract %388[0, 0, 0, 0] : f32 from vector<1x1x1x1xf32>
    %cst_24 = arith.constant 9.765625E-4 : f32
    %390 = arith.mulf %389, %cst_24 : f32
    %391 = vector.broadcast %390 : f32 to vector<16x16x4xf32>
    %392 = arith.subf %385, %391 : vector<16x16x4xf32>
    %393 = arith.mulf %392, %392 : vector<16x16x4xf32>
    %394 = vector.shape_cast %393 : vector<16x16x4xf32> to vector<1x16x16x4xf32>
    %cst_25 = arith.constant dense<0.000000e+00> : vector<1xf32>
    %395 = vector.multi_reduction <add>, %394, %cst_25 [1, 2, 3] : vector<1x16x16x4xf32> to vector<1xf32>
    %396 = vector.shape_cast %395 : vector<1xf32> to vector<1x1x1x1xf32>
    %397 = vector.extract %396[0, 0, 0, 0] : f32 from vector<1x1x1x1xf32>
    %cst_26 = arith.constant 9.765625E-4 : f32
    %398 = arith.mulf %397, %cst_26 : f32
    %cst_27 = arith.constant 9.99999997E-7 : f32
    %399 = arith.addf %398, %cst_27 : f32
    %400 = math.rsqrt %399 : f32
    %c0_28 = arith.constant 0 : index
    %c0_29 = arith.constant 0 : index
    %401 = vector.load %arg4[%c0_28, %c0_29] : memref<1x4xf32, #tpu.memory_space<vmem>>, vector<1x4xf32>
    %402 = vector.shape_cast %401 : vector<1x4xf32> to vector<4xf32>
    %403 = vector.broadcast %400 : f32 to vector<4xf32>
    %404 = arith.mulf %402, %403 : vector<4xf32>
    %405 = vector.shape_cast %404 : vector<4xf32> to vector<1x1x4xf32>
    %406 = vector.broadcast %405 : vector<1x1x4xf32> to vector<16x16x4xf32>
    %407 = arith.mulf %392, %406 : vector<16x16x4xf32>
    %c0_30 = arith.constant 0 : index
    %c0_31 = arith.constant 0 : index
    %408 = vector.load %arg5[%c0_30, %c0_31] : memref<1x4xf32, #tpu.memory_space<vmem>>, vector<1x4xf32>
    %409 = vector.shape_cast %408 : vector<1x4xf32> to vector<4xf32>
    %410 = vector.shape_cast %409 : vector<4xf32> to vector<1x1x4xf32>
    %411 = vector.broadcast %410 : vector<1x1x4xf32> to vector<16x16x4xf32>
    %412 = arith.addf %407, %411 : vector<16x16x4xf32>
    %c0_32 = arith.constant 0 : index
    %c0_33 = arith.constant 0 : index
    %413 = vector.load %arg6[%c0_32, %c0_33] : memref<4x16xbf16, #tpu.memory_space<vmem>>, vector<4x16xbf16>
    %c0_34 = arith.constant 0 : index
    %c0_35 = arith.constant 0 : index
    %414 = vector.load %arg8[%c0_34, %c0_35] : memref<16x4xbf16, #tpu.memory_space<vmem>>, vector<16x4xbf16>
    %c0_36 = arith.constant 0 : index
    %c0_37 = arith.constant 0 : index
    %415 = vector.load %arg7[%c0_36, %c0_37] : memref<1x16xf32, #tpu.memory_space<vmem>>, vector<1x16xf32>
    %416 = vector.shape_cast %415 : vector<1x16xf32> to vector<16xf32>
    %c0_38 = arith.constant 0 : index
    %c0_39 = arith.constant 0 : index
    %417 = vector.load %arg9[%c0_38, %c0_39] : memref<1x4xf32, #tpu.memory_space<vmem>>, vector<1x4xf32>
    %418 = vector.shape_cast %417 : vector<1x4xf32> to vector<4xf32>
    %419 = vector.shape_cast %412 : vector<16x16x4xf32> to vector<256x4xf32>
    %420 = arith.truncf %419 : vector<256x4xf32> to vector<256x4xbf16>
    %cst_40 = arith.constant dense<0.000000e+00> : vector<256x16xf32>
    %421 = tpu.matmul %420, %413, %cst_40 {dimension_numbers = #tpu.dot_dimension_numbers<[1], [0], [0], [1], [0, 0, 1, 1], [], []>} : vector<256x4xbf16>, vector<4x16xbf16>, vector<256x16xf32> -> vector<256x16xf32>
    %422 = vector.shape_cast %416 : vector<16xf32> to vector<1x16xf32>
    %423 = vector.broadcast %422 : vector<1x16xf32> to vector<256x16xf32>
    %424 = arith.addf %421, %423 : vector<256x16xf32>
    %425 = arith.truncf %424 : vector<256x16xf32> to vector<256x16xbf16>
    %426 = arith.mulf %425, %425 : vector<256x16xbf16>
    %427 = arith.mulf %425, %426 : vector<256x16xbf16>
    %cst_41 = arith.constant 4.467770e-02 : bf16
    %428 = vector.broadcast %cst_41 : bf16 to vector<256x16xbf16>
    %429 = arith.mulf %428, %427 : vector<256x16xbf16>
    %430 = arith.addf %425, %429 : vector<256x16xbf16>
    %cst_42 = arith.constant 7.968750e-01 : bf16
    %431 = vector.broadcast %cst_42 : bf16 to vector<256x16xbf16>
    %432 = arith.mulf %431, %430 : vector<256x16xbf16>
    %433 = math.tanh %432 : vector<256x16xbf16>
    %cst_43 = arith.constant 1.000000e+00 : bf16
    %434 = vector.broadcast %cst_43 : bf16 to vector<256x16xbf16>
    %435 = arith.addf %434, %433 : vector<256x16xbf16>
    %cst_44 = arith.constant 5.000000e-01 : bf16
    %436 = vector.broadcast %cst_44 : bf16 to vector<256x16xbf16>
    %437 = arith.mulf %436, %435 : vector<256x16xbf16>
    %438 = arith.mulf %425, %437 : vector<256x16xbf16>
    %cst_45 = arith.constant dense<0.000000e+00> : vector<256x4xf32>
    %439 = tpu.matmul %438, %414, %cst_45 {dimension_numbers = #tpu.dot_dimension_numbers<[1], [0], [0], [1], [0, 0, 1, 1], [], []>} : vector<256x16xbf16>, vector<16x4xbf16>, vector<256x4xf32> -> vector<256x4xf32>
    %440 = vector.shape_cast %418 : vector<4xf32> to vector<1x4xf32>
    %441 = vector.broadcast %440 : vector<1x4xf32> to vector<256x4xf32>
    %442 = arith.addf %439, %441 : vector<256x4xf32>
    %443 = vector.shape_cast %442 : vector<256x4xf32> to vector<16x16x4xf32>
    %444 = arith.addf %443, %1 : vector<16x16x4xf32>
    %c0_46 = arith.constant 0 : index
    %c0_47 = arith.constant 0 : index
    %c0_48 = arith.constant 0 : index
    %c0_49 = arith.constant 0 : index
    %445 = vector.load %arg10[%c0_46, %c0_47, %c0_48, %c0_49] : memref<1x16x16x4xf32, #tpu.memory_space<vmem>>, vector<1x16x16x4xf32>
    %446 = vector.shape_cast %445 : vector<1x16x16x4xf32> to vector<16x16x4xf32>
    %447 = vector.shape_cast %444 : vector<16x16x4xf32> to vector<1x16x16x4xf32>
    tpu.vector_store %arg10[%c0_46, %c0_47, %c0_48, %c0_49], %447 {strides = array<i32>} : memref<1x16x16x4xf32, #tpu.memory_space<vmem>>, vector<1x16x16x4xf32>,
    return
  }
  func.func @transform_0(%arg0: i32) -> (i32, i32, i32, i32) {
    %c0_i32 = arith.constant 0 : i32
    %c0_i32_0 = arith.constant 0 : i32
    %c0_i32_1 = arith.constant 0 : i32
    %c0_i32_2 = arith.constant 0 : i32
    return %arg0, %c0_i32, %c0_i32_0, %c0_i32_1 : i32, i32, i32, i32
  }
  func.func @transform_1(%arg0: i32) -> (i32, i32, i32) {
    %c0_i32 = arith.constant 0 : i32
    %c0_i32_0 = arith.constant 0 : i32
    %c0_i32_1 = arith.constant 0 : i32
    %c0_i32_2 = arith.constant 0 : i32
    return %c0_i32, %c0_i32_0, %c0_i32_1 : i32, i32, i32
  }
  func.func @transform_2(%arg0: i32) -> (i32, i32) {
    %c0_i32 = arith.constant 0 : i32
    %c0_i32_0 = arith.constant 0 : i32
    %c0_i32_1 = arith.constant 0 : i32
    return %c0_i32, %c0_i32_0 : i32, i32
  }
  func.func @transform_3(%arg0: i32) -> (i32, i32) {
    %c0_i32 = arith.constant 0 : i32
    %c0_i32_0 = arith.constant 0 : i32
    %c0_i32_1 = arith.constant 0 : i32
    return %c0_i32, %c0_i32_0 : i32, i32
  }
  func.func @transform_4(%arg0: i32) -> (i32, i32) {
    %c0_i32 = arith.constant 0 : i32
    %c0_i32_0 = arith.constant 0 : i32
    %c0_i32_1 = arith.constant 0 : i32
    return %c0_i32, %c0_i32_0 : i32, i32
  }
  func.func @transform_5(%arg0: i32) -> (i32, i32) {
    %c0_i32 = arith.constant 0 : i32
    %c0_i32_0 = arith.constant 0 : i32
    %c0_i32_1 = arith.constant 0 : i32
    return %c0_i32, %c0_i32_0 : i32, i32
  }
  func.func @transform_6(%arg0: i32) -> (i32, i32) {
    %c0_i32 = arith.constant 0 : i32
    %c0_i32_0 = arith.constant 0 : i32
    %c0_i32_1 = arith.constant 0 : i32
    return %c0_i32, %c0_i32_0 : i32, i32
  }
  func.func @transform_7(%arg0: i32) -> (i32, i32) {
    %c0_i32 = arith.constant 0 : i32
    %c0_i32_0 = arith.constant 0 : i32
    %c0_i32_1 = arith.constant 0 : i32
    return %c0_i32, %c0_i32_0 : i32, i32
  }
  func.func @transform_8(%arg0: i32) -> (i32, i32) {
    %c0_i32 = arith.constant 0 : i32
    %c0_i32_0 = arith.constant 0 : i32
    %c0_i32_1 = arith.constant 0 : i32
    return %c0_i32, %c0_i32_0 : i32, i32
  }
  func.func @transform_9(%arg0: i32) -> (i32, i32, i32, i32) {
    %c0_i32 = arith.constant 0 : i32
    %c0_i32_0 = arith.constant 0 : i32
    %c0_i32_1 = arith.constant 0 : i32
    %c0_i32_2 = arith.constant 0 : i32
    return %arg0, %c0_i32, %c0_i32_0, %c0_i32_1 : i32, i32, i32, i32
  }
}

</mosaic_0001>

<bundles_post_ra>
// kernel: tpu_custom_call.1
= control target key start
LH: loop header
LB: loop body
LE: loop exit
PB: predicated region body
PF: predicated region fallthrough
CT: control target
= control target key end

     0   :  { %s5008_s30 = smov 0   ;;  %s10868_s0 = inlined_call_operand.vmem [shape: f32[2,16,16,4], index: 0, kind: input, shape index: {}]   ;;  %s10869_s1 = inlined_call_operand.vmem [shape: f32[7,7,4], index: 1, kind: input, shape index: {}]   ;;  %s10870_s2 = inlined_call_operand.vmem [shape: f32[1,4], index: 2, kind: input, shape index: {}]   ;;  %s10871_s3 = inlined_call_operand.vmem [shape: f32[1,4], index: 3, kind: input, shape index: {}]   ;;  %s10872_s4 = inlined_call_operand.vmem [shape: f32[1,4], index: 4, kind: input, shape index: {}]   ;;  %s10873_s5 = inlined_call_operand.vmem [shape: bf16[4,16], index: 5, kind: input, shape index: {}]   ;;  %s10874_s6 = inlined_call_operand.vmem [shape: f32[1,16], index: 6, kind: input, shape index: {}]   ;;  %s10875_s7 = inlined_call_operand.vmem [shape: bf16[16,4], index: 7, kind: input, shape index: {}]   ;;  %s10876_s8 = inlined_call_operand.vmem [shape: f32[1,4], index: 8, kind: input, shape index: {}]   ;;  %s10877_s9 = inlined_call_operand.vmem [shape: f32[2,16,16,4], index: 9, kind: output, shape index: {}]  }
   0x1 LB: > { %s4570_s10 = sadd.s32 4294967295, %s4955_s30   ;;  %p4574_p0 = scmp.ge.s32.totalorder %s4955_s30, 1  ;;  %s4955_s30 = sphi %s5008_s30, %s19_s30  }
   0x2   : > { %p287_p1 = scmp.lt.s32.totalorder %s4955_s30, 3 }
   0x4   : > { %p288_p2 = pnand %p4574_p0, %p287_p1 }
   0x6   : > { %291 = sbr.rel (%p288_p2) target bundleno = 1997 (0x7cd), region = 56 }
   0xb   : > { %p5018_p3 = scmp.lt.s32.totalorder %s4570_s10, 1  ;;  %vm370_vm0 = vcmask 31744   ;;  %v4957_v0 = vmov 0.0   ;;  %v636_v33 = vlaneseq  ;;  %v549_v34 = vld [vmem:[%s10869_s1] sm:$0x7f]  ;;  %vm3904_vm7 = vcmask 1041408  }
   0xc   : > { %371 = vst.msk [vmem:[#allocation2] sm:$0xff] %vm370_vm0, %v4957_v0  ;;  %372 = vst.msk [vmem:[#allocation2 + $0x8] sm:$0xff] %vm370_vm0, %v4957_v0  ;;  %v550_v35 = vld [vmem:[%s10869_s1 + $0x8] sm:$0x7f]  ;;  %v551_v36 = vld [vmem:[%s10869_s1 + $0x10] sm:$0x7f]  ;;  %v556_v39 = vpack.c.bf16 %v549_v34, %v549_v34 }
   0xd   : > { %373 = vst.msk [vmem:[#allocation2 + $0x10] sm:$0xff] %vm370_vm0, %v4957_v0  ;;  %374 = vst.msk [vmem:[#allocation2 + $0x18] sm:$0xff] %vm370_vm0, %v4957_v0  ;;  %s12933_s10 = smov (!%p5018_p3, %s4570_s10), 1  ;;  %v552_v37 = vld [vmem:[%s10869_s1 + $0x18] sm:$0x7f]  ;;  %v5267_v40 = vshrl.u32 %v636_v33, 7  ;;  %v5275_v43 = vpack.c.bf16 %v550_v35, %v550_v35  ;;  %v5277_v44 = vpack.c.bf16 %v551_v36, %v551_v36 }
   0xe   : > { %375 = vst.msk [vmem:[#allocation2 + $0x20] sm:$0xff] %vm370_vm0, %v4957_v0  ;;  %376 = vst.msk [vmem:[#allocation2 + $0x28] sm:$0xff] %vm370_vm0, %v4957_v0  ;;  %s4618_s12 = sshll.u32 %s12933_s10, 8  ;;  %v553_v38 = vld [vmem:[%s10869_s1 + $0x20] sm:$0x7f]  ;;  %v5279_v45 = vpack.c.bf16 %v552_v37, %v552_v37  ;;  %v5287_v49 = vpack.i.b16 %v556_v39, %v556_v39  ;;  %v1159_v51 = vshrl.u32 %v556_v39, 16 }
   0xf   : > { %377 = vst.msk [vmem:[#allocation2 + $0x30] sm:$0xff] %vm370_vm0, %v4957_v0  ;;  %378 = vst.msk [vmem:[#allocation2 + $0x38] sm:$0xff] %vm370_vm0, %v4957_v0  ;;  %s5090_s15 = scalar_lea.vmem %s10868_s0, %s4618_s12  ;;  %v554_v41 = vld [vmem:[%s10869_s1 + $0x28] sm:$0x7f]  ;;  %v555_v42 = vld [vmem:[%s10869_s1 + $0x30] sm:$0x7f]  ;;  %v5281_v46 = vpack.c.bf16 %v553_v38, %v553_v38  ;;  %v5298_v55 = vpack.i.b16 %v5275_v43, %v5275_v43  ;;  %v5307_v59 = vpack.i.b16 %v5277_v44, %v5277_v44  ;;  %s10736_s16 = scalar_lea.vmem %s10877_s9, %s4618_s12 }
  0x10   : > { %379 = vst.msk [vmem:[#allocation2 + $0x40] sm:$0xff] %vm370_vm0, %v4957_v0  ;;  %380 = vst.msk [vmem:[#allocation2 + $0x48] sm:$0xff] %vm370_vm0, %v4957_v0  ;;  %v5093_v1 = vld [vmem:[%s5090_s15] sm:$0xff]  ;;  %v5096_v2 = vld [vmem:[%s5090_s15 + $0x8] sm:$0xff]  ;;  %v5283_v47 = vpack.c.bf16 %v554_v41, %v554_v41  ;;  %v5285_v48 = vpack.c.bf16 %v555_v42, %v555_v42  ;;  %v5290_v50 = vsub.s32 0, %v5267_v40  ;;  %vm638_vm1 = vcmp.lt.s32.totalorder %v5267_v40, 3 }
  0x11   : > { %381 = vst.msk [vmem:[#allocation2 + $0x50] sm:$0xff] %vm370_vm0, %v4957_v0  ;;  %382 = vst.msk [vmem:[#allocation2 + $0x58] sm:$0xff] %vm370_vm0, %v4957_v0  ;;  %v5099_v3 = vld [vmem:[%s5090_s15 + $0x10] sm:$0xff]  ;;  %v5102_v4 = vld [vmem:[%s5090_s15 + $0x18] sm:$0xff]  ;;  %v5311_v60 = vpack.i.b16 %v5279_v45, %v5279_v45  ;;  %v5335_v38 = vpack.i.b16 %v1159_v51, %v1159_v51  ;;  %vm4241_vm8 = vcmask 130048  }
  0x12   : > { %384 = vst.msk [vmem:[#allocation2 + $0x260] sm:$0xff] %vm370_vm0, %v4957_v0  ;;  %385 = vst.msk [vmem:[#allocation2 + $0x268] sm:$0xff] %vm370_vm0, %v4957_v0  ;;  %v5105_v5 = vld [vmem:[%s5090_s15 + $0x20] sm:$0xff]  ;;  %v5108_v6 = vld [vmem:[%s5090_s15 + $0x28] sm:$0xff]  ;;  %v5319_v63 = vrot.slane %v5287_v49, %v5290_v50  ;;  %v5327_v33 = vpack.i.b16 %v5283_v47, %v5283_v47  ;;  %v5331_v34 = vpack.i.b16 %v5285_v48, %v5285_v48 }
  0x13   : > { %386 = vst.msk [vmem:[#allocation2 + $0x270] sm:$0xff] %vm370_vm0, %v4957_v0  ;;  %387 = vst.msk [vmem:[#allocation2 + $0x278] sm:$0xff] %vm370_vm0, %v4957_v0  ;;  %v5117_v7 = vld [vmem:[%s5090_s15 + $0x30] sm:$0xff]  ;;  %v5120_v8 = vld [vmem:[%s5090_s15 + $0x38] sm:$0xff] }
  0x14   : > { %388 = vst.msk [vmem:[#allocation2 + $0x280] sm:$0xff] %vm370_vm0, %v4957_v0  ;;  %389 = vst.msk [vmem:[#allocation2 + $0x288] sm:$0xff] %vm370_vm0, %v4957_v0  ;;  %v5123_v9 = vld [vmem:[%s5090_s15 + $0x40] sm:$0xff]  ;;  %v5132_v10 = vld [vmem:[%s5090_s15 + $0x48] sm:$0xff] }
  0x15   : > { %390 = vst.msk [vmem:[#allocation2 + $0x290] sm:$0xff] %vm370_vm0, %v4957_v0  ;;  %391 = vst.msk [vmem:[#allocation2 + $0x298] sm:$0xff] %vm370_vm0, %v4957_v0  ;;  %v5135_v11 = vld [vmem:[%s5090_s15 + $0x50] sm:$0xff]  ;;  %v5138_v12 = vld [vmem:[%s5090_s15 + $0x58] sm:$0xff] }
  0x16   : > { %392 = vst.msk [vmem:[#allocation2 + $0x2a0] sm:$0xff] %vm370_vm0, %v4957_v0  ;;  %393 = vst.msk [vmem:[#allocation2 + $0x2a8] sm:$0xff] %vm370_vm0, %v4957_v0  ;;  %v5147_v13 = vld [vmem:[%s5090_s15 + $0x60] sm:$0xff]  ;;  %v5150_v14 = vld [vmem:[%s5090_s15 + $0x68] sm:$0xff] }
  0x17   : > { %394 = vst.msk [vmem:[#allocation2 + $0x2b0] sm:$0xff] %vm370_vm0, %v4957_v0  ;;  %395 = vst.msk [vmem:[#allocation2 + $0x2b8] sm:$0xff] %vm370_vm0, %v4957_v0  ;;  %v5153_v15 = vld [vmem:[%s5090_s15 + $0x70] sm:$0xff]  ;;  %v5162_v16 = vld [vmem:[%s5090_s15 + $0x78] sm:$0xff] }
  0x18   : > { %397 = vst.msk [vmem:[#allocation2 + $0x60] sm:$0xff] %vm370_vm0, %v4957_v0  ;;  %398 = vst.msk [vmem:[#allocation2 + $0x80] sm:$0xff] %vm370_vm0, %v4957_v0  ;;  %v5165_v17 = vld [vmem:[%s5090_s15 + $0x80] sm:$0xff]  ;;  %v5168_v18 = vld [vmem:[%s5090_s15 + $0x88] sm:$0xff] }
  0x19   : > { %399 = vst.msk [vmem:[#allocation2 + $0xa0] sm:$0xff] %vm370_vm0, %v4957_v0  ;;  %400 = vst.msk [vmem:[#allocation2 + $0xc0] sm:$0xff] %vm370_vm0, %v4957_v0  ;;  %v5177_v19 = vld [vmem:[%s5090_s15 + $0x90] sm:$0xff]  ;;  %v5180_v20 = vld [vmem:[%s5090_s15 + $0x98] sm:$0xff] }
  0x1a   : > { %401 = vst.msk [vmem:[#allocation2 + $0xe0] sm:$0xff] %vm370_vm0, %v4957_v0  ;;  %402 = vst.msk [vmem:[#allocation2 + $0x100] sm:$0xff] %vm370_vm0, %v4957_v0  ;;  %v5183_v21 = vld [vmem:[%s5090_s15 + $0xa0] sm:$0xff]  ;;  %v5192_v22 = vld [vmem:[%s5090_s15 + $0xa8] sm:$0xff] }
  0x1b   : > { %403 = vst.msk [vmem:[#allocation2 + $0x120] sm:$0xff] %vm370_vm0, %v4957_v0  ;;  %404 = vst.msk [vmem:[#allocation2 + $0x140] sm:$0xff] %vm370_vm0, %v4957_v0  ;;  %v5195_v23 = vld [vmem:[%s5090_s15 + $0xb0] sm:$0xff]  ;;  %v5198_v24 = vld [vmem:[%s5090_s15 + $0xb8] sm:$0xff] }
  0x1c   : > { %405 = vst.msk [vmem:[#allocation2 + $0x160] sm:$0xff] %vm370_vm0, %v4957_v0  ;;  %406 = vst.msk [vmem:[#allocation2 + $0x180] sm:$0xff] %vm370_vm0, %v4957_v0  ;;  %v5207_v25 = vld [vmem:[%s5090_s15 + $0xc0] sm:$0xff]  ;;  %v5210_v26 = vld [vmem:[%s5090_s15 + $0xc8] sm:$0xff] }
  0x1d   : > { %407 = vst.msk [vmem:[#allocation2 + $0x1a0] sm:$0xff] %vm370_vm0, %v4957_v0  ;;  %408 = vst.msk [vmem:[#allocation2 + $0x1c0] sm:$0xff] %vm370_vm0, %v4957_v0  ;;  %v5213_v27 = vld [vmem:[%s5090_s15 + $0xd0] sm:$0xff]  ;;  %v5222_v28 = vld [vmem:[%s5090_s15 + $0xd8] sm:$0xff] }
  0x1e   : > { %409 = vst.msk [vmem:[#allocation2 + $0x1e0] sm:$0xff] %vm370_vm0, %v4957_v0  ;;  %410 = vst.msk [vmem:[#allocation2 + $0x200] sm:$0xff] %vm370_vm0, %v4957_v0  ;;  %v5225_v29 = vld [vmem:[%s5090_s15 + $0xe0] sm:$0xff]  ;;  %v5228_v30 = vld [vmem:[%s5090_s15 + $0xe8] sm:$0xff] }
  0x1f   : > { %411 = vst.msk [vmem:[#allocation2 + $0x220] sm:$0xff] %vm370_vm0, %v4957_v0  ;;  %412 = vst.msk [vmem:[#allocation2 + $0x240] sm:$0xff] %vm370_vm0, %v4957_v0  ;;  %v5237_v31 = vld [vmem:[%s5090_s15 + $0xf0] sm:$0xff]  ;;  %v5240_v32 = vld [vmem:[%s5090_s15 + $0xf8] sm:$0xff] }
  0x20   : > { %413 = vst.msk [vmem:[#allocation2 + $0x78] sm:$0xff] %vm370_vm0, %v4957_v0  ;;  %414 = vst.msk [vmem:[#allocation2 + $0x98] sm:$0xff] %vm370_vm0, %v4957_v0  ;;  %v5292_v52 = vld [vmem:[#allocation2] sm:$0xff]  ;;  %v5294_v53 = vld [vmem:[#allocation2 + $0x8] sm:$0xff] }
  0x21   : > { %415 = vst.msk [vmem:[#allocation2 + $0xb8] sm:$0xff] %vm370_vm0, %v4957_v0  ;;  %416 = vst.msk [vmem:[#allocation2 + $0xd8] sm:$0xff] %vm370_vm0, %v4957_v0  ;;  %v463_v54 = vld [vmem:[#allocation2 + $0x10] sm:$0xff]  ;;  %v5300_v56 = vld [vmem:[#allocation2 + $0x20] sm:$0xff]  ;;  %v570_v35 = vrot.slane %v5292_v52, 5  ;;  %v592_v36 = vrot.slane %v5294_v53, 5 }
  0x22   : > { %417 = vst.msk [vmem:[#allocation2 + $0xf8] sm:$0xff] %vm370_vm0, %v4957_v0  ;;  %418 = vst.msk [vmem:[#allocation2 + $0x118] sm:$0xff] %vm370_vm0, %v4957_v0  ;;  %v5302_v57 = vld [vmem:[#allocation2 + $0x28] sm:$0xff]  ;;  %v467_v58 = vld [vmem:[#allocation2 + $0x30] sm:$0xff]  ;;  %v614_v37 = vrot.slane %v463_v54, 5  ;;  %v571_v41 = vrot.slane %v5300_v56, 5 }
  0x23   : > { %419 = vst.msk [vmem:[#allocation2 + $0x138] sm:$0xff] %vm370_vm0, %v4957_v0  ;;  %420 = vst.msk [vmem:[#allocation2 + $0x158] sm:$0xff] %vm370_vm0, %v4957_v0  ;;  %v5313_v61 = vld [vmem:[#allocation2 + $0x40] sm:$0xff]  ;;  %v5315_v62 = vld [vmem:[#allocation2 + $0x48] sm:$0xff]  ;;  %v593_v42 = vrot.slane %v5302_v57, 5 }
  0x24   : > { %421 = vst.msk [vmem:[#allocation2 + $0x178] sm:$0xff] %vm370_vm0, %v4957_v0  ;;  %422 = vst.msk [vmem:[#allocation2 + $0x198] sm:$0xff] %vm370_vm0, %v4957_v0  ;;  %v471_v39 = vld [vmem:[#allocation2 + $0x50] sm:$0xff]  ;;  %v572_v54 = vrot.slane %v5313_v61, 5  ;;  %v594_v51 = vrot.slane %v5315_v62, 5 }
  0x25   : > { %423 = vst.msk [vmem:[#allocation2 + $0x1b8] sm:$0xff] %vm370_vm0, %v4957_v0  ;;  %424 = vst.msk [vmem:[#allocation2 + $0x1d8] sm:$0xff] %vm370_vm0, %v4957_v0 }
  0x26   : > { %425 = vst.msk [vmem:[#allocation2 + $0x1f8] sm:$0xff] %vm370_vm0, %v4957_v0  ;;  %426 = vst.msk [vmem:[#allocation2 + $0x218] sm:$0xff] %vm370_vm0, %v4957_v0 }
  0x27   : > { %427 = vst.msk [vmem:[#allocation2 + $0x238] sm:$0xff] %vm370_vm0, %v4957_v0  ;;  %428 = vst.msk [vmem:[#allocation2 + $0x258] sm:$0xff] %vm370_vm0, %v4957_v0  ;;  %v5323_v0 = vpack.i.b16 %v5281_v46, %v5281_v46 }
  0x28   : > { %11410 = vst [vmem:[#allocation3_spill] sm:$0xff] %v5093_v1  ;;  %11411 = vst [vmem:[#allocation4_spill] sm:$0xff] %v5096_v2 }
  0x29   : > { %11412 = vst [vmem:[#allocation5_spill] sm:$0xff] %v5099_v3  ;;  %11413 = vst [vmem:[#allocation6_spill] sm:$0xff] %v5102_v4 }
  0x2a   : > { %11414 = vst [vmem:[#allocation7_spill] sm:$0xff] %v5105_v5  ;;  %11415 = vst [vmem:[#allocation8_spill] sm:$0xff] %v5108_v6 }
  0x2b   : > { %429 = vst.msk [vmem:[#allocation2 + $0x68] sm:$0xff] %vm370_vm0, %v5093_v1  ;;  %430 = vst.msk [vmem:[#allocation2 + $0x70] sm:$0xff] %vm370_vm0, %v5096_v2  ;;  %v5419_v2 = vld [vmem:[#allocation2 + $0x100] sm:$0xff] }
  0x2c   : > { %431 = vst.msk [vmem:[#allocation2 + $0x88] sm:$0xff] %vm370_vm0, %v5099_v3  ;;  %11416 = vst [vmem:[#allocation9_spill] sm:$0xff] %v5117_v7 }
  0x2d   : > { %11417 = vst [vmem:[#allocation10_spill] sm:$0xff] %v5120_v8  ;;  %11418 = vst [vmem:[#allocation11_spill] sm:$0xff] %v5123_v9 }
  0x2e   : > { %432 = vst.msk [vmem:[#allocation2 + $0x90] sm:$0xff] %vm370_vm0, %v5102_v4  ;;  %433 = vst.msk [vmem:[#allocation2 + $0xa8] sm:$0xff] %vm370_vm0, %v5105_v5 }
  0x2f   : > { %434 = vst.msk [vmem:[#allocation2 + $0xb0] sm:$0xff] %vm370_vm0, %v5108_v6  ;;  %11419 = vst [vmem:[#allocation12_spill] sm:$0xff] %v5132_v10 }
  0x30   : > { %11420 = vst [vmem:[#allocation13_spill] sm:$0xff] %v5135_v11  ;;  %11421 = vst [vmem:[#allocation14_spill] sm:$0xff] %v5138_v12 }
  0x31   : > { %435 = vst.msk [vmem:[#allocation2 + $0xc8] sm:$0xff] %vm370_vm0, %v5117_v7  ;;  %436 = vst.msk [vmem:[#allocation2 + $0xd0] sm:$0xff] %vm370_vm0, %v5120_v8 }
  0x32   : > { %437 = vst.msk [vmem:[#allocation2 + $0xe8] sm:$0xff] %vm370_vm0, %v5123_v9  ;;  %11422 = vst [vmem:[#allocation15_spill] sm:$0xff] %v5147_v13 }
  0x33   : > { %11423 = vst [vmem:[#allocation16_spill] sm:$0xff] %v5150_v14  ;;  %11424 = vst [vmem:[#allocation17_spill] sm:$0xff] %v5153_v15 }
  0x34   : > { %438 = vst.msk [vmem:[#allocation2 + $0xf0] sm:$0xff] %vm370_vm0, %v5132_v10  ;;  %439 = vst.msk [vmem:[#allocation2 + $0x108] sm:$0xff] %vm370_vm0, %v5135_v11 }
  0x35   : > { %440 = vst.msk [vmem:[#allocation2 + $0x110] sm:$0xff] %vm370_vm0, %v5138_v12  ;;  %11425 = vst [vmem:[#allocation18_spill] sm:$0xff] %v5162_v16 }
  0x36   : > { %11426 = vst [vmem:[#allocation19_spill] sm:$0xff] %v5165_v17  ;;  %11427 = vst [vmem:[#allocation20_spill] sm:$0xff] %v5168_v18 }
  0x37   : > { %441 = vst.msk [vmem:[#allocation2 + $0x128] sm:$0xff] %vm370_vm0, %v5147_v13  ;;  %442 = vst.msk [vmem:[#allocation2 + $0x130] sm:$0xff] %vm370_vm0, %v5150_v14  ;;  %v5386_v14 = vsel %vm638_vm1, %v592_v36, %v614_v37  ;;  %v616_v37 = vrot.slane %v471_v39, 5  ;;  %v663_v39 = vsel %vm638_vm1, %v572_v54, %v594_v51 }
  0x38   : > { %443 = vst.msk [vmem:[#allocation2 + $0x148] sm:$0xff] %vm370_vm0, %v5153_v15  ;;  %11428 = vst [vmem:[#allocation21_spill] sm:$0xff] %v5177_v19  ;;  %v5395_v15 = vrot.slane %v5335_v38, %v5290_v50  ;;  %v5399_v10 = vld [vmem:[#allocation2 + $0xc8] sm:$0xff]  ;;  %v5401_v12 = vld [vmem:[#allocation2 + $0xd0] sm:$0xff] }
  0x39   : > { %11429 = vst [vmem:[#allocation22_spill] sm:$0xff] %v5180_v20  ;;  %11430 = vst [vmem:[#allocation23_spill] sm:$0xff] %v5183_v21  ;;  %v5410_v13 = vld [vmem:[#allocation2 + $0xe8] sm:$0xff]  ;;  %v620_v54 = vrot.slane %v5401_v12, 5 }
  0x3a   : > { %444 = vst.msk [vmem:[#allocation2 + $0x150] sm:$0xff] %vm370_vm0, %v5162_v16  ;;  %445 = vst.msk [vmem:[#allocation2 + $0x168] sm:$0xff] %vm370_vm0, %v5165_v17  ;;  %v5380_v17 = vld [vmem:[#allocation2 + $0xa8] sm:$0xff]  ;;  %v5390_v16 = vsel %vm638_vm1, %v570_v35, %v592_v36  ;;  %v662_v35 = vsel %vm638_vm1, %v571_v41, %v593_v42  ;;  %v5408_v36 = vld [vmem:[#allocation2 + $0xe0] sm:$0xff] }
  0x3b   : > { %446 = vst.msk [vmem:[#allocation2 + $0x170] sm:$0xff] %vm370_vm0, %v5168_v18  ;;  %11431 = vst [vmem:[#allocation24_spill] sm:$0xff] %v5192_v22  ;;  %v5397_v18 = vld [vmem:[#allocation2 + $0xc0] sm:$0xff]  ;;  %v5412_v6 = vld [vmem:[#allocation2 + $0xf0] sm:$0xff]  ;;  %v597_v4 = vrot.slane %v5380_v17, 5 }
  0x3c   : > { %11432 = vst [vmem:[#allocation25_spill] sm:$0xff] %v5195_v23  ;;  %11433 = vst [vmem:[#allocation26_spill] sm:$0xff] %v5198_v24  ;;  %v576_v3 = vrot.slane %v5397_v18, 5 }
  0x3d   : > { %447 = vst.msk [vmem:[#allocation2 + $0x188] sm:$0xff] %vm370_vm0, %v5177_v19  ;;  %448 = vst.msk [vmem:[#allocation2 + $0x190] sm:$0xff] %vm370_vm0, %v5180_v20  ;;  %v5378_v20 = vld [vmem:[#allocation2 + $0xa0] sm:$0xff]  ;;  %v5382_v19 = vld [vmem:[#allocation2 + $0xb0] sm:$0xff] }
  0x3e   : > { %449 = vst.msk [vmem:[#allocation2 + $0x1a8] sm:$0xff] %vm370_vm0, %v5183_v21  ;;  %11434 = vst [vmem:[#allocation27_spill] sm:$0xff] %v5207_v25  ;;  %v5371_v21 = vrot.slane %v5327_v33, %v5290_v50  ;;  %v575_v41 = vrot.slane %v5378_v20, 5 }
  0x3f   : > { %11435 = vst [vmem:[#allocation28_spill] sm:$0xff] %v5210_v26  ;;  %11436 = vst [vmem:[#allocation29_spill] sm:$0xff] %v5213_v27 }
  0x40   : > { %450 = vst.msk [vmem:[#allocation2 + $0x1b0] sm:$0xff] %vm370_vm0, %v5192_v22  ;;  %451 = vst.msk [vmem:[#allocation2 + $0x1c8] sm:$0xff] %vm370_vm0, %v5195_v23  ;;  %v5363_v22 = vld [vmem:[#allocation2 + $0x90] sm:$0xff]  ;;  %v5375_v23 = vrot.slane %v5331_v34, %v5290_v50 }
  0x41   : > { %452 = vst.msk [vmem:[#allocation2 + $0x1d0] sm:$0xff] %vm370_vm0, %v5198_v24  ;;  %11437 = vst [vmem:[#allocation30_spill] sm:$0xff] %v5222_v28  ;;  %v5367_v24 = vrot.slane %v5323_v0, %v5290_v50  ;;  %v618_v1 = vrot.slane %v5363_v22, 5 }
  0x42   : > { %11438 = vst [vmem:[#allocation31_spill] sm:$0xff] %v5225_v29  ;;  %11439 = vst [vmem:[#allocation32_spill] sm:$0xff] %v5228_v30 }
  0x43   : > { %453 = vst.msk [vmem:[#allocation2 + $0x1e8] sm:$0xff] %vm370_vm0, %v5207_v25  ;;  %454 = vst.msk [vmem:[#allocation2 + $0x1f0] sm:$0xff] %vm370_vm0, %v5210_v26  ;;  %v5347_v26 = vld [vmem:[#allocation2 + $0x70] sm:$0xff]  ;;  %v5359_v25 = vld [vmem:[#allocation2 + $0x80] sm:$0xff] }
  0x44   : > { %455 = vst.msk [vmem:[#allocation2 + $0x208] sm:$0xff] %vm370_vm0, %v5213_v27  ;;  %11440 = vst [vmem:[#allocation33_spill] sm:$0xff] %v5237_v31  ;;  %v5361_v27 = vld [vmem:[#allocation2 + $0x88] sm:$0xff]  ;;  %v574_v8 = vrot.slane %v5359_v25, 5  ;;  %v617_v7 = vrot.slane %v5347_v26, 5 }
  0x45   : > { %11441 = vst [vmem:[#allocation34_spill] sm:$0xff] %v5240_v32  ;;  %456 = vst.msk [vmem:[#allocation2 + $0x210] sm:$0xff] %vm370_vm0, %v5222_v28  ;;  %v5353_v28 = vrot.slane %v5307_v59, %v5290_v50 }
  0x46   : > { %457 = vst.msk [vmem:[#allocation2 + $0x228] sm:$0xff] %vm370_vm0, %v5225_v29  ;;  %458 = vst.msk [vmem:[#allocation2 + $0x230] sm:$0xff] %vm370_vm0, %v5228_v30  ;;  %v615_v30 = vrot.slane %v467_v58, 5  ;;  %v5343_v29 = vld [vmem:[#allocation2 + $0x60] sm:$0xff]  ;;  %v5357_v58 = vrot.slane %v5311_v60, %v5290_v50 }
  0x47   : > { %459 = vst.msk [vmem:[#allocation2 + $0x248] sm:$0xff] %vm370_vm0, %v5237_v31  ;;  %460 = vst.msk [vmem:[#allocation2 + $0x250] sm:$0xff] %vm370_vm0, %v5240_v32  ;;  %v5341_v32 = vrot.slane %v5298_v55, %v5290_v50  ;;  %v5345_v31 = vld [vmem:[#allocation2 + $0x68] sm:$0xff]  ;;  %v573_v9 = vrot.slane %v5343_v29, 5 }
  0x48   : > { %11442 = vst [vmem:[#allocation35_spill] sm:$0xff] %v5267_v40  ;;  %11443 = vst [vmem:[#allocation36_spill] sm:$0xff] %v5275_v43  ;;  %v640_v11 = vsel %vm638_vm1, %v593_v42, %v615_v30  ;;  %v595_v5 = vrot.slane %v5345_v31, 5  ;;  %v5421_v30 = vld [vmem:[#allocation2 + $0x108] sm:$0xff]  ;;  %v596_v42 = vrot.slane %v5361_v27, 5 }
  0x49   : > { %11444 = vst [vmem:[#allocation37_spill] sm:$0xff] %v5277_v44  ;;  %11445 = vst [vmem:[#allocation38_spill] sm:$0xff] %v5279_v45  ;;  %v5450_v45 = vld [vmem:[#allocation2 + $0x130] sm:$0xff]  ;;  %v5454_v44 = vld [vmem:[#allocation2 + $0x148] sm:$0xff] }
  0x4a   : > { %11446 = vst [vmem:[#allocation39_spill] sm:$0xff] %v5281_v46  ;;  %11447 = vst [vmem:[#allocation40_spill] sm:$0xff] %v5283_v47  ;;  %v600_v47 = vrot.slane %v5421_v30, 5  ;;  %v5448_v46 = vsel %vm638_vm1, %v595_v5, %v617_v7  ;;  %v5458_v43 = vsel %vm638_vm1, %v596_v42, %v618_v1  ;;  %v5468_v7 = vsel %vm638_vm1, %v575_v41, %v597_v4  ;;  %v5490_v41 = vld [vmem:[#allocation2 + $0x170] sm:$0xff] }
  0x4b   : > { %11448 = vst [vmem:[#allocation41_spill] sm:$0xff] %v5285_v48  ;;  %11449 = vst [vmem:[#allocation42_spill] sm:$0xff] %v5287_v49  ;;  %v5438_v49 = vld [vmem:[#allocation2 + $0x120] sm:$0xff]  ;;  %v578_v48 = vrot.slane %v5419_v2, 5 }
  0x4c   : > { %11450 = vst [vmem:[#allocation43_spill] sm:$0xff] %v5290_v50  ;;  %11451 = vst [vmem:[#allocation44_spill] sm:$0xff] %v5292_v52  ;;  %v5440_v50 = vld [vmem:[#allocation2 + $0x128] sm:$0xff]  ;;  %v664_v52 = vsel %vm638_vm1, %v573_v9, %v595_v5  ;;  %v5488_v9 = vpack.c.bf16 %v640_v11, %v662_v35  ;;  %v5506_v11 = vld [vmem:[#allocation2 + $0x180] sm:$0xff] }
  0x4d   : > { %11452 = vst [vmem:[#allocation45_spill] sm:$0xff] %v5294_v53  ;;  %11453 = vst [vmem:[#allocation46_spill] sm:$0xff] %v5298_v55  ;;  %v5436_v55 = vld [vmem:[#allocation2 + $0x110] sm:$0xff]  ;;  %v5472_v53 = vld [vmem:[#allocation2 + $0x160] sm:$0xff] }
  0x4e   : > { %11454 = vst [vmem:[#allocation47_spill] sm:$0xff] %v5300_v56  ;;  %11455 = vst [vmem:[#allocation48_spill] sm:$0xff] %v5302_v57  ;;  %v5510_v35 = vld [vmem:[#allocation2 + $0x1a8] sm:$0xff] }
  0x4f   : > { %11456 = vst [vmem:[#allocation49_spill] sm:$0xff] %v5307_v59  ;;  %11457 = vst [vmem:[#allocation50_spill] sm:$0xff] %v5311_v60  ;;  %v621_v60 = vrot.slane %v5412_v6, 5  ;;  %v5452_v59 = vld [vmem:[#allocation2 + $0x140] sm:$0xff] }
  0x50   : > { %11458 = vst [vmem:[#allocation51_spill] sm:$0xff] %v5313_v61  ;;  %11459 = vst [vmem:[#allocation52_spill] sm:$0xff] %v5315_v62  ;;  %v582_v62 = vrot.slane %v5506_v11, 5 }
  0x51   : > { %11460 = vst [vmem:[#allocation53_spill] sm:$0xff] %v5323_v0  ;;  %11461 = vst [vmem:[#allocation54_spill] sm:$0xff] %v5327_v33  ;;  %v577_v33 = vrot.slane %v5408_v36, 5  ;;  %v599_v0 = vrot.slane %v5410_v13, 5 }
  0x52   : > { %11462 = vst [vmem:[#allocation55_spill] sm:$0xff] %v5331_v34  ;;  %11463 = vst [vmem:[#allocation56_spill] sm:$0xff] %v5335_v38  ;;  %v598_v38 = vrot.slane %v5399_v10, 5  ;;  %v619_v34 = vrot.slane %v5382_v19, 5 }
  0x53   : > { %11464 = vst [vmem:[#allocation57_spill] sm:$0xff] %v5343_v29  ;;  %11465 = vst [vmem:[#allocation58_spill] sm:$0xff] %v5345_v31  ;;  %v5636_v29 = vld [vmem:[#allocation2 + $0x2a0] sm:$0xff] }
  0x54   : > { %11466 = vst [vmem:[#allocation59_spill] sm:$0xff] %v5347_v26  ;;  %11467 = vst [vmem:[#allocation60_spill] sm:$0xff] %v5357_v58  ;;  %v5478_v1 = vsel %vm638_vm1, %v597_v4, %v619_v34  ;;  %v5482_v5 = vsel %vm638_vm1, %v598_v38, %v620_v54  ;;  %v622_v4 = vrot.slane %v5436_v55, 5  ;;  %v5500_v34 = vsel %vm638_vm1, %v599_v0, %v621_v60  ;;  %v5519_v26 = vld [vmem:[#allocation2 + $0x1b0] sm:$0xff] }
  0x55   : > { %11468 = vst [vmem:[#allocation61_spill] sm:$0xff] %v5359_v25  ;;  %11469 = vst [vmem:[#allocation62_spill] sm:$0xff] %v5361_v27  ;;  %v580_v54 = vrot.slane %v5452_v59, 5  ;;  %v5517_v60 = vsel %vm638_vm1, %v578_v48, %v600_v47  ;;  %v625_v27 = vrot.slane %v5490_v41, 5 }
  0x56   : > { %11470 = vst [vmem:[#allocation63_spill] sm:$0xff] %v5363_v22  ;;  %11471 = vst [vmem:[#allocation64_spill] sm:$0xff] %v5367_v24  ;;  %v601_v22 = vrot.slane %v5440_v50, 5 }
  0x57   : > { %11472 = vst [vmem:[#allocation65_spill] sm:$0xff] %v5371_v21  ;;  %11473 = vst [vmem:[#allocation66_spill] sm:$0xff] %v5375_v23 }
  0x58   : > { %11474 = vst [vmem:[#allocation67_spill] sm:$0xff] %v5378_v20  ;;  %11475 = vst [vmem:[#allocation68_spill] sm:$0xff] %v5380_v17 }
  0x59   : > { %11476 = vst [vmem:[#allocation69_spill] sm:$0xff] %v5382_v19  ;;  %11477 = vst [vmem:[#allocation70_spill] sm:$0xff] %v5395_v15  ;;  %v641_v15 = vsel %vm638_vm1, %v594_v51, %v616_v37  ;;  %v5464_v51 = vsel %vm638_vm1, %v574_v8, %v596_v42  ;;  %v5470_v37 = vld [vmem:[#allocation2 + $0x150] sm:$0xff]  ;;  %v5486_v8 = vsel %vm638_vm1, %v576_v3, %v598_v38  ;;  %v5492_v42 = vld [vmem:[#allocation2 + $0x188] sm:$0xff]  ;;  %v579_v19 = vrot.slane %v5438_v49, 5 }
  0x5a   : > { %11478 = vst [vmem:[#allocation71_spill] sm:$0xff] %v5397_v18  ;;  %11479 = vst [vmem:[#allocation72_spill] sm:$0xff] %v5399_v10  ;;  %v5504_v3 = vsel %vm638_vm1, %v577_v33, %v599_v0  ;;  %v5508_v38 = vld [vmem:[#allocation2 + $0x1a0] sm:$0xff]  ;;  %v5523_v33 = vld [vmem:[#allocation2 + $0x1c8] sm:$0xff]  ;;  %v624_v10 = vrot.slane %v5470_v37, 5  ;;  %v5528_v17 = vpack.c.bf16 %v641_v15, %v663_v39  ;;  %v604_v48 = vrot.slane %v5492_v42, 5 }
  0x5b   : > { %11480 = vst [vmem:[#allocation73_spill] sm:$0xff] %v5401_v12  ;;  %11481 = vst [vmem:[#allocation74_spill] sm:$0xff] %v5408_v36  ;;  %v5494_v12 = vld [vmem:[#allocation2 + $0x190] sm:$0xff]  ;;  %v5521_v0 = vld [vmem:[#allocation2 + $0x1c0] sm:$0xff]  ;;  %v583_v57 = vrot.slane %v5508_v38, 5  ;;  %v5541_v15 = vsel %vm638_vm1, %v600_v47, %v622_v4 }
  0x5c   : > { %11482 = vst [vmem:[#allocation75_spill] sm:$0xff] %v5410_v13  ;;  %11483 = vst [vmem:[#allocation76_spill] sm:$0xff] %v5412_v6  ;;  %v5474_v6 = vld [vmem:[#allocation2 + $0x168] sm:$0xff]  ;;  %v602_v13 = vrot.slane %v5454_v44, 5  ;;  %v626_v31 = vrot.slane %v5494_v12, 5  ;;  %v5543_v39 = vld [vmem:[#allocation2 + $0x1e0] sm:$0xff] }
  0x5d   : > { %11484 = vst [vmem:[#allocation77_spill] sm:$0xff] %v5419_v2  ;;  %11485 = vst [vmem:[#allocation78_spill] sm:$0xff] %v5421_v30  ;;  %v581_v30 = vrot.slane %v5472_v53, 5  ;;  %v5558_v47 = vld [vmem:[#allocation2 + $0x208] sm:$0xff]  ;;  %v5603_v36 = vld [vmem:[#allocation2 + $0x250] sm:$0xff] }
  0x5e   : > { %11486 = vst [vmem:[#allocation79_spill] sm:$0xff] %v5436_v55  ;;  %11487 = vst [vmem:[#allocation80_spill] sm:$0xff] %v5438_v49  ;;  %v623_v55 = vrot.slane %v5450_v45, 5  ;;  %v585_v49 = vrot.slane %v5543_v39, 5 }
  0x5f   : > { %11488 = vst [vmem:[#allocation81_spill] sm:$0xff] %v5440_v50  ;;  %11489 = vst [vmem:[#allocation82_spill] sm:$0xff] %v5450_v45  ;;  %v5530_v50 = vld [vmem:[#allocation2 + $0x1d0] sm:$0xff]  ;;  %v603_v45 = vrot.slane %v5474_v6, 5 }
  0x60   : > { %11490 = vst [vmem:[#allocation83_spill] sm:$0xff] %v5452_v59  ;;  %11491 = vst [vmem:[#allocation84_spill] sm:$0xff] %v5454_v44  ;;  %v605_v44 = vrot.slane %v5510_v35, 5  ;;  %v628_v4 = vrot.slane %v5530_v50, 5  ;;  %v5596_v59 = vld [vmem:[#allocation2 + $0x248] sm:$0xff] }
  0x61   : > { %11492 = vst [vmem:[#allocation85_spill] sm:$0xff] %v5470_v37  ;;  %11493 = vst [vmem:[#allocation86_spill] sm:$0xff] %v5472_v53  ;;  %v5545_v37 = vld [vmem:[#allocation2 + $0x1e8] sm:$0xff] }
  0x62   : > { %11494 = vst [vmem:[#allocation87_spill] sm:$0xff] %v5474_v6  ;;  %11495 = vst [vmem:[#allocation88_spill] sm:$0xff] %v5490_v41  ;;  %v5547_v6 = vld [vmem:[#allocation2 + $0x1f0] sm:$0xff]  ;;  %v584_v41 = vrot.slane %v5521_v0, 5  ;;  %v5577_v53 = vld [vmem:[#allocation2 + $0x228] sm:$0xff] }
  0x63   : > { %11496 = vst [vmem:[#allocation89_spill] sm:$0xff] %v5492_v42  ;;  %11497 = vst [vmem:[#allocation90_spill] sm:$0xff] %v5494_v12  ;;  %v606_v12 = vrot.slane %v5523_v33, 5  ;;  %v627_v42 = vrot.slane %v5519_v26, 5  ;;  %v629_v2 = vrot.slane %v5547_v6, 5 }
  0x64   : > { %11498 = vst [vmem:[#allocation91_spill] sm:$0xff] %v5506_v11  ;;  %11499 = vst [vmem:[#allocation92_spill] sm:$0xff] %v5508_v38  ;;  %v5554_v38 = vsel %vm638_vm1, %v601_v22, %v623_v55  ;;  %v5563_v11 = vsel %vm638_vm1, %v602_v13, %v624_v10  ;;  %v5573_v55 = vld [vmem:[#allocation2 + $0x210] sm:$0xff]  ;;  %v5585_v10 = vsel %vm638_vm1, %v604_v48, %v626_v31 }
  0x65   : > { %11500 = vst [vmem:[#allocation93_spill] sm:$0xff] %v5510_v35  ;;  %11501 = vst [vmem:[#allocation94_spill] sm:$0xff] %v5519_v26  ;;  %v5556_v35 = vld [vmem:[#allocation2 + $0x200] sm:$0xff]  ;;  %v5571_v26 = vsel %vm638_vm1, %v580_v54, %v602_v13  ;;  %v5590_v13 = vpack.c.bf16 %v5448_v46, %v664_v52  ;;  %v673_v31 = vsel %vm638_vm1, %v582_v62, %v604_v48  ;;  %v5607_v46 = vld [vmem:[#allocation2 + $0x268] sm:$0xff]  ;;  %v630_v20 = vrot.slane %v5573_v55, 5 }
  0x66   : > { %11502 = vst [vmem:[#allocation95_spill] sm:$0xff] %v5521_v0  ;;  %11503 = vst [vmem:[#allocation96_spill] sm:$0xff] %v5523_v33  ;;  %v5567_v0 = vsel %vm638_vm1, %v579_v19, %v601_v22  ;;  %v5575_v33 = vld [vmem:[#allocation2 + $0x220] sm:$0xff]  ;;  %v672_v19 = vsel %vm638_vm1, %v581_v30, %v603_v45  ;;  %v5592_v22 = vld [vmem:[#allocation2 + $0x230] sm:$0xff]  ;;  %v652_v52 = vsel %vm638_vm1, %v605_v44, %v627_v42  ;;  %v586_v18 = vrot.slane %v5556_v35, 5 }
  0x67   : > { %11504 = vst [vmem:[#allocation97_spill] sm:$0xff] %v5530_v50  ;;  %11505 = vst [vmem:[#allocation98_spill] sm:$0xff] %v5543_v39  ;;  %v5581_v50 = vsel %vm638_vm1, %v603_v45, %v625_v27  ;;  %v5594_v54 = vld [vmem:[#allocation2 + $0x240] sm:$0xff]  ;;  %v607_v27 = vrot.slane %v5545_v37, 5  ;;  %v674_v30 = vsel %vm638_vm1, %v583_v57, %v605_v44  ;;  %v5619_v62 = vld [vmem:[#allocation2 + $0x270] sm:$0xff]  ;;  %v608_v42 = vrot.slane %v5558_v47, 5 }
  0x68   : > { %11506 = vst [vmem:[#allocation99_spill] sm:$0xff] %v5545_v37  ;;  %11507 = vst [vmem:[#allocation100_spill] sm:$0xff] %v5547_v6  ;;  %v5605_v45 = vld [vmem:[#allocation2 + $0x260] sm:$0xff]  ;;  %v675_v37 = vsel %vm638_vm1, %v584_v41, %v606_v12  ;;  %v5617_v6 = vpack.c.bf16 %v5458_v43, %v5464_v51  ;;  %v5623_v39 = vld [vmem:[#allocation2 + $0x288] sm:$0xff]  ;;  %v653_v44 = vsel %vm638_vm1, %v606_v12, %v628_v4  ;;  %v587_v43 = vrot.slane %v5575_v33, 5 }
  0x69   : > { %11508 = vst [vmem:[#allocation101_spill] sm:$0xff] %v5556_v35  ;;  %11509 = vst [vmem:[#allocation102_spill] sm:$0xff] %v5558_v47  ;;  %v5621_v48 = vld [vmem:[#allocation2 + $0x280] sm:$0xff]  ;;  %v5630_v57 = vld [vmem:[#allocation2 + $0x290] sm:$0xff]  ;;  %v588_v51 = vrot.slane %v5594_v54, 5  ;;  %v609_v41 = vrot.slane %v5577_v53, 5 }
  0x6a   : > { %11510 = vst [vmem:[#allocation103_spill] sm:$0xff] %v5573_v55  ;;  %11511 = vst [vmem:[#allocation104_spill] sm:$0xff] %v5575_v33  ;;  %v631_v25 = vrot.slane %v5592_v22, 5  ;;  %v5638_v35 = vld [vmem:[#allocation2 + $0x2a8] sm:$0xff]  ;;  %v5640_v47 = vld [vmem:[#allocation2 + $0x2b0] sm:$0xff]  ;;  %v589_v55 = vrot.slane %v5605_v45, 5  ;;  %v654_v33 = vsel %vm638_vm1, %v607_v27, %v629_v2 }
  0x6b   : > { %11512 = vst [vmem:[#allocation105_spill] sm:$0xff] %v5577_v53  ;;  %11513 = vst [vmem:[#allocation106_spill] sm:$0xff] %v5592_v22  ;;  %v610_v12 = vrot.slane %v5596_v59, 5  ;;  %v632_v4 = vrot.slane %v5603_v36, 5  ;;  %v611_v53 = vrot.slane %v5607_v46, 5  ;;  %v612_v22 = vrot.slane %v5623_v39, 5 }
  0x6c   : > { %11514 = vst [vmem:[#allocation107_spill] sm:$0xff] %v5594_v54  ;;  %11515 = vst [vmem:[#allocation108_spill] sm:$0xff] %v5596_v59  ;;  %v590_v54 = vrot.slane %v5621_v48, 5  ;;  %v633_v61 = vrot.slane %v5619_v62, 5  ;;  %v634_v56 = vrot.slane %v5630_v57, 5  ;;  %v676_v59 = vsel %vm638_vm1, %v585_v49, %v607_v27 }
  0x6d   : > { %11516 = vst [vmem:[#allocation109_spill] sm:$0xff] %v5603_v36  ;;  %11517 = vst [vmem:[#allocation110_spill] sm:$0xff] %v5605_v45  ;;  %v655_v45 = vsel %vm638_vm1, %v608_v42, %v630_v20  ;;  %v677_v36 = vsel %vm638_vm1, %v586_v18, %v608_v42  ;;  %v591_v2 = vrot.slane %v5636_v29, 5  ;;  %v657_v20 = vsel %vm638_vm1, %v610_v12, %v632_v4 }
  0x6e   : > { %11518 = vst [vmem:[#allocation111_spill] sm:$0xff] %v5607_v46  ;;  %11519 = vst [vmem:[#allocation112_spill] sm:$0xff] %v5619_v62  ;;  %v635_v46 = vrot.slane %v5640_v47, 5  ;;  %v678_v62 = vsel %vm638_vm1, %v587_v43, %v609_v41  ;;  %v679_v49 = vsel %vm638_vm1, %v588_v51, %v610_v12  ;;  %v5671_v18 = vpack.c.bf16 %v5478_v1, %v5468_v7 }
  0x6f   : > { %11520 = vst [vmem:[#allocation113_spill] sm:$0xff] %v5621_v48  ;;  %11521 = vst [vmem:[#allocation114_spill] sm:$0xff] %v5623_v39  ;;  %v613_v48 = vrot.slane %v5638_v35, 5  ;;  %v658_v27 = vsel %vm638_vm1, %v611_v53, %v633_v61  ;;  %v680_v42 = vsel %vm638_vm1, %v589_v55, %v611_v53  ;;  %v681_v43 = vsel %vm638_vm1, %v590_v54, %v612_v22 }
  0x70   : > { %11522 = vst [vmem:[#allocation115_spill] sm:$0xff] %v5630_v57  ;;  %11523 = vst [vmem:[#allocation116_spill] sm:$0xff] %v5636_v29  ;;  %v656_v57 = vsel %vm638_vm1, %v609_v41, %v631_v25  ;;  %v5681_v25 = vpack.c.bf16 %v5482_v5, %v5486_v8  ;;  %v659_v51 = vsel %vm638_vm1, %v612_v22, %v634_v56 }
  0x71   : > { %11524 = vst [vmem:[#allocation117_spill] sm:$0xff] %v5638_v35  ;;  %11525 = vst [vmem:[#allocation118_spill] sm:$0xff] %v5640_v47  ;;  %v5687_v7 = vpack.c.bf16 %v5500_v34, %v5504_v3  ;;  %v5691_v61 = vpack.c.bf16 %v5541_v15, %v5517_v60  ;;  %v5695_v53 = vpack.c.bf16 %v5554_v38, %v5567_v0 }
  0x72   : > { %v5699_v1 = vsel %vm638_vm1, %v613_v48, %v635_v46  ;;  %v5703_v5 = vsel %vm638_vm1, %v591_v2, %v613_v48  ;;  %v5707_v56 = vpack.c.bf16 %v5563_v11, %v5571_v26  ;;  %v5710_v8 = vpack.c.bf16 %v5581_v50, %v672_v19 }
  0x73   : > { %11526 = vst [vmem:[#allocation119_spill] sm:$0xff] %v5699_v1  ;;  %11527 = vst [vmem:[#allocation120_spill] sm:$0xff] %v5703_v5  ;;  %v5713_v34 = vpack.c.bf16 %v5585_v10, %v673_v31  ;;  %v5715_v3 = vpack.c.bf16 %v652_v52, %v674_v30  ;;  %v5717_v38 = vpack.c.bf16 %v653_v44, %v675_v37 }
  0x74   : > { %v5719_v60 = vpack.c.bf16 %v654_v33, %v676_v59  ;;  %v5721_v0 = vpack.c.bf16 %v655_v45, %v677_v36  ;;  %v5723_v15 = vpack.c.bf16 %v656_v57, %v678_v62  ;;  %v5725_v55 = vpack.c.bf16 %v657_v20, %v679_v49 }
  0x75   : > { %11528 = vst [vmem:[#allocation121_spill] sm:$0xff] %v5717_v38  ;;  %v5727_v26 = vpack.c.bf16 %v658_v27, %v680_v42  ;;  %v5729_v11 = vpack.c.bf16 %v659_v51, %v681_v43  ;;  %v11535_v10 = vpack.c.bf16 %v5386_v14, %v5390_v16  ;;  %v713_v59 = vmul.bf16 %v5319_v63, %v5488_v9 }
  0x76   : > { %11529 = vst [vmem:[#allocation122_spill] sm:$0xff] %v5719_v60  ;;  %11530 = vst [vmem:[#allocation123_spill] sm:$0xff] %v5721_v0  ;;  %v714_v36 = vmul.bf16 %v5319_v63, %v5528_v17  ;;  %v715_v33 = vmul.bf16 %v5319_v63, %v5590_v13  ;;  %v716_v19 = vmul.bf16 %v5319_v63, %v5617_v6 }
  0x77   : > { %11531 = vst [vmem:[#allocation124_spill] sm:$0xff] %v5723_v15  ;;  %11532 = vst [vmem:[#allocation125_spill] sm:$0xff] %v5725_v55  ;;  %v712_v37 = vmul.bf16 %v5319_v63, %v11535_v10  ;;  %v717_v22 = vmul.bf16 %v5319_v63, %v5671_v18  ;;  %v718_v14 = vmul.bf16 %v5319_v63, %v5681_v25 }
  0x78   : > { %11533 = vst [vmem:[#allocation126_spill] sm:$0xff] %v5727_v26  ;;  %11534 = vst [vmem:[#allocation127_spill] sm:$0xff] %v5729_v11  ;;  %v719_v16 = vmul.bf16 %v5319_v63, %v5687_v7  ;;  %v720_v54 = vmul.bf16 %v5319_v63, %v5691_v61  ;;  %v721_v31 = vmul.bf16 %v5319_v63, %v5695_v53 }
  0x79   : > { %v722_v45 = vmul.bf16 %v5319_v63, %v5707_v56  ;;  %v723_v46 = vmul.bf16 %v5319_v63, %v5710_v8  ;;  %v724_v52 = vmul.bf16 %v5319_v63, %v5713_v34  ;;  %v725_v30 = vmul.bf16 %v5319_v63, %v5715_v3 }
  0x7a   : > { %v726_v62 = vmul.bf16 %v5319_v63, %v5717_v38  ;;  %v727_v48 = vmul.bf16 %v5319_v63, %v5719_v60  ;;  %v735_v44 = vmul.bf16 %v5341_v32, %v5488_v9  ;;  %v736_v57 = vmul.bf16 %v5341_v32, %v5528_v17 }
  0x7b   : > { %v737_v41 = vmul.bf16 %v5341_v32, %v5590_v13  ;;  %v738_v12 = vmul.bf16 %v5341_v32, %v5617_v6  ;;  %v739_v4 = vmul.bf16 %v5341_v32, %v5671_v18  ;;  %v740_v2 = vmul.bf16 %v5341_v32, %v5681_v25 }
  0x7c   : > { %v741_v63 = vmul.bf16 %v5341_v32, %v5687_v7  ;;  %v742_v9 = vmul.bf16 %v5341_v32, %v5691_v61  ;;  %v743_v20 = vmul.bf16 %v5341_v32, %v5695_v53  ;;  %v744_v49 = vmul.bf16 %v5341_v32, %v5707_v56 }
  0x7d   : > { %v745_v27 = vmul.bf16 %v5341_v32, %v5710_v8  ;;  %v746_v42 = vmul.bf16 %v5341_v32, %v5713_v34  ;;  %v747_v43 = vmul.bf16 %v5341_v32, %v5715_v3  ;;  %v748_v51 = vmul.bf16 %v5341_v32, %v5717_v38 }
  0x7e   : > { %v749_v10 = vmul.bf16 %v5341_v32, %v5719_v60  ;;  %v750_v50 = vmul.bf16 %v5341_v32, %v5721_v0  ;;  %v751_v47 = vadd.bf16 %v735_v44, %v712_v37  ;;  %v752_v35 = vadd.bf16 %v736_v57, %v713_v59 }
  0x7f   : > { %v753_v39 = vadd.bf16 %v737_v41, %v714_v36  ;;  %v754_v40 = vadd.bf16 %v738_v12, %v715_v33  ;;  %v755_v29 = vadd.bf16 %v739_v4, %v716_v19  ;;  %v756_v5 = vadd.bf16 %v740_v2, %v717_v22 }
  0x80   : > { %v757_v1 = vadd.bf16 %v741_v63, %v718_v14  ;;  %v758_v23 = vadd.bf16 %v742_v9, %v719_v16  ;;  %v759_v11 = vadd.bf16 %v743_v20, %v720_v54  ;;  %v760_v21 = vadd.bf16 %v744_v49, %v721_v31  ;;  %v11536_v54 = vld [vmem:[#allocation121_spill] sm:$0xff] }
  0x81   : > { %v761_v26 = vadd.bf16 %v745_v27, %v722_v45  ;;  %v762_v24 = vadd.bf16 %v746_v42, %v723_v46  ;;  %v763_v55 = vadd.bf16 %v747_v43, %v724_v52  ;;  %v764_v58 = vadd.bf16 %v748_v51, %v725_v30  ;;  %v11537_v45 = vld [vmem:[#allocation122_spill] sm:$0xff]  ;;  %v11538_v30 = vld [vmem:[#allocation124_spill] sm:$0xff] }
  0x82   : > { %v765_v15 = vadd.bf16 %v749_v10, %v726_v62  ;;  %v766_v38 = vadd.bf16 %v750_v50, %v727_v48  ;;  %v774_v60 = vmul.bf16 %v5353_v28, %v5528_v17  ;;  %v775_v32 = vmul.bf16 %v5353_v28, %v5590_v13 }
  0x83   : > { %v776_v37 = vmul.bf16 %v5353_v28, %v5617_v6  ;;  %v777_v59 = vmul.bf16 %v5353_v28, %v5671_v18  ;;  %v778_v36 = vmul.bf16 %v5353_v28, %v5681_v25  ;;  %v779_v33 = vmul.bf16 %v5353_v28, %v5687_v7 }
  0x84   : > { %v780_v50 = vmul.bf16 %v5353_v28, %v5691_v61  ;;  %v781_v17 = vmul.bf16 %v5353_v28, %v5695_v53  ;;  %v782_v19 = vmul.bf16 %v5353_v28, %v5707_v56  ;;  %v783_v22 = vmul.bf16 %v5353_v28, %v5710_v8 }
  0x85   : > { %v784_v14 = vmul.bf16 %v5353_v28, %v5713_v34  ;;  %v785_v16 = vmul.bf16 %v5353_v28, %v5715_v3  ;;  %v786_v31 = vmul.bf16 %v5353_v28, %v11536_v54  ;;  %v787_v46 = vmul.bf16 %v5353_v28, %v11537_v45 }
  0x86   : > { %v788_v52 = vmul.bf16 %v5353_v28, %v5721_v0  ;;  %v789_v62 = vmul.bf16 %v5353_v28, %v11538_v30  ;;  %v790_v48 = vadd.bf16 %v774_v60, %v751_v47  ;;  %v791_v44 = vadd.bf16 %v775_v32, %v752_v35  ;;  %v11539_v0 = vld [vmem:[#allocation60_spill] sm:$0xff] }
  0x87   : > { %v792_v57 = vadd.bf16 %v776_v37, %v753_v39  ;;  %v793_v41 = vadd.bf16 %v777_v59, %v754_v40  ;;  %v794_v12 = vadd.bf16 %v778_v36, %v755_v29  ;;  %v795_v4 = vadd.bf16 %v779_v33, %v756_v5 }
  0x88   : > { %v796_v2 = vadd.bf16 %v780_v50, %v757_v1  ;;  %v797_v63 = vadd.bf16 %v781_v17, %v758_v23  ;;  %v798_v9 = vadd.bf16 %v782_v19, %v759_v11  ;;  %v799_v20 = vadd.bf16 %v783_v22, %v760_v21  ;;  %v11540_v1 = vld [vmem:[#allocation122_spill] sm:$0xff] }
  0x89   : > { %v800_v49 = vadd.bf16 %v784_v14, %v761_v26  ;;  %v801_v27 = vadd.bf16 %v785_v16, %v762_v24  ;;  %v802_v42 = vadd.bf16 %v786_v31, %v763_v55  ;;  %v803_v43 = vadd.bf16 %v787_v46, %v764_v58  ;;  %v11542_v55 = vld [vmem:[#allocation125_spill] sm:$0xff] }
  0x8a   : > { %v804_v51 = vadd.bf16 %v788_v52, %v765_v15  ;;  %v805_v10 = vadd.bf16 %v789_v62, %v766_v38  ;;  %v813_v45 = vmul.bf16 %v11539_v0, %v5590_v13  ;;  %v814_v28 = vmul.bf16 %v11539_v0, %v5617_v6  ;;  %v11541_v38 = vld [vmem:[#allocation123_spill] sm:$0xff] }
  0x8b   : > { %v815_v29 = vmul.bf16 %v11539_v0, %v5671_v18  ;;  %v816_v23 = vmul.bf16 %v11539_v0, %v5681_v25  ;;  %v817_v21 = vmul.bf16 %v11539_v0, %v5687_v7  ;;  %v818_v24 = vmul.bf16 %v11539_v0, %v5691_v61 }
  0x8c   : > { %v819_v40 = vmul.bf16 %v11539_v0, %v5695_v53  ;;  %v820_v58 = vmul.bf16 %v11539_v0, %v5707_v56  ;;  %v821_v35 = vmul.bf16 %v11539_v0, %v5710_v8  ;;  %v822_v39 = vmul.bf16 %v11539_v0, %v5713_v34 }
  0x8d   : > { %v823_v47 = vmul.bf16 %v11539_v0, %v5715_v3  ;;  %v824_v13 = vmul.bf16 %v11539_v0, %v11536_v54  ;;  %v825_v5 = vmul.bf16 %v11539_v0, %v11540_v1  ;;  %v826_v60 = vmul.bf16 %v11539_v0, %v11541_v38 }
  0x8e   : > { %v827_v15 = vmul.bf16 %v11539_v0, %v11538_v30  ;;  %v828_v26 = vmul.bf16 %v11539_v0, %v11542_v55  ;;  %v829_v11 = vadd.bf16 %v813_v45, %v790_v48  ;;  %v830_v32 = vadd.bf16 %v814_v28, %v791_v44  ;;  %v11543_v30 = vld [vmem:[#allocation64_spill] sm:$0xff] }
  0x8f   : > { %v831_v37 = vadd.bf16 %v815_v29, %v792_v57  ;;  %v832_v59 = vadd.bf16 %v816_v23, %v793_v41  ;;  %v833_v36 = vadd.bf16 %v817_v21, %v794_v12  ;;  %v834_v33 = vadd.bf16 %v818_v24, %v795_v4 }
  0x90   : > { %v835_v50 = vadd.bf16 %v819_v40, %v796_v2  ;;  %v836_v17 = vadd.bf16 %v820_v58, %v797_v63  ;;  %v837_v19 = vadd.bf16 %v821_v35, %v798_v9  ;;  %v838_v22 = vadd.bf16 %v822_v39, %v799_v20  ;;  %v11544_v9 = vld [vmem:[#allocation123_spill] sm:$0xff] }
  0x91   : > { %v839_v14 = vadd.bf16 %v823_v47, %v800_v49  ;;  %v840_v16 = vadd.bf16 %v824_v13, %v801_v27  ;;  %v841_v31 = vadd.bf16 %v825_v5, %v802_v42  ;;  %v842_v46 = vadd.bf16 %v826_v60, %v803_v43  ;;  %v11545_v49 = vld [vmem:[#allocation124_spill] sm:$0xff]  ;;  %v11546_v43 = vld [vmem:[#allocation126_spill] sm:$0xff] }
  0x92   : > { %v843_v52 = vadd.bf16 %v827_v15, %v804_v51  ;;  %v844_v62 = vadd.bf16 %v828_v26, %v805_v10  ;;  %v852_v38 = vmul.bf16 %v11543_v30, %v5617_v6  ;;  %v853_v0 = vmul.bf16 %v11543_v30, %v5671_v18 }
  0x93   : > { %v854_v45 = vmul.bf16 %v11543_v30, %v5681_v25  ;;  %v855_v48 = vmul.bf16 %v11543_v30, %v5687_v7  ;;  %v856_v44 = vmul.bf16 %v11543_v30, %v5691_v61  ;;  %v857_v57 = vmul.bf16 %v11543_v30, %v5695_v53 }
  0x94   : > { %v858_v41 = vmul.bf16 %v11543_v30, %v5707_v56  ;;  %v859_v6 = vmul.bf16 %v11543_v30, %v5710_v8  ;;  %v860_v12 = vmul.bf16 %v11543_v30, %v5713_v34  ;;  %v861_v4 = vmul.bf16 %v11543_v30, %v5715_v3 }
  0x95   : > { %v862_v2 = vmul.bf16 %v11543_v30, %v11536_v54  ;;  %v863_v63 = vmul.bf16 %v11543_v30, %v11540_v1  ;;  %v864_v20 = vmul.bf16 %v11543_v30, %v11544_v9  ;;  %v865_v27 = vmul.bf16 %v11543_v30, %v11545_v49 }
  0x96   : > { %v866_v42 = vmul.bf16 %v11543_v30, %v11542_v55  ;;  %v867_v51 = vmul.bf16 %v11543_v30, %v11546_v43  ;;  %v868_v10 = vadd.bf16 %v852_v38, %v829_v11  ;;  %v869_v28 = vadd.bf16 %v853_v0, %v830_v32  ;;  %v11547_v55 = vld [vmem:[#allocation65_spill] sm:$0xff] }
  0x97   : > { %v870_v29 = vadd.bf16 %v854_v45, %v831_v37  ;;  %v871_v23 = vadd.bf16 %v855_v48, %v832_v59  ;;  %v872_v21 = vadd.bf16 %v856_v44, %v833_v36  ;;  %v873_v24 = vadd.bf16 %v857_v57, %v834_v33 }
  0x98   : > { %v874_v40 = vadd.bf16 %v858_v41, %v835_v50  ;;  %v875_v58 = vadd.bf16 %v859_v6, %v836_v17  ;;  %v876_v35 = vadd.bf16 %v860_v12, %v837_v19  ;;  %v877_v39 = vadd.bf16 %v861_v4, %v838_v22  ;;  %v11548_v19 = vld [vmem:[#allocation124_spill] sm:$0xff] }
  0x99   : > { %v878_v47 = vadd.bf16 %v862_v2, %v839_v14  ;;  %v879_v13 = vadd.bf16 %v863_v63, %v840_v16  ;;  %v880_v5 = vadd.bf16 %v864_v20, %v841_v31  ;;  %v881_v60 = vadd.bf16 %v865_v27, %v842_v46  ;;  %v11549_v14 = vld [vmem:[#allocation125_spill] sm:$0xff]  ;;  %v11550_v46 = vld [vmem:[#allocation127_spill] sm:$0xff] }
  0x9a   : > { %v882_v15 = vadd.bf16 %v866_v42, %v843_v52  ;;  %v883_v26 = vadd.bf16 %v867_v51, %v844_v62  ;;  %v891_v49 = vmul.bf16 %v11547_v55, %v5671_v18  ;;  %v892_v30 = vmul.bf16 %v11547_v55, %v5681_v25 }
  0x9b   : > { %v893_v38 = vmul.bf16 %v11547_v55, %v5687_v7  ;;  %v894_v11 = vmul.bf16 %v11547_v55, %v5691_v61  ;;  %v895_v32 = vmul.bf16 %v11547_v55, %v5695_v53  ;;  %v896_v37 = vmul.bf16 %v11547_v55, %v5707_v56 }
  0x9c   : > { %v897_v59 = vmul.bf16 %v11547_v55, %v5710_v8  ;;  %v898_v18 = vmul.bf16 %v11547_v55, %v5713_v34  ;;  %v899_v36 = vmul.bf16 %v11547_v55, %v5715_v3  ;;  %v900_v33 = vmul.bf16 %v11547_v55, %v11536_v54 }
  0x9d   : > { %v901_v50 = vmul.bf16 %v11547_v55, %v11540_v1  ;;  %v902_v17 = vmul.bf16 %v11547_v55, %v11544_v9  ;;  %v903_v22 = vmul.bf16 %v11547_v55, %v11548_v19  ;;  %v904_v16 = vmul.bf16 %v11547_v55, %v11549_v14 }
  0x9e   : > { %v905_v31 = vmul.bf16 %v11547_v55, %v11546_v43  ;;  %v906_v52 = vmul.bf16 %v11547_v55, %v11550_v46  ;;  %v907_v62 = vadd.bf16 %v891_v49, %v868_v10  ;;  %v908_v0 = vadd.bf16 %v892_v30, %v869_v28  ;;  %v11551_v43 = vld [vmem:[#allocation66_spill] sm:$0xff] }
  0x9f   : > { %v909_v45 = vadd.bf16 %v893_v38, %v870_v29  ;;  %v910_v48 = vadd.bf16 %v894_v11, %v871_v23  ;;  %v911_v44 = vadd.bf16 %v895_v32, %v872_v21  ;;  %v912_v57 = vadd.bf16 %v896_v37, %v873_v24  ;;  %v11552_v21 = vld [vmem:[#allocation125_spill] sm:$0xff]  ;;  %v11553_v24 = vld [vmem:[#allocation126_spill] sm:$0xff] }
  0xa0   : > { %v913_v41 = vadd.bf16 %v897_v59, %v874_v40  ;;  %v914_v6 = vadd.bf16 %v898_v18, %v875_v58  ;;  %v915_v12 = vadd.bf16 %v899_v36, %v876_v35  ;;  %v916_v4 = vadd.bf16 %v900_v33, %v877_v39  ;;  %v11554_v40 = vld [vmem:[#allocation119_spill] sm:$0xff] }
  0xa1   : > { %v917_v2 = vadd.bf16 %v901_v50, %v878_v47  ;;  %v918_v63 = vadd.bf16 %v902_v17, %v879_v13  ;;  %v919_v20 = vadd.bf16 %v903_v22, %v880_v5  ;;  %v920_v27 = vadd.bf16 %v904_v16, %v881_v60 }
  0xa2   : > { %v921_v42 = vadd.bf16 %v905_v31, %v882_v15  ;;  %v922_v51 = vadd.bf16 %v906_v52, %v883_v26  ;;  %v930_v14 = vmul.bf16 %v11551_v43, %v5681_v25  ;;  %v931_v55 = vmul.bf16 %v11551_v43, %v5687_v7 }
  0xa3   : > { %v932_v49 = vmul.bf16 %v11551_v43, %v5691_v61  ;;  %v933_v10 = vmul.bf16 %v11551_v43, %v5695_v53  ;;  %v934_v28 = vmul.bf16 %v11551_v43, %v5707_v56  ;;  %v935_v29 = vmul.bf16 %v11551_v43, %v5710_v8 }
  0xa4   : > { %v936_v23 = vmul.bf16 %v11551_v43, %v5713_v34  ;;  %v937_v25 = vmul.bf16 %v11551_v43, %v5715_v3  ;;  %v938_v7 = vmul.bf16 %v11551_v43, %v11536_v54  ;;  %v939_v61 = vmul.bf16 %v11551_v43, %v11540_v1  ;;  %v11555_v54 = vld [vmem:[#allocation120_spill] sm:$0xff] }
  0xa5   : > { %v940_v53 = vmul.bf16 %v11551_v43, %v11544_v9  ;;  %v941_v56 = vmul.bf16 %v11551_v43, %v11548_v19  ;;  %v942_v8 = vmul.bf16 %v11551_v43, %v11552_v21  ;;  %v943_v34 = vmul.bf16 %v11551_v43, %v11553_v24 }
  0xa6   : > { %v944_v3 = vmul.bf16 %v11551_v43, %v11550_v46  ;;  %v11556_v58 = vpack.c.bf16 %v11554_v40, %v11555_v54  ;;  %v946_v35 = vadd.bf16 %v930_v14, %v907_v62  ;;  %v947_v39 = vadd.bf16 %v931_v55, %v908_v0 }
  0xa7   : > { %v948_v9 = vadd.bf16 %v932_v49, %v909_v45  ;;  %v949_v47 = vadd.bf16 %v933_v10, %v910_v48  ;;  %v950_v13 = vadd.bf16 %v934_v28, %v911_v44  ;;  %v951_v5 = vadd.bf16 %v935_v29, %v912_v57 }
  0xa8   : > { %v945_v1 = vmul.bf16 %v11551_v43, %v11556_v58  ;;  %v952_v60 = vadd.bf16 %v936_v23, %v913_v41  ;;  %v953_v15 = vadd.bf16 %v937_v25, %v914_v6  ;;  %v954_v26 = vadd.bf16 %v938_v7, %v915_v12  ;;  %v4579_v41 = vld [vmem:[%s10870_s2] ss:$0 sm:$0xff] }
  0xa9   : > { %v955_v30 = vadd.bf16 %v939_v61, %v916_v4  ;;  %v956_v38 = vadd.bf16 %v940_v53, %v917_v2  ;;  %v957_v11 = vadd.bf16 %v941_v56, %v918_v63  ;;  %v5961_v32 = vadd.bf16 %v942_v8, %v919_v20 }
  0xaa   : > { %v5963_v37 = vadd.bf16 %v943_v34, %v920_v27  ;;  %v5965_v59 = vadd.bf16 %v944_v3, %v921_v42  ;;  %v5967_v18 = vadd.bf16 %v945_v1, %v922_v51  ;;  %v962_v43 = vunpack.c.l.bf16 %v946_v35 }
  0xab   : > { %v963_v36 = vunpack.c.h.bf16 %v946_v35  ;;  %v964_v33 = vunpack.c.l.bf16 %v947_v39  ;;  %v965_v50 = vunpack.c.h.bf16 %v947_v39  ;;  %v966_v17 = vunpack.c.l.bf16 %v948_v9 }
  0xac   : > { %v967_v19 = vunpack.c.h.bf16 %v948_v9  ;;  %v968_v22 = vunpack.c.l.bf16 %v949_v47  ;;  %v969_v14 = vunpack.c.h.bf16 %v949_v47  ;;  %v970_v16 = vunpack.c.l.bf16 %v950_v13 }
  0xad   : > { %v971_v31 = vunpack.c.h.bf16 %v950_v13  ;;  %v972_v46 = vunpack.c.l.bf16 %v951_v5  ;;  %v973_v52 = vunpack.c.h.bf16 %v951_v5  ;;  %v974_v62 = vunpack.c.l.bf16 %v952_v60 }
  0xae   : > { %v975_v0 = vunpack.c.h.bf16 %v952_v60  ;;  %v976_v45 = vunpack.c.l.bf16 %v953_v15  ;;  %v977_v48 = vunpack.c.h.bf16 %v953_v15  ;;  %v978_v44 = vunpack.c.l.bf16 %v954_v26 }
  0xaf   : > { %v979_v57 = vunpack.c.h.bf16 %v954_v26  ;;  %v980_v6 = vunpack.c.l.bf16 %v955_v30  ;;  %v981_v12 = vunpack.c.h.bf16 %v955_v30  ;;  %v982_v4 = vunpack.c.l.bf16 %v956_v38 }
  0xb0   : > { %v983_v2 = vunpack.c.h.bf16 %v956_v38  ;;  %v984_v63 = vunpack.c.l.bf16 %v957_v11  ;;  %v985_v20 = vunpack.c.h.bf16 %v957_v11  ;;  %v986_v27 = vunpack.c.l.bf16 %v5961_v32 }
  0xb1   : > { %v987_v42 = vunpack.c.h.bf16 %v5961_v32  ;;  %v988_v51 = vunpack.c.l.bf16 %v5963_v37  ;;  %v989_v55 = vunpack.c.h.bf16 %v5963_v37  ;;  %v990_v49 = vunpack.c.l.bf16 %v5965_v59 }
  0xb2   : > { %v991_v10 = vunpack.c.h.bf16 %v5965_v59  ;;  %v992_v28 = vunpack.c.l.bf16 %v5967_v18  ;;  %v993_v29 = vunpack.c.h.bf16 %v5967_v18  ;;  %v5980_v23 = vadd.f32 %v4579_v41, %v962_v43 }
  0xb3   : > { %v5982_v25 = vadd.f32 %v4579_v41, %v963_v36  ;;  %v5984_v7 = vadd.f32 %v4579_v41, %v964_v33  ;;  %v5986_v61 = vadd.f32 %v4579_v41, %v965_v50  ;;  %v5988_v53 = vadd.f32 %v4579_v41, %v966_v17  ;;  %v11589_v36 = vld [vmem:[#allocation47_spill] sm:$0xff]  ;;  %v11610_v33 = vld [vmem:[#allocation48_spill] sm:$0xff] }
  0xb4   : > { %11557 = vst [vmem:[#allocation121_spill] sm:$0xff] %v5980_v23  ;;  %v5990_v56 = vadd.f32 %v4579_v41, %v967_v19  ;;  %v5992_v21 = vadd.f32 %v4579_v41, %v968_v22  ;;  %v5994_v8 = vadd.f32 %v4579_v41, %v969_v14  ;;  %v5996_v24 = vadd.f32 %v4579_v41, %v970_v16  ;;  %v11590_v50 = vld [vmem:[#allocation51_spill] sm:$0xff]  ;;  %v11591_v19 = vld [vmem:[#allocation57_spill] sm:$0xff]  ;;  %v11644_v22 = vld [vmem:[#allocation90_spill] sm:$0xff] }
  0xb5   : > { %11558 = vst [vmem:[#allocation60_spill] sm:$0xff] %v5982_v25  ;;  %11559 = vst [vmem:[#allocation122_spill] sm:$0xff] %v5984_v7  ;;  %v5998_v34 = vadd.f32 %v4579_v41, %v971_v31  ;;  %v6000_v3 = vadd.f32 %v4579_v41, %v972_v46  ;;  %v6002_v40 = vadd.f32 %v4579_v41, %v973_v52  ;;  %v11592_v14 = vld [vmem:[#allocation61_spill] sm:$0xff]  ;;  %v11593_v31 = vld [vmem:[#allocation67_spill] sm:$0xff] }
  0xb6   : > { %11560 = vst [vmem:[#allocation64_spill] sm:$0xff] %v5986_v61  ;;  %11561 = vst [vmem:[#allocation123_spill] sm:$0xff] %v5988_v53  ;;  %v6004_v54 = vadd.f32 %v4579_v41, %v974_v62  ;;  %v6006_v58 = vadd.f32 %v4579_v41, %v975_v0  ;;  %v6008_v1 = vadd.f32 %v4579_v41, %v976_v45  ;;  %v11594_v52 = vld [vmem:[#allocation71_spill] sm:$0xff]  ;;  %v11595_v0 = vld [vmem:[#allocation74_spill] sm:$0xff] }
  0xb7   : > { %11562 = vst [vmem:[#allocation65_spill] sm:$0xff] %v5990_v56  ;;  %11563 = vst [vmem:[#allocation124_spill] sm:$0xff] %v5992_v21  ;;  %v6010_v35 = vadd.f32 %v4579_v41, %v977_v48  ;;  %v6012_v39 = vadd.f32 %v4579_v41, %v978_v44  ;;  %v6014_v9 = vadd.f32 %v4579_v41, %v979_v57  ;;  %v11596_v48 = vld [vmem:[#allocation77_spill] sm:$0xff]  ;;  %v11597_v57 = vld [vmem:[#allocation80_spill] sm:$0xff] }
  0xb8   : > { %11564 = vst [vmem:[#allocation127_spill] sm:$0xff] %v5994_v8  ;;  %11565 = vst [vmem:[#allocation66_spill] sm:$0xff] %v5996_v24  ;;  %v6016_v47 = vadd.f32 %v4579_v41, %v980_v6  ;;  %v6018_v13 = vadd.f32 %v4579_v41, %v981_v12  ;;  %v6020_v5 = vadd.f32 %v4579_v41, %v982_v4  ;;  %v11630_v24 = vld [vmem:[#allocation114_spill] sm:$0xff]  ;;  %v11631_v8 = vld [vmem:[#allocation117_spill] sm:$0xff] }
  0xb9   : > { %11566 = vst [vmem:[#allocation125_spill] sm:$0xff] %v5998_v34  ;;  %11567 = vst [vmem:[#allocation126_spill] sm:$0xff] %v6000_v3  ;;  %v6022_v60 = vadd.f32 %v4579_v41, %v983_v2  ;;  %v6024_v15 = vadd.f32 %v4579_v41, %v984_v63  ;;  %v6026_v26 = vadd.f32 %v4579_v41, %v985_v20  ;;  %v11628_v3 = vld [vmem:[#allocation108_spill] sm:$0xff]  ;;  %v11629_v34 = vld [vmem:[#allocation111_spill] sm:$0xff] }
  0xba   : > { %11568 = vst [vmem:[#allocation119_spill] sm:$0xff] %v6002_v40  ;;  %11569 = vst [vmem:[#allocation120_spill] sm:$0xff] %v6004_v54  ;;  %v6028_v30 = vadd.f32 %v4579_v41, %v986_v27  ;;  %v6030_v38 = vadd.f32 %v4579_v41, %v987_v42  ;;  %v6032_v11 = vadd.f32 %v4579_v41, %v988_v51  ;;  %v11612_v42 = vld [vmem:[#allocation52_spill] sm:$0xff]  ;;  %v11626_v54 = vld [vmem:[#allocation102_spill] sm:$0xff] }
  0xbb   : > { %11570 = vst [vmem:[#allocation128_spill] sm:$0xff] %v6006_v58  ;;  %11571 = vst [vmem:[#allocation129_spill] sm:$0xff] %v6008_v1  ;;  %v6034_v32 = vadd.f32 %v4579_v41, %v989_v55  ;;  %v6036_v37 = vadd.f32 %v4579_v41, %v990_v49  ;;  %v6038_v59 = vadd.f32 %v4579_v41, %v991_v10  ;;  %v11624_v1 = vld [vmem:[#allocation96_spill] sm:$0xff]  ;;  %v11625_v58 = vld [vmem:[#allocation99_spill] sm:$0xff] }
  0xbc   : > { %11572 = vst [vmem:[#allocation130_spill] sm:$0xff] %v6010_v35  ;;  %11573 = vst [vmem:[#allocation131_spill] sm:$0xff] %v6012_v39  ;;  %v6040_v18 = vadd.f32 %v4579_v41, %v992_v28  ;;  %v6042_v43 = vadd.f32 %v4579_v41, %v993_v29  ;;  %v11622_v39 = vld [vmem:[#allocation89_spill] sm:$0xff]  ;;  %v11635_v44 = vld [vmem:[#allocation59_spill] sm:$0xff] }
  0xbd   : > { %11574 = vst [vmem:[#allocation132_spill] sm:$0xff] %v6014_v9  ;;  %11575 = vst [vmem:[#allocation133_spill] sm:$0xff] %v6016_v47  ;;  %v11621_v47 = vld [vmem:[#allocation87_spill] sm:$0xff]  ;;  %v11623_v35 = vld [vmem:[#allocation93_spill] sm:$0xff]  ;;  %v1073_v12 = vrot.slane %v11635_v44, 6 }
  0xbe   : > { %11576 = vst [vmem:[#allocation134_spill] sm:$0xff] %v6018_v13  ;;  %11577 = vst [vmem:[#allocation135_spill] sm:$0xff] %v6020_v5  ;;  %v11619_v5 = vld [vmem:[#allocation81_spill] sm:$0xff]  ;;  %v11620_v13 = vld [vmem:[#allocation84_spill] sm:$0xff] }
  0xbf   : > { %11578 = vst [vmem:[#allocation136_spill] sm:$0xff] %v6022_v60  ;;  %11579 = vst [vmem:[#allocation137_spill] sm:$0xff] %v6024_v15  ;;  %v11617_v15 = vld [vmem:[#allocation75_spill] sm:$0xff]  ;;  %v11618_v60 = vld [vmem:[#allocation78_spill] sm:$0xff] }
  0xc0   : > { %11580 = vst [vmem:[#allocation138_spill] sm:$0xff] %v6026_v26  ;;  %11581 = vst [vmem:[#allocation139_spill] sm:$0xff] %v6028_v30  ;;  %v11615_v30 = vld [vmem:[#allocation68_spill] sm:$0xff]  ;;  %v11627_v40 = vld [vmem:[#allocation105_spill] sm:$0xff] }
  0xc1   : > { %11582 = vst [vmem:[#allocation140_spill] sm:$0xff] %v6030_v38  ;;  %11583 = vst [vmem:[#allocation141_spill] sm:$0xff] %v6032_v11  ;;  %v11613_v11 = vld [vmem:[#allocation58_spill] sm:$0xff]  ;;  %v11616_v26 = vld [vmem:[#allocation72_spill] sm:$0xff] }
  0xc2   : > { %11584 = vst [vmem:[#allocation142_spill] sm:$0xff] %v6034_v32  ;;  %11585 = vst [vmem:[#allocation143_spill] sm:$0xff] %v6036_v37  ;;  %v11611_v32 = vld [vmem:[#allocation35_spill] sm:$0xff]  ;;  %v11614_v38 = vld [vmem:[#allocation62_spill] sm:$0xff] }
  0xc3   : > { %11586 = vst [vmem:[#allocation144_spill] sm:$0xff] %v6038_v59  ;;  %11587 = vst [vmem:[#allocation145_spill] sm:$0xff] %v6040_v18  ;;  %vm1092_vm2 = vcmp.lt.s32.totalorder %v11611_v32, 2  ;;  %v6087_v21 = vld [vmem:[#allocation2 + $0x10] sm:$0xff]  ;;  %v11636_v56 = vld [vmem:[#allocation63_spill] sm:$0xff] }
  0xc4   : > { %11588 = vst [vmem:[#allocation146_spill] sm:$0xff] %v6042_v43  ;;  %11632 = vst [vmem:[#allocation47_spill] sm:$0xff] %v6087_v21  ;;  %v1070_v10 = vrot.slane %v6087_v21, 6  ;;  %v6090_v55 = vld [vmem:[#allocation2 + $0x30] sm:$0xff]  ;;  %v1074_v2 = vrot.slane %v11636_v56, 6  ;;  %v11639_v7 = vld [vmem:[#allocation76_spill] sm:$0xff] }
  0xc5   : > { %11633 = vst [vmem:[#allocation51_spill] sm:$0xff] %v6090_v55  ;;  %v1071_v45 = vrot.slane %v6090_v55, 6  ;;  %v6093_v29 = vld [vmem:[#allocation2 + $0x50] sm:$0xff]  ;;  %v1077_v25 = vrot.slane %v11639_v7, 6  ;;  %v11640_v23 = vld [vmem:[#allocation79_spill] sm:$0xff]  ;;  %v11641_v43 = vld [vmem:[#allocation82_spill] sm:$0xff] }
  0xc6   : > { %11634 = vst [vmem:[#allocation57_spill] sm:$0xff] %v6093_v29  ;;  %v1072_v6 = vrot.slane %v6093_v29, 6  ;;  %v11637_v53 = vld [vmem:[#allocation69_spill] sm:$0xff]  ;;  %v1078_v21 = vrot.slane %v11640_v23, 6  ;;  %v1079_v18 = vrot.slane %v11641_v43, 6  ;;  %v11643_v37 = vld [vmem:[#allocation88_spill] sm:$0xff] }
  0xc7   : > { %v1075_v20 = vrot.slane %v11637_v53, 6  ;;  %v11638_v61 = vld [vmem:[#allocation73_spill] sm:$0xff]  ;;  %v1081_v17 = vrot.slane %v11643_v37, 6  ;;  %v1082_v29 = vrot.slane %v11644_v22, 6  ;;  %v11645_v16 = vld [vmem:[#allocation94_spill] sm:$0xff]  ;;  %v11647_v62 = vld [vmem:[#allocation100_spill] sm:$0xff] }
  0xc8   : > { %v1076_v9 = vrot.slane %v11638_v61, 6  ;;  %v11642_v59 = vld [vmem:[#allocation85_spill] sm:$0xff]  ;;  %v1083_v44 = vrot.slane %v11645_v16, 6  ;;  %v1085_v53 = vrot.slane %v11647_v62, 6  ;;  %v11648_v28 = vld [vmem:[#allocation103_spill] sm:$0xff]  ;;  %v11649_v49 = vld [vmem:[#allocation106_spill] sm:$0xff] }
  0xc9   : > { %v1080_v55 = vrot.slane %v11642_v59, 6  ;;  %v11646_v46 = vld [vmem:[#allocation97_spill] sm:$0xff]  ;;  %v1086_v61 = vrot.slane %v11648_v28, 6  ;;  %v1087_v7 = vrot.slane %v11649_v49, 6  ;;  %v11651_v27 = vld [vmem:[#allocation112_spill] sm:$0xff]  ;;  %v11652_v63 = vld [vmem:[#allocation115_spill] sm:$0xff] }
  0xca   : > { %v1084_v56 = vrot.slane %v11646_v46, 6  ;;  %v11650_v51 = vld [vmem:[#allocation109_spill] sm:$0xff]  ;;  %v1089_v43 = vrot.slane %v11651_v27, 6  ;;  %v1090_v59 = vrot.slane %v11652_v63, 6  ;;  %v11653_v4 = vld [vmem:[#allocation118_spill] sm:$0xff]  ;;  %v11657_v46 = vrot.slane %v11610_v33, 6 }
  0xcb   : > { %v1088_v23 = vrot.slane %v11650_v51, 6  ;;  %v1091_v37 = vrot.slane %v11653_v4, 6  ;;  %v11654_v41 = vld [vmem:[#allocation45_spill] sm:$0xff]  ;;  %v11658_v49 = vrot.slane %v11612_v42, 6  ;;  %v11659_v63 = vrot.slane %v11613_v11, 6 }
  0xcc   : > { %v11655_v22 = vrot.slane %v11654_v41, 6  ;;  %v1094_v62 = vsel %vm1092_vm2, %v11657_v46, %v1071_v45  ;;  %v11660_v51 = vrot.slane %v11614_v38, 6  ;;  %v11661_v28 = vrot.slane %v11615_v30, 6 }
  0xcd   : > { %v1095_v27 = vsel %vm1092_vm2, %v11658_v49, %v1072_v6  ;;  %v1096_v4 = vsel %vm1092_vm2, %v11659_v63, %v1073_v12  ;;  %v11663_v46 = vrot.slane %v11617_v15, 6  ;;  %v11664_v49 = vrot.slane %v11618_v60, 6 }
  0xce   : > { %v6119_v16 = vsel %vm1092_vm2, %v11655_v22, %v1070_v10  ;;  %v1097_v10 = vsel %vm1092_vm2, %v11660_v51, %v1074_v2  ;;  %v1098_v45 = vsel %vm1092_vm2, %v11661_v28, %v1075_v20  ;;  %v11662_v22 = vrot.slane %v11616_v26, 6 }
  0xcf   : > { %11656 = vst [vmem:[#allocation61_spill] sm:$0xff] %v6119_v16  ;;  %v1100_v12 = vsel %vm1092_vm2, %v11663_v46, %v1077_v25  ;;  %v1101_v2 = vsel %vm1092_vm2, %v11664_v49, %v1078_v21  ;;  %v11665_v63 = vrot.slane %v11619_v5, 6  ;;  %v11666_v51 = vrot.slane %v11620_v13, 6 }
  0xd0   : > { %v1099_v6 = vsel %vm1092_vm2, %v11662_v22, %v1076_v9  ;;  %v11667_v28 = vrot.slane %v11621_v47, 6  ;;  %v11668_v22 = vrot.slane %v11622_v39, 6  ;;  %v11669_v46 = vrot.slane %v11623_v35, 6 }
  0xd1   : > { %v1102_v20 = vsel %vm1092_vm2, %v11665_v63, %v1079_v18  ;;  %v1103_v9 = vsel %vm1092_vm2, %v11666_v51, %v1080_v55  ;;  %v11670_v49 = vrot.slane %v11624_v1, 6  ;;  %v11671_v63 = vrot.slane %v11625_v58, 6 }
  0xd2   : > { %v1104_v25 = vsel %vm1092_vm2, %v11667_v28, %v1081_v17  ;;  %v1105_v21 = vsel %vm1092_vm2, %v11668_v22, %v1082_v29  ;;  %v1106_v18 = vsel %vm1092_vm2, %v11669_v46, %v1083_v44  ;;  %v11672_v51 = vrot.slane %v11626_v54, 6 }
  0xd3   : > { %v1107_v55 = vsel %vm1092_vm2, %v11670_v49, %v1084_v56  ;;  %v1108_v17 = vsel %vm1092_vm2, %v11671_v63, %v1085_v53  ;;  %v11673_v28 = vrot.slane %v11627_v40, 6  ;;  %v11674_v22 = vrot.slane %v11628_v3, 6 }
  0xd4   : > { %v1109_v29 = vsel %vm1092_vm2, %v11672_v51, %v1086_v61  ;;  %v11675_v46 = vrot.slane %v11629_v34, 6  ;;  %v11676_v49 = vrot.slane %v11630_v24, 6  ;;  %v11677_v63 = vrot.slane %v11631_v8, 6 }
  0xd5   : > { %v1110_v44 = vsel %vm1092_vm2, %v11673_v28, %v1087_v7  ;;  %v1111_v56 = vsel %vm1092_vm2, %v11674_v22, %v1088_v23  ;;  %v11679_v51 = vrot.slane %v11654_v41, 6  ;;  %v11680_v28 = vld [vmem:[#allocation44_spill] sm:$0xff]  ;;  %v11685_v16 = vrot.slane %v11590_v50, 6 }
  0xd6   : > { %v1112_v53 = vsel %vm1092_vm2, %v11675_v46, %v1089_v43  ;;  %v1113_v61 = vsel %vm1092_vm2, %v11676_v49, %v1090_v59  ;;  %v6205_v7 = vsel %vm1092_vm2, %v11677_v63, %v1091_v37  ;;  %v11681_v23 = vrot.slane %v11680_v28, 6 }
  0xd7   : > { %11678 = vst [vmem:[#allocation67_spill] sm:$0xff] %v6205_v7  ;;  %v11682_v43 = vrot.slane %v11610_v33, 6  ;;  %v11683_v46 = vrot.slane %v11589_v36, 6  ;;  %v11684_v49 = vrot.slane %v11612_v42, 6  ;;  %v11686_v41 = vrot.slane %v11613_v11, 6 }
  0xd8   : > { %v1115_v22 = vsel %vm1092_vm2, %v11681_v23, %v11679_v51  ;;  %v11687_v63 = vrot.slane %v11591_v19, 6  ;;  %v11688_v33 = vrot.slane %v11614_v38, 6  ;;  %v11689_v36 = vrot.slane %v11592_v14, 6 }
  0xd9   : > { %v1116_v59 = vsel %vm1092_vm2, %v11683_v46, %v11682_v43  ;;  %v1117_v37 = vsel %vm1092_vm2, %v11685_v16, %v11684_v49  ;;  %v11690_v42 = vrot.slane %v11615_v30, 6  ;;  %v11691_v50 = vrot.slane %v11593_v31, 6 }
  0xda   : > { %v1118_v51 = vsel %vm1092_vm2, %v11687_v63, %v11686_v41  ;;  %v1119_v28 = vsel %vm1092_vm2, %v11689_v36, %v11688_v33  ;;  %v11692_v11 = vrot.slane %v11616_v26, 6  ;;  %v11693_v19 = vrot.slane %v11594_v52, 6 }
  0xdb   : > { %v1120_v16 = vsel %vm1092_vm2, %v11691_v50, %v11690_v42  ;;  %v11694_v38 = vrot.slane %v11617_v15, 6  ;;  %v11695_v14 = vrot.slane %v11595_v0, 6  ;;  %v11696_v30 = vrot.slane %v11618_v60, 6  ;;  %v11701_v0 = vld [vmem:[#allocation83_spill] sm:$0xff] }
  0xdc   : > { %v1121_v23 = vsel %vm1092_vm2, %v11693_v19, %v11692_v11  ;;  %v11697_v31 = vrot.slane %v11596_v48, 6  ;;  %v11698_v26 = vrot.slane %v11619_v5, 6  ;;  %v11699_v52 = vrot.slane %v11597_v57, 6  ;;  %v11704_v48 = vld [vmem:[#allocation86_spill] sm:$0xff]  ;;  %v11707_v57 = vld [vmem:[#allocation91_spill] sm:$0xff]  ;;  %v11710_v11 = vld [vmem:[#allocation92_spill] sm:$0xff] }
  0xdd   : > { %v1122_v43 = vsel %vm1092_vm2, %v11695_v14, %v11694_v38  ;;  %v11700_v15 = vrot.slane %v11620_v13, 6  ;;  %v11702_v41 = vrot.slane %v11701_v0, 6  ;;  %v11703_v60 = vrot.slane %v11621_v47, 6  ;;  %v11713_v14 = vld [vmem:[#allocation95_spill] sm:$0xff]  ;;  %v11719_v0 = vld [vmem:[#allocation101_spill] sm:$0xff] }
  0xde   : > { %v1123_v46 = vsel %vm1092_vm2, %v11697_v31, %v11696_v30  ;;  %v1124_v49 = vsel %vm1092_vm2, %v11699_v52, %v11698_v26  ;;  %v11705_v33 = vrot.slane %v11704_v48, 6  ;;  %v11706_v5 = vrot.slane %v11622_v39, 6  ;;  %v11716_v26 = vld [vmem:[#allocation98_spill] sm:$0xff]  ;;  %v11722_v48 = vld [vmem:[#allocation104_spill] sm:$0xff] }
  0xdf   : > { %v1125_v63 = vsel %vm1092_vm2, %v11702_v41, %v11700_v15  ;;  %v11708_v42 = vrot.slane %v11707_v57, 6  ;;  %v11709_v13 = vrot.slane %v11623_v35, 6  ;;  %v11711_v19 = vrot.slane %v11710_v11, 6  ;;  %v11725_v57 = vld [vmem:[#allocation107_spill] sm:$0xff]  ;;  %v11728_v11 = vld [vmem:[#allocation110_spill] sm:$0xff] }
  0xe0   : > { %v1126_v36 = vsel %vm1092_vm2, %v11705_v33, %v11703_v60  ;;  %v11712_v47 = vrot.slane %v11624_v1, 6  ;;  %v11714_v30 = vrot.slane %v11713_v14, 6  ;;  %v11715_v39 = vrot.slane %v11625_v58, 6  ;;  %v11731_v14 = vld [vmem:[#allocation113_spill] sm:$0xff] }
  0xe1   : > { %v1127_v50 = vsel %vm1092_vm2, %v11708_v42, %v11706_v5  ;;  %v1128_v38 = vsel %vm1092_vm2, %v11711_v19, %v11709_v13  ;;  %v11717_v52 = vrot.slane %v11716_v26, 6  ;;  %v11718_v35 = vrot.slane %v11626_v54, 6  ;;  %v11734_v26 = vld [vmem:[#allocation116_spill] sm:$0xff] }
  0xe2   : > { %v1129_v31 = vsel %vm1092_vm2, %v11714_v30, %v11712_v47  ;;  %v11720_v41 = vrot.slane %v11719_v0, 6  ;;  %v11721_v1 = vrot.slane %v11627_v40, 6  ;;  %v11723_v33 = vrot.slane %v11722_v48, 6 }
  0xe3   : > { %v1130_v15 = vsel %vm1092_vm2, %v11717_v52, %v11715_v39  ;;  %v11724_v58 = vrot.slane %v11628_v3, 6  ;;  %v11726_v42 = vrot.slane %v11725_v57, 6  ;;  %v11727_v54 = vrot.slane %v11629_v34, 6  ;;  %v11737_v34 = vld [vmem:[#allocation61_spill] sm:$0xff] }
  0xe4   : > { %v1131_v60 = vsel %vm1092_vm2, %v11720_v41, %v11718_v35  ;;  %v1132_v5 = vsel %vm1092_vm2, %v11723_v33, %v11721_v1  ;;  %v11729_v19 = vrot.slane %v11728_v11, 6  ;;  %v11730_v40 = vrot.slane %v11630_v24, 6 }
  0xe5   : > { %v1133_v13 = vsel %vm1092_vm2, %v11726_v42, %v11724_v58  ;;  %v11732_v30 = vrot.slane %v11731_v14, 6  ;;  %v11733_v3 = vrot.slane %v11631_v8, 6  ;;  %v11735_v52 = vrot.slane %v11734_v26, 6 }
  0xe6   : > { %v1134_v47 = vsel %vm1092_vm2, %v11729_v19, %v11727_v54  ;;  %v1137_v0 = vpack.c.bf16 %v11737_v34, %v1115_v22  ;;  %v6342_v41 = vpack.c.bf16 %v1094_v62, %v1116_v59  ;;  %v6344_v1 = vpack.c.bf16 %v1095_v27, %v1117_v37  ;;  %v11750_v59 = vld [vmem:[#allocation38_spill] sm:$0xff]  ;;  %v11751_v37 = vld [vmem:[#allocation39_spill] sm:$0xff] }
  0xe7   : > { %v1135_v39 = vsel %vm1092_vm2, %v11732_v30, %v11730_v40  ;;  %v6339_v35 = vsel %vm1092_vm2, %v11735_v52, %v11733_v3  ;;  %v6346_v24 = vpack.c.bf16 %v1096_v4, %v1118_v51  ;;  %v6348_v48 = vpack.c.bf16 %v1097_v10, %v1119_v28  ;;  %v11752_v51 = vld [vmem:[#allocation70_spill] sm:$0xff]  ;;  %v6435_v52 = vld [vmem:[#allocation2] sm:$0xff] }
  0xe8   : > { %11736 = vst [vmem:[#allocation71_spill] sm:$0xff] %v6339_v35  ;;  %v6350_v33 = vpack.c.bf16 %v1098_v45, %v1120_v16  ;;  %v6352_v58 = vpack.c.bf16 %v1099_v6, %v1121_v23  ;;  %v6354_v8 = vpack.c.bf16 %v1100_v12, %v1122_v43  ;;  %v6356_v57 = vpack.c.bf16 %v1101_v2, %v1123_v46  ;;  %v11744_v12 = vld [vmem:[#allocation36_spill] sm:$0xff] }
  0xe9   : > { %v6358_v42 = vpack.c.bf16 %v1102_v20, %v1124_v49  ;;  %v6360_v54 = vpack.c.bf16 %v1103_v9, %v1125_v63  ;;  %v6362_v62 = vpack.c.bf16 %v1104_v25, %v1126_v36  ;;  %v6364_v27 = vpack.c.bf16 %v1105_v21, %v1127_v50  ;;  %11762 = vst [vmem:[#allocation96_spill] sm:$0xff] %v6435_v52 }
  0xea   : > { %v6366_v4 = vpack.c.bf16 %v1106_v18, %v1128_v38  ;;  %v6368_v10 = vpack.c.bf16 %v1107_v55, %v1129_v31  ;;  %v6370_v45 = vpack.c.bf16 %v1108_v17, %v1130_v15  ;;  %v6372_v6 = vpack.c.bf16 %v1109_v29, %v1131_v60  ;;  %v11749_v18 = vld [vmem:[#allocation37_spill] sm:$0xff] }
  0xeb   : > { %11738 = vst [vmem:[#allocation74_spill] sm:$0xff] %v6362_v62  ;;  %11739 = vst [vmem:[#allocation77_spill] sm:$0xff] %v6364_v27  ;;  %v1182_v22 = vshrl.u32 %v11744_v12, 16  ;;  %v6375_v2 = vpack.c.bf16 %v1110_v44, %v1132_v5  ;;  %v6377_v20 = vpack.c.bf16 %v1111_v56, %v1133_v13  ;;  %v6379_v9 = vpack.c.bf16 %v1112_v53, %v1134_v47  ;;  %v11753_v56 = vld [vmem:[#allocation40_spill] sm:$0xff]  ;;  %v11754_v53 = vld [vmem:[#allocation41_spill] sm:$0xff] }
  0xec   : > { %11740 = vst [vmem:[#allocation80_spill] sm:$0xff] %v6366_v4  ;;  %11741 = vst [vmem:[#allocation48_spill] sm:$0xff] %v6368_v10  ;;  %v6381_v25 = vpack.c.bf16 %v1113_v61, %v1135_v39  ;;  %v1221_v55 = vshrl.u32 %v11749_v18, 16  ;;  %v1260_v17 = vshrl.u32 %v11750_v59, 16  ;;  %v1299_v29 = vshrl.u32 %v11751_v37, 16  ;;  %v11761_v39 = vld [vmem:[#allocation43_spill] sm:$0xff] }
  0xed   : > { %11742 = vst [vmem:[#allocation52_spill] sm:$0xff] %v6370_v45  ;;  %11743 = vst [vmem:[#allocation58_spill] sm:$0xff] %v6372_v6  ;;  %v1166_v28 = vmul.bf16 %v11752_v51, %v1137_v0  ;;  %v1167_v44 = vmul.bf16 %v11752_v51, %v6342_v41  ;;  %v1338_v16 = vshrl.u32 %v11753_v56, 16  ;;  %v1377_v23 = vshrl.u32 %v11754_v53, 16  ;;  %v6438_v0 = vld [vmem:[#allocation2 + $0x20] sm:$0xff] }
  0xee   : > { %11745 = vst [vmem:[#allocation62_spill] sm:$0xff] %v6375_v2  ;;  %11746 = vst [vmem:[#allocation68_spill] sm:$0xff] %v6377_v20  ;;  %v1168_v61 = vmul.bf16 %v11752_v51, %v6344_v1  ;;  %v1169_v43 = vmul.bf16 %v11752_v51, %v6346_v24  ;;  %v1170_v46 = vmul.bf16 %v11752_v51, %v6348_v48  ;;  %v6456_v37 = vld [vmem:[#allocation2 + $0x60] sm:$0xff] }
  0xef   : > { %11747 = vst [vmem:[#allocation72_spill] sm:$0xff] %v6379_v9  ;;  %11748 = vst [vmem:[#allocation75_spill] sm:$0xff] %v6381_v25  ;;  %v6399_v49 = vpack.i.b16 %v1182_v22, %v1182_v22  ;;  %v1171_v63 = vmul.bf16 %v11752_v51, %v6350_v33  ;;  %v1172_v36 = vmul.bf16 %v11752_v51, %v6352_v58  ;;  %v6441_v22 = vld [vmem:[#allocation2 + $0x40] sm:$0xff] }
  0xf0   : > { %v1173_v50 = vmul.bf16 %v11752_v51, %v6354_v8  ;;  %v1174_v38 = vmul.bf16 %v11752_v51, %v6356_v57  ;;  %v1175_v31 = vmul.bf16 %v11752_v51, %v6358_v42  ;;  %v6411_v15 = vpack.i.b16 %v1221_v55, %v1221_v55  ;;  %11763 = vst [vmem:[#allocation99_spill] sm:$0xff] %v6438_v0 }
  0xf1   : > { %11755 = vst [vmem:[#allocation78_spill] sm:$0xff] %v6399_v49  ;;  %v6413_v60 = vpack.i.b16 %v1260_v17, %v1260_v17  ;;  %v6415_v5 = vpack.i.b16 %v1299_v29, %v1299_v29  ;;  %v1176_v13 = vmul.bf16 %v11752_v51, %v6360_v54  ;;  %v1177_v11 = vmul.bf16 %v11752_v51, %v6362_v62 }
  0xf2   : > { %11756 = vst [vmem:[#allocation81_spill] sm:$0xff] %v6411_v15  ;;  %v6421_v19 = vpack.i.b16 %v1338_v16, %v1338_v16  ;;  %v6423_v47 = vpack.i.b16 %v1377_v23, %v1377_v23  ;;  %v1178_v40 = vmul.bf16 %v11752_v51, %v6364_v27  ;;  %v1179_v14 = vmul.bf16 %v11752_v51, %v6366_v4 }
  0xf3   : > { %11757 = vst [vmem:[#allocation84_spill] sm:$0xff] %v6413_v60  ;;  %11758 = vst [vmem:[#allocation87_spill] sm:$0xff] %v6415_v5  ;;  %v1180_v30 = vmul.bf16 %v11752_v51, %v6368_v10  ;;  %v1188_v3 = vrot.slane %v6399_v49, %v11761_v39  ;;  %v1181_v26 = vmul.bf16 %v11752_v51, %v6370_v45 }
  0xf4   : > { %11759 = vst [vmem:[#allocation89_spill] sm:$0xff] %v6421_v19  ;;  %11760 = vst [vmem:[#allocation93_spill] sm:$0xff] %v6423_v47  ;;  %v6446_v55 = vrot.slane %v6411_v15, %v11761_v39  ;;  %v6450_v59 = vrot.slane %v6413_v60, %v11761_v39  ;;  %v6454_v17 = vrot.slane %v6415_v5, %v11761_v39 }
  0xf5   : > { %11764 = vst [vmem:[#allocation102_spill] sm:$0xff] %v6441_v22  ;;  %11766 = vst [vmem:[#allocation108_spill] sm:$0xff] %v6456_v37  ;;  %v1203_v51 = vmul.bf16 %v1188_v3, %v6370_v45  ;;  %v1204_v56 = vmul.bf16 %v1188_v3, %v6372_v6  ;;  %v6463_v16 = vrot.slane %v6421_v19, %v11761_v39 }
  0xf6   : > { %11765 = vst [vmem:[#allocation105_spill] sm:$0xff] %v6454_v17  ;;  %v6467_v53 = vrot.slane %v6423_v47, %v11761_v39  ;;  %v1189_v23 = vmul.bf16 %v1188_v3, %v6342_v41  ;;  %v1190_v18 = vmul.bf16 %v1188_v3, %v6344_v1  ;;  %v1191_v12 = vmul.bf16 %v1188_v3, %v6346_v24 }
  0xf7   : > { %11767 = vst [vmem:[#allocation111_spill] sm:$0xff] %v6463_v16  ;;  %v1192_v29 = vmul.bf16 %v1188_v3, %v6348_v48  ;;  %v1193_v34 = vmul.bf16 %v1188_v3, %v6350_v33  ;;  %v1194_v21 = vmul.bf16 %v1188_v3, %v6352_v58  ;;  %v1195_v5 = vmul.bf16 %v1188_v3, %v6354_v8 }
  0xf8   : > { %11768 = vst [vmem:[#allocation114_spill] sm:$0xff] %v6467_v53  ;;  %v1196_v19 = vmul.bf16 %v1188_v3, %v6356_v57  ;;  %v1197_v60 = vmul.bf16 %v1188_v3, %v6358_v42  ;;  %v1198_v39 = vmul.bf16 %v1188_v3, %v6360_v54  ;;  %v1199_v41 = vmul.bf16 %v1188_v3, %v6362_v62 }
  0xf9   : > { %v1200_v47 = vmul.bf16 %v1188_v3, %v6364_v27  ;;  %v1219_v15 = vadd.bf16 %v1203_v51, %v1180_v30  ;;  %v1220_v49 = vadd.bf16 %v1204_v56, %v1181_v26  ;;  %v1242_v37 = vmul.bf16 %v6446_v55, %v6372_v6 }
  0xfa   : > { %v1243_v22 = vmul.bf16 %v6446_v55, %v6375_v2  ;;  %v1201_v0 = vmul.bf16 %v1188_v3, %v6366_v4  ;;  %v1202_v52 = vmul.bf16 %v1188_v3, %v6368_v10  ;;  %v1205_v32 = vadd.bf16 %v1189_v23, %v1166_v28 }
  0xfb   : > { %v1206_v35 = vadd.bf16 %v1190_v18, %v1167_v44  ;;  %v1207_v7 = vadd.bf16 %v1191_v12, %v1168_v61  ;;  %v1208_v53 = vadd.bf16 %v1192_v29, %v1169_v43  ;;  %v1209_v25 = vadd.bf16 %v1193_v34, %v1170_v46 }
  0xfc   : > { %v1210_v16 = vadd.bf16 %v1194_v21, %v1171_v63  ;;  %v1211_v45 = vadd.bf16 %v1195_v5, %v1172_v36  ;;  %v1212_v27 = vadd.bf16 %v1196_v19, %v1173_v50  ;;  %v1213_v30 = vadd.bf16 %v1197_v60, %v1174_v38  ;;  %v11769_v5 = vld [vmem:[#allocation74_spill] sm:$0xff] }
  0xfd   : > { %v1214_v26 = vadd.bf16 %v1198_v39, %v1175_v31  ;;  %v1258_v51 = vadd.bf16 %v1242_v37, %v1219_v15  ;;  %v1259_v56 = vadd.bf16 %v1243_v22, %v1220_v49  ;;  %v1281_v6 = vmul.bf16 %v6450_v59, %v6375_v2 }
  0xfe   : > { %v1282_v4 = vmul.bf16 %v6450_v59, %v6377_v20  ;;  %v1215_v62 = vadd.bf16 %v1199_v41, %v1176_v13  ;;  %v1216_v3 = vadd.bf16 %v1200_v47, %v1177_v11  ;;  %v1217_v28 = vadd.bf16 %v1201_v0, %v1178_v40  ;;  %v11770_v11 = vld [vmem:[#allocation77_spill] sm:$0xff]  ;;  %v11771_v47 = vld [vmem:[#allocation80_spill] sm:$0xff]  ;;  %v11773_v29 = vld [vmem:[#allocation111_spill] sm:$0xff] }
  0xff   : > { %v1218_v44 = vadd.bf16 %v1202_v52, %v1179_v14  ;;  %v1228_v61 = vmul.bf16 %v6446_v55, %v6344_v1  ;;  %v1229_v21 = vmul.bf16 %v6446_v55, %v6346_v24  ;;  %v1230_v43 = vmul.bf16 %v6446_v55, %v6348_v48  ;;  %v11774_v41 = vld [vmem:[#allocation75_spill] sm:$0xff] }
 0x100   : > { %v1231_v46 = vmul.bf16 %v6446_v55, %v6350_v33  ;;  %v1232_v49 = vmul.bf16 %v6446_v55, %v6352_v58  ;;  %v1233_v63 = vmul.bf16 %v6446_v55, %v6354_v8  ;;  %v1234_v36 = vmul.bf16 %v6446_v55, %v6356_v57 }
 0x101   : > { %v1235_v1 = vmul.bf16 %v6446_v55, %v6358_v42  ;;  %v1297_v50 = vadd.bf16 %v1281_v6, %v1258_v51  ;;  %v1298_v38 = vadd.bf16 %v1282_v4, %v1259_v56  ;;  %v1320_v31 = vmul.bf16 %v6454_v17, %v6377_v20  ;;  %v11772_v6 = vld [vmem:[#allocation52_spill] sm:$0xff] }
 0x102   : > { %v1321_v15 = vmul.bf16 %v6454_v17, %v6379_v9  ;;  %v1236_v60 = vmul.bf16 %v6446_v55, %v6360_v54  ;;  %v1237_v13 = vmul.bf16 %v6446_v55, %v11769_v5  ;;  %v1238_v19 = vmul.bf16 %v6446_v55, %v11770_v11 }
 0x103   : > { %v1239_v40 = vmul.bf16 %v6446_v55, %v11771_v47  ;;  %v1240_v4 = vmul.bf16 %v6446_v55, %v6368_v10  ;;  %v1241_v14 = vmul.bf16 %v6446_v55, %v11772_v6  ;;  %v1244_v39 = vadd.bf16 %v1228_v61, %v1205_v32 }
 0x104   : > { %v1245_v52 = vadd.bf16 %v1229_v21, %v1206_v35  ;;  %v1246_v34 = vadd.bf16 %v1230_v43, %v1207_v7  ;;  %v1247_v0 = vadd.bf16 %v1231_v46, %v1208_v53  ;;  %v1248_v12 = vadd.bf16 %v1232_v49, %v1209_v25 }
 0x105   : > { %v1249_v22 = vadd.bf16 %v1233_v63, %v1210_v16  ;;  %v1336_v18 = vadd.bf16 %v1320_v31, %v1297_v50  ;;  %v1337_v37 = vadd.bf16 %v1321_v15, %v1298_v38  ;;  %v1359_v23 = vmul.bf16 %v11773_v29, %v6379_v9  ;;  %v11780_v38 = vld [vmem:[#allocation58_spill] sm:$0xff] }
 0x106   : > { %v1360_v51 = vmul.bf16 %v11773_v29, %v11774_v41  ;;  %v1250_v56 = vadd.bf16 %v1234_v36, %v1211_v45  ;;  %v1251_v20 = vadd.bf16 %v1235_v1, %v1212_v27  ;;  %v1252_v2 = vadd.bf16 %v1236_v60, %v1213_v30  ;;  %v11775_v30 = vld [vmem:[#allocation114_spill] sm:$0xff]  ;;  %v11779_v36 = vld [vmem:[#allocation48_spill] sm:$0xff] }
 0x107   : > { %v1253_v17 = vadd.bf16 %v1237_v13, %v1214_v26  ;;  %v1254_v10 = vadd.bf16 %v1238_v19, %v1215_v62  ;;  %v1255_v55 = vadd.bf16 %v1239_v40, %v1216_v3  ;;  %v1256_v32 = vadd.bf16 %v1240_v4, %v1217_v28  ;;  %v11776_v26 = vld [vmem:[#allocation67_spill] sm:$0xff] }
 0x108   : > { %v1257_v35 = vadd.bf16 %v1241_v14, %v1218_v44  ;;  %v1267_v7 = vmul.bf16 %v6450_v59, %v6346_v24  ;;  %v1268_v25 = vmul.bf16 %v6450_v59, %v6348_v48  ;;  %v1269_v16 = vmul.bf16 %v6450_v59, %v6350_v33  ;;  %v11777_v3 = vld [vmem:[#allocation71_spill] sm:$0xff] }
 0x109   : > { %v1270_v53 = vmul.bf16 %v6450_v59, %v6352_v58  ;;  %v1375_v45 = vadd.bf16 %v1359_v23, %v1336_v18  ;;  %v1376_v27 = vadd.bf16 %v1360_v51, %v1337_v37  ;;  %v1398_v62 = vmul.bf16 %v11775_v30, %v11774_v41 }
 0x10a   : > { %v11778_v28 = vpack.c.bf16 %v11776_v26, %v11777_v3  ;;  %v1271_v24 = vmul.bf16 %v6450_v59, %v6354_v8  ;;  %v1272_v61 = vmul.bf16 %v6450_v59, %v6356_v57  ;;  %v1273_v21 = vmul.bf16 %v6450_v59, %v6358_v42 }
 0x10b   : > { %v1274_v43 = vmul.bf16 %v6450_v59, %v6360_v54  ;;  %v1275_v46 = vmul.bf16 %v6450_v59, %v11769_v5  ;;  %v1276_v49 = vmul.bf16 %v6450_v59, %v11770_v11  ;;  %v1277_v63 = vmul.bf16 %v6450_v59, %v11771_v47 }
 0x10c   : > { %v1399_v44 = vmul.bf16 %v11775_v30, %v11778_v28  ;;  %v1278_v1 = vmul.bf16 %v6450_v59, %v11779_v36  ;;  %v1279_v50 = vmul.bf16 %v6450_v59, %v11772_v6  ;;  %v1280_v31 = vmul.bf16 %v6450_v59, %v11780_v38  ;;  %v11781_v30 = vld [vmem:[#allocation105_spill] sm:$0xff] }
 0x10d   : > { %v1283_v15 = vadd.bf16 %v1267_v7, %v1244_v39  ;;  %v1284_v60 = vadd.bf16 %v1268_v25, %v1245_v52  ;;  %v1285_v13 = vadd.bf16 %v1269_v16, %v1246_v34  ;;  %v1286_v19 = vadd.bf16 %v1270_v53, %v1247_v0  ;;  %v11782_v7 = vld [vmem:[#allocation62_spill] sm:$0xff]  ;;  %v11783_v16 = vld [vmem:[#allocation143_spill] sm:$0xff] }
 0x10e   : > { %v1414_v40 = vadd.bf16 %v1398_v62, %v1375_v45  ;;  %v1415_v4 = vadd.bf16 %v1399_v44, %v1376_v27  ;;  %v1287_v14 = vadd.bf16 %v1271_v24, %v1248_v12  ;;  %v1288_v18 = vadd.bf16 %v1272_v61, %v1249_v22  ;;  %v11785_v45 = vld [vmem:[#allocation144_spill] sm:$0xff]  ;;  %v11787_v62 = vld [vmem:[#allocation145_spill] sm:$0xff]  ;;  %v11789_v24 = vld [vmem:[#allocation146_spill] sm:$0xff] }
 0x10f   : > { %v1289_v37 = vadd.bf16 %v1273_v21, %v1250_v56  ;;  %v1290_v23 = vadd.bf16 %v1274_v43, %v1251_v20  ;;  %v1291_v41 = vadd.bf16 %v1275_v46, %v1252_v2  ;;  %v1292_v51 = vadd.bf16 %v1276_v49, %v1253_v17 }
 0x110   : > { %v1293_v26 = vadd.bf16 %v1277_v63, %v1254_v10  ;;  %v1294_v3 = vadd.bf16 %v1278_v1, %v1255_v55  ;;  %v1295_v28 = vadd.bf16 %v1279_v50, %v1256_v32  ;;  %v1296_v9 = vadd.bf16 %v1280_v31, %v1257_v35 }
 0x111   : > { %v1306_v29 = vmul.bf16 %v11781_v30, %v6348_v48  ;;  %v1307_v59 = vmul.bf16 %v11781_v30, %v6350_v33  ;;  %v1444_v39 = vunpack.c.l.bf16 %v1414_v40  ;;  %v1445_v52 = vunpack.c.h.bf16 %v1414_v40 }
 0x112   : > { %v1446_v34 = vunpack.c.l.bf16 %v1415_v4  ;;  %v1447_v0 = vunpack.c.h.bf16 %v1415_v4  ;;  %v1308_v12 = vmul.bf16 %v11781_v30, %v6352_v58  ;;  %v1309_v2 = vmul.bf16 %v11781_v30, %v6354_v8 }
 0x113   : > { %v1310_v10 = vmul.bf16 %v11781_v30, %v6356_v57  ;;  %v1311_v20 = vmul.bf16 %v11781_v30, %v6358_v42  ;;  %v1312_v48 = vmul.bf16 %v11781_v30, %v6360_v54  ;;  %v1313_v17 = vmul.bf16 %v11781_v30, %v11769_v5 }
 0x114   : > { %v1314_v22 = vmul.bf16 %v11781_v30, %v11770_v11  ;;  %v1315_v56 = vmul.bf16 %v11781_v30, %v11771_v47  ;;  %v1316_v55 = vmul.bf16 %v11781_v30, %v11779_v36  ;;  %v1317_v32 = vmul.bf16 %v11781_v30, %v11772_v6 }
 0x115   : > { %v1318_v35 = vmul.bf16 %v11781_v30, %v11780_v38  ;;  %v1319_v25 = vmul.bf16 %v11781_v30, %v11782_v7  ;;  %v6590_v53 = vadd.f32 %v1444_v39, %v11783_v16  ;;  %v6593_v27 = vadd.f32 %v1445_v52, %v11785_v45  ;;  %v11791_v52 = vld [vmem:[#allocation111_spill] sm:$0xff] }
 0x116   : > { %v6596_v44 = vadd.f32 %v1446_v34, %v11787_v62  ;;  %v6599_v61 = vadd.f32 %v1447_v0, %v11789_v24  ;;  %v1322_v21 = vadd.bf16 %v1306_v29, %v1283_v15  ;;  %v1323_v43 = vadd.bf16 %v1307_v59, %v1284_v60 }
 0x117   : > { %11784 = vst [vmem:[#allocation117_spill] sm:$0xff] %v6590_v53  ;;  %11786 = vst [vmem:[#allocation59_spill] sm:$0xff] %v6593_v27  ;;  %v1324_v46 = vadd.bf16 %v1308_v12, %v1285_v13  ;;  %v1325_v49 = vadd.bf16 %v1309_v2, %v1286_v19  ;;  %v1326_v63 = vadd.bf16 %v1310_v10, %v1287_v14  ;;  %v6901_v27 = vld [vmem:[#allocation2 + $0x1f0] sm:$0xff] }
 0x118   : > { %11788 = vst [vmem:[#allocation63_spill] sm:$0xff] %v6596_v44  ;;  %11790 = vst [vmem:[#allocation69_spill] sm:$0xff] %v6599_v61  ;;  %v1327_v1 = vadd.bf16 %v1311_v20, %v1288_v18  ;;  %v1328_v50 = vadd.bf16 %v1312_v48, %v1289_v37  ;;  %v1329_v30 = vadd.bf16 %v1313_v17, %v1290_v23  ;;  %v6895_v61 = vld [vmem:[#allocation2 + $0x1b0] sm:$0xff] }
 0x119   : > { %v1330_v31 = vadd.bf16 %v1314_v22, %v1291_v41  ;;  %v1331_v40 = vadd.bf16 %v1315_v56, %v1292_v51  ;;  %v1332_v4 = vadd.bf16 %v1316_v55, %v1293_v26  ;;  %v1333_v39 = vadd.bf16 %v1317_v32, %v1294_v3  ;;  %v11792_v3 = vld [vmem:[#allocation68_spill] sm:$0xff]  ;;  %v6898_v44 = vld [vmem:[#allocation2 + $0x1d0] sm:$0xff] }
 0x11a   : > { %v1345_v16 = vmul.bf16 %v11791_v52, %v6350_v33  ;;  %v1346_v34 = vmul.bf16 %v11791_v52, %v6352_v58  ;;  %v1347_v29 = vmul.bf16 %v11791_v52, %v6354_v8  ;;  %v1348_v15 = vmul.bf16 %v11791_v52, %v6356_v57  ;;  %v6904_v53 = vld [vmem:[#allocation2 + $0x210] sm:$0xff] }
 0x11b   : > { %v1349_v60 = vmul.bf16 %v11791_v52, %v6358_v42  ;;  %v1350_v13 = vmul.bf16 %v11791_v52, %v6360_v54  ;;  %v1351_v19 = vmul.bf16 %v11791_v52, %v11769_v5  ;;  %v1352_v33 = vmul.bf16 %v11791_v52, %v11770_v11 }
 0x11c   : > { %v1353_v14 = vmul.bf16 %v11791_v52, %v11771_v47  ;;  %v1354_v18 = vmul.bf16 %v11791_v52, %v11779_v36  ;;  %v1355_v37 = vmul.bf16 %v11791_v52, %v11772_v6  ;;  %v1356_v23 = vmul.bf16 %v11791_v52, %v11780_v38 }
 0x11d   : > { %v1334_v41 = vadd.bf16 %v1318_v35, %v1295_v28  ;;  %v1335_v51 = vadd.bf16 %v1319_v25, %v1296_v9  ;;  %v1357_v26 = vmul.bf16 %v11791_v52, %v11782_v7  ;;  %v1358_v59 = vmul.bf16 %v11791_v52, %v11792_v3  ;;  %v11793_v35 = vld [vmem:[#allocation114_spill] sm:$0xff] }
 0x11e   : > { %v1361_v0 = vadd.bf16 %v1345_v16, %v1322_v21  ;;  %v1362_v12 = vadd.bf16 %v1346_v34, %v1323_v43  ;;  %v1363_v2 = vadd.bf16 %v1347_v29, %v1324_v46  ;;  %v1364_v10 = vadd.bf16 %v1348_v15, %v1325_v49 }
 0x11f   : > { %v1365_v20 = vadd.bf16 %v1349_v60, %v1326_v63  ;;  %v1366_v48 = vadd.bf16 %v1350_v13, %v1327_v1  ;;  %v1367_v17 = vadd.bf16 %v1351_v19, %v1328_v50  ;;  %v1368_v22 = vadd.bf16 %v1352_v33, %v1329_v30  ;;  %v11794_v63 = vld [vmem:[#allocation72_spill] sm:$0xff]  ;;  %v6657_v50 = vld [vmem:[#allocation2 + $0x80] sm:$0xff] }
 0x120   : > { %v1369_v56 = vadd.bf16 %v1353_v14, %v1330_v31  ;;  %v1370_v55 = vadd.bf16 %v1354_v18, %v1331_v40  ;;  %v1371_v32 = vadd.bf16 %v1355_v37, %v1332_v4  ;;  %v1372_v45 = vadd.bf16 %v1356_v23, %v1333_v39  ;;  %v6660_v30 = vld [vmem:[#allocation2 + $0xa0] sm:$0xff] }
 0x121   : > { %v1373_v28 = vadd.bf16 %v1357_v26, %v1334_v41  ;;  %v1374_v9 = vadd.bf16 %v1358_v59, %v1335_v51  ;;  %v1384_v25 = vmul.bf16 %v11793_v35, %v6352_v58  ;;  %v1385_v62 = vmul.bf16 %v11793_v35, %v6354_v8 }
 0x122   : > { %v1386_v24 = vmul.bf16 %v11793_v35, %v6356_v57  ;;  %v1387_v21 = vmul.bf16 %v11793_v35, %v6358_v42  ;;  %v1388_v43 = vmul.bf16 %v11793_v35, %v6360_v54  ;;  %v1389_v46 = vmul.bf16 %v11793_v35, %v11769_v5 }
 0x123   : > { %v1390_v49 = vmul.bf16 %v11793_v35, %v11770_v11  ;;  %v1391_v58 = vmul.bf16 %v11793_v35, %v11771_v47  ;;  %v1392_v8 = vmul.bf16 %v11793_v35, %v11779_v36  ;;  %v1393_v57 = vmul.bf16 %v11793_v35, %v11772_v6  ;;  %v6813_v6 = vld [vmem:[#allocation2 + $0xc8] sm:$0xff] }
 0x124   : > { %v1394_v42 = vmul.bf16 %v11793_v35, %v11780_v38  ;;  %v1395_v54 = vmul.bf16 %v11793_v35, %v11782_v7  ;;  %v1396_v5 = vmul.bf16 %v11793_v35, %v11792_v3  ;;  %v1397_v11 = vmul.bf16 %v11793_v35, %v11794_v63  ;;  %v11807_v63 = vld [vmem:[#allocation124_spill] sm:$0xff]  ;;  %11866 = vst [vmem:[#allocation67_spill] sm:$0xff] %v6813_v6 }
 0x125   : > { %v1400_v1 = vadd.bf16 %v1384_v25, %v1361_v0  ;;  %v1401_v47 = vadd.bf16 %v1385_v62, %v1362_v12  ;;  %v1402_v38 = vadd.bf16 %v1386_v24, %v1363_v2  ;;  %v1403_v31 = vadd.bf16 %v1387_v21, %v1364_v10  ;;  %v11795_v62 = vld [vmem:[#allocation121_spill] sm:$0xff]  ;;  %v11797_v21 = vld [vmem:[#allocation60_spill] sm:$0xff] }
 0x126   : > { %v1404_v40 = vadd.bf16 %v1388_v43, %v1365_v20  ;;  %v1405_v7 = vadd.bf16 %v1389_v46, %v1366_v48  ;;  %v1406_v4 = vadd.bf16 %v1390_v49, %v1367_v17  ;;  %v1407_v39 = vadd.bf16 %v1391_v58, %v1368_v22  ;;  %v11799_v46 = vld [vmem:[#allocation122_spill] sm:$0xff]  ;;  %v11801_v58 = vld [vmem:[#allocation64_spill] sm:$0xff] }
 0x127   : > { %v1408_v52 = vadd.bf16 %v1392_v8, %v1369_v56  ;;  %v1409_v16 = vadd.bf16 %v1393_v57, %v1370_v55  ;;  %v1410_v34 = vadd.bf16 %v1394_v42, %v1371_v32  ;;  %v1411_v29 = vadd.bf16 %v1395_v54, %v1372_v45  ;;  %v11803_v57 = vld [vmem:[#allocation123_spill] sm:$0xff]  ;;  %v11805_v54 = vld [vmem:[#allocation65_spill] sm:$0xff] }
 0x128   : > { %v1412_v15 = vadd.bf16 %v1396_v5, %v1373_v28  ;;  %v1413_v60 = vadd.bf16 %v1397_v11, %v1374_v9  ;;  %v1416_v13 = vunpack.c.l.bf16 %v1400_v1  ;;  %v1417_v19 = vunpack.c.h.bf16 %v1400_v1  ;;  %v11809_v1 = vld [vmem:[#allocation127_spill] sm:$0xff] }
 0x129   : > { %v1418_v33 = vunpack.c.l.bf16 %v1401_v47  ;;  %v1419_v14 = vunpack.c.h.bf16 %v1401_v47  ;;  %v1420_v18 = vunpack.c.l.bf16 %v1402_v38  ;;  %v1421_v37 = vunpack.c.h.bf16 %v1402_v38  ;;  %v11811_v38 = vld [vmem:[#allocation66_spill] sm:$0xff] }
 0x12a   : > { %v1422_v23 = vunpack.c.l.bf16 %v1403_v31  ;;  %v1423_v41 = vunpack.c.h.bf16 %v1403_v31  ;;  %v1424_v51 = vunpack.c.l.bf16 %v1404_v40  ;;  %v1425_v26 = vunpack.c.h.bf16 %v1404_v40  ;;  %v11813_v40 = vld [vmem:[#allocation125_spill] sm:$0xff] }
 0x12b   : > { %v1426_v3 = vunpack.c.l.bf16 %v1405_v7  ;;  %v1427_v59 = vunpack.c.h.bf16 %v1405_v7  ;;  %v1428_v0 = vunpack.c.l.bf16 %v1406_v4  ;;  %v1429_v12 = vunpack.c.h.bf16 %v1406_v4  ;;  %v11815_v4 = vld [vmem:[#allocation126_spill] sm:$0xff] }
 0x12c   : > { %v1430_v2 = vunpack.c.l.bf16 %v1407_v39  ;;  %v1431_v10 = vunpack.c.h.bf16 %v1407_v39  ;;  %v1432_v20 = vunpack.c.l.bf16 %v1408_v52  ;;  %v1433_v48 = vunpack.c.h.bf16 %v1408_v52  ;;  %v11817_v52 = vld [vmem:[#allocation119_spill] sm:$0xff] }
 0x12d   : > { %v1434_v17 = vunpack.c.l.bf16 %v1409_v16  ;;  %v1435_v22 = vunpack.c.h.bf16 %v1409_v16  ;;  %v1436_v56 = vunpack.c.l.bf16 %v1410_v34  ;;  %v1437_v55 = vunpack.c.h.bf16 %v1410_v34  ;;  %v11819_v34 = vld [vmem:[#allocation120_spill] sm:$0xff] }
 0x12e   : > { %v1438_v32 = vunpack.c.l.bf16 %v1411_v29  ;;  %v1439_v45 = vunpack.c.h.bf16 %v1411_v29  ;;  %v1440_v28 = vunpack.c.l.bf16 %v1412_v15  ;;  %v1441_v9 = vunpack.c.h.bf16 %v1412_v15  ;;  %v11821_v15 = vld [vmem:[#allocation128_spill] sm:$0xff]  ;;  %11896 = vst [vmem:[#allocation120_spill] sm:$0xff] %v6895_v61 }
 0x12f   : > { %v1442_v35 = vunpack.c.l.bf16 %v1413_v60  ;;  %v1443_v25 = vunpack.c.h.bf16 %v1413_v60  ;;  %v6664_v24 = vadd.f32 %v1416_v13, %v11795_v62  ;;  %v6667_v43 = vadd.f32 %v1417_v19, %v11797_v21  ;;  %v11823_v13 = vld [vmem:[#allocation129_spill] sm:$0xff]  ;;  %11897 = vst [vmem:[#allocation128_spill] sm:$0xff] %v6898_v44 }
 0x130   : > { %v6670_v49 = vadd.f32 %v1418_v33, %v11799_v46  ;;  %v6673_v8 = vadd.f32 %v1419_v14, %v11801_v58  ;;  %v6676_v42 = vadd.f32 %v1420_v18, %v11803_v57  ;;  %v6679_v5 = vadd.f32 %v1421_v37, %v11805_v54  ;;  %v11825_v33 = vld [vmem:[#allocation130_spill] sm:$0xff]  ;;  %v11827_v18 = vld [vmem:[#allocation131_spill] sm:$0xff]  ;;  %11898 = vst [vmem:[#allocation129_spill] sm:$0xff] %v6901_v27 }
 0x131   : > { %11796 = vst [vmem:[#allocation73_spill] sm:$0xff] %v6664_v24  ;;  %11798 = vst [vmem:[#allocation76_spill] sm:$0xff] %v6667_v43  ;;  %v6682_v11 = vadd.f32 %v1422_v23, %v11807_v63  ;;  %v6685_v47 = vadd.f32 %v1423_v41, %v11809_v1  ;;  %v6688_v31 = vadd.f32 %v1424_v51, %v11811_v38  ;;  %v11829_v23 = vld [vmem:[#allocation132_spill] sm:$0xff]  ;;  %v11831_v51 = vld [vmem:[#allocation133_spill] sm:$0xff] }
 0x132   : > { %11800 = vst [vmem:[#allocation79_spill] sm:$0xff] %v6670_v49  ;;  %11802 = vst [vmem:[#allocation82_spill] sm:$0xff] %v6673_v8  ;;  %v6691_v7 = vadd.f32 %v1425_v26, %v11813_v40  ;;  %v6694_v39 = vadd.f32 %v1426_v3, %v11815_v4  ;;  %v6697_v16 = vadd.f32 %v1427_v59, %v11817_v52  ;;  %v11833_v3 = vld [vmem:[#allocation134_spill] sm:$0xff]  ;;  %v6750_v1 = vld [vmem:[#allocation2 + $0xe0] sm:$0xff] }
 0x133   : > { %11804 = vst [vmem:[#allocation85_spill] sm:$0xff] %v6676_v42  ;;  %11806 = vst [vmem:[#allocation88_spill] sm:$0xff] %v6679_v5  ;;  %v6700_v29 = vadd.f32 %v1428_v0, %v11819_v34  ;;  %v6703_v60 = vadd.f32 %v1429_v12, %v11821_v15  ;;  %v6706_v19 = vadd.f32 %v1430_v2, %v11823_v13  ;;  %v11835_v0 = vld [vmem:[#allocation135_spill] sm:$0xff]  ;;  %v11837_v2 = vld [vmem:[#allocation136_spill] sm:$0xff] }
 0x134   : > { %11808 = vst [vmem:[#allocation90_spill] sm:$0xff] %v6682_v11  ;;  %11810 = vst [vmem:[#allocation94_spill] sm:$0xff] %v6685_v47  ;;  %v6709_v14 = vadd.f32 %v1431_v10, %v11825_v33  ;;  %v6712_v37 = vadd.f32 %v1432_v20, %v11827_v18  ;;  %v6715_v41 = vadd.f32 %v1433_v48, %v11829_v23  ;;  %v11839_v10 = vld [vmem:[#allocation137_spill] sm:$0xff]  ;;  %v11841_v20 = vld [vmem:[#allocation138_spill] sm:$0xff] }
 0x135   : > { %11812 = vst [vmem:[#allocation97_spill] sm:$0xff] %v6688_v31  ;;  %11814 = vst [vmem:[#allocation100_spill] sm:$0xff] %v6691_v7  ;;  %v6718_v26 = vadd.f32 %v1434_v17, %v11831_v51  ;;  %v6721_v59 = vadd.f32 %v1435_v22, %v11833_v3  ;;  %v6724_v12 = vadd.f32 %v1436_v56, %v11835_v0  ;;  %v11843_v48 = vld [vmem:[#allocation139_spill] sm:$0xff]  ;;  %v11845_v17 = vld [vmem:[#allocation140_spill] sm:$0xff] }
 0x136   : > { %11816 = vst [vmem:[#allocation103_spill] sm:$0xff] %v6694_v39  ;;  %11818 = vst [vmem:[#allocation106_spill] sm:$0xff] %v6697_v16  ;;  %v6727_v62 = vadd.f32 %v1437_v55, %v11837_v2  ;;  %v6730_v21 = vadd.f32 %v1438_v32, %v11839_v10  ;;  %v6733_v46 = vadd.f32 %v1439_v45, %v11841_v20  ;;  %v11847_v22 = vld [vmem:[#allocation141_spill] sm:$0xff]  ;;  %v11849_v56 = vld [vmem:[#allocation142_spill] sm:$0xff] }
 0x137   : > { %11820 = vst [vmem:[#allocation109_spill] sm:$0xff] %v6700_v29  ;;  %11822 = vst [vmem:[#allocation112_spill] sm:$0xff] %v6703_v60  ;;  %v6736_v58 = vadd.f32 %v1440_v28, %v11843_v48  ;;  %v6739_v57 = vadd.f32 %v1441_v9, %v11845_v17  ;;  %v6742_v54 = vadd.f32 %v1442_v35, %v11847_v22  ;;  %v6747_v55 = vld [vmem:[#allocation2 + $0xc0] sm:$0xff]  ;;  %v6795_v15 = vld [vmem:[#allocation2 + $0x8] sm:$0xff] }
 0x138   : > { %11824 = vst [vmem:[#allocation115_spill] sm:$0xff] %v6706_v19  ;;  %11826 = vst [vmem:[#allocation118_spill] sm:$0xff] %v6709_v14  ;;  %v6745_v63 = vadd.f32 %v1443_v25, %v11849_v56  ;;  %v6753_v38 = vld [vmem:[#allocation2 + $0x100] sm:$0xff]  ;;  %v6798_v52 = vld [vmem:[#allocation2 + $0x28] sm:$0xff] }
 0x139   : > { %11828 = vst [vmem:[#allocation45_spill] sm:$0xff] %v6712_v37  ;;  %11830 = vst [vmem:[#allocation44_spill] sm:$0xff] %v6715_v41  ;;  %v6756_v9 = vld [vmem:[#allocation2 + $0x120] sm:$0xff]  ;;  %v6801_v25 = vld [vmem:[#allocation2 + $0x48] sm:$0xff] }
 0x13a   : > { %11832 = vst [vmem:[#allocation83_spill] sm:$0xff] %v6718_v26  ;;  %11834 = vst [vmem:[#allocation86_spill] sm:$0xff] %v6721_v59  ;;  %v6759_v40 = vld [vmem:[#allocation2 + $0x140] sm:$0xff]  ;;  %v6804_v35 = vld [vmem:[#allocation2 + $0x68] sm:$0xff] }
 0x13b   : > { %11836 = vst [vmem:[#allocation91_spill] sm:$0xff] %v6724_v12  ;;  %11838 = vst [vmem:[#allocation92_spill] sm:$0xff] %v6727_v62  ;;  %v6762_v4 = vld [vmem:[#allocation2 + $0x160] sm:$0xff]  ;;  %v6807_v28 = vld [vmem:[#allocation2 + $0x88] sm:$0xff] }
 0x13c   : > { %11840 = vst [vmem:[#allocation95_spill] sm:$0xff] %v6730_v21  ;;  %11842 = vst [vmem:[#allocation98_spill] sm:$0xff] %v6733_v46  ;;  %v6765_v34 = vld [vmem:[#allocation2 + $0x180] sm:$0xff]  ;;  %v6810_v45 = vld [vmem:[#allocation2 + $0xa8] sm:$0xff] }
 0x13d   : > { %11844 = vst [vmem:[#allocation101_spill] sm:$0xff] %v6736_v58  ;;  %11846 = vst [vmem:[#allocation104_spill] sm:$0xff] %v6739_v57  ;;  %v6768_v13 = vld [vmem:[#allocation2 + $0x1a0] sm:$0xff]  ;;  %v6816_v17 = vld [vmem:[#allocation2 + $0xe8] sm:$0xff] }
 0x13e   : > { %11848 = vst [vmem:[#allocation107_spill] sm:$0xff] %v6742_v54  ;;  %11850 = vst [vmem:[#allocation110_spill] sm:$0xff] %v6745_v63  ;;  %v6771_v18 = vld [vmem:[#allocation2 + $0x1c0] sm:$0xff]  ;;  %v6819_v20 = vld [vmem:[#allocation2 + $0x108] sm:$0xff] }
 0x13f   : > { %11851 = vst [vmem:[#allocation113_spill] sm:$0xff] %v6768_v13  ;;  %11852 = vst [vmem:[#allocation116_spill] sm:$0xff] %v6771_v18  ;;  %v6774_v51 = vld [vmem:[#allocation2 + $0x1e0] sm:$0xff]  ;;  %v6822_v63 = vld [vmem:[#allocation2 + $0x128] sm:$0xff]  ;;  %v11909_v18 = vrot.slane %v6801_v25, 7  ;;  %v11910_v13 = vrot.slane %v6804_v35, 7 }
 0x140   : > { %11853 = vst [vmem:[#allocation61_spill] sm:$0xff] %v6774_v51  ;;  %v6777_v0 = vld [vmem:[#allocation2 + $0x200] sm:$0xff]  ;;  %11860 = vst [vmem:[#allocation41_spill] sm:$0xff] %v6795_v15  ;;  %v6825_v54 = vld [vmem:[#allocation2 + $0x148] sm:$0xff]  ;;  %v11908_v51 = vrot.slane %v6798_v52, 7 }
 0x141   : > { %11854 = vst [vmem:[#allocation36_spill] sm:$0xff] %v6777_v0  ;;  %v6780_v10 = vld [vmem:[#allocation2 + $0x220] sm:$0xff]  ;;  %11861 = vst [vmem:[#allocation74_spill] sm:$0xff] %v6798_v52  ;;  %v6828_v57 = vld [vmem:[#allocation2 + $0x168] sm:$0xff]  ;;  %v11905_v0 = vrot.slane %v6795_v15, 7 }
 0x142   : > { %11855 = vst [vmem:[#allocation37_spill] sm:$0xff] %v6780_v10  ;;  %v6783_v48 = vld [vmem:[#allocation2 + $0x240] sm:$0xff]  ;;  %11862 = vst [vmem:[#allocation77_spill] sm:$0xff] %v6801_v25  ;;  %v6831_v58 = vld [vmem:[#allocation2 + $0x188] sm:$0xff] }
 0x143   : > { %11856 = vst [vmem:[#allocation38_spill] sm:$0xff] %v6783_v48  ;;  %v6786_v22 = vld [vmem:[#allocation2 + $0x260] sm:$0xff]  ;;  %11863 = vst [vmem:[#allocation80_spill] sm:$0xff] %v6804_v35  ;;  %v6834_v46 = vld [vmem:[#allocation2 + $0x1a8] sm:$0xff] }
 0x144   : > { %11857 = vst [vmem:[#allocation39_spill] sm:$0xff] %v6786_v22  ;;  %v6789_v23 = vld [vmem:[#allocation2 + $0x280] sm:$0xff]  ;;  %11864 = vst [vmem:[#allocation52_spill] sm:$0xff] %v6807_v28  ;;  %v6837_v21 = vld [vmem:[#allocation2 + $0x1c8] sm:$0xff] }
 0x145   : > { %11858 = vst [vmem:[#allocation70_spill] sm:$0xff] %v6789_v23  ;;  %v6792_v33 = vld [vmem:[#allocation2 + $0x2a0] sm:$0xff]  ;;  %11865 = vst [vmem:[#allocation75_spill] sm:$0xff] %v6810_v45  ;;  %v6840_v62 = vld [vmem:[#allocation2 + $0x1e8] sm:$0xff] }
 0x146   : > { %11859 = vst [vmem:[#allocation40_spill] sm:$0xff] %v6792_v33  ;;  %11867 = vst [vmem:[#allocation71_spill] sm:$0xff] %v6816_v17  ;;  %v6843_v12 = vld [vmem:[#allocation2 + $0x208] sm:$0xff]  ;;  %v11882_v19 = vld [vmem:[#allocation47_spill] sm:$0xff] }
 0x147   : > { %11868 = vst [vmem:[#allocation48_spill] sm:$0xff] %v6819_v20  ;;  %11869 = vst [vmem:[#allocation58_spill] sm:$0xff] %v6822_v63  ;;  %v6846_v59 = vld [vmem:[#allocation2 + $0x228] sm:$0xff]  ;;  %v1524_v60 = vrot.slane %v11882_v19, 7  ;;  %v11883_v29 = vld [vmem:[#allocation51_spill] sm:$0xff]  ;;  %v11912_v19 = vrot.slane %v6810_v45, 7 }
 0x148   : > { %11870 = vst [vmem:[#allocation105_spill] sm:$0xff] %v6825_v54  ;;  %11871 = vst [vmem:[#allocation62_spill] sm:$0xff] %v6828_v57  ;;  %v6849_v26 = vld [vmem:[#allocation2 + $0x248] sm:$0xff]  ;;  %v1525_v56 = vrot.slane %v11883_v29, 7  ;;  %v11884_v16 = vld [vmem:[#allocation57_spill] sm:$0xff] }
 0x149   : > { %11872 = vst [vmem:[#allocation143_spill] sm:$0xff] %v6831_v58  ;;  %11873 = vst [vmem:[#allocation144_spill] sm:$0xff] %v6834_v46  ;;  %v6852_v41 = vld [vmem:[#allocation2 + $0x268] sm:$0xff]  ;;  %v1526_v39 = vrot.slane %v11884_v16, 7  ;;  %v6864_v7 = vld [vmem:[#allocation2 + $0x70] sm:$0xff] }
 0x14a   : > { %11874 = vst [vmem:[#allocation145_spill] sm:$0xff] %v6837_v21  ;;  %11875 = vst [vmem:[#allocation146_spill] sm:$0xff] %v6840_v62  ;;  %v6855_v37 = vld [vmem:[#allocation2 + $0x288] sm:$0xff]  ;;  %v1527_v3 = vrot.slane %v6864_v7, 7  ;;  %v6867_v31 = vld [vmem:[#allocation2 + $0x90] sm:$0xff] }
 0x14b   : > { %11876 = vst [vmem:[#allocation111_spill] sm:$0xff] %v6843_v12  ;;  %11877 = vst [vmem:[#allocation68_spill] sm:$0xff] %v6846_v59  ;;  %v6858_v14 = vld [vmem:[#allocation2 + $0x2a8] sm:$0xff]  ;;  %v1528_v2 = vrot.slane %v6867_v31, 7  ;;  %v6870_v47 = vld [vmem:[#allocation2 + $0xb0] sm:$0xff] }
 0x14c   : > { %11878 = vst [vmem:[#allocation114_spill] sm:$0xff] %v6849_v26  ;;  %11879 = vst [vmem:[#allocation72_spill] sm:$0xff] %v6852_v41  ;;  %v1529_v32 = vrot.slane %v6870_v47, 7  ;;  %v6873_v11 = vld [vmem:[#allocation2 + $0xd0] sm:$0xff] }
 0x14d   : > { %11880 = vst [vmem:[#allocation121_spill] sm:$0xff] %v6855_v37  ;;  %11881 = vst [vmem:[#allocation60_spill] sm:$0xff] %v6858_v14  ;;  %v1530_v36 = vrot.slane %v6873_v11, 7  ;;  %v6876_v5 = vld [vmem:[#allocation2 + $0xf0] sm:$0xff] }
 0x14e   : > { %11885 = vst [vmem:[#allocation122_spill] sm:$0xff] %v6864_v7  ;;  %11886 = vst [vmem:[#allocation64_spill] sm:$0xff] %v6867_v31  ;;  %v1531_v16 = vrot.slane %v6876_v5, 7  ;;  %v6879_v29 = vld [vmem:[#allocation2 + $0x110] sm:$0xff]  ;;  %v11895_v7 = vld [vmem:[#allocation35_spill] sm:$0xff] }
 0x14f   : > { %11887 = vst [vmem:[#allocation123_spill] sm:$0xff] %v6870_v47  ;;  %11888 = vst [vmem:[#allocation65_spill] sm:$0xff] %v6873_v11  ;;  %v1532_v42 = vrot.slane %v6879_v29, 7  ;;  %v6882_v8 = vld [vmem:[#allocation2 + $0x130] sm:$0xff]  ;;  %vm1546_vm3 = vcmp.lt.s32.totalorder %v11895_v7, 1 }
 0x150   : > { %11889 = vst [vmem:[#allocation124_spill] sm:$0xff] %v6876_v5  ;;  %11890 = vst [vmem:[#allocation127_spill] sm:$0xff] %v6879_v29  ;;  %v1533_v49 = vrot.slane %v6882_v8, 7  ;;  %v6885_v43 = vld [vmem:[#allocation2 + $0x150] sm:$0xff]  ;;  %v1537_v29 = vrot.slane %v6895_v61, 7 }
 0x151   : > { %11891 = vst [vmem:[#allocation66_spill] sm:$0xff] %v6882_v8  ;;  %11892 = vst [vmem:[#allocation125_spill] sm:$0xff] %v6885_v43  ;;  %v1534_v24 = vrot.slane %v6885_v43, 7  ;;  %v6888_v47 = vld [vmem:[#allocation2 + $0x170] sm:$0xff]  ;;  %v1538_v8 = vrot.slane %v6898_v44, 7  ;;  %v1539_v43 = vrot.slane %v6901_v27, 7 }
 0x152   : > { %11893 = vst [vmem:[#allocation126_spill] sm:$0xff] %v6888_v47  ;;  %v1535_v11 = vrot.slane %v6888_v47, 7  ;;  %v6891_v31 = vld [vmem:[#allocation2 + $0x190] sm:$0xff]  ;;  %11899 = vst [vmem:[#allocation130_spill] sm:$0xff] %v6904_v53  ;;  %v1540_v47 = vrot.slane %v6904_v53, 7 }
 0x153   : > { %11894 = vst [vmem:[#allocation119_spill] sm:$0xff] %v6891_v31  ;;  %v1536_v5 = vrot.slane %v6891_v31, 7  ;;  %v6907_v33 = vld [vmem:[#allocation2 + $0x230] sm:$0xff] }
 0x154   : > { %11900 = vst [vmem:[#allocation131_spill] sm:$0xff] %v6907_v33  ;;  %v1541_v31 = vrot.slane %v6907_v33, 7  ;;  %v6910_v23 = vld [vmem:[#allocation2 + $0x250] sm:$0xff]  ;;  %v6926_v33 = vsel %vm1546_vm3, %v11905_v0, %v1524_v60  ;;  %v1550_v60 = vsel %vm1546_vm3, %v11910_v13, %v1527_v3  ;;  %v11911_v0 = vrot.slane %v6807_v28, 7 }
 0x155   : > { %11901 = vst [vmem:[#allocation132_spill] sm:$0xff] %v6910_v23  ;;  %v1542_v61 = vrot.slane %v6910_v23, 7  ;;  %v6913_v22 = vld [vmem:[#allocation2 + $0x270] sm:$0xff]  ;;  %11906 = vst [vmem:[#allocation136_spill] sm:$0xff] %v6926_v33  ;;  %v6929_v23 = vsub.s32 1, %v11895_v7  ;;  %v11915_v3 = vrot.slane %v6819_v20, 7 }
 0x156   : > { %11902 = vst [vmem:[#allocation133_spill] sm:$0xff] %v6913_v22  ;;  %v1543_v44 = vrot.slane %v6913_v22, 7  ;;  %v6916_v48 = vld [vmem:[#allocation2 + $0x290] sm:$0xff]  ;;  %v1551_v22 = vsel %vm1546_vm3, %v11911_v0, %v1528_v2  ;;  %v11916_v0 = vrot.slane %v6822_v63, 7 }
 0x157   : > { %11903 = vst [vmem:[#allocation134_spill] sm:$0xff] %v6916_v48  ;;  %v1544_v27 = vrot.slane %v6916_v48, 7  ;;  %v6919_v10 = vld [vmem:[#allocation2 + $0x2b0] sm:$0xff]  ;;  %11907 = vst [vmem:[#allocation137_spill] sm:$0xff] %v6929_v23  ;;  %v1548_v48 = vsel %vm1546_vm3, %v11908_v51, %v1525_v56  ;;  %v1552_v51 = vsel %vm1546_vm3, %v11912_v19, %v1529_v32  ;;  %v11913_v56 = vrot.slane %v6813_v6, 7  ;;  %v11931_v23 = vld [vmem:[#allocation96_spill] sm:$0xff] }
 0x158   : > { %11904 = vst [vmem:[#allocation135_spill] sm:$0xff] %v6919_v10  ;;  %v1545_v53 = vrot.slane %v6919_v10, 7  ;;  %v1549_v10 = vsel %vm1546_vm3, %v11909_v18, %v1526_v39  ;;  %v11914_v18 = vrot.slane %v6816_v17, 7  ;;  %v1555_v2 = vsel %vm1546_vm3, %v11915_v3, %v1532_v42 }
 0x159   : > { %v1553_v39 = vsel %vm1546_vm3, %v11913_v56, %v1530_v36  ;;  %v1556_v19 = vsel %vm1546_vm3, %v11916_v0, %v1533_v49  ;;  %v11917_v32 = vrot.slane %v6825_v54, 7  ;;  %v11918_v56 = vrot.slane %v6828_v57, 7 }
 0x15a   : > { %v1554_v13 = vsel %vm1546_vm3, %v11914_v18, %v1531_v16  ;;  %v11919_v18 = vrot.slane %v6831_v58, 7  ;;  %v11920_v3 = vrot.slane %v6834_v46, 7  ;;  %v11921_v0 = vrot.slane %v6837_v21, 7 }
 0x15b   : > { %v1557_v36 = vsel %vm1546_vm3, %v11917_v32, %v1534_v24  ;;  %v1558_v16 = vsel %vm1546_vm3, %v11918_v56, %v1535_v11  ;;  %v11922_v32 = vrot.slane %v6840_v62, 7  ;;  %v11923_v56 = vrot.slane %v6843_v12, 7 }
 0x15c   : > { %v1559_v42 = vsel %vm1546_vm3, %v11919_v18, %v1536_v5  ;;  %v1560_v49 = vsel %vm1546_vm3, %v11920_v3, %v1537_v29  ;;  %v1561_v24 = vsel %vm1546_vm3, %v11921_v0, %v1538_v8  ;;  %v11924_v18 = vrot.slane %v6846_v59, 7 }
 0x15d   : > { %v1562_v11 = vsel %vm1546_vm3, %v11922_v32, %v1539_v43  ;;  %v1563_v5 = vsel %vm1546_vm3, %v11923_v56, %v1540_v47  ;;  %v11925_v3 = vrot.slane %v6849_v26, 7  ;;  %v11926_v0 = vrot.slane %v6852_v41, 7 }
 0x15e   : > { %v1564_v29 = vsel %vm1546_vm3, %v11924_v18, %v1541_v31  ;;  %v11927_v32 = vrot.slane %v6855_v37, 7  ;;  %v11928_v56 = vrot.slane %v6858_v14, 7  ;;  %v11930_v18 = vrot.slane %v6795_v15, 7  ;;  %v11937_v14 = vld [vmem:[#allocation102_spill] sm:$0xff] }
 0x15f   : > { %v1565_v8 = vsel %vm1546_vm3, %v11925_v3, %v1542_v61  ;;  %v1566_v43 = vsel %vm1546_vm3, %v11926_v0, %v1543_v44  ;;  %v11932_v61 = vrot.slane %v11931_v23, 7  ;;  %v11933_v44 = vrot.slane %v6798_v52, 7  ;;  %v11934_v0 = vld [vmem:[#allocation99_spill] sm:$0xff]  ;;  %v11940_v23 = vld [vmem:[#allocation108_spill] sm:$0xff] }
 0x160   : > { %v1567_v47 = vsel %vm1546_vm3, %v11927_v32, %v1544_v27  ;;  %v7017_v31 = vsel %vm1546_vm3, %v11928_v56, %v1545_v53  ;;  %v11935_v33 = vrot.slane %v11934_v0, 7  ;;  %v11936_v32 = vrot.slane %v6801_v25, 7 }
 0x161   : > { %11929 = vst [vmem:[#allocation138_spill] sm:$0xff] %v7017_v31  ;;  %v1569_v3 = vsel %vm1546_vm3, %v11932_v61, %v11930_v18  ;;  %v11938_v37 = vrot.slane %v11937_v14, 7  ;;  %v11939_v56 = vrot.slane %v6804_v35, 7  ;;  %v11941_v15 = vrot.slane %v11940_v23, 7 }
 0x162   : > { %v1570_v27 = vsel %vm1546_vm3, %v11935_v33, %v11933_v44  ;;  %v11942_v61 = vrot.slane %v6807_v28, 7  ;;  %v11943_v0 = vrot.slane %v6657_v50, 7  ;;  %v11944_v44 = vrot.slane %v6810_v45, 7 }
 0x163   : > { %v1571_v53 = vsel %vm1546_vm3, %v11938_v37, %v11936_v32  ;;  %v1572_v18 = vsel %vm1546_vm3, %v11941_v15, %v11939_v56  ;;  %v11945_v14 = vrot.slane %v6660_v30, 7  ;;  %v11946_v32 = vrot.slane %v6813_v6, 7 }
 0x164   : > { %v1573_v33 = vsel %vm1546_vm3, %v11943_v0, %v11942_v61  ;;  %v11947_v23 = vrot.slane %v6747_v55, 7  ;;  %v11948_v56 = vrot.slane %v6816_v17, 7  ;;  %v11949_v50 = vrot.slane %v6750_v1, 7 }
 0x165   : > { %v1574_v37 = vsel %vm1546_vm3, %v11945_v14, %v11944_v44  ;;  %v11950_v0 = vrot.slane %v6819_v20, 7  ;;  %v11951_v30 = vrot.slane %v6753_v38, 7  ;;  %v11952_v14 = vrot.slane %v6822_v63, 7 }
 0x166   : > { %v1575_v15 = vsel %vm1546_vm3, %v11947_v23, %v11946_v32  ;;  %v1576_v61 = vsel %vm1546_vm3, %v11949_v50, %v11948_v56  ;;  %v11953_v55 = vrot.slane %v6756_v9, 7  ;;  %v11954_v23 = vrot.slane %v6825_v54, 7 }
 0x167   : > { %v1577_v44 = vsel %vm1546_vm3, %v11951_v30, %v11950_v0  ;;  %v11955_v1 = vrot.slane %v6759_v40, 7  ;;  %v11956_v50 = vrot.slane %v6828_v57, 7  ;;  %v11957_v38 = vrot.slane %v6762_v4, 7  ;;  %v11961_v40 = vld [vmem:[#allocation113_spill] sm:$0xff]  ;;  %v11964_v4 = vld [vmem:[#allocation116_spill] sm:$0xff] }
 0x168   : > { %v1578_v32 = vsel %vm1546_vm3, %v11953_v55, %v11952_v14  ;;  %v11958_v30 = vrot.slane %v6831_v58, 7  ;;  %v11959_v9 = vrot.slane %v6765_v34, 7  ;;  %v11960_v55 = vrot.slane %v6834_v46, 7  ;;  %v11967_v34 = vld [vmem:[#allocation61_spill] sm:$0xff] }
 0x169   : > { %v1579_v56 = vsel %vm1546_vm3, %v11955_v1, %v11954_v23  ;;  %v1580_v0 = vsel %vm1546_vm3, %v11957_v38, %v11956_v50  ;;  %v11962_v54 = vrot.slane %v11961_v40, 7  ;;  %v11963_v1 = vrot.slane %v6837_v21, 7  ;;  %v11970_v40 = vld [vmem:[#allocation36_spill] sm:$0xff] }
 0x16a   : > { %v1581_v14 = vsel %vm1546_vm3, %v11959_v9, %v11958_v30  ;;  %v11965_v57 = vrot.slane %v11964_v4, 7  ;;  %v11966_v38 = vrot.slane %v6840_v62, 7  ;;  %v11968_v58 = vrot.slane %v11967_v34, 7  ;;  %v11973_v4 = vld [vmem:[#allocation37_spill] sm:$0xff]  ;;  %v11976_v34 = vld [vmem:[#allocation38_spill] sm:$0xff] }
 0x16b   : > { %v1582_v23 = vsel %vm1546_vm3, %v11962_v54, %v11960_v55  ;;  %v11969_v9 = vrot.slane %v6843_v12, 7  ;;  %v11971_v46 = vrot.slane %v11970_v40, 7  ;;  %v11972_v55 = vrot.slane %v6846_v59, 7  ;;  %v11979_v40 = vld [vmem:[#allocation39_spill] sm:$0xff] }
 0x16c   : > { %v1583_v50 = vsel %vm1546_vm3, %v11965_v57, %v11963_v1  ;;  %v1584_v30 = vsel %vm1546_vm3, %v11968_v58, %v11966_v38  ;;  %v11974_v21 = vrot.slane %v11973_v4, 7  ;;  %v11975_v1 = vrot.slane %v6849_v26, 7  ;;  %v11983_v4 = vld [vmem:[#allocation70_spill] sm:$0xff] }
 0x16d   : > { %v1585_v54 = vsel %vm1546_vm3, %v11971_v46, %v11969_v9  ;;  %v11977_v62 = vrot.slane %v11976_v34, 7  ;;  %v11978_v38 = vrot.slane %v6852_v41, 7  ;;  %v11980_v12 = vrot.slane %v11979_v40, 7  ;;  %v11981_v9 = vld [vmem:[#allocation121_spill] sm:$0xff]  ;;  %v11987_v34 = vld [vmem:[#allocation40_spill] sm:$0xff] }
 0x16e   : > { %v1586_v57 = vsel %vm1546_vm3, %v11974_v21, %v11972_v55  ;;  %v11982_v59 = vrot.slane %v11981_v9, 7  ;;  %v11984_v63 = vrot.slane %v11983_v4, 7  ;;  %v11985_v55 = vld [vmem:[#allocation60_spill] sm:$0xff]  ;;  %v11988_v20 = vrot.slane %v11987_v34, 7 }
 0x16f   : > { %v1587_v58 = vsel %vm1546_vm3, %v11977_v62, %v11975_v1  ;;  %v1588_v46 = vsel %vm1546_vm3, %v11980_v12, %v11978_v38  ;;  %v11986_v26 = vrot.slane %v11985_v55, 7  ;;  %v11990_v1 = vld [vmem:[#allocation136_spill] sm:$0xff]  ;;  %v1592_v41 = vpack.c.bf16 %v1548_v48, %v1570_v27  ;;  %v11992_v48 = vld [vmem:[#allocation42_spill] sm:$0xff] }
 0x170   : > { %v1589_v21 = vsel %vm1546_vm3, %v11984_v63, %v11982_v59  ;;  %v1591_v40 = vpack.c.bf16 %v11990_v1, %v1569_v3  ;;  %v7154_v17 = vpack.c.bf16 %v1549_v10, %v1571_v53  ;;  %v7156_v12 = vpack.c.bf16 %v1550_v60, %v1572_v18  ;;  %v11991_v10 = vld [vmem:[#allocation137_spill] sm:$0xff]  ;;  %v12007_v53 = vld [vmem:[#allocation54_spill] sm:$0xff] }
 0x171   : > { %v7151_v62 = vsel %vm1546_vm3, %v11988_v20, %v11986_v26  ;;  %v7158_v38 = vpack.c.bf16 %v1551_v22, %v1573_v33  ;;  %v7160_v4 = vpack.c.bf16 %v1552_v51, %v1574_v37  ;;  %v7162_v59 = vpack.c.bf16 %v1553_v39, %v1575_v15 }
 0x172   : > { %11989 = vst [vmem:[#allocation139_spill] sm:$0xff] %v7151_v62  ;;  %v7164_v63 = vpack.c.bf16 %v1554_v13, %v1576_v61  ;;  %v7166_v34 = vpack.c.bf16 %v1555_v2, %v1577_v44  ;;  %v7168_v7 = vpack.c.bf16 %v1556_v19, %v1578_v32  ;;  %v7170_v26 = vpack.c.bf16 %v1557_v36, %v1579_v56 }
 0x173   : > { %v7172_v20 = vpack.c.bf16 %v1558_v16, %v1580_v0  ;;  %v7176_v60 = vrot.slane %v11992_v48, %v11991_v10  ;;  %v7178_v22 = vpack.c.bf16 %v1559_v42, %v1581_v14  ;;  %v7180_v51 = vpack.c.bf16 %v1560_v49, %v1582_v23  ;;  %v12002_v49 = vld [vmem:[#allocation46_spill] sm:$0xff] }
 0x174   : > { %v7182_v39 = vpack.c.bf16 %v1561_v24, %v1583_v50  ;;  %v7184_v13 = vpack.c.bf16 %v1562_v11, %v1584_v30  ;;  %v7186_v2 = vpack.c.bf16 %v1563_v5, %v1585_v54  ;;  %v7188_v19 = vpack.c.bf16 %v1564_v29, %v1586_v57  ;;  %v12003_v24 = vld [vmem:[#allocation49_spill] sm:$0xff]  ;;  %v12004_v29 = vld [vmem:[#allocation50_spill] sm:$0xff] }
 0x175   : > { %11993 = vst [vmem:[#allocation140_spill] sm:$0xff] %v7178_v22  ;;  %11994 = vst [vmem:[#allocation141_spill] sm:$0xff] %v7180_v51  ;;  %v7190_v36 = vpack.c.bf16 %v1565_v8, %v1587_v58  ;;  %v7192_v16 = vpack.c.bf16 %v1566_v43, %v1588_v46  ;;  %v7194_v3 = vpack.c.bf16 %v1567_v47, %v1589_v21  ;;  %v12005_v43 = vld [vmem:[#allocation53_spill] sm:$0xff] }
 0x176   : > { %11995 = vst [vmem:[#allocation142_spill] sm:$0xff] %v7182_v39  ;;  %11996 = vst [vmem:[#allocation51_spill] sm:$0xff] %v7184_v13  ;;  %v1636_v27 = vrot.slane %v12002_v49, %v11991_v10  ;;  %v7202_v11 = vrot.slane %v12003_v24, %v11991_v10  ;;  %v1617_v5 = vmul.bf16 %v7176_v60, %v1591_v40 }
 0x177   : > { %11997 = vst [vmem:[#allocation57_spill] sm:$0xff] %v7186_v2  ;;  %11998 = vst [vmem:[#allocation96_spill] sm:$0xff] %v7188_v19  ;;  %v7207_v8 = vrot.slane %v12004_v29, %v11991_v10  ;;  %v7211_v47 = vrot.slane %v12005_v43, %v11991_v10  ;;  %v7215_v18 = vrot.slane %v12007_v53, %v11991_v10 }
 0x178   : > { %11999 = vst [vmem:[#allocation99_spill] sm:$0xff] %v7190_v36  ;;  %12000 = vst [vmem:[#allocation102_spill] sm:$0xff] %v7192_v16  ;;  %v1618_v33 = vmul.bf16 %v7176_v60, %v1592_v41  ;;  %v1619_v37 = vmul.bf16 %v7176_v60, %v7154_v17  ;;  %v1620_v15 = vmul.bf16 %v7176_v60, %v7156_v12 }
 0x179   : > { %12001 = vst [vmem:[#allocation108_spill] sm:$0xff] %v7194_v3  ;;  %12006 = vst [vmem:[#allocation113_spill] sm:$0xff] %v7211_v47  ;;  %v1621_v61 = vmul.bf16 %v7176_v60, %v7158_v38  ;;  %v1622_v44 = vmul.bf16 %v7176_v60, %v7160_v4  ;;  %v1623_v32 = vmul.bf16 %v7176_v60, %v7162_v59 }
 0x17a   : > { %12008 = vst [vmem:[#allocation116_spill] sm:$0xff] %v7215_v18  ;;  %v1624_v56 = vmul.bf16 %v7176_v60, %v7164_v63  ;;  %v1625_v0 = vmul.bf16 %v7176_v60, %v7166_v34  ;;  %v1626_v14 = vmul.bf16 %v7176_v60, %v7168_v7  ;;  %v1627_v23 = vmul.bf16 %v7176_v60, %v7170_v26 }
 0x17b   : > { %v1628_v50 = vmul.bf16 %v7176_v60, %v7172_v20  ;;  %v1629_v30 = vmul.bf16 %v7176_v60, %v7178_v22  ;;  %v1630_v54 = vmul.bf16 %v7176_v60, %v7180_v51  ;;  %v1631_v57 = vmul.bf16 %v7176_v60, %v7182_v39 }
 0x17c   : > { %v1632_v58 = vmul.bf16 %v7176_v60, %v7184_v13  ;;  %v1637_v46 = vmul.bf16 %v1636_v27, %v1592_v41  ;;  %v1638_v21 = vmul.bf16 %v1636_v27, %v7154_v17  ;;  %v1639_v1 = vmul.bf16 %v1636_v27, %v7156_v12 }
 0x17d   : > { %v1640_v40 = vmul.bf16 %v1636_v27, %v7158_v38  ;;  %v1641_v42 = vmul.bf16 %v1636_v27, %v7160_v4  ;;  %v1642_v53 = vmul.bf16 %v1636_v27, %v7162_v59  ;;  %v1643_v43 = vmul.bf16 %v1636_v27, %v7164_v63 }
 0x17e   : > { %v1651_v29 = vmul.bf16 %v1636_v27, %v7184_v13  ;;  %v1652_v24 = vmul.bf16 %v1636_v27, %v7186_v2  ;;  %v1644_v49 = vmul.bf16 %v1636_v27, %v7166_v34  ;;  %v1645_v41 = vmul.bf16 %v1636_v27, %v7168_v7 }
 0x17f   : > { %v1646_v60 = vmul.bf16 %v1636_v27, %v7170_v26  ;;  %v1647_v48 = vmul.bf16 %v1636_v27, %v7172_v20  ;;  %v1648_v55 = vmul.bf16 %v1636_v27, %v7178_v22  ;;  %v1649_v9 = vmul.bf16 %v1636_v27, %v7180_v51 }
 0x180   : > { %v1650_v6 = vmul.bf16 %v1636_v27, %v7182_v39  ;;  %v1653_v45 = vadd.bf16 %v1637_v46, %v1617_v5  ;;  %v1654_v28 = vadd.bf16 %v1638_v21, %v1618_v33  ;;  %v1655_v35 = vadd.bf16 %v1639_v1, %v1619_v37 }
 0x181   : > { %v1656_v25 = vadd.bf16 %v1640_v40, %v1620_v15  ;;  %v1657_v52 = vadd.bf16 %v1641_v42, %v1621_v61  ;;  %v1667_v62 = vadd.bf16 %v1651_v29, %v1631_v57  ;;  %v1668_v31 = vadd.bf16 %v1652_v24, %v1632_v58 }
 0x182   : > { %v1687_v10 = vmul.bf16 %v7202_v11, %v7186_v2  ;;  %v1688_v3 = vmul.bf16 %v7202_v11, %v7188_v19  ;;  %v1658_v18 = vadd.bf16 %v1642_v53, %v1622_v44  ;;  %v1659_v16 = vadd.bf16 %v1643_v43, %v1623_v32  ;;  %v12010_v53 = vld [vmem:[#allocation141_spill] sm:$0xff]  ;;  %v12011_v32 = vld [vmem:[#allocation51_spill] sm:$0xff] }
 0x183   : > { %v1660_v47 = vadd.bf16 %v1644_v49, %v1624_v56  ;;  %v1661_v13 = vadd.bf16 %v1645_v41, %v1625_v0  ;;  %v1662_v51 = vadd.bf16 %v1646_v60, %v1626_v14  ;;  %v1663_v22 = vadd.bf16 %v1647_v48, %v1627_v23 }
 0x184   : > { %v1664_v27 = vadd.bf16 %v1648_v55, %v1628_v50  ;;  %v1665_v5 = vadd.bf16 %v1649_v9, %v1629_v30  ;;  %v1666_v33 = vadd.bf16 %v1650_v6, %v1630_v54  ;;  %v1673_v42 = vmul.bf16 %v7202_v11, %v7154_v17  ;;  %v12012_v50 = vld [vmem:[#allocation113_spill] sm:$0xff]  ;;  %v12013_v54 = vld [vmem:[#allocation102_spill] sm:$0xff] }
 0x185   : > { %v1674_v24 = vmul.bf16 %v7202_v11, %v7156_v12  ;;  %v1675_v29 = vmul.bf16 %v7202_v11, %v7158_v38  ;;  %v1703_v37 = vadd.bf16 %v1687_v10, %v1667_v62  ;;  %v1704_v15 = vadd.bf16 %v1688_v3, %v1668_v31  ;;  %v12009_v3 = vld [vmem:[#allocation140_spill] sm:$0xff] }
 0x186   : > { %v1723_v49 = vmul.bf16 %v7207_v8, %v7188_v19  ;;  %v1724_v48 = vmul.bf16 %v7207_v8, %v7190_v36  ;;  %v1676_v6 = vmul.bf16 %v7202_v11, %v7160_v4  ;;  %v1677_v17 = vmul.bf16 %v7202_v11, %v7162_v59 }
 0x187   : > { %v1678_v9 = vmul.bf16 %v7202_v11, %v7164_v63  ;;  %v1679_v55 = vmul.bf16 %v7202_v11, %v7166_v34  ;;  %v1680_v31 = vmul.bf16 %v7202_v11, %v7168_v7  ;;  %v1681_v62 = vmul.bf16 %v7202_v11, %v7170_v26 }
 0x188   : > { %v1682_v10 = vmul.bf16 %v7202_v11, %v7172_v20  ;;  %v1683_v43 = vmul.bf16 %v7202_v11, %v12009_v3  ;;  %v1684_v61 = vmul.bf16 %v7202_v11, %v12010_v53  ;;  %v1685_v44 = vmul.bf16 %v7202_v11, %v7182_v39 }
 0x189   : > { %v1686_v56 = vmul.bf16 %v7202_v11, %v12011_v32  ;;  %v1689_v0 = vadd.bf16 %v1673_v42, %v1653_v45  ;;  %v1739_v14 = vadd.bf16 %v1723_v49, %v1703_v37  ;;  %v1740_v23 = vadd.bf16 %v1724_v48, %v1704_v15  ;;  %v12014_v15 = vld [vmem:[#allocation116_spill] sm:$0xff] }
 0x18a   : > { %v1759_v30 = vmul.bf16 %v12012_v50, %v7190_v36  ;;  %v1760_v57 = vmul.bf16 %v12012_v50, %v12013_v54  ;;  %v1690_v58 = vadd.bf16 %v1674_v24, %v1654_v28  ;;  %v1691_v46 = vadd.bf16 %v1675_v29, %v1655_v35  ;;  %v12015_v48 = vld [vmem:[#allocation108_spill] sm:$0xff] }
 0x18b   : > { %v1692_v21 = vadd.bf16 %v1676_v6, %v1656_v25  ;;  %v1693_v1 = vadd.bf16 %v1677_v17, %v1657_v52  ;;  %v1694_v40 = vadd.bf16 %v1678_v9, %v1658_v18  ;;  %v1695_v41 = vadd.bf16 %v1679_v55, %v1659_v16  ;;  %v12016_v16 = vld [vmem:[#allocation137_spill] sm:$0xff]  ;;  %v12019_v17 = vld [vmem:[#allocation138_spill] sm:$0xff]  ;;  %v12020_v9 = vld [vmem:[#allocation139_spill] sm:$0xff] }
 0x18c   : > { %v1696_v60 = vadd.bf16 %v1680_v31, %v1660_v47  ;;  %v1697_v19 = vadd.bf16 %v1681_v62, %v1661_v13  ;;  %v1698_v2 = vadd.bf16 %v1682_v10, %v1662_v51  ;;  %v1699_v39 = vadd.bf16 %v1683_v43, %v1663_v22  ;;  %v12017_v47 = vld [vmem:[#allocation55_spill] sm:$0xff]  ;;  %v12022_v10 = vld [vmem:[#allocation142_spill] sm:$0xff] }
 0x18d   : > { %v1700_v11 = vadd.bf16 %v1684_v61, %v1664_v27  ;;  %v1701_v45 = vadd.bf16 %v1685_v44, %v1665_v5  ;;  %v1775_v42 = vadd.bf16 %v1759_v30, %v1739_v14  ;;  %v1776_v37 = vadd.bf16 %v1760_v57, %v1740_v23  ;;  %v12023_v44 = vld [vmem:[#allocation57_spill] sm:$0xff] }
 0x18e   : > { %v1795_v49 = vmul.bf16 %v12014_v15, %v12013_v54  ;;  %v1796_v36 = vmul.bf16 %v12014_v15, %v12015_v48  ;;  %v1702_v28 = vadd.bf16 %v1686_v56, %v1666_v33  ;;  %v1709_v35 = vmul.bf16 %v7207_v8, %v7156_v12 }
 0x18f   : > { %v1710_v25 = vmul.bf16 %v7207_v8, %v7158_v38  ;;  %v1711_v52 = vmul.bf16 %v7207_v8, %v7160_v4  ;;  %v1712_v22 = vmul.bf16 %v7207_v8, %v7162_v59  ;;  %v1713_v51 = vmul.bf16 %v7207_v8, %v7164_v63 }
 0x190   : > { %v1714_v13 = vmul.bf16 %v7207_v8, %v7166_v34  ;;  %v7319_v18 = vrot.slane %v12017_v47, %v12016_v16  ;;  %v1715_v12 = vmul.bf16 %v7207_v8, %v7168_v7  ;;  %v1716_v27 = vmul.bf16 %v7207_v8, %v7170_v26 }
 0x191   : > { %v1717_v5 = vmul.bf16 %v7207_v8, %v7172_v20  ;;  %v1718_v33 = vmul.bf16 %v7207_v8, %v12009_v3  ;;  %v1811_v24 = vadd.bf16 %v1795_v49, %v1775_v42  ;;  %v1812_v29 = vadd.bf16 %v1796_v36, %v1776_v37 }
 0x192   : > { %12018 = vst [vmem:[#allocation61_spill] sm:$0xff] %v7319_v18  ;;  %v1831_v6 = vmul.bf16 %v7319_v18, %v12015_v48  ;;  %v12021_v55 = vpack.c.bf16 %v12019_v17, %v12020_v9  ;;  %v1719_v62 = vmul.bf16 %v7207_v8, %v12010_v53  ;;  %v1720_v43 = vmul.bf16 %v7207_v8, %v12022_v10 }
 0x193   : > { %v1721_v61 = vmul.bf16 %v7207_v8, %v12011_v32  ;;  %v1722_v36 = vmul.bf16 %v7207_v8, %v12023_v44  ;;  %v1725_v56 = vadd.bf16 %v1709_v35, %v1689_v0  ;;  %v1726_v14 = vadd.bf16 %v1710_v25, %v1690_v58  ;;  %v12024_v35 = vld [vmem:[#allocation96_spill] sm:$0xff] }
 0x194   : > { %v1832_v31 = vmul.bf16 %v7319_v18, %v12021_v55  ;;  %v1727_v23 = vadd.bf16 %v1711_v52, %v1691_v46  ;;  %v1728_v30 = vadd.bf16 %v1712_v22, %v1692_v21  ;;  %v1729_v57 = vadd.bf16 %v1713_v51, %v1693_v1 }
 0x195   : > { %v1730_v42 = vadd.bf16 %v1714_v13, %v1694_v40  ;;  %v1731_v37 = vadd.bf16 %v1715_v12, %v1695_v41  ;;  %v1732_v49 = vadd.bf16 %v1716_v27, %v1696_v60  ;;  %v1733_v48 = vadd.bf16 %v1717_v5, %v1697_v19  ;;  %v12025_v5 = vld [vmem:[#allocation117_spill] sm:$0xff] }
 0x196   : > { %v1734_v17 = vadd.bf16 %v1718_v33, %v1698_v2  ;;  %v1847_v9 = vadd.bf16 %v1831_v6, %v1811_v24  ;;  %v1848_v55 = vadd.bf16 %v1832_v31, %v1812_v29  ;;  %v1735_v47 = vadd.bf16 %v1719_v62, %v1699_v39  ;;  %v12027_v24 = vld [vmem:[#allocation59_spill] sm:$0xff]  ;;  %v12031_v62 = vld [vmem:[#allocation69_spill] sm:$0xff] }
 0x197   : > { %v1736_v16 = vadd.bf16 %v1720_v43, %v1700_v11  ;;  %v1737_v54 = vadd.bf16 %v1721_v61, %v1701_v45  ;;  %v1738_v18 = vadd.bf16 %v1722_v36, %v1702_v28  ;;  %v1745_v15 = vmul.bf16 %v12012_v50, %v7158_v38  ;;  %v12029_v6 = vld [vmem:[#allocation63_spill] sm:$0xff] }
 0x198   : > { %v1746_v8 = vmul.bf16 %v12012_v50, %v7160_v4  ;;  %v1747_v0 = vmul.bf16 %v12012_v50, %v7162_v59  ;;  %v1748_v58 = vmul.bf16 %v12012_v50, %v7164_v63  ;;  %v1749_v2 = vmul.bf16 %v12012_v50, %v7166_v34 }
 0x199   : > { %v1750_v39 = vmul.bf16 %v12012_v50, %v7168_v7  ;;  %v1751_v19 = vmul.bf16 %v12012_v50, %v7170_v26  ;;  %v1752_v38 = vmul.bf16 %v12012_v50, %v7172_v20  ;;  %v1877_v46 = vunpack.c.l.bf16 %v1847_v9 }
 0x19a   : > { %v1878_v21 = vunpack.c.h.bf16 %v1847_v9  ;;  %v1879_v1 = vunpack.c.l.bf16 %v1848_v55  ;;  %v1880_v40 = vunpack.c.h.bf16 %v1848_v55  ;;  %v1753_v41 = vmul.bf16 %v12012_v50, %v12009_v3 }
 0x19b   : > { %v1754_v60 = vmul.bf16 %v12012_v50, %v12010_v53  ;;  %v1755_v11 = vmul.bf16 %v12012_v50, %v12022_v10  ;;  %v1756_v45 = vmul.bf16 %v12012_v50, %v12011_v32  ;;  %v1757_v28 = vmul.bf16 %v12012_v50, %v12023_v44 }
 0x19c   : > { %v1758_v25 = vmul.bf16 %v12012_v50, %v12024_v35  ;;  %v1761_v52 = vadd.bf16 %v1745_v15, %v1725_v56  ;;  %v1762_v22 = vadd.bf16 %v1746_v8, %v1726_v14  ;;  %v1763_v51 = vadd.bf16 %v1747_v0, %v1727_v23 }
 0x19d   : > { %v1764_v13 = vadd.bf16 %v1748_v58, %v1728_v30  ;;  %v1765_v12 = vadd.bf16 %v1749_v2, %v1729_v57  ;;  %v1766_v27 = vadd.bf16 %v1750_v39, %v1730_v42  ;;  %v7372_v33 = vadd.f32 %v1877_v46, %v12025_v5  ;;  %v12033_v30 = vld [vmem:[#allocation116_spill] sm:$0xff]  ;;  %v12034_v58 = vld [vmem:[#allocation99_spill] sm:$0xff] }
 0x19e   : > { %v7375_v29 = vadd.f32 %v1878_v21, %v12027_v24  ;;  %v7378_v31 = vadd.f32 %v1879_v1, %v12029_v6  ;;  %v7381_v43 = vadd.f32 %v1880_v40, %v12031_v62  ;;  %v1767_v61 = vadd.bf16 %v1751_v19, %v1731_v37  ;;  %v7411_v19 = vld [vmem:[#allocation2 + $0x30] sm:$0xff] }
 0x19f   : > { %12026 = vst [vmem:[#allocation36_spill] sm:$0xff] %v7372_v33  ;;  %v1768_v50 = vadd.bf16 %v1752_v38, %v1732_v49  ;;  %v1769_v15 = vadd.bf16 %v1753_v41, %v1733_v48  ;;  %v1770_v36 = vadd.bf16 %v1754_v60, %v1734_v17  ;;  %v1771_v56 = vadd.bf16 %v1755_v11, %v1735_v47  ;;  %v12036_v38 = vld [vmem:[#allocation74_spill] sm:$0xff]  ;;  %v12038_v62 = vld [vmem:[#allocation77_spill] sm:$0xff] }
 0x1a0   : > { %12028 = vst [vmem:[#allocation37_spill] sm:$0xff] %v7375_v29  ;;  %12030 = vst [vmem:[#allocation38_spill] sm:$0xff] %v7378_v31  ;;  %v1772_v14 = vadd.bf16 %v1756_v45, %v1736_v16  ;;  %v1773_v23 = vadd.bf16 %v1757_v28, %v1737_v54  ;;  %v1781_v57 = vmul.bf16 %v12033_v30, %v7160_v4  ;;  %v12155_v33 = vld [vmem:[#allocation41_spill] sm:$0xff] }
 0x1a1   : > { %12032 = vst [vmem:[#allocation39_spill] sm:$0xff] %v7381_v43  ;;  %v1782_v42 = vmul.bf16 %v12033_v30, %v7162_v59  ;;  %v1783_v9 = vmul.bf16 %v12033_v30, %v7164_v63  ;;  %v1784_v55 = vmul.bf16 %v12033_v30, %v7166_v34  ;;  %v1785_v37 = vmul.bf16 %v12033_v30, %v7168_v7 }
 0x1a2   : > { %v1786_v47 = vmul.bf16 %v12033_v30, %v7170_v26  ;;  %v1787_v54 = vmul.bf16 %v12033_v30, %v7172_v20  ;;  %v1788_v4 = vmul.bf16 %v12033_v30, %v12009_v3  ;;  %v1789_v16 = vmul.bf16 %v12033_v30, %v12010_v53  ;;  %12035 = vst [vmem:[#allocation70_spill] sm:$0xff] %v7411_v19 }
 0x1a3   : > { %v1790_v49 = vmul.bf16 %v12033_v30, %v12022_v10  ;;  %v1791_v48 = vmul.bf16 %v12033_v30, %v12011_v32  ;;  %v1792_v17 = vmul.bf16 %v12033_v30, %v12023_v44  ;;  %v1793_v8 = vmul.bf16 %v12033_v30, %v12024_v35 }
 0x1a4   : > { %v1774_v0 = vadd.bf16 %v1758_v25, %v1738_v18  ;;  %v1794_v2 = vmul.bf16 %v12033_v30, %v12034_v58  ;;  %v1797_v39 = vadd.bf16 %v1781_v57, %v1761_v52  ;;  %v7415_v46 = vpack.c.bf16 %v7411_v19, %v12036_v38  ;;  %v7417_v52 = vld [vmem:[#allocation2 + $0x50] sm:$0xff]  ;;  %v12039_v57 = vld [vmem:[#allocation80_spill] sm:$0xff] }
 0x1a5   : > { %v1798_v21 = vadd.bf16 %v1782_v42, %v1762_v22  ;;  %v1799_v1 = vadd.bf16 %v1783_v9, %v1763_v51  ;;  %v1800_v40 = vadd.bf16 %v1784_v55, %v1764_v13  ;;  %v1801_v41 = vadd.bf16 %v1785_v37, %v1765_v12  ;;  %12037 = vst [vmem:[#allocation40_spill] sm:$0xff] %v7417_v52  ;;  %v12040_v22 = vld [vmem:[#allocation122_spill] sm:$0xff]  ;;  %v12041_v13 = vld [vmem:[#allocation52_spill] sm:$0xff]  ;;  %v12047_v42 = vld [vmem:[#allocation65_spill] sm:$0xff] }
 0x1a6   : > { %v1802_v60 = vadd.bf16 %v1786_v47, %v1766_v27  ;;  %v1803_v11 = vadd.bf16 %v1787_v54, %v1767_v61  ;;  %v1804_v45 = vadd.bf16 %v1788_v4, %v1768_v50  ;;  %v1805_v28 = vadd.bf16 %v1789_v16, %v1769_v15  ;;  %v12042_v12 = vld [vmem:[#allocation64_spill] sm:$0xff]  ;;  %v12043_v61 = vld [vmem:[#allocation61_spill] sm:$0xff]  ;;  %v12048_v16 = vld [vmem:[#allocation102_spill] sm:$0xff] }
 0x1a7   : > { %v1806_v5 = vadd.bf16 %v1790_v49, %v1770_v36  ;;  %v1807_v18 = vadd.bf16 %v1791_v48, %v1771_v56  ;;  %v1808_v25 = vadd.bf16 %v1792_v17, %v1772_v14  ;;  %v1809_v24 = vadd.bf16 %v1793_v8, %v1773_v23  ;;  %v12044_v36 = vld [vmem:[#allocation75_spill] sm:$0xff]  ;;  %v12050_v17 = vld [vmem:[#allocation124_spill] sm:$0xff] }
 0x1a8   : > { %v1810_v6 = vadd.bf16 %v1794_v2, %v1774_v0  ;;  %v7421_v30 = vpack.c.bf16 %v7417_v52, %v12038_v62  ;;  %v7425_v51 = vpack.c.bf16 %v12040_v22, %v12039_v57  ;;  %v7429_v27 = vpack.c.bf16 %v12042_v12, %v12041_v13  ;;  %v12045_v56 = vld [vmem:[#allocation123_spill] sm:$0xff]  ;;  %v12051_v8 = vld [vmem:[#allocation48_spill] sm:$0xff] }
 0x1a9   : > { %v1817_v50 = vmul.bf16 %v12043_v61, %v7162_v59  ;;  %v1818_v15 = vmul.bf16 %v12043_v61, %v7164_v63  ;;  %v7437_v14 = vpack.c.bf16 %v12045_v56, %v12044_v36  ;;  %v12046_v23 = vld [vmem:[#allocation67_spill] sm:$0xff]  ;;  %v1819_v55 = vmul.bf16 %v12043_v61, %v7166_v34 }
 0x1aa   : > { %v7441_v9 = vpack.c.bf16 %v12047_v42, %v12046_v23  ;;  %v1820_v37 = vmul.bf16 %v12043_v61, %v7168_v7  ;;  %v1821_v59 = vmul.bf16 %v12043_v61, %v7170_v26  ;;  %v1822_v63 = vmul.bf16 %v12043_v61, %v7172_v20  ;;  %v12049_v48 = vld [vmem:[#allocation71_spill] sm:$0xff] }
 0x1ab   : > { %v1823_v47 = vmul.bf16 %v12043_v61, %v12009_v3  ;;  %v1824_v54 = vmul.bf16 %v12043_v61, %v12010_v53  ;;  %v1825_v4 = vmul.bf16 %v12043_v61, %v12022_v10  ;;  %v1826_v34 = vmul.bf16 %v12043_v61, %v12011_v32  ;;  %v12052_v32 = vld [vmem:[#allocation127_spill] sm:$0xff] }
 0x1ac   : > { %v1827_v7 = vmul.bf16 %v12043_v61, %v12023_v44  ;;  %v1828_v26 = vmul.bf16 %v12043_v61, %v12024_v35  ;;  %v1829_v20 = vmul.bf16 %v12043_v61, %v12034_v58  ;;  %v1830_v3 = vmul.bf16 %v12043_v61, %v12048_v16 }
 0x1ad   : > { %v1833_v49 = vadd.bf16 %v1817_v50, %v1797_v39  ;;  %v1834_v53 = vadd.bf16 %v1818_v15, %v1798_v21  ;;  %v7469_v10 = vpack.c.bf16 %v12050_v17, %v12049_v48  ;;  %v7473_v0 = vpack.c.bf16 %v12052_v32, %v12051_v8  ;;  %v12059_v48 = vld [vmem:[#allocation82_spill] sm:$0xff]  ;;  %v12061_v8 = vld [vmem:[#allocation85_spill] sm:$0xff] }
 0x1ae   : > { %v1835_v44 = vadd.bf16 %v1819_v55, %v1799_v1  ;;  %v1836_v2 = vadd.bf16 %v1820_v37, %v1800_v40  ;;  %v1837_v38 = vadd.bf16 %v1821_v59, %v1801_v41  ;;  %v1838_v35 = vadd.bf16 %v1822_v63, %v1802_v60 }
 0x1af   : > { %v1839_v62 = vadd.bf16 %v1823_v47, %v1803_v11  ;;  %v1840_v57 = vadd.bf16 %v1824_v54, %v1804_v45  ;;  %v1841_v58 = vadd.bf16 %v1825_v4, %v1805_v28  ;;  %v1842_v22 = vadd.bf16 %v1826_v34, %v1806_v5 }
 0x1b0   : > { %v1843_v13 = vadd.bf16 %v1827_v7, %v1807_v18  ;;  %v1844_v12 = vadd.bf16 %v1828_v26, %v1808_v25  ;;  %v1845_v39 = vadd.bf16 %v1829_v20, %v1809_v24  ;;  %v1846_v21 = vadd.bf16 %v1830_v3, %v1810_v6  ;;  %v12053_v7 = vld [vmem:[#allocation73_spill] sm:$0xff]  ;;  %v12055_v20 = vld [vmem:[#allocation76_spill] sm:$0xff] }
 0x1b1   : > { %v1849_v61 = vunpack.c.l.bf16 %v1833_v49  ;;  %v1850_v50 = vunpack.c.h.bf16 %v1833_v49  ;;  %v1851_v15 = vunpack.c.l.bf16 %v1834_v53  ;;  %v1852_v36 = vunpack.c.h.bf16 %v1834_v53  ;;  %v12057_v49 = vld [vmem:[#allocation79_spill] sm:$0xff] }
 0x1b2   : > { %v1853_v56 = vunpack.c.l.bf16 %v1835_v44  ;;  %v1854_v23 = vunpack.c.h.bf16 %v1835_v44  ;;  %v1855_v42 = vunpack.c.l.bf16 %v1836_v2  ;;  %v1856_v16 = vunpack.c.h.bf16 %v1836_v2  ;;  %v12063_v44 = vld [vmem:[#allocation88_spill] sm:$0xff] }
 0x1b3   : > { %v1857_v1 = vunpack.c.l.bf16 %v1837_v38  ;;  %v1858_v40 = vunpack.c.h.bf16 %v1837_v38  ;;  %v1859_v41 = vunpack.c.l.bf16 %v1838_v35  ;;  %v1860_v60 = vunpack.c.h.bf16 %v1838_v35  ;;  %v12065_v38 = vld [vmem:[#allocation90_spill] sm:$0xff] }
 0x1b4   : > { %v1861_v11 = vunpack.c.l.bf16 %v1839_v62  ;;  %v1862_v45 = vunpack.c.h.bf16 %v1839_v62  ;;  %v1863_v28 = vunpack.c.l.bf16 %v1840_v57  ;;  %v1864_v5 = vunpack.c.h.bf16 %v1840_v57  ;;  %v12067_v62 = vld [vmem:[#allocation94_spill] sm:$0xff] }
 0x1b5   : > { %v1865_v18 = vunpack.c.l.bf16 %v1841_v58  ;;  %v1866_v25 = vunpack.c.h.bf16 %v1841_v58  ;;  %v1867_v24 = vunpack.c.l.bf16 %v1842_v22  ;;  %v1868_v6 = vunpack.c.h.bf16 %v1842_v22  ;;  %v12069_v58 = vld [vmem:[#allocation97_spill] sm:$0xff] }
 0x1b6   : > { %v1869_v55 = vunpack.c.l.bf16 %v1843_v13  ;;  %v1870_v37 = vunpack.c.h.bf16 %v1843_v13  ;;  %v1871_v59 = vunpack.c.l.bf16 %v1844_v12  ;;  %v1872_v63 = vunpack.c.h.bf16 %v1844_v12  ;;  %v12071_v13 = vld [vmem:[#allocation100_spill] sm:$0xff] }
 0x1b7   : > { %v1873_v47 = vunpack.c.l.bf16 %v1845_v39  ;;  %v1874_v54 = vunpack.c.h.bf16 %v1845_v39  ;;  %v1875_v4 = vunpack.c.l.bf16 %v1846_v21  ;;  %v1876_v34 = vunpack.c.h.bf16 %v1846_v21  ;;  %v12073_v39 = vld [vmem:[#allocation103_spill] sm:$0xff] }
 0x1b8   : > { %v7476_v26 = vadd.f32 %v1849_v61, %v12053_v7  ;;  %v7479_v3 = vadd.f32 %v1850_v50, %v12055_v20  ;;  %v7482_v53 = vadd.f32 %v1851_v15, %v12057_v49  ;;  %v7485_v17 = vadd.f32 %v1852_v36, %v12059_v48  ;;  %v12075_v61 = vld [vmem:[#allocation106_spill] sm:$0xff]  ;;  %v12077_v15 = vld [vmem:[#allocation109_spill] sm:$0xff] }
 0x1b9   : > { %v7488_v32 = vadd.f32 %v1853_v56, %v12061_v8  ;;  %v7491_v2 = vadd.f32 %v1854_v23, %v12063_v44  ;;  %v7494_v35 = vadd.f32 %v1855_v42, %v12065_v38  ;;  %v7497_v57 = vadd.f32 %v1856_v16, %v12067_v62  ;;  %v12079_v56 = vld [vmem:[#allocation112_spill] sm:$0xff]  ;;  %v12081_v42 = vld [vmem:[#allocation115_spill] sm:$0xff] }
 0x1ba   : > { %12054 = vst [vmem:[#allocation136_spill] sm:$0xff] %v7476_v26  ;;  %12056 = vst [vmem:[#allocation140_spill] sm:$0xff] %v7479_v3  ;;  %v7500_v22 = vadd.f32 %v1857_v1, %v12069_v58  ;;  %v7503_v12 = vadd.f32 %v1858_v40, %v12071_v13  ;;  %v7506_v21 = vadd.f32 %v1859_v41, %v12073_v39  ;;  %v12083_v1 = vld [vmem:[#allocation118_spill] sm:$0xff]  ;;  %v12085_v40 = vld [vmem:[#allocation45_spill] sm:$0xff] }
 0x1bb   : > { %12058 = vst [vmem:[#allocation141_spill] sm:$0xff] %v7482_v53  ;;  %12060 = vst [vmem:[#allocation51_spill] sm:$0xff] %v7485_v17  ;;  %v7509_v50 = vadd.f32 %v1860_v60, %v12075_v61  ;;  %v7512_v36 = vadd.f32 %v1861_v11, %v12077_v15  ;;  %v7515_v23 = vadd.f32 %v1862_v45, %v12079_v56  ;;  %v12087_v41 = vld [vmem:[#allocation44_spill] sm:$0xff]  ;;  %v12089_v60 = vld [vmem:[#allocation83_spill] sm:$0xff] }
 0x1bc   : > { %12062 = vst [vmem:[#allocation113_spill] sm:$0xff] %v7488_v32  ;;  %12064 = vst [vmem:[#allocation108_spill] sm:$0xff] %v7491_v2  ;;  %v7518_v16 = vadd.f32 %v1863_v28, %v12081_v42  ;;  %v7521_v7 = vadd.f32 %v1864_v5, %v12083_v1  ;;  %v7524_v20 = vadd.f32 %v1865_v18, %v12085_v40  ;;  %v12091_v11 = vld [vmem:[#allocation86_spill] sm:$0xff]  ;;  %v12093_v45 = vld [vmem:[#allocation91_spill] sm:$0xff] }
 0x1bd   : > { %12066 = vst [vmem:[#allocation138_spill] sm:$0xff] %v7494_v35  ;;  %12068 = vst [vmem:[#allocation139_spill] sm:$0xff] %v7497_v57  ;;  %v7527_v49 = vadd.f32 %v1866_v25, %v12087_v41  ;;  %v7530_v48 = vadd.f32 %v1867_v24, %v12089_v60  ;;  %v7533_v8 = vadd.f32 %v1868_v6, %v12091_v11  ;;  %v12095_v28 = vld [vmem:[#allocation92_spill] sm:$0xff]  ;;  %v12097_v5 = vld [vmem:[#allocation95_spill] sm:$0xff] }
 0x1be   : > { %12070 = vst [vmem:[#allocation142_spill] sm:$0xff] %v7500_v22  ;;  %12072 = vst [vmem:[#allocation57_spill] sm:$0xff] %v7503_v12  ;;  %v7536_v44 = vadd.f32 %v1869_v55, %v12093_v45  ;;  %v7539_v38 = vadd.f32 %v1870_v37, %v12095_v28  ;;  %v7542_v62 = vadd.f32 %v1871_v59, %v12097_v5  ;;  %v12099_v18 = vld [vmem:[#allocation98_spill] sm:$0xff]  ;;  %v12101_v25 = vld [vmem:[#allocation101_spill] sm:$0xff] }
 0x1bf   : > { %12074 = vst [vmem:[#allocation96_spill] sm:$0xff] %v7506_v21  ;;  %12076 = vst [vmem:[#allocation117_spill] sm:$0xff] %v7509_v50  ;;  %v7545_v58 = vadd.f32 %v1872_v63, %v12099_v18  ;;  %v7548_v13 = vadd.f32 %v1873_v47, %v12101_v25  ;;  %v12103_v24 = vld [vmem:[#allocation104_spill] sm:$0xff]  ;;  %v12105_v6 = vld [vmem:[#allocation107_spill] sm:$0xff] }
 0x1c0   : > { %12078 = vst [vmem:[#allocation59_spill] sm:$0xff] %v7512_v36  ;;  %12080 = vst [vmem:[#allocation63_spill] sm:$0xff] %v7515_v23  ;;  %v7551_v39 = vadd.f32 %v1874_v54, %v12103_v24  ;;  %v7554_v61 = vadd.f32 %v1875_v4, %v12105_v6  ;;  %v12107_v55 = vld [vmem:[#allocation110_spill] sm:$0xff]  ;;  %v12111_v59 = vld [vmem:[#allocation105_spill] sm:$0xff] }
 0x1c1   : > { %12082 = vst [vmem:[#allocation69_spill] sm:$0xff] %v7518_v16  ;;  %12084 = vst [vmem:[#allocation116_spill] sm:$0xff] %v7521_v7  ;;  %v7557_v15 = vadd.f32 %v1876_v34, %v12107_v55  ;;  %v12109_v37 = vld [vmem:[#allocation58_spill] sm:$0xff]  ;;  %v12112_v1 = vld [vmem:[#allocation125_spill] sm:$0xff] }
 0x1c2   : > { %12086 = vst [vmem:[#allocation99_spill] sm:$0xff] %v7524_v20  ;;  %12088 = vst [vmem:[#allocation74_spill] sm:$0xff] %v7527_v49  ;;  %v12110_v56 = vld [vmem:[#allocation66_spill] sm:$0xff]  ;;  %v7565_v63 = vpack.c.bf16 %v12112_v1, %v12111_v59  ;;  %v12115_v54 = vld [vmem:[#allocation143_spill] sm:$0xff] }
 0x1c3   : > { %12090 = vst [vmem:[#allocation77_spill] sm:$0xff] %v7530_v48  ;;  %12092 = vst [vmem:[#allocation80_spill] sm:$0xff] %v7533_v8  ;;  %v7561_v42 = vpack.c.bf16 %v12110_v56, %v12109_v37  ;;  %v12113_v40 = vld [vmem:[#allocation62_spill] sm:$0xff]  ;;  %v12116_v60 = vld [vmem:[#allocation119_spill] sm:$0xff] }
 0x1c4   : > { %12094 = vst [vmem:[#allocation122_spill] sm:$0xff] %v7536_v44  ;;  %12096 = vst [vmem:[#allocation52_spill] sm:$0xff] %v7539_v38  ;;  %v12114_v47 = vld [vmem:[#allocation126_spill] sm:$0xff]  ;;  %v7573_v11 = vpack.c.bf16 %v12116_v60, %v12115_v54  ;;  %v12117_v4 = vld [vmem:[#allocation144_spill] sm:$0xff] }
 0x1c5   : > { %12098 = vst [vmem:[#allocation64_spill] sm:$0xff] %v7542_v62  ;;  %12100 = vst [vmem:[#allocation61_spill] sm:$0xff] %v7545_v58  ;;  %v7569_v41 = vpack.c.bf16 %v12114_v47, %v12113_v40  ;;  %v12118_v45 = vld [vmem:[#allocation120_spill] sm:$0xff]  ;;  %v12119_v28 = vld [vmem:[#allocation145_spill] sm:$0xff] }
 0x1c6   : > { %12102 = vst [vmem:[#allocation75_spill] sm:$0xff] %v7548_v13  ;;  %12104 = vst [vmem:[#allocation123_spill] sm:$0xff] %v7551_v39  ;;  %v7577_v34 = vpack.c.bf16 %v12118_v45, %v12117_v4  ;;  %v12120_v5 = vld [vmem:[#allocation128_spill] sm:$0xff]  ;;  %v12122_v25 = vld [vmem:[#allocation146_spill] sm:$0xff] }
 0x1c7   : > { %12106 = vst [vmem:[#allocation67_spill] sm:$0xff] %v7554_v61  ;;  %12108 = vst [vmem:[#allocation65_spill] sm:$0xff] %v7557_v15  ;;  %v7581_v18 = vpack.c.bf16 %v12120_v5, %v12119_v28  ;;  %v12123_v24 = vld [vmem:[#allocation129_spill] sm:$0xff]  ;;  %v12126_v37 = vld [vmem:[#allocation56_spill] sm:$0xff] }
 0x1c8   : > { %v7585_v6 = vpack.c.bf16 %v12123_v24, %v12122_v25  ;;  %v12125_v55 = vld [vmem:[#allocation137_spill] sm:$0xff]  ;;  %v12127_v59 = vld [vmem:[#allocation111_spill] sm:$0xff]  ;;  %v12128_v1 = vld [vmem:[#allocation130_spill] sm:$0xff] }
 0x1c9   : > { %12121 = vst [vmem:[#allocation102_spill] sm:$0xff] %v7581_v18  ;;  %v1938_v56 = vrot.slane %v12126_v37, %v12125_v55  ;;  %v7591_v40 = vpack.c.bf16 %v12128_v1, %v12127_v59  ;;  %v12130_v47 = vld [vmem:[#allocation68_spill] sm:$0xff]  ;;  %v12131_v54 = vld [vmem:[#allocation131_spill] sm:$0xff]  ;;  %v12133_v4 = vld [vmem:[#allocation114_spill] sm:$0xff] }
 0x1ca   : > { %12124 = vst [vmem:[#allocation71_spill] sm:$0xff] %v7585_v6  ;;  %v7595_v60 = vpack.c.bf16 %v12131_v54, %v12130_v47  ;;  %v12134_v45 = vld [vmem:[#allocation132_spill] sm:$0xff]  ;;  %v12137_v5 = vld [vmem:[#allocation133_spill] sm:$0xff]  ;;  %v12140_v24 = vld [vmem:[#allocation134_spill] sm:$0xff] }
 0x1cb   : > { %12129 = vst [vmem:[#allocation124_spill] sm:$0xff] %v7591_v40  ;;  %v7599_v15 = vpack.c.bf16 %v12134_v45, %v12133_v4  ;;  %v12136_v28 = vld [vmem:[#allocation72_spill] sm:$0xff]  ;;  %v12139_v25 = vld [vmem:[#allocation121_spill] sm:$0xff]  ;;  %v12144_v1 = vld [vmem:[#allocation78_spill] sm:$0xff]  ;;  %v1940_v39 = vmul.bf16 %v1938_v56, %v7415_v46  ;;  %v1942_v13 = vmul.bf16 %v1938_v56, %v7425_v51  ;;  %v1944_v58 = vmul.bf16 %v1938_v56, %v7437_v14 }
 0x1cc   : > { %12132 = vst [vmem:[#allocation48_spill] sm:$0xff] %v7595_v60  ;;  %v7603_v52 = vpack.c.bf16 %v12137_v5, %v12136_v28  ;;  %v7607_v19 = vpack.c.bf16 %v12140_v24, %v12139_v25  ;;  %v1958_v31 = vrot.slane %v12144_v1, %v12125_v55  ;;  %v12145_v47 = vld [vmem:[#allocation81_spill] sm:$0xff]  ;;  %v12146_v4 = vld [vmem:[#allocation84_spill] sm:$0xff]  ;;  %v12148_v28 = vld [vmem:[#allocation87_spill] sm:$0xff]  ;;  %v1946_v62 = vmul.bf16 %v1938_v56, %v7469_v10 }
 0x1cd   : > { %12135 = vst [vmem:[#allocation127_spill] sm:$0xff] %v7599_v15  ;;  %v7615_v54 = vrot.slane %v12145_v47, %v12125_v55  ;;  %v7619_v45 = vrot.slane %v12146_v4, %v12125_v55  ;;  %v7623_v5 = vrot.slane %v12148_v28, %v12125_v55  ;;  %v12150_v25 = vld [vmem:[#allocation89_spill] sm:$0xff]  ;;  %v12154_v1 = vld [vmem:[#allocation47_spill] sm:$0xff]  ;;  %v1941_v4 = vmul.bf16 %v1938_v56, %v7421_v30 }
 0x1ce   : > { %12138 = vst [vmem:[#allocation73_spill] sm:$0xff] %v7603_v52  ;;  %12141 = vst [vmem:[#allocation76_spill] sm:$0xff] %v7607_v19  ;;  %v7627_v24 = vrot.slane %v12150_v25, %v12125_v55  ;;  %v12152_v59 = vld [vmem:[#allocation93_spill] sm:$0xff]  ;;  %v12156_v47 = vpack.c.bf16 %v12154_v1, %v12155_v33  ;;  %v1943_v28 = vmul.bf16 %v1938_v56, %v7429_v27 }
 0x1cf   : > { %12147 = vst [vmem:[#allocation79_spill] sm:$0xff] %v7619_v45  ;;  %12149 = vst [vmem:[#allocation82_spill] sm:$0xff] %v7623_v5  ;;  %v7631_v29 = vrot.slane %v12152_v59, %v12125_v55  ;;  %v1945_v25 = vmul.bf16 %v1938_v56, %v7441_v9  ;;  %v1947_v55 = vmul.bf16 %v1938_v56, %v7473_v0 }
 0x1d0   : > { %12151 = vst [vmem:[#allocation85_spill] sm:$0xff] %v7627_v24  ;;  %v1939_v61 = vmul.bf16 %v1938_v56, %v12156_v47  ;;  %v1948_v59 = vmul.bf16 %v1938_v56, %v7561_v42  ;;  %v1949_v33 = vmul.bf16 %v1938_v56, %v7565_v63  ;;  %v1950_v1 = vmul.bf16 %v1938_v56, %v7569_v41 }
 0x1d1   : > { %12153 = vst [vmem:[#allocation88_spill] sm:$0xff] %v7631_v29  ;;  %v1951_v47 = vmul.bf16 %v1938_v56, %v7573_v11  ;;  %v1952_v38 = vmul.bf16 %v1938_v56, %v7577_v34  ;;  %v1953_v44 = vmul.bf16 %v1938_v56, %v7581_v18  ;;  %v1954_v8 = vmul.bf16 %v1938_v56, %v7585_v6 }
 0x1d2   : > { %v1959_v48 = vmul.bf16 %v1958_v31, %v7415_v46  ;;  %v1960_v49 = vmul.bf16 %v1958_v31, %v7421_v30  ;;  %v1961_v20 = vmul.bf16 %v1958_v31, %v7425_v51  ;;  %v1962_v7 = vmul.bf16 %v1958_v31, %v7429_v27 }
 0x1d3   : > { %v1963_v16 = vmul.bf16 %v1958_v31, %v7437_v14  ;;  %v1964_v23 = vmul.bf16 %v1958_v31, %v7441_v9  ;;  %v1965_v36 = vmul.bf16 %v1958_v31, %v7469_v10  ;;  %v1966_v50 = vmul.bf16 %v1958_v31, %v7473_v0 }
 0x1d4   : > { %v1967_v21 = vmul.bf16 %v1958_v31, %v7561_v42  ;;  %v1968_v56 = vmul.bf16 %v1958_v31, %v7565_v63  ;;  %v1969_v46 = vmul.bf16 %v1958_v31, %v7569_v41  ;;  %v1970_v12 = vmul.bf16 %v1958_v31, %v7573_v11 }
 0x1d5   : > { %v1971_v22 = vmul.bf16 %v1958_v31, %v7577_v34  ;;  %v1972_v57 = vmul.bf16 %v1958_v31, %v7581_v18  ;;  %v1973_v35 = vmul.bf16 %v1958_v31, %v7585_v6  ;;  %v1974_v2 = vmul.bf16 %v1958_v31, %v7591_v40 }
 0x1d6   : > { %v1975_v32 = vadd.bf16 %v1959_v48, %v1939_v61  ;;  %v1976_v17 = vadd.bf16 %v1960_v49, %v1940_v39  ;;  %v1977_v53 = vadd.bf16 %v1961_v20, %v1941_v4  ;;  %v1978_v3 = vadd.bf16 %v1962_v7, %v1942_v13  ;;  %v12158_v20 = vld [vmem:[#allocation71_spill] sm:$0xff] }
 0x1d7   : > { %v1979_v26 = vadd.bf16 %v1963_v16, %v1943_v28  ;;  %v1980_v37 = vadd.bf16 %v1964_v23, %v1944_v58  ;;  %v1981_v43 = vadd.bf16 %v1965_v36, %v1945_v25  ;;  %v1982_v29 = vadd.bf16 %v1966_v50, %v1946_v62  ;;  %v12157_v23 = vld [vmem:[#allocation102_spill] sm:$0xff] }
 0x1d8   : > { %v1983_v19 = vadd.bf16 %v1967_v21, %v1947_v55  ;;  %v1984_v24 = vadd.bf16 %v1968_v56, %v1948_v59  ;;  %v1985_v52 = vadd.bf16 %v1969_v46, %v1949_v33  ;;  %v1986_v5 = vadd.bf16 %v1970_v12, %v1950_v1 }
 0x1d9   : > { %v1987_v15 = vadd.bf16 %v1971_v22, %v1951_v47  ;;  %v1988_v45 = vadd.bf16 %v1972_v57, %v1952_v38  ;;  %v1989_v60 = vadd.bf16 %v1973_v35, %v1953_v44  ;;  %v1990_v18 = vadd.bf16 %v1974_v2, %v1954_v8  ;;  %v12159_v8 = vld [vmem:[#allocation48_spill] sm:$0xff] }
 0x1da   : > { %v1995_v6 = vmul.bf16 %v7615_v54, %v7421_v30  ;;  %v1996_v31 = vmul.bf16 %v7615_v54, %v7425_v51  ;;  %v1997_v16 = vmul.bf16 %v7615_v54, %v7429_v27  ;;  %v1998_v50 = vmul.bf16 %v7615_v54, %v7437_v14 }
 0x1db   : > { %v1999_v21 = vmul.bf16 %v7615_v54, %v7441_v9  ;;  %v2000_v57 = vmul.bf16 %v7615_v54, %v7469_v10  ;;  %v2001_v2 = vmul.bf16 %v7615_v54, %v7473_v0  ;;  %v2002_v30 = vmul.bf16 %v7615_v54, %v7561_v42 }
 0x1dc   : > { %v2003_v35 = vmul.bf16 %v7615_v54, %v7565_v63  ;;  %v2004_v22 = vmul.bf16 %v7615_v54, %v7569_v41  ;;  %v2005_v12 = vmul.bf16 %v7615_v54, %v7573_v11  ;;  %v2006_v36 = vmul.bf16 %v7615_v54, %v7577_v34 }
 0x1dd   : > { %v2007_v7 = vmul.bf16 %v7615_v54, %v12157_v23  ;;  %v2008_v49 = vmul.bf16 %v7615_v54, %v12158_v20  ;;  %v2009_v48 = vmul.bf16 %v7615_v54, %v7591_v40  ;;  %v2010_v44 = vmul.bf16 %v7615_v54, %v12159_v8  ;;  %v12160_v40 = vld [vmem:[#allocation79_spill] sm:$0xff] }
 0x1de   : > { %v2011_v38 = vadd.bf16 %v1995_v6, %v1975_v32  ;;  %v2012_v62 = vadd.bf16 %v1996_v31, %v1976_v17  ;;  %v2013_v58 = vadd.bf16 %v1997_v16, %v1977_v53  ;;  %v2014_v13 = vadd.bf16 %v1998_v50, %v1978_v3 }
 0x1df   : > { %v2015_v39 = vadd.bf16 %v1999_v21, %v1979_v26  ;;  %v2016_v61 = vadd.bf16 %v2000_v57, %v1980_v37  ;;  %v2017_v59 = vadd.bf16 %v2001_v2, %v1981_v43  ;;  %v2018_v4 = vadd.bf16 %v2002_v30, %v1982_v29  ;;  %v12162_v37 = vld [vmem:[#allocation124_spill] sm:$0xff] }
 0x1e0   : > { %v2019_v28 = vadd.bf16 %v2003_v35, %v1983_v19  ;;  %v2020_v25 = vadd.bf16 %v2004_v22, %v1984_v24  ;;  %v2021_v55 = vadd.bf16 %v2005_v12, %v1985_v52  ;;  %v2022_v33 = vadd.bf16 %v2006_v36, %v1986_v5 }
 0x1e1   : > { %v2023_v1 = vadd.bf16 %v2007_v7, %v1987_v15  ;;  %v2024_v47 = vadd.bf16 %v2008_v49, %v1988_v45  ;;  %v2025_v56 = vadd.bf16 %v2009_v48, %v1989_v60  ;;  %v2026_v46 = vadd.bf16 %v2010_v44, %v1990_v18  ;;  %v12161_v18 = vld [vmem:[#allocation71_spill] sm:$0xff] }
 0x1e2   : > { %v2031_v20 = vmul.bf16 %v12160_v40, %v7425_v51  ;;  %v2032_v17 = vmul.bf16 %v12160_v40, %v7429_v27  ;;  %v2033_v26 = vmul.bf16 %v12160_v40, %v7437_v14  ;;  %v2034_v29 = vmul.bf16 %v12160_v40, %v7441_v9  ;;  %v12163_v45 = vld [vmem:[#allocation127_spill] sm:$0xff] }
 0x1e3   : > { %v2035_v43 = vmul.bf16 %v12160_v40, %v7469_v10  ;;  %v2036_v19 = vmul.bf16 %v12160_v40, %v7473_v0  ;;  %v2037_v52 = vmul.bf16 %v12160_v40, %v7561_v42  ;;  %v2038_v51 = vmul.bf16 %v12160_v40, %v7565_v63 }
 0x1e4   : > { %v2039_v3 = vmul.bf16 %v12160_v40, %v7569_v41  ;;  %v2040_v53 = vmul.bf16 %v12160_v40, %v7573_v11  ;;  %v2041_v32 = vmul.bf16 %v12160_v40, %v7577_v34  ;;  %v2042_v15 = vmul.bf16 %v12160_v40, %v12157_v23 }
 0x1e5   : > { %v2043_v6 = vmul.bf16 %v12160_v40, %v12161_v18  ;;  %v2044_v60 = vmul.bf16 %v12160_v40, %v12162_v37  ;;  %v2045_v54 = vmul.bf16 %v12160_v40, %v12159_v8  ;;  %v2046_v5 = vmul.bf16 %v12160_v40, %v12163_v45  ;;  %v12164_v8 = vld [vmem:[#allocation82_spill] sm:$0xff] }
 0x1e6   : > { %v2047_v24 = vadd.bf16 %v2031_v20, %v2011_v38  ;;  %v2048_v31 = vadd.bf16 %v2032_v17, %v2012_v62  ;;  %v2049_v16 = vadd.bf16 %v2033_v26, %v2013_v58  ;;  %v2050_v50 = vadd.bf16 %v2034_v29, %v2014_v13 }
 0x1e7   : > { %v2051_v21 = vadd.bf16 %v2035_v43, %v2015_v39  ;;  %v2052_v57 = vadd.bf16 %v2036_v19, %v2016_v61  ;;  %v2053_v2 = vadd.bf16 %v2037_v52, %v2017_v59  ;;  %v2054_v30 = vadd.bf16 %v2038_v51, %v2018_v4 }
 0x1e8   : > { %v2055_v35 = vadd.bf16 %v2039_v3, %v2019_v28  ;;  %v2056_v22 = vadd.bf16 %v2040_v53, %v2020_v25  ;;  %v2057_v12 = vadd.bf16 %v2041_v32, %v2021_v55  ;;  %v2058_v36 = vadd.bf16 %v2042_v15, %v2022_v33  ;;  %v12165_v28 = vld [vmem:[#allocation124_spill] sm:$0xff] }
 0x1e9   : > { %v2059_v7 = vadd.bf16 %v2043_v6, %v2023_v1  ;;  %v2060_v49 = vadd.bf16 %v2044_v60, %v2024_v47  ;;  %v2061_v48 = vadd.bf16 %v2045_v54, %v2025_v56  ;;  %v2062_v44 = vadd.bf16 %v2046_v5, %v2026_v46  ;;  %v12166_v55 = vld [vmem:[#allocation48_spill] sm:$0xff]  ;;  %v12167_v47 = vld [vmem:[#allocation73_spill] sm:$0xff] }
 0x1ea   : > { %v2067_v37 = vmul.bf16 %v12164_v8, %v7429_v27  ;;  %v2068_v40 = vmul.bf16 %v12164_v8, %v7437_v14  ;;  %v2069_v20 = vmul.bf16 %v12164_v8, %v7441_v9  ;;  %v2070_v38 = vmul.bf16 %v12164_v8, %v7469_v10 }
 0x1eb   : > { %v2071_v62 = vmul.bf16 %v12164_v8, %v7473_v0  ;;  %v2072_v58 = vmul.bf16 %v12164_v8, %v7561_v42  ;;  %v2073_v13 = vmul.bf16 %v12164_v8, %v7565_v63  ;;  %v2074_v27 = vmul.bf16 %v12164_v8, %v7569_v41 }
 0x1ec   : > { %v2075_v39 = vmul.bf16 %v12164_v8, %v7573_v11  ;;  %v2076_v61 = vmul.bf16 %v12164_v8, %v7577_v34  ;;  %v2077_v59 = vmul.bf16 %v12164_v8, %v12157_v23  ;;  %v2078_v4 = vmul.bf16 %v12164_v8, %v12161_v18 }
 0x1ed   : > { %v2079_v25 = vmul.bf16 %v12164_v8, %v12165_v28  ;;  %v2080_v33 = vmul.bf16 %v12164_v8, %v12166_v55  ;;  %v2081_v1 = vmul.bf16 %v12164_v8, %v12163_v45  ;;  %v2082_v56 = vmul.bf16 %v12164_v8, %v12167_v47  ;;  %v12168_v45 = vld [vmem:[#allocation85_spill] sm:$0xff] }
 0x1ee   : > { %v2083_v46 = vadd.bf16 %v2067_v37, %v2047_v24  ;;  %v2084_v17 = vadd.bf16 %v2068_v40, %v2048_v31  ;;  %v2085_v26 = vadd.bf16 %v2069_v20, %v2049_v16  ;;  %v2086_v29 = vadd.bf16 %v2070_v38, %v2050_v50 }
 0x1ef   : > { %v2087_v43 = vadd.bf16 %v2071_v62, %v2051_v21  ;;  %v2088_v19 = vadd.bf16 %v2072_v58, %v2052_v57  ;;  %v2089_v52 = vadd.bf16 %v2073_v13, %v2053_v2  ;;  %v2090_v51 = vadd.bf16 %v2074_v27, %v2054_v30 }
 0x1f0   : > { %v2091_v3 = vadd.bf16 %v2075_v39, %v2055_v35  ;;  %v2092_v53 = vadd.bf16 %v2076_v61, %v2056_v22  ;;  %v2093_v32 = vadd.bf16 %v2077_v59, %v2057_v12  ;;  %v2094_v15 = vadd.bf16 %v2078_v4, %v2058_v36  ;;  %v12169_v35 = vld [vmem:[#allocation48_spill] sm:$0xff]  ;;  %v12170_v12 = vld [vmem:[#allocation127_spill] sm:$0xff] }
 0x1f1   : > { %v2095_v6 = vadd.bf16 %v2079_v25, %v2059_v7  ;;  %v2096_v60 = vadd.bf16 %v2080_v33, %v2060_v49  ;;  %v2097_v54 = vadd.bf16 %v2081_v1, %v2061_v48  ;;  %v2098_v5 = vadd.bf16 %v2082_v56, %v2062_v44  ;;  %v12171_v49 = vld [vmem:[#allocation76_spill] sm:$0xff] }
 0x1f2   : > { %v2103_v55 = vmul.bf16 %v12168_v45, %v7437_v14  ;;  %v2104_v8 = vmul.bf16 %v12168_v45, %v7441_v9  ;;  %v2105_v37 = vmul.bf16 %v12168_v45, %v7469_v10  ;;  %v2106_v24 = vmul.bf16 %v12168_v45, %v7473_v0 }
 0x1f3   : > { %v2107_v31 = vmul.bf16 %v12168_v45, %v7561_v42  ;;  %v2108_v16 = vmul.bf16 %v12168_v45, %v7565_v63  ;;  %v2109_v50 = vmul.bf16 %v12168_v45, %v7569_v41  ;;  %v2110_v14 = vmul.bf16 %v12168_v45, %v7573_v11 }
 0x1f4   : > { %v2111_v21 = vmul.bf16 %v12168_v45, %v7577_v34  ;;  %v2112_v57 = vmul.bf16 %v12168_v45, %v12157_v23  ;;  %v2113_v2 = vmul.bf16 %v12168_v45, %v12161_v18  ;;  %v2114_v30 = vmul.bf16 %v12168_v45, %v12165_v28 }
 0x1f5   : > { %v2115_v22 = vmul.bf16 %v12168_v45, %v12169_v35  ;;  %v2116_v36 = vmul.bf16 %v12168_v45, %v12170_v12  ;;  %v2117_v7 = vmul.bf16 %v12168_v45, %v12167_v47  ;;  %v2118_v48 = vmul.bf16 %v12168_v45, %v12171_v49  ;;  %v12172_v47 = vld [vmem:[#allocation88_spill] sm:$0xff] }
 0x1f6   : > { %v2119_v44 = vadd.bf16 %v2103_v55, %v2083_v46  ;;  %v2120_v40 = vadd.bf16 %v2104_v8, %v2084_v17  ;;  %v2121_v20 = vadd.bf16 %v2105_v37, %v2085_v26  ;;  %v2122_v38 = vadd.bf16 %v2106_v24, %v2086_v29 }
 0x1f7   : > { %v2123_v62 = vadd.bf16 %v2107_v31, %v2087_v43  ;;  %v2124_v58 = vadd.bf16 %v2108_v16, %v2088_v19  ;;  %v2125_v13 = vadd.bf16 %v2109_v50, %v2089_v52  ;;  %v2126_v27 = vadd.bf16 %v2110_v14, %v2090_v51  ;;  %v12173_v43 = vld [vmem:[#allocation127_spill] sm:$0xff]  ;;  %v12174_v19 = vld [vmem:[#allocation73_spill] sm:$0xff] }
 0x1f8   : > { %v2127_v39 = vadd.bf16 %v2111_v21, %v2091_v3  ;;  %v2128_v61 = vadd.bf16 %v2112_v57, %v2092_v53  ;;  %v2129_v59 = vadd.bf16 %v2113_v2, %v2093_v32  ;;  %v2130_v4 = vadd.bf16 %v2114_v30, %v2094_v15  ;;  %v12175_v52 = vld [vmem:[#allocation135_spill] sm:$0xff] }
 0x1f9   : > { %v2131_v25 = vadd.bf16 %v2115_v22, %v2095_v6  ;;  %v2132_v33 = vadd.bf16 %v2116_v36, %v2096_v60  ;;  %v2133_v1 = vadd.bf16 %v2117_v7, %v2097_v54  ;;  %v2134_v56 = vadd.bf16 %v2118_v48, %v2098_v5 }
 0x1fa   : > { %v2139_v12 = vmul.bf16 %v12172_v47, %v7441_v9  ;;  %v2140_v45 = vmul.bf16 %v12172_v47, %v7469_v10  ;;  %v2141_v55 = vmul.bf16 %v12172_v47, %v7473_v0  ;;  %v2142_v46 = vmul.bf16 %v12172_v47, %v7561_v42 }
 0x1fb   : > { %v2143_v17 = vmul.bf16 %v12172_v47, %v7565_v63  ;;  %v2144_v26 = vmul.bf16 %v12172_v47, %v7569_v41  ;;  %v2145_v29 = vmul.bf16 %v12172_v47, %v7573_v11  ;;  %v2146_v9 = vmul.bf16 %v12172_v47, %v7577_v34 }
 0x1fc   : > { %v2147_v10 = vmul.bf16 %v12172_v47, %v12157_v23  ;;  %v2148_v0 = vmul.bf16 %v12172_v47, %v12161_v18  ;;  %v2149_v42 = vmul.bf16 %v12172_v47, %v12165_v28  ;;  %v2150_v63 = vmul.bf16 %v12172_v47, %v12169_v35  ;;  %v12176_v23 = vld [vmem:[#allocation60_spill] sm:$0xff] }
 0x1fd   : > { %v2151_v41 = vmul.bf16 %v12172_v47, %v12173_v43  ;;  %v2152_v11 = vmul.bf16 %v12172_v47, %v12174_v19  ;;  %v2153_v34 = vmul.bf16 %v12172_v47, %v12171_v49  ;;  %v12177_v51 = vpack.c.bf16 %v12175_v52, %v12176_v23  ;;  %v12191_v52 = vld [vmem:[#allocation138_spill] sm:$0xff] }
 0x1fe   : > { %v2155_v3 = vadd.bf16 %v2139_v12, %v2119_v44  ;;  %v2156_v53 = vadd.bf16 %v2140_v45, %v2120_v40  ;;  %v2157_v28 = vadd.bf16 %v2141_v55, %v2121_v20  ;;  %v2158_v32 = vadd.bf16 %v2142_v46, %v2122_v38 }
 0x1ff   : > { %v2154_v18 = vmul.bf16 %v12172_v47, %v12177_v51  ;;  %v2159_v15 = vadd.bf16 %v2143_v17, %v2123_v62  ;;  %v2160_v6 = vadd.bf16 %v2144_v26, %v2124_v58  ;;  %v2161_v60 = vadd.bf16 %v2145_v29, %v2125_v13  ;;  %v12179_v26 = vld [vmem:[#allocation136_spill] sm:$0xff]  ;;  %v12193_v51 = vld [vmem:[#allocation139_spill] sm:$0xff] }
 0x200   : > { %v2162_v54 = vadd.bf16 %v2146_v9, %v2126_v27  ;;  %v2163_v5 = vadd.bf16 %v2147_v10, %v2127_v39  ;;  %v2164_v8 = vadd.bf16 %v2148_v0, %v2128_v61  ;;  %v2165_v37 = vadd.bf16 %v2149_v42, %v2129_v59  ;;  %v12181_v9 = vld [vmem:[#allocation140_spill] sm:$0xff]  ;;  %v12183_v0 = vld [vmem:[#allocation141_spill] sm:$0xff] }
 0x201   : > { %v2166_v24 = vadd.bf16 %v2150_v63, %v2130_v4  ;;  %v2167_v31 = vadd.bf16 %v2151_v41, %v2131_v25  ;;  %v7829_v16 = vadd.bf16 %v2152_v11, %v2132_v33  ;;  %v7831_v50 = vadd.bf16 %v2153_v34, %v2133_v1  ;;  %v12185_v63 = vld [vmem:[#allocation51_spill] sm:$0xff]  ;;  %v12187_v41 = vld [vmem:[#allocation113_spill] sm:$0xff]  ;;  %v12189_v11 = vld [vmem:[#allocation108_spill] sm:$0xff] }
 0x202   : > { %v7833_v14 = vadd.bf16 %v2154_v18, %v2134_v56  ;;  %v2171_v47 = vunpack.c.l.bf16 %v2155_v3  ;;  %v2172_v21 = vunpack.c.h.bf16 %v2155_v3  ;;  %v2173_v57 = vunpack.c.l.bf16 %v2156_v53  ;;  %v12195_v3 = vld [vmem:[#allocation142_spill] sm:$0xff] }
 0x203   : > { %12178 = vst [vmem:[#allocation90_spill] sm:$0xff] %v7829_v16  ;;  %v2174_v2 = vunpack.c.h.bf16 %v2156_v53  ;;  %v2175_v30 = vunpack.c.l.bf16 %v2157_v28  ;;  %v2176_v35 = vunpack.c.h.bf16 %v2157_v28  ;;  %v2177_v22 = vunpack.c.l.bf16 %v2158_v32  ;;  %v12197_v28 = vld [vmem:[#allocation57_spill] sm:$0xff]  ;;  %v8013_v56 = vld [vmem:[#allocation2 + $0x98] sm:$0xff] }
 0x204   : > { %v2178_v12 = vunpack.c.h.bf16 %v2158_v32  ;;  %v2179_v36 = vunpack.c.l.bf16 %v2159_v15  ;;  %v2180_v7 = vunpack.c.h.bf16 %v2159_v15  ;;  %v2181_v49 = vunpack.c.l.bf16 %v2160_v6  ;;  %v12199_v15 = vld [vmem:[#allocation96_spill] sm:$0xff]  ;;  %12270 = vst [vmem:[#allocation73_spill] sm:$0xff] %v8013_v56 }
 0x205   : > { %v2182_v48 = vunpack.c.h.bf16 %v2160_v6  ;;  %v2183_v44 = vunpack.c.l.bf16 %v2161_v60  ;;  %v2184_v40 = vunpack.c.h.bf16 %v2161_v60  ;;  %v2185_v20 = vunpack.c.l.bf16 %v2162_v54  ;;  %v12201_v60 = vld [vmem:[#allocation117_spill] sm:$0xff] }
 0x206   : > { %v2186_v38 = vunpack.c.h.bf16 %v2162_v54  ;;  %v2187_v62 = vunpack.c.l.bf16 %v2163_v5  ;;  %v2188_v58 = vunpack.c.h.bf16 %v2163_v5  ;;  %v2189_v13 = vunpack.c.l.bf16 %v2164_v8  ;;  %v12203_v5 = vld [vmem:[#allocation59_spill] sm:$0xff] }
 0x207   : > { %v2190_v27 = vunpack.c.h.bf16 %v2164_v8  ;;  %v2191_v39 = vunpack.c.l.bf16 %v2165_v37  ;;  %v2192_v61 = vunpack.c.h.bf16 %v2165_v37  ;;  %v2193_v59 = vunpack.c.l.bf16 %v2166_v24  ;;  %v12205_v37 = vld [vmem:[#allocation63_spill] sm:$0xff] }
 0x208   : > { %v2194_v4 = vunpack.c.h.bf16 %v2166_v24  ;;  %v2195_v25 = vunpack.c.l.bf16 %v2167_v31  ;;  %v2196_v33 = vunpack.c.h.bf16 %v2167_v31  ;;  %v2197_v1 = vunpack.c.l.bf16 %v7829_v16  ;;  %v12207_v31 = vld [vmem:[#allocation69_spill] sm:$0xff]  ;;  %v8081_v16 = vld [vmem:[#allocation2 + $0x1d8] sm:$0xff] }
 0x209   : > { %v2199_v45 = vunpack.c.l.bf16 %v7831_v50  ;;  %v2200_v55 = vunpack.c.h.bf16 %v7831_v50  ;;  %v2201_v46 = vunpack.c.l.bf16 %v7833_v14  ;;  %v2202_v17 = vunpack.c.h.bf16 %v7833_v14  ;;  %v12209_v14 = vld [vmem:[#allocation116_spill] sm:$0xff] }
 0x20a   : > { %v7842_v29 = vadd.f32 %v2171_v47, %v12179_v26  ;;  %v7845_v10 = vadd.f32 %v2172_v21, %v12181_v9  ;;  %v7848_v42 = vadd.f32 %v2173_v57, %v12183_v0  ;;  %v7851_v43 = vadd.f32 %v2174_v2, %v12185_v63  ;;  %v12211_v21 = vld [vmem:[#allocation99_spill] sm:$0xff]  ;;  %v12213_v2 = vld [vmem:[#allocation74_spill] sm:$0xff] }
 0x20b   : > { %v7854_v19 = vadd.f32 %v2175_v30, %v12187_v41  ;;  %v7857_v34 = vadd.f32 %v2176_v35, %v12189_v11  ;;  %v7860_v23 = vadd.f32 %v2177_v22, %v12191_v52  ;;  %v7863_v18 = vadd.f32 %v2178_v12, %v12193_v51  ;;  %v12215_v35 = vld [vmem:[#allocation77_spill] sm:$0xff]  ;;  %v12217_v12 = vld [vmem:[#allocation80_spill] sm:$0xff] }
 0x20c   : > { %12180 = vst [vmem:[#allocation94_spill] sm:$0xff] %v7842_v29  ;;  %12182 = vst [vmem:[#allocation97_spill] sm:$0xff] %v7845_v10  ;;  %v7866_v53 = vadd.f32 %v2179_v36, %v12195_v3  ;;  %v7869_v32 = vadd.f32 %v2180_v7, %v12197_v28  ;;  %v7872_v6 = vadd.f32 %v2181_v49, %v12199_v15  ;;  %v12219_v7 = vld [vmem:[#allocation122_spill] sm:$0xff]  ;;  %v7937_v51 = vld [vmem:[#allocation2 + $0x28] sm:$0xff] }
 0x20d   : > { %12184 = vst [vmem:[#allocation100_spill] sm:$0xff] %v7848_v42  ;;  %12186 = vst [vmem:[#allocation103_spill] sm:$0xff] %v7851_v43  ;;  %v7875_v54 = vadd.f32 %v2182_v48, %v12201_v60  ;;  %v7878_v8 = vadd.f32 %v2183_v44, %v12203_v5  ;;  %v7881_v24 = vadd.f32 %v2184_v40, %v12205_v37  ;;  %v12221_v48 = vld [vmem:[#allocation52_spill] sm:$0xff]  ;;  %v7997_v60 = vld [vmem:[#allocation2 + $0x18] sm:$0xff] }
 0x20e   : > { %12188 = vst [vmem:[#allocation106_spill] sm:$0xff] %v7854_v19  ;;  %12190 = vst [vmem:[#allocation109_spill] sm:$0xff] %v7857_v34  ;;  %v7884_v50 = vadd.f32 %v2185_v20, %v12207_v31  ;;  %v7887_v47 = vadd.f32 %v2186_v38, %v12209_v14  ;;  %v7890_v57 = vadd.f32 %v2187_v62, %v12211_v21  ;;  %v12223_v40 = vld [vmem:[#allocation64_spill] sm:$0xff]  ;;  %v12225_v38 = vld [vmem:[#allocation61_spill] sm:$0xff] }
 0x20f   : > { %12192 = vst [vmem:[#allocation112_spill] sm:$0xff] %v7860_v23  ;;  %12194 = vst [vmem:[#allocation115_spill] sm:$0xff] %v7863_v18  ;;  %v7893_v30 = vadd.f32 %v2188_v58, %v12213_v2  ;;  %v7896_v22 = vadd.f32 %v2189_v13, %v12215_v35  ;;  %v7899_v36 = vadd.f32 %v2190_v27, %v12217_v12  ;;  %v12227_v58 = vld [vmem:[#allocation75_spill] sm:$0xff]  ;;  %v7940_v3 = vld [vmem:[#allocation2 + $0x48] sm:$0xff] }
 0x210   : > { %12196 = vst [vmem:[#allocation118_spill] sm:$0xff] %v7866_v53  ;;  %12198 = vst [vmem:[#allocation45_spill] sm:$0xff] %v7869_v32  ;;  %v7902_v49 = vadd.f32 %v2191_v39, %v12219_v7  ;;  %v7905_v44 = vadd.f32 %v2192_v61, %v12221_v48  ;;  %v7908_v20 = vadd.f32 %v2193_v59, %v12223_v40  ;;  %v12229_v13 = vld [vmem:[#allocation123_spill] sm:$0xff]  ;;  %v12233_v39 = vld [vmem:[#allocation36_spill] sm:$0xff] }
 0x211   : > { %12200 = vst [vmem:[#allocation44_spill] sm:$0xff] %v7872_v6  ;;  %12202 = vst [vmem:[#allocation83_spill] sm:$0xff] %v7875_v54  ;;  %v7911_v62 = vadd.f32 %v2194_v4, %v12225_v38  ;;  %v7914_v26 = vadd.f32 %v2195_v25, %v12227_v58  ;;  %v7917_v9 = vadd.f32 %v2196_v33, %v12229_v13  ;;  %v12231_v27 = vld [vmem:[#allocation67_spill] sm:$0xff]  ;;  %v12235_v61 = vld [vmem:[#allocation37_spill] sm:$0xff] }
 0x212   : > { %12204 = vst [vmem:[#allocation86_spill] sm:$0xff] %v7878_v8  ;;  %12206 = vst [vmem:[#allocation91_spill] sm:$0xff] %v7881_v24  ;;  %v7920_v0 = vadd.f32 %v2197_v1, %v12231_v27  ;;  %v7923_v63 = vadd.f32 %v2199_v45, %v12233_v39  ;;  %v7926_v41 = vadd.f32 %v2200_v55, %v12235_v61  ;;  %v12237_v59 = vld [vmem:[#allocation38_spill] sm:$0xff]  ;;  %v12239_v4 = vld [vmem:[#allocation39_spill] sm:$0xff] }
 0x213   : > { %12208 = vst [vmem:[#allocation92_spill] sm:$0xff] %v7884_v50  ;;  %12210 = vst [vmem:[#allocation95_spill] sm:$0xff] %v7887_v47  ;;  %v7929_v11 = vadd.f32 %v2201_v46, %v12237_v59  ;;  %v7932_v52 = vadd.f32 %v2202_v17, %v12239_v4  ;;  %v7934_v25 = vld [vmem:[#allocation2 + $0x8] sm:$0xff]  ;;  %v8002_v46 = vld [vmem:[#allocation2 + $0x10] sm:$0xff] }
 0x214   : > { %12212 = vst [vmem:[#allocation98_spill] sm:$0xff] %v7890_v57  ;;  %12214 = vst [vmem:[#allocation101_spill] sm:$0xff] %v7893_v30  ;;  %v7943_v55 = vld [vmem:[#allocation2 + $0x68] sm:$0xff]  ;;  %v12265_v45 = vld [vmem:[#allocation70_spill] sm:$0xff] }
 0x215   : > { %12216 = vst [vmem:[#allocation104_spill] sm:$0xff] %v7896_v22  ;;  %12218 = vst [vmem:[#allocation107_spill] sm:$0xff] %v7899_v36  ;;  %v7946_v28 = vld [vmem:[#allocation2 + $0x88] sm:$0xff]  ;;  %v8009_v59 = vld [vmem:[#allocation2 + $0x58] sm:$0xff] }
 0x216   : > { %12220 = vst [vmem:[#allocation110_spill] sm:$0xff] %v7902_v49  ;;  %12222 = vst [vmem:[#allocation58_spill] sm:$0xff] %v7905_v44  ;;  %v7949_v15 = vld [vmem:[#allocation2 + $0xa8] sm:$0xff]  ;;  %v8024_v39 = vld [vmem:[#allocation2 + $0xd0] sm:$0xff] }
 0x217   : > { %12224 = vst [vmem:[#allocation66_spill] sm:$0xff] %v7908_v20  ;;  %12226 = vst [vmem:[#allocation105_spill] sm:$0xff] %v7911_v62  ;;  %v7952_v5 = vld [vmem:[#allocation2 + $0xc8] sm:$0xff]  ;;  %v8018_v62 = vld [vmem:[#allocation2 + $0x90] sm:$0xff] }
 0x218   : > { %12228 = vst [vmem:[#allocation125_spill] sm:$0xff] %v7914_v26  ;;  %12230 = vst [vmem:[#allocation62_spill] sm:$0xff] %v7917_v9  ;;  %v7955_v31 = vld [vmem:[#allocation2 + $0xe8] sm:$0xff]  ;;  %v8011_v9 = vld [vmem:[#allocation2 + $0x78] sm:$0xff] }
 0x219   : > { %12232 = vst [vmem:[#allocation126_spill] sm:$0xff] %v7920_v0  ;;  %12234 = vst [vmem:[#allocation143_spill] sm:$0xff] %v7923_v63  ;;  %v7958_v21 = vld [vmem:[#allocation2 + $0x108] sm:$0xff]  ;;  %v8007_v0 = vld [vmem:[#allocation2 + $0x38] sm:$0xff]  ;;  %v2282_v13 = vrot.slane %v8011_v9, 1 }
 0x21a   : > { %12236 = vst [vmem:[#allocation119_spill] sm:$0xff] %v7926_v41  ;;  %12238 = vst [vmem:[#allocation144_spill] sm:$0xff] %v7929_v11  ;;  %v7961_v35 = vld [vmem:[#allocation2 + $0x128] sm:$0xff]  ;;  %v8015_v26 = vld [vmem:[#allocation2 + $0x70] sm:$0xff] }
 0x21b   : > { %12240 = vst [vmem:[#allocation120_spill] sm:$0xff] %v7932_v52  ;;  %12241 = vst [vmem:[#allocation145_spill] sm:$0xff] %v7934_v25  ;;  %v7964_v7 = vld [vmem:[#allocation2 + $0x148] sm:$0xff]  ;;  %v8021_v20 = vld [vmem:[#allocation2 + $0xb0] sm:$0xff] }
 0x21c   : > { %12242 = vst [vmem:[#allocation128_spill] sm:$0xff] %v7937_v51  ;;  %12243 = vst [vmem:[#allocation146_spill] sm:$0xff] %v7940_v3  ;;  %v7967_v40 = vld [vmem:[#allocation2 + $0x168] sm:$0xff]  ;;  %v8027_v49 = vld [vmem:[#allocation2 + $0xb8] sm:$0xff] }
 0x21d   : > { %12244 = vst [vmem:[#allocation129_spill] sm:$0xff] %v7943_v55  ;;  %12245 = vst [vmem:[#allocation137_spill] sm:$0xff] %v7946_v28  ;;  %v7970_v58 = vld [vmem:[#allocation2 + $0x188] sm:$0xff]  ;;  %v8029_v36 = vld [vmem:[#allocation2 + $0xd8] sm:$0xff]  ;;  %v2284_v44 = vrot.slane %v8027_v49, 1 }
 0x21e   : > { %12246 = vst [vmem:[#allocation111_spill] sm:$0xff] %v7949_v15  ;;  %12247 = vst [vmem:[#allocation130_spill] sm:$0xff] %v7952_v5  ;;  %v7973_v27 = vld [vmem:[#allocation2 + $0x1a8] sm:$0xff]  ;;  %v8031_v22 = vld [vmem:[#allocation2 + $0xf8] sm:$0xff] }
 0x21f   : > { %12248 = vst [vmem:[#allocation68_spill] sm:$0xff] %v7955_v31  ;;  %12249 = vst [vmem:[#allocation131_spill] sm:$0xff] %v7958_v21  ;;  %v7976_v61 = vld [vmem:[#allocation2 + $0x1c8] sm:$0xff]  ;;  %v8033_v30 = vld [vmem:[#allocation2 + $0x118] sm:$0xff] }
 0x220   : > { %12250 = vst [vmem:[#allocation114_spill] sm:$0xff] %v7961_v35  ;;  %12251 = vst [vmem:[#allocation132_spill] sm:$0xff] %v7964_v7  ;;  %v7979_v4 = vld [vmem:[#allocation2 + $0x1e8] sm:$0xff]  ;;  %v8035_v38 = vld [vmem:[#allocation2 + $0xf0] sm:$0xff] }
 0x221   : > { %12252 = vst [vmem:[#allocation72_spill] sm:$0xff] %v7967_v40  ;;  %12253 = vst [vmem:[#allocation133_spill] sm:$0xff] %v7970_v58  ;;  %v7982_v48 = vld [vmem:[#allocation2 + $0x208] sm:$0xff]  ;;  %v8038_v57 = vld [vmem:[#allocation2 + $0x110] sm:$0xff] }
 0x222   : > { %12254 = vst [vmem:[#allocation121_spill] sm:$0xff] %v7973_v27  ;;  %12255 = vst [vmem:[#allocation134_spill] sm:$0xff] %v7976_v61  ;;  %v7985_v12 = vld [vmem:[#allocation2 + $0x228] sm:$0xff]  ;;  %v8041_v47 = vld [vmem:[#allocation2 + $0x130] sm:$0xff]  ;;  %v2287_v61 = vrot.slane %v8033_v30, 1 }
 0x223   : > { %12256 = vst [vmem:[#allocation47_spill] sm:$0xff] %v7979_v4  ;;  %12257 = vst [vmem:[#allocation41_spill] sm:$0xff] %v7982_v48  ;;  %v7988_v2 = vld [vmem:[#allocation2 + $0x248] sm:$0xff]  ;;  %v8044_v50 = vld [vmem:[#allocation2 + $0x150] sm:$0xff]  ;;  %v2286_v4 = vrot.slane %v8031_v22, 1 }
 0x224   : > { %12258 = vst [vmem:[#allocation102_spill] sm:$0xff] %v7985_v12  ;;  %12259 = vst [vmem:[#allocation79_spill] sm:$0xff] %v7988_v2  ;;  %v7991_v14 = vld [vmem:[#allocation2 + $0x268] sm:$0xff]  ;;  %v8047_v8 = vld [vmem:[#allocation2 + $0x138] sm:$0xff]  ;;  %v2281_v2 = vrot.slane %v8009_v59, 1  ;;  %v2283_v12 = vrot.slane %v8013_v56, 1 }
 0x225   : > { %12260 = vst [vmem:[#allocation71_spill] sm:$0xff] %v7991_v14  ;;  %v7994_v37 = vld [vmem:[#allocation2 + $0x288] sm:$0xff]  ;;  %12262 = vst [vmem:[#allocation124_spill] sm:$0xff] %v7997_v60  ;;  %v8049_v54 = vld [vmem:[#allocation2 + $0x158] sm:$0xff]  ;;  %v2280_v14 = vrot.slane %v8007_v0, 1 }
 0x226   : > { %12261 = vst [vmem:[#allocation82_spill] sm:$0xff] %v7994_v37  ;;  %v7999_v17 = vld [vmem:[#allocation2 + $0x2a8] sm:$0xff]  ;;  %12264 = vst [vmem:[#allocation48_spill] sm:$0xff] %v8002_v46  ;;  %v8051_v6 = vld [vmem:[#allocation2 + $0x178] sm:$0xff]  ;;  %v2289_v56 = vrot.slane %v8049_v54, 1 }
 0x227   : > { %12263 = vst [vmem:[#allocation85_spill] sm:$0xff] %v7999_v17  ;;  %v12266_v1 = vld [vmem:[#allocation40_spill] sm:$0xff]  ;;  %12267 = vst [vmem:[#allocation76_spill] sm:$0xff] %v8007_v0  ;;  %v8053_v32 = vld [vmem:[#allocation2 + $0x170] sm:$0xff]  ;;  %v2279_v17 = vrot.slane %v7997_v60, 1  ;;  %v2285_v60 = vrot.slane %v8029_v36, 1 }
 0x228   : > { %12268 = vst [vmem:[#allocation88_spill] sm:$0xff] %v8009_v59  ;;  %12269 = vst [vmem:[#allocation127_spill] sm:$0xff] %v8011_v9  ;;  %v8056_v53 = vld [vmem:[#allocation2 + $0x190] sm:$0xff]  ;;  %v8065_v34 = vld [vmem:[#allocation2 + $0x198] sm:$0xff]  ;;  %v2288_v9 = vrot.slane %v8047_v8, 1  ;;  %v2290_v59 = vrot.slane %v8051_v6, 1 }
 0x229   : > { %12271 = vst [vmem:[#allocation135_spill] sm:$0xff] %v8015_v26  ;;  %12272 = vst [vmem:[#allocation60_spill] sm:$0xff] %v8018_v62  ;;  %v8059_v18 = vld [vmem:[#allocation2 + $0x1b0] sm:$0xff]  ;;  %v8067_v19 = vld [vmem:[#allocation2 + $0x1b8] sm:$0xff] }
 0x22a   : > { %12273 = vst [vmem:[#allocation136_spill] sm:$0xff] %v8021_v20  ;;  %12274 = vst [vmem:[#allocation140_spill] sm:$0xff] %v8024_v39  ;;  %v8062_v23 = vld [vmem:[#allocation2 + $0x1d0] sm:$0xff]  ;;  %v8083_v52 = vld [vmem:[#allocation2 + $0x1f8] sm:$0xff] }
 0x22b   : > { %12275 = vst [vmem:[#allocation141_spill] sm:$0xff] %v8027_v49  ;;  %12276 = vst [vmem:[#allocation51_spill] sm:$0xff] %v8029_v36  ;;  %v8069_v43 = vld [vmem:[#allocation2 + $0x1f0] sm:$0xff]  ;;  %v8095_v37 = vld [vmem:[#allocation2 + $0x218] sm:$0xff]  ;;  %v2291_v49 = vrot.slane %v8065_v34, 1  ;;  %v2292_v36 = vrot.slane %v8067_v19, 1 }
 0x22c   : > { %12277 = vst [vmem:[#allocation113_spill] sm:$0xff] %v8031_v22  ;;  %12278 = vst [vmem:[#allocation108_spill] sm:$0xff] %v8033_v30  ;;  %v8072_v42 = vld [vmem:[#allocation2 + $0x210] sm:$0xff]  ;;  %v8097_v24 = vld [vmem:[#allocation2 + $0x238] sm:$0xff]  ;;  %v2293_v22 = vrot.slane %v8081_v16, 1  ;;  %v2294_v30 = vrot.slane %v8083_v52, 1 }
 0x22d   : > { %12279 = vst [vmem:[#allocation138_spill] sm:$0xff] %v8035_v38  ;;  %12280 = vst [vmem:[#allocation139_spill] sm:$0xff] %v8038_v57  ;;  %v8075_v10 = vld [vmem:[#allocation2 + $0x230] sm:$0xff]  ;;  %v8103_v48 = vld [vmem:[#allocation2 + $0x258] sm:$0xff]  ;;  %v2295_v40 = vrot.slane %v8095_v37, 1  ;;  %v2296_v7 = vrot.slane %v8097_v24, 1 }
 0x22e   : > { %12281 = vst [vmem:[#allocation142_spill] sm:$0xff] %v8041_v47  ;;  %12282 = vst [vmem:[#allocation57_spill] sm:$0xff] %v8044_v50  ;;  %v8078_v29 = vld [vmem:[#allocation2 + $0x250] sm:$0xff]  ;;  %v8105_v33 = vld [vmem:[#allocation2 + $0x278] sm:$0xff] }
 0x22f   : > { %12283 = vst [vmem:[#allocation96_spill] sm:$0xff] %v8047_v8  ;;  %12284 = vst [vmem:[#allocation117_spill] sm:$0xff] %v8049_v54  ;;  %v8085_v11 = vld [vmem:[#allocation2 + $0x270] sm:$0xff]  ;;  %v8111_v27 = vld [vmem:[#allocation2 + $0x298] sm:$0xff]  ;;  %v2297_v8 = vrot.slane %v8103_v48, 1  ;;  %v2298_v54 = vrot.slane %v8105_v33, 1 }
 0x230   : > { %12285 = vst [vmem:[#allocation59_spill] sm:$0xff] %v8051_v6  ;;  %12286 = vst [vmem:[#allocation63_spill] sm:$0xff] %v8053_v32  ;;  %v8088_v41 = vld [vmem:[#allocation2 + $0x290] sm:$0xff]  ;;  %v8113_v0 = vld [vmem:[#allocation2 + $0x2b8] sm:$0xff]  ;;  %v2299_v6 = vrot.slane %v8111_v27, 1 }
 0x231   : > { %12287 = vst [vmem:[#allocation69_spill] sm:$0xff] %v8056_v53  ;;  %12288 = vst [vmem:[#allocation116_spill] sm:$0xff] %v8059_v18  ;;  %v8091_v63 = vld [vmem:[#allocation2 + $0x2b0] sm:$0xff]  ;;  %v12307_v58 = vld [vmem:[#allocation35_spill] sm:$0xff]  ;;  %v2300_v35 = vrot.slane %v8113_v0, 1 }
 0x232   : > { %12289 = vst [vmem:[#allocation99_spill] sm:$0xff] %v8062_v23  ;;  %12290 = vst [vmem:[#allocation74_spill] sm:$0xff] %v8065_v34  ;;  %vm2301_vm4 = vcmp.lt.s32.totalorder %v12307_v58, 7  ;;  %v12308_v34 = vrot.slane %v8002_v46, 1 }
 0x233   : > { %12291 = vst [vmem:[#allocation77_spill] sm:$0xff] %v8067_v19  ;;  %12292 = vst [vmem:[#allocation80_spill] sm:$0xff] %v8069_v43 }
 0x234   : > { %12293 = vst [vmem:[#allocation122_spill] sm:$0xff] %v8072_v42  ;;  %12294 = vst [vmem:[#allocation52_spill] sm:$0xff] %v8075_v10  ;;  %v8133_v19 = vsel %vm2301_vm4, %v12308_v34, %v2279_v17  ;;  %v12313_v34 = vrot.slane %v8018_v62, 1 }
 0x235   : > { %12295 = vst [vmem:[#allocation64_spill] sm:$0xff] %v8078_v29  ;;  %12296 = vst [vmem:[#allocation61_spill] sm:$0xff] %v8081_v16  ;;  %v12314_v16 = vrot.slane %v8021_v20, 1 }
 0x236   : > { %12297 = vst [vmem:[#allocation75_spill] sm:$0xff] %v8083_v52  ;;  %12298 = vst [vmem:[#allocation123_spill] sm:$0xff] %v8085_v11  ;;  %v8136_v52 = vsub.s32 2, %v12307_v58  ;;  %v2306_v17 = vsel %vm2301_vm4, %v12313_v34, %v2283_v12  ;;  %v12318_v34 = vrot.slane %v8041_v47, 1 }
 0x237   : > { %12299 = vst [vmem:[#allocation67_spill] sm:$0xff] %v8088_v41  ;;  %12300 = vst [vmem:[#allocation36_spill] sm:$0xff] %v8091_v63 }
 0x238   : > { %12301 = vst [vmem:[#allocation37_spill] sm:$0xff] %v8095_v37  ;;  %12302 = vst [vmem:[#allocation38_spill] sm:$0xff] %v8097_v24  ;;  %v12310_v37 = vrot.slane %v12265_v45, 1 }
 0x239   : > { %12303 = vst [vmem:[#allocation39_spill] sm:$0xff] %v8103_v48  ;;  %12304 = vst [vmem:[#allocation70_spill] sm:$0xff] %v8105_v33  ;;  %v12311_v33 = vrot.slane %v12266_v1, 1 }
 0x23a   : > { %12305 = vst [vmem:[#allocation40_spill] sm:$0xff] %v8111_v27  ;;  %12306 = vst [vmem:[#allocation147_spill] sm:$0xff] %v8113_v0  ;;  %v2303_v48 = vsel %vm2301_vm4, %v12310_v37, %v2280_v14  ;;  %v12312_v0 = vrot.slane %v8015_v26, 1  ;;  %v2307_v37 = vsel %vm2301_vm4, %v12314_v16, %v2284_v44  ;;  %v12315_v14 = vrot.slane %v8024_v39, 1 }
 0x23b   : > { %12309 = vst [vmem:[#allocation148_spill] sm:$0xff] %v8136_v52  ;;  %v2304_v27 = vsel %vm2301_vm4, %v12311_v33, %v2281_v2  ;;  %v12316_v2 = vrot.slane %v8035_v38, 1  ;;  %v2311_v16 = vsel %vm2301_vm4, %v12318_v34, %v2288_v9  ;;  %v12319_v44 = vrot.slane %v8044_v50, 1 }
 0x23c   : > { %v2305_v24 = vsel %vm2301_vm4, %v12312_v0, %v2282_v13  ;;  %v2308_v33 = vsel %vm2301_vm4, %v12315_v14, %v2285_v60  ;;  %v12317_v13 = vrot.slane %v8038_v57, 1  ;;  %v12320_v14 = vrot.slane %v8053_v32, 1 }
 0x23d   : > { %v2309_v0 = vsel %vm2301_vm4, %v12316_v2, %v2286_v4  ;;  %v2312_v60 = vsel %vm2301_vm4, %v12319_v44, %v2289_v56  ;;  %v12321_v2 = vrot.slane %v8056_v53, 1  ;;  %v12323_v34 = vrot.slane %v8062_v23, 1 }
 0x23e   : > { %v2310_v12 = vsel %vm2301_vm4, %v12317_v13, %v2287_v61  ;;  %v2313_v4 = vsel %vm2301_vm4, %v12320_v14, %v2290_v59  ;;  %v12322_v13 = vrot.slane %v8059_v18, 1  ;;  %v12324_v44 = vrot.slane %v8069_v43, 1 }
 0x23f   : > { %v2314_v61 = vsel %vm2301_vm4, %v12321_v2, %v2291_v49  ;;  %v2316_v56 = vsel %vm2301_vm4, %v12323_v34, %v2293_v22  ;;  %v12325_v14 = vrot.slane %v8072_v42, 1  ;;  %v12326_v2 = vrot.slane %v8075_v10, 1 }
 0x240   : > { %v2315_v9 = vsel %vm2301_vm4, %v12322_v13, %v2292_v36  ;;  %v2317_v59 = vsel %vm2301_vm4, %v12324_v44, %v2294_v30  ;;  %v12327_v13 = vrot.slane %v8078_v29, 1  ;;  %v12328_v34 = vrot.slane %v8085_v11, 1 }
 0x241   : > { %v2318_v49 = vsel %vm2301_vm4, %v12325_v14, %v2295_v40  ;;  %v2319_v36 = vsel %vm2301_vm4, %v12326_v2, %v2296_v7  ;;  %v12329_v44 = vrot.slane %v8088_v41, 1  ;;  %v12330_v14 = vrot.slane %v8091_v63, 1 }
 0x242   : > { %v2320_v22 = vsel %vm2301_vm4, %v12327_v13, %v2297_v8  ;;  %v2321_v30 = vsel %vm2301_vm4, %v12328_v34, %v2298_v54  ;;  %v12332_v2 = vrot.slane %v8002_v46, 1  ;;  %v12333_v8 = vrot.slane %v7934_v25, 1 }
 0x243   : > { %v2322_v40 = vsel %vm2301_vm4, %v12329_v44, %v2299_v6  ;;  %v8222_v7 = vsel %vm2301_vm4, %v12330_v14, %v2300_v35  ;;  %v12334_v54 = vrot.slane %v12265_v45, 1  ;;  %v12335_v34 = vrot.slane %v7937_v51, 1 }
 0x244   : > { %12331 = vst [vmem:[#allocation149_spill] sm:$0xff] %v8222_v7  ;;  %v2324_v13 = vsel %vm2301_vm4, %v12333_v8, %v12332_v2  ;;  %v12336_v44 = vrot.slane %v12266_v1, 1  ;;  %v12337_v52 = vrot.slane %v7940_v3, 1  ;;  %v12338_v14 = vrot.slane %v8015_v26, 1 }
 0x245   : > { %v2325_v6 = vsel %vm2301_vm4, %v12335_v34, %v12334_v54  ;;  %v12339_v46 = vrot.slane %v7943_v55, 1  ;;  %v12340_v45 = vrot.slane %v8018_v62, 1  ;;  %v12341_v8 = vrot.slane %v7946_v28, 1 }
 0x246   : > { %v2326_v35 = vsel %vm2301_vm4, %v12337_v52, %v12336_v44  ;;  %v12342_v1 = vrot.slane %v8021_v20, 1  ;;  %v12343_v34 = vrot.slane %v7949_v15, 1  ;;  %v12344_v44 = vrot.slane %v8024_v39, 1  ;;  %v12351_v39 = vld [vmem:[#allocation114_spill] sm:$0xff] }
 0x247   : > { %v2327_v2 = vsel %vm2301_vm4, %v12339_v46, %v12338_v14  ;;  %v2328_v54 = vsel %vm2301_vm4, %v12341_v8, %v12340_v45  ;;  %v12345_v26 = vrot.slane %v7952_v5, 1  ;;  %v12346_v14 = vrot.slane %v8035_v38, 1  ;;  %v12354_v38 = vld [vmem:[#allocation132_spill] sm:$0xff] }
 0x248   : > { %v2329_v52 = vsel %vm2301_vm4, %v12343_v34, %v12342_v1  ;;  %v12347_v62 = vrot.slane %v7955_v31, 1  ;;  %v12348_v8 = vrot.slane %v8038_v57, 1  ;;  %v12349_v20 = vrot.slane %v7958_v21, 1  ;;  %v12357_v57 = vld [vmem:[#allocation72_spill] sm:$0xff] }
 0x249   : > { %v2330_v46 = vsel %vm2301_vm4, %v12345_v26, %v12344_v44  ;;  %v12350_v34 = vrot.slane %v8041_v47, 1  ;;  %v12352_v5 = vrot.slane %v12351_v39, 1  ;;  %v12353_v44 = vrot.slane %v8044_v50, 1  ;;  %v12360_v47 = vld [vmem:[#allocation133_spill] sm:$0xff] }
 0x24a   : > { %v2331_v45 = vsel %vm2301_vm4, %v12347_v62, %v12346_v14  ;;  %v2332_v1 = vsel %vm2301_vm4, %v12349_v20, %v12348_v8  ;;  %v12355_v31 = vrot.slane %v12354_v38, 1  ;;  %v12356_v14 = vrot.slane %v8053_v32, 1  ;;  %v12363_v50 = vld [vmem:[#allocation121_spill] sm:$0xff]  ;;  %v12366_v32 = vld [vmem:[#allocation134_spill] sm:$0xff] }
 0x24b   : > { %v2333_v26 = vsel %vm2301_vm4, %v12352_v5, %v12350_v34  ;;  %v12358_v21 = vrot.slane %v12357_v57, 1  ;;  %v12359_v8 = vrot.slane %v8056_v53, 1  ;;  %v12361_v39 = vrot.slane %v12360_v47, 1  ;;  %v12369_v53 = vld [vmem:[#allocation47_spill] sm:$0xff] }
 0x24c   : > { %v2334_v62 = vsel %vm2301_vm4, %v12355_v31, %v12353_v44  ;;  %v12362_v34 = vrot.slane %v8059_v18, 1  ;;  %v12364_v38 = vrot.slane %v12363_v50, 1  ;;  %v12365_v44 = vrot.slane %v8062_v23, 1  ;;  %v12372_v18 = vld [vmem:[#allocation41_spill] sm:$0xff]  ;;  %v12375_v23 = vld [vmem:[#allocation102_spill] sm:$0xff] }
 0x24d   : > { %v2335_v20 = vsel %vm2301_vm4, %v12358_v21, %v12356_v14  ;;  %v2336_v5 = vsel %vm2301_vm4, %v12361_v39, %v12359_v8  ;;  %v12367_v57 = vrot.slane %v12366_v32, 1  ;;  %v12368_v14 = vrot.slane %v8069_v43, 1  ;;  %v12378_v43 = vld [vmem:[#allocation79_spill] sm:$0xff] }
 0x24e   : > { %v2337_v31 = vsel %vm2301_vm4, %v12364_v38, %v12362_v34  ;;  %v12370_v47 = vrot.slane %v12369_v53, 1  ;;  %v12371_v8 = vrot.slane %v8072_v42, 1  ;;  %v12373_v50 = vrot.slane %v12372_v18, 1  ;;  %v12381_v42 = vld [vmem:[#allocation71_spill] sm:$0xff] }
 0x24f   : > { %v2338_v21 = vsel %vm2301_vm4, %v12367_v57, %v12365_v44  ;;  %v12374_v34 = vrot.slane %v8075_v10, 1  ;;  %v12376_v32 = vrot.slane %v12375_v23, 1  ;;  %v12377_v44 = vrot.slane %v8078_v29, 1  ;;  %v12384_v10 = vld [vmem:[#allocation82_spill] sm:$0xff]  ;;  %v12387_v29 = vld [vmem:[#allocation85_spill] sm:$0xff] }
 0x250   : > { %v2339_v39 = vsel %vm2301_vm4, %v12370_v47, %v12368_v14  ;;  %v2340_v38 = vsel %vm2301_vm4, %v12373_v50, %v12371_v8  ;;  %v12379_v53 = vrot.slane %v12378_v43, 1  ;;  %v12380_v14 = vrot.slane %v8085_v11, 1 }
 0x251   : > { %v2341_v57 = vsel %vm2301_vm4, %v12376_v32, %v12374_v34  ;;  %v12382_v18 = vrot.slane %v12381_v42, 1  ;;  %v12383_v8 = vrot.slane %v8088_v41, 1  ;;  %v12385_v23 = vrot.slane %v12384_v10, 1 }
 0x252   : > { %v2342_v47 = vsel %vm2301_vm4, %v12379_v53, %v12377_v44  ;;  %v12386_v34 = vrot.slane %v8091_v63, 1  ;;  %v12388_v43 = vrot.slane %v12387_v29, 1  ;;  %v2346_v44 = vpack.c.bf16 %v8133_v19, %v2324_v13 }
 0x253   : > { %v2343_v50 = vsel %vm2301_vm4, %v12382_v18, %v12380_v14  ;;  %v2344_v32 = vsel %vm2301_vm4, %v12385_v23, %v12383_v8  ;;  %v2347_v11 = vpack.c.bf16 %v2303_v48, %v2325_v6  ;;  %v8359_v42 = vpack.c.bf16 %v2304_v27, %v2326_v35  ;;  %v12390_v48 = vld [vmem:[#allocation148_spill] sm:$0xff]  ;;  %v12391_v27 = vld [vmem:[#allocation42_spill] sm:$0xff] }
 0x254   : > { %v8356_v53 = vsel %vm2301_vm4, %v12388_v43, %v12386_v34  ;;  %v8361_v18 = vpack.c.bf16 %v2305_v24, %v2327_v2  ;;  %v8363_v14 = vpack.c.bf16 %v2306_v17, %v2328_v54  ;;  %v8365_v41 = vpack.c.bf16 %v2307_v37, %v2329_v52  ;;  %v12406_v35 = vld [vmem:[#allocation54_spill] sm:$0xff] }
 0x255   : > { %12389 = vst [vmem:[#allocation150_spill] sm:$0xff] %v8356_v53  ;;  %v8367_v23 = vpack.c.bf16 %v2308_v33, %v2330_v46  ;;  %v8369_v8 = vpack.c.bf16 %v2309_v0, %v2331_v45  ;;  %v8371_v63 = vpack.c.bf16 %v2310_v12, %v2332_v1  ;;  %v8373_v58 = vpack.c.bf16 %v2311_v16, %v2333_v26 }
 0x256   : > { %v8375_v43 = vpack.c.bf16 %v2312_v60, %v2334_v62  ;;  %v8377_v19 = vpack.c.bf16 %v2313_v4, %v2335_v20  ;;  %v8381_v24 = vrot.slane %v12391_v27, %v12390_v48  ;;  %v8383_v17 = vpack.c.bf16 %v2314_v61, %v2336_v5 }
 0x257   : > { %v8385_v37 = vpack.c.bf16 %v2315_v9, %v2337_v31  ;;  %v8387_v33 = vpack.c.bf16 %v2316_v56, %v2338_v21  ;;  %v8389_v0 = vpack.c.bf16 %v2317_v59, %v2339_v39  ;;  %v8391_v12 = vpack.c.bf16 %v2318_v49, %v2340_v38  ;;  %v12401_v9 = vld [vmem:[#allocation46_spill] sm:$0xff]  ;;  %v12402_v56 = vld [vmem:[#allocation49_spill] sm:$0xff] }
 0x258   : > { %12392 = vst [vmem:[#allocation151_spill] sm:$0xff] %v8383_v17  ;;  %v8393_v16 = vpack.c.bf16 %v2319_v36, %v2341_v57  ;;  %v8395_v60 = vpack.c.bf16 %v2320_v22, %v2342_v47  ;;  %v8397_v4 = vpack.c.bf16 %v2321_v30, %v2343_v50  ;;  %v8399_v13 = vpack.c.bf16 %v2322_v40, %v2344_v32  ;;  %v12403_v36 = vld [vmem:[#allocation50_spill] sm:$0xff]  ;;  %v12404_v30 = vld [vmem:[#allocation53_spill] sm:$0xff] }
 0x259   : > { %12393 = vst [vmem:[#allocation152_spill] sm:$0xff] %v8385_v37  ;;  %12394 = vst [vmem:[#allocation153_spill] sm:$0xff] %v8387_v33  ;;  %v2391_v6 = vrot.slane %v12401_v9, %v12390_v48  ;;  %v8407_v59 = vrot.slane %v12402_v56, %v12390_v48  ;;  %v2372_v49 = vmul.bf16 %v8381_v24, %v2346_v44 }
 0x25a   : > { %12395 = vst [vmem:[#allocation154_spill] sm:$0xff] %v8389_v0  ;;  %12396 = vst [vmem:[#allocation155_spill] sm:$0xff] %v8391_v12  ;;  %v8412_v22 = vrot.slane %v12403_v36, %v12390_v48  ;;  %v8416_v40 = vrot.slane %v12404_v30, %v12390_v48  ;;  %v8420_v2 = vrot.slane %v12406_v35, %v12390_v48 }
 0x25b   : > { %12397 = vst [vmem:[#allocation156_spill] sm:$0xff] %v8393_v16  ;;  %12398 = vst [vmem:[#allocation157_spill] sm:$0xff] %v8395_v60  ;;  %v2373_v54 = vmul.bf16 %v8381_v24, %v2347_v11  ;;  %v2374_v52 = vmul.bf16 %v8381_v24, %v8359_v42  ;;  %v2375_v46 = vmul.bf16 %v8381_v24, %v8361_v18 }
 0x25c   : > { %12399 = vst [vmem:[#allocation158_spill] sm:$0xff] %v8397_v4  ;;  %12400 = vst [vmem:[#allocation159_spill] sm:$0xff] %v8399_v13  ;;  %v2376_v45 = vmul.bf16 %v8381_v24, %v8363_v14  ;;  %v2377_v1 = vmul.bf16 %v8381_v24, %v8365_v41  ;;  %v2378_v26 = vmul.bf16 %v8381_v24, %v8367_v23 }
 0x25d   : > { %12405 = vst [vmem:[#allocation160_spill] sm:$0xff] %v8416_v40  ;;  %12407 = vst [vmem:[#allocation161_spill] sm:$0xff] %v8420_v2  ;;  %v2379_v62 = vmul.bf16 %v8381_v24, %v8369_v8  ;;  %v2380_v20 = vmul.bf16 %v8381_v24, %v8371_v63  ;;  %v2381_v5 = vmul.bf16 %v8381_v24, %v8373_v58 }
 0x25e   : > { %v2382_v31 = vmul.bf16 %v8381_v24, %v8375_v43  ;;  %v2383_v21 = vmul.bf16 %v8381_v24, %v8377_v19  ;;  %v2384_v39 = vmul.bf16 %v8381_v24, %v8383_v17  ;;  %v2385_v38 = vmul.bf16 %v8381_v24, %v8385_v37 }
 0x25f   : > { %v2386_v57 = vmul.bf16 %v8381_v24, %v8387_v33  ;;  %v2387_v47 = vmul.bf16 %v8381_v24, %v8389_v0  ;;  %v2392_v50 = vmul.bf16 %v2391_v6, %v2347_v11  ;;  %v2393_v32 = vmul.bf16 %v2391_v6, %v8359_v42 }
 0x260   : > { %v2394_v34 = vmul.bf16 %v2391_v6, %v8361_v18  ;;  %v2395_v44 = vmul.bf16 %v2391_v6, %v8363_v14  ;;  %v2396_v61 = vmul.bf16 %v2391_v6, %v8365_v41  ;;  %v2397_v35 = vmul.bf16 %v2391_v6, %v8367_v23 }
 0x261   : > { %v2398_v30 = vmul.bf16 %v2391_v6, %v8369_v8  ;;  %v2406_v36 = vmul.bf16 %v2391_v6, %v8389_v0  ;;  %v2407_v56 = vmul.bf16 %v2391_v6, %v8391_v12  ;;  %v2399_v9 = vmul.bf16 %v2391_v6, %v8371_v63 }
 0x262   : > { %v2400_v11 = vmul.bf16 %v2391_v6, %v8373_v58  ;;  %v2401_v24 = vmul.bf16 %v2391_v6, %v8375_v43  ;;  %v2402_v27 = vmul.bf16 %v2391_v6, %v8377_v19  ;;  %v2403_v29 = vmul.bf16 %v2391_v6, %v8383_v17 }
 0x263   : > { %v2404_v10 = vmul.bf16 %v2391_v6, %v8385_v37  ;;  %v2405_v15 = vmul.bf16 %v2391_v6, %v8387_v33  ;;  %v2408_v28 = vadd.bf16 %v2392_v50, %v2372_v49  ;;  %v2409_v55 = vadd.bf16 %v2393_v32, %v2373_v54 }
 0x264   : > { %v2410_v3 = vadd.bf16 %v2394_v34, %v2374_v52  ;;  %v2411_v51 = vadd.bf16 %v2395_v44, %v2375_v46  ;;  %v2412_v25 = vadd.bf16 %v2396_v61, %v2376_v45  ;;  %v2422_v53 = vadd.bf16 %v2406_v36, %v2386_v57 }
 0x265   : > { %v2423_v7 = vadd.bf16 %v2407_v56, %v2387_v47  ;;  %v2442_v48 = vmul.bf16 %v8407_v59, %v8391_v12  ;;  %v2443_v13 = vmul.bf16 %v8407_v59, %v8393_v16  ;;  %v2413_v2 = vadd.bf16 %v2397_v35, %v2377_v1  ;;  %v12409_v35 = vld [vmem:[#allocation152_spill] sm:$0xff] }
 0x266   : > { %v2414_v4 = vadd.bf16 %v2398_v30, %v2378_v26  ;;  %v2415_v40 = vadd.bf16 %v2399_v9, %v2379_v62  ;;  %v2416_v0 = vadd.bf16 %v2400_v11, %v2380_v20  ;;  %v2417_v37 = vadd.bf16 %v2401_v24, %v2381_v5  ;;  %v12410_v26 = vld [vmem:[#allocation154_spill] sm:$0xff] }
 0x267   : > { %v2418_v17 = vadd.bf16 %v2402_v27, %v2382_v31  ;;  %v2419_v6 = vadd.bf16 %v2403_v29, %v2383_v21  ;;  %v2420_v49 = vadd.bf16 %v2404_v10, %v2384_v39  ;;  %v2421_v54 = vadd.bf16 %v2405_v15, %v2385_v38  ;;  %v12411_v21 = vld [vmem:[#allocation160_spill] sm:$0xff]  ;;  %v12412_v38 = vld [vmem:[#allocation158_spill] sm:$0xff] }
 0x268   : > { %v2428_v61 = vmul.bf16 %v8407_v59, %v8359_v42  ;;  %v2429_v56 = vmul.bf16 %v8407_v59, %v8361_v18  ;;  %v2430_v36 = vmul.bf16 %v8407_v59, %v8363_v14  ;;  %v2458_v52 = vadd.bf16 %v2442_v48, %v2422_v53 }
 0x269   : > { %v2459_v46 = vadd.bf16 %v2443_v13, %v2423_v7  ;;  %v2478_v9 = vmul.bf16 %v8412_v22, %v8393_v16  ;;  %v2479_v27 = vmul.bf16 %v8412_v22, %v8395_v60  ;;  %v2431_v29 = vmul.bf16 %v8407_v59, %v8365_v41  ;;  %v12408_v13 = vld [vmem:[#allocation151_spill] sm:$0xff] }
 0x26a   : > { %v2432_v10 = vmul.bf16 %v8407_v59, %v8367_v23  ;;  %v2433_v42 = vmul.bf16 %v8407_v59, %v8369_v8  ;;  %v2434_v15 = vmul.bf16 %v8407_v59, %v8371_v63  ;;  %v2435_v7 = vmul.bf16 %v8407_v59, %v8373_v58 }
 0x26b   : > { %v2436_v53 = vmul.bf16 %v8407_v59, %v8375_v43  ;;  %v2437_v48 = vmul.bf16 %v8407_v59, %v8377_v19  ;;  %v2438_v30 = vmul.bf16 %v8407_v59, %v12408_v13  ;;  %v2439_v45 = vmul.bf16 %v8407_v59, %v12409_v35 }
 0x26c   : > { %v2440_v1 = vmul.bf16 %v8407_v59, %v8387_v33  ;;  %v2441_v62 = vmul.bf16 %v8407_v59, %v12410_v26  ;;  %v2444_v20 = vadd.bf16 %v2428_v61, %v2408_v28  ;;  %v2494_v5 = vadd.bf16 %v2478_v9, %v2458_v52 }
 0x26d   : > { %v2495_v31 = vadd.bf16 %v2479_v27, %v2459_v46  ;;  %v2514_v39 = vmul.bf16 %v12411_v21, %v8395_v60  ;;  %v2515_v57 = vmul.bf16 %v12411_v21, %v12412_v38  ;;  %v2445_v47 = vadd.bf16 %v2429_v56, %v2409_v55  ;;  %v12413_v46 = vld [vmem:[#allocation161_spill] sm:$0xff]  ;;  %v12414_v27 = vld [vmem:[#allocation159_spill] sm:$0xff] }
 0x26e   : > { %v2446_v50 = vadd.bf16 %v2430_v36, %v2410_v3  ;;  %v2447_v32 = vadd.bf16 %v2431_v29, %v2411_v51  ;;  %v2448_v34 = vadd.bf16 %v2432_v10, %v2412_v25  ;;  %v2449_v44 = vadd.bf16 %v2433_v42, %v2413_v2  ;;  %v12418_v10 = vld [vmem:[#allocation149_spill] sm:$0xff]  ;;  %v12419_v42 = vld [vmem:[#allocation150_spill] sm:$0xff] }
 0x26f   : > { %v2450_v11 = vadd.bf16 %v2434_v15, %v2414_v4  ;;  %v2451_v24 = vadd.bf16 %v2435_v7, %v2415_v40  ;;  %v2452_v16 = vadd.bf16 %v2436_v53, %v2416_v0  ;;  %v2453_v12 = vadd.bf16 %v2437_v48, %v2417_v37  ;;  %v12415_v4 = vld [vmem:[#allocation148_spill] sm:$0xff]  ;;  %v12416_v40 = vld [vmem:[#allocation55_spill] sm:$0xff]  ;;  %v12421_v48 = vld [vmem:[#allocation153_spill] sm:$0xff] }
 0x270   : > { %v2454_v33 = vadd.bf16 %v2438_v30, %v2418_v17  ;;  %v2455_v59 = vadd.bf16 %v2439_v45, %v2419_v6  ;;  %v2456_v28 = vadd.bf16 %v2440_v1, %v2420_v49  ;;  %v2530_v61 = vadd.bf16 %v2514_v39, %v2494_v5  ;;  %v12422_v1 = vld [vmem:[#allocation155_spill] sm:$0xff] }
 0x271   : > { %v2531_v52 = vadd.bf16 %v2515_v57, %v2495_v31  ;;  %v2550_v9 = vmul.bf16 %v12413_v46, %v12412_v38  ;;  %v2551_v60 = vmul.bf16 %v12413_v46, %v12414_v27  ;;  %v2457_v55 = vadd.bf16 %v2441_v62, %v2421_v54 }
 0x272   : > { %v2464_v25 = vmul.bf16 %v8412_v22, %v8361_v18  ;;  %v2465_v51 = vmul.bf16 %v8412_v22, %v8363_v14  ;;  %v2466_v3 = vmul.bf16 %v8412_v22, %v8365_v41  ;;  %v2467_v17 = vmul.bf16 %v8412_v22, %v8367_v23 }
 0x273   : > { %v2468_v37 = vmul.bf16 %v8412_v22, %v8369_v8  ;;  %v2469_v0 = vmul.bf16 %v8412_v22, %v8371_v63  ;;  %v8524_v2 = vrot.slane %v12416_v40, %v12415_v4  ;;  %v2470_v18 = vmul.bf16 %v8412_v22, %v8373_v58 }
 0x274   : > { %v2471_v6 = vmul.bf16 %v8412_v22, %v8375_v43  ;;  %v2472_v49 = vmul.bf16 %v8412_v22, %v8377_v19  ;;  %v2473_v54 = vmul.bf16 %v8412_v22, %v12408_v13  ;;  %v2566_v56 = vadd.bf16 %v2550_v9, %v2530_v61 }
 0x275   : > { %12417 = vst [vmem:[#allocation151_spill] sm:$0xff] %v8524_v2  ;;  %v2567_v36 = vadd.bf16 %v2551_v60, %v2531_v52  ;;  %v2586_v29 = vmul.bf16 %v8524_v2, %v12414_v27  ;;  %v12420_v15 = vpack.c.bf16 %v12418_v10, %v12419_v42  ;;  %v2474_v53 = vmul.bf16 %v8412_v22, %v12409_v35 }
 0x276   : > { %v2475_v30 = vmul.bf16 %v8412_v22, %v12421_v48  ;;  %v2476_v45 = vmul.bf16 %v8412_v22, %v12410_v26  ;;  %v2477_v60 = vmul.bf16 %v8412_v22, %v12422_v1  ;;  %v2480_v62 = vadd.bf16 %v2464_v25, %v2444_v20  ;;  %v12423_v25 = vld [vmem:[#allocation156_spill] sm:$0xff] }
 0x277   : > { %v2587_v7 = vmul.bf16 %v8524_v2, %v12420_v15  ;;  %v2481_v5 = vadd.bf16 %v2465_v51, %v2445_v47  ;;  %v2482_v31 = vadd.bf16 %v2466_v3, %v2446_v50  ;;  %v2483_v39 = vadd.bf16 %v2467_v17, %v2447_v32 }
 0x278   : > { %v2484_v57 = vadd.bf16 %v2468_v37, %v2448_v34  ;;  %v2485_v61 = vadd.bf16 %v2469_v0, %v2449_v44  ;;  %v2486_v52 = vadd.bf16 %v2470_v18, %v2450_v11  ;;  %v2487_v9 = vadd.bf16 %v2471_v6, %v2451_v24 }
 0x279   : > { %v2488_v27 = vadd.bf16 %v2472_v49, %v2452_v16  ;;  %v2489_v10 = vadd.bf16 %v2473_v54, %v2453_v12  ;;  %v2602_v42 = vadd.bf16 %v2586_v29, %v2566_v56  ;;  %v2603_v15 = vadd.bf16 %v2587_v7, %v2567_v36  ;;  %v12424_v49 = vld [vmem:[#allocation143_spill] sm:$0xff]  ;;  %v12428_v29 = vld [vmem:[#allocation144_spill] sm:$0xff] }
 0x27a   : > { %v2490_v40 = vadd.bf16 %v2474_v53, %v2454_v33  ;;  %v2491_v4 = vadd.bf16 %v2475_v30, %v2455_v59  ;;  %v2492_v38 = vadd.bf16 %v2476_v45, %v2456_v28  ;;  %v2493_v2 = vadd.bf16 %v2477_v60, %v2457_v55  ;;  %v12426_v56 = vld [vmem:[#allocation119_spill] sm:$0xff]  ;;  %v12430_v53 = vld [vmem:[#allocation120_spill] sm:$0xff] }
 0x27b   : > { %v2500_v46 = vmul.bf16 %v12411_v21, %v8363_v14  ;;  %v2501_v22 = vmul.bf16 %v12411_v21, %v8365_v41  ;;  %v2502_v20 = vmul.bf16 %v12411_v21, %v8367_v23  ;;  %v2503_v47 = vmul.bf16 %v12411_v21, %v8369_v8 }
 0x27c   : > { %v2504_v12 = vmul.bf16 %v12411_v21, %v8371_v63  ;;  %v2505_v33 = vmul.bf16 %v12411_v21, %v8373_v58  ;;  %v2506_v16 = vmul.bf16 %v12411_v21, %v8375_v43  ;;  %v2507_v14 = vmul.bf16 %v12411_v21, %v8377_v19 }
 0x27d   : > { %v2632_v50 = vunpack.c.l.bf16 %v2602_v42  ;;  %v2633_v32 = vunpack.c.h.bf16 %v2602_v42  ;;  %v2634_v34 = vunpack.c.l.bf16 %v2603_v15  ;;  %v2635_v44 = vunpack.c.h.bf16 %v2603_v15 }
 0x27e   : > { %v2508_v11 = vmul.bf16 %v12411_v21, %v12408_v13  ;;  %v2509_v24 = vmul.bf16 %v12411_v21, %v12409_v35  ;;  %v2510_v59 = vmul.bf16 %v12411_v21, %v12421_v48  ;;  %v2511_v28 = vmul.bf16 %v12411_v21, %v12410_v26 }
 0x27f   : > { %v2512_v55 = vmul.bf16 %v12411_v21, %v12422_v1  ;;  %v2513_v51 = vmul.bf16 %v12411_v21, %v12423_v25  ;;  %v2516_v3 = vadd.bf16 %v2500_v46, %v2480_v62  ;;  %v2517_v17 = vadd.bf16 %v2501_v22, %v2481_v5 }
 0x280   : > { %v2518_v37 = vadd.bf16 %v2502_v20, %v2482_v31  ;;  %v2519_v0 = vadd.bf16 %v2503_v47, %v2483_v39  ;;  %v2520_v18 = vadd.bf16 %v2504_v12, %v2484_v57  ;;  %v2521_v6 = vadd.bf16 %v2505_v33, %v2485_v61  ;;  %v12432_v39 = vld [vmem:[#allocation161_spill] sm:$0xff]  ;;  %v12434_v47 = vld [vmem:[#allocation90_spill] sm:$0xff] }
 0x281   : > { %v8577_v54 = vadd.f32 %v2632_v50, %v12424_v49  ;;  %v8580_v36 = vadd.f32 %v2633_v32, %v12426_v56  ;;  %v8583_v7 = vadd.f32 %v2634_v34, %v12428_v29  ;;  %v8586_v30 = vadd.f32 %v2635_v44, %v12430_v53  ;;  %v12433_v20 = vld [vmem:[#allocation65_spill] sm:$0xff] }
 0x282   : > { %v2522_v45 = vadd.bf16 %v2506_v16, %v2486_v52  ;;  %v2523_v21 = vadd.bf16 %v2507_v14, %v2487_v9  ;;  %v2524_v46 = vadd.bf16 %v2508_v11, %v2488_v27  ;;  %v2525_v60 = vadd.bf16 %v2509_v24, %v2489_v10  ;;  %v12437_v14 = vld [vmem:[#allocation157_spill] sm:$0xff] }
 0x283   : > { %12425 = vst [vmem:[#allocation152_spill] sm:$0xff] %v8577_v54  ;;  %12427 = vst [vmem:[#allocation154_spill] sm:$0xff] %v8580_v36  ;;  %v2526_v62 = vadd.bf16 %v2510_v59, %v2490_v40  ;;  %v2527_v5 = vadd.bf16 %v2511_v28, %v2491_v4  ;;  %v2528_v31 = vadd.bf16 %v2512_v55, %v2492_v38  ;;  %v12435_v12 = vunpack.c.h.bf16 %v12434_v47  ;;  %v12542_v36 = vld [vmem:[#allocation108_spill] sm:$0xff] }
 0x284   : > { %12429 = vst [vmem:[#allocation160_spill] sm:$0xff] %v8583_v7  ;;  %12431 = vst [vmem:[#allocation159_spill] sm:$0xff] %v8586_v30  ;;  %v2536_v57 = vmul.bf16 %v12432_v39, %v8365_v41  ;;  %v2537_v61 = vmul.bf16 %v12432_v39, %v8367_v23  ;;  %v2538_v42 = vmul.bf16 %v12432_v39, %v8369_v8  ;;  %v12541_v7 = vld [vmem:[#allocation113_spill] sm:$0xff]  ;;  %v12543_v54 = vld [vmem:[#allocation96_spill] sm:$0xff] }
 0x285   : > { %v2539_v15 = vmul.bf16 %v12432_v39, %v8371_v63  ;;  %v2540_v52 = vmul.bf16 %v12432_v39, %v8373_v58  ;;  %v2541_v40 = vmul.bf16 %v12432_v39, %v8375_v43  ;;  %v2542_v38 = vmul.bf16 %v12432_v39, %v8377_v19 }
 0x286   : > { %v2543_v41 = vmul.bf16 %v12432_v39, %v12408_v13  ;;  %v2544_v4 = vmul.bf16 %v12432_v39, %v12409_v35  ;;  %v2545_v9 = vmul.bf16 %v12432_v39, %v12421_v48  ;;  %v2546_v27 = vmul.bf16 %v12432_v39, %v12410_v26 }
 0x287   : > { %v2547_v10 = vmul.bf16 %v12432_v39, %v12422_v1  ;;  %v2548_v22 = vmul.bf16 %v12432_v39, %v12423_v25  ;;  %v8617_v33 = vadd.f32 %v12435_v12, %v12433_v20  ;;  %v2529_v16 = vadd.bf16 %v2513_v51, %v2493_v2  ;;  %v12438_v20 = vld [vmem:[#allocation145_spill] sm:$0xff]  ;;  %v12439_v2 = vld [vmem:[#allocation128_spill] sm:$0xff] }
 0x288   : > { %v2549_v50 = vmul.bf16 %v12432_v39, %v12437_v14  ;;  %v2552_v32 = vadd.bf16 %v2536_v57, %v2516_v3  ;;  %v2553_v34 = vadd.bf16 %v2537_v61, %v2517_v17  ;;  %v2554_v44 = vadd.bf16 %v2538_v42, %v2518_v37  ;;  %v12441_v3 = vld [vmem:[#allocation151_spill] sm:$0xff]  ;;  %v12512_v39 = vld [vmem:[#allocation48_spill] sm:$0xff]  ;;  %v8751_v51 = vld [vmem:[#allocation2 + $0x30] sm:$0xff] }
 0x289   : > { %12436 = vst [vmem:[#allocation149_spill] sm:$0xff] %v8617_v33  ;;  %v2555_v11 = vadd.bf16 %v2539_v15, %v2519_v0  ;;  %v2556_v24 = vadd.bf16 %v2540_v52, %v2520_v18  ;;  %v2557_v59 = vadd.bf16 %v2541_v40, %v2521_v6  ;;  %v2558_v28 = vadd.bf16 %v2542_v38, %v2522_v45  ;;  %v12440_v33 = vld [vmem:[#allocation146_spill] sm:$0xff]  ;;  %v12442_v0 = vld [vmem:[#allocation129_spill] sm:$0xff]  ;;  %v12445_v61 = vld [vmem:[#allocation111_spill] sm:$0xff] }
 0x28a   : > { %v2559_v55 = vadd.bf16 %v2543_v41, %v2523_v21  ;;  %v2560_v49 = vadd.bf16 %v2544_v4, %v2524_v46  ;;  %v2561_v56 = vadd.bf16 %v2545_v9, %v2525_v60  ;;  %v2562_v29 = vadd.bf16 %v2546_v27, %v2526_v62  ;;  %v12443_v6 = vld [vmem:[#allocation137_spill] sm:$0xff]  ;;  %v12516_v12 = vld [vmem:[#allocation60_spill] sm:$0xff]  ;;  %v12545_v45 = vld [vmem:[#allocation35_spill] sm:$0xff] }
 0x28b   : > { %v2563_v53 = vadd.bf16 %v2547_v10, %v2527_v5  ;;  %v2564_v30 = vadd.bf16 %v2548_v22, %v2528_v31  ;;  %v2565_v47 = vadd.bf16 %v2549_v50, %v2529_v16  ;;  %v2572_v17 = vmul.bf16 %v12441_v3, %v8367_v23  ;;  %v12444_v31 = vld [vmem:[#allocation158_spill] sm:$0xff]  ;;  %v12544_v18 = vld [vmem:[#allocation117_spill] sm:$0xff] }
 0x28c   : > { %v2573_v37 = vmul.bf16 %v12441_v3, %v8369_v8  ;;  %v2574_v21 = vmul.bf16 %v12441_v3, %v8371_v63  ;;  %v2575_v46 = vmul.bf16 %v12441_v3, %v8373_v58  ;;  %v2576_v60 = vmul.bf16 %v12441_v3, %v8375_v43  ;;  %v12547_v42 = vld [vmem:[#allocation74_spill] sm:$0xff]  ;;  %v12548_v15 = vld [vmem:[#allocation77_spill] sm:$0xff] }
 0x28d   : > { %v2577_v62 = vmul.bf16 %v12441_v3, %v8377_v19  ;;  %v2578_v23 = vmul.bf16 %v12441_v3, %v12408_v13  ;;  %v2579_v8 = vmul.bf16 %v12441_v3, %v12409_v35  ;;  %v2580_v5 = vmul.bf16 %v12441_v3, %v12421_v48  ;;  %v12446_v48 = vld [vmem:[#allocation130_spill] sm:$0xff] }
 0x28e   : > { %v2581_v63 = vmul.bf16 %v12441_v3, %v12410_v26  ;;  %v2582_v58 = vmul.bf16 %v12441_v3, %v12422_v1  ;;  %v2583_v43 = vmul.bf16 %v12441_v3, %v12423_v25  ;;  %v2584_v19 = vmul.bf16 %v12441_v3, %v12437_v14 }
 0x28f   : > { %v2585_v13 = vmul.bf16 %v12441_v3, %v12444_v31  ;;  %v2588_v57 = vadd.bf16 %v2572_v17, %v2552_v32  ;;  %v2589_v35 = vadd.bf16 %v2573_v37, %v2553_v34  ;;  %v2590_v52 = vadd.bf16 %v2574_v21, %v2554_v44  ;;  %v12453_v31 = vld [vmem:[#allocation100_spill] sm:$0xff] }
 0x290   : > { %v2591_v26 = vadd.bf16 %v2575_v46, %v2555_v11  ;;  %v2592_v40 = vadd.bf16 %v2576_v60, %v2556_v24  ;;  %v2593_v38 = vadd.bf16 %v2577_v62, %v2557_v59  ;;  %v2594_v1 = vadd.bf16 %v2578_v23, %v2558_v28  ;;  %v12549_v23 = vld [vmem:[#allocation61_spill] sm:$0xff] }
 0x291   : > { %v2595_v41 = vadd.bf16 %v2579_v8, %v2559_v55  ;;  %v2596_v4 = vadd.bf16 %v2580_v5, %v2560_v49  ;;  %v2597_v25 = vadd.bf16 %v2581_v63, %v2561_v56  ;;  %v2598_v9 = vadd.bf16 %v2582_v58, %v2562_v29  ;;  %v12449_v63 = vld [vmem:[#allocation94_spill] sm:$0xff]  ;;  %v12515_v8 = vld [vmem:[#allocation135_spill] sm:$0xff] }
 0x292   : > { %v2599_v27 = vadd.bf16 %v2583_v43, %v2563_v53  ;;  %v8656_v10 = vadd.bf16 %v2584_v19, %v2564_v30  ;;  %v8658_v22 = vadd.bf16 %v2585_v13, %v2565_v47  ;;  %v2604_v16 = vunpack.c.l.bf16 %v2588_v57  ;;  %v12451_v43 = vld [vmem:[#allocation97_spill] sm:$0xff]  ;;  %v12552_v5 = vld [vmem:[#allocation38_spill] sm:$0xff] }
 0x293   : > { %v2605_v14 = vunpack.c.h.bf16 %v2588_v57  ;;  %v2606_v50 = vunpack.c.l.bf16 %v2589_v35  ;;  %v2607_v32 = vunpack.c.h.bf16 %v2589_v35  ;;  %v2608_v34 = vunpack.c.l.bf16 %v2590_v52  ;;  %v12455_v57 = vld [vmem:[#allocation103_spill] sm:$0xff] }
 0x294   : > { %12447 = vst [vmem:[#allocation150_spill] sm:$0xff] %v8656_v10  ;;  %12448 = vst [vmem:[#allocation153_spill] sm:$0xff] %v8658_v22  ;;  %v2609_v3 = vunpack.c.h.bf16 %v2590_v52  ;;  %v2610_v44 = vunpack.c.l.bf16 %v2591_v26  ;;  %v2611_v11 = vunpack.c.h.bf16 %v2591_v26  ;;  %v2612_v24 = vunpack.c.l.bf16 %v2592_v40  ;;  %v12457_v52 = vld [vmem:[#allocation106_spill] sm:$0xff]  ;;  %v12518_v22 = vld [vmem:[#allocation140_spill] sm:$0xff] }
 0x295   : > { %v2613_v59 = vunpack.c.h.bf16 %v2592_v40  ;;  %v2614_v28 = vunpack.c.l.bf16 %v2593_v38  ;;  %v2615_v55 = vunpack.c.h.bf16 %v2593_v38  ;;  %v2616_v49 = vunpack.c.l.bf16 %v2594_v1  ;;  %v12459_v40 = vld [vmem:[#allocation109_spill] sm:$0xff]  ;;  %v12540_v10 = vld [vmem:[#allocation51_spill] sm:$0xff] }
 0x296   : > { %v2617_v56 = vunpack.c.h.bf16 %v2594_v1  ;;  %v2618_v29 = vunpack.c.l.bf16 %v2595_v41  ;;  %v2619_v53 = vunpack.c.h.bf16 %v2595_v41  ;;  %v2620_v30 = vunpack.c.l.bf16 %v2596_v4  ;;  %v12461_v1 = vld [vmem:[#allocation112_spill] sm:$0xff]  ;;  %12513 = vst [vmem:[#allocation109_spill] sm:$0xff] %v8751_v51 }
 0x297   : > { %v2621_v17 = vunpack.c.h.bf16 %v2596_v4  ;;  %v2622_v47 = vunpack.c.l.bf16 %v2597_v25  ;;  %v2623_v37 = vunpack.c.h.bf16 %v2597_v25  ;;  %v2624_v21 = vunpack.c.l.bf16 %v2598_v9  ;;  %v12463_v4 = vld [vmem:[#allocation115_spill] sm:$0xff] }
 0x298   : > { %v2625_v46 = vunpack.c.h.bf16 %v2598_v9  ;;  %v2626_v60 = vunpack.c.l.bf16 %v2599_v27  ;;  %v2627_v62 = vunpack.c.h.bf16 %v2599_v27  ;;  %v8664_v58 = vadd.f32 %v2604_v16, %v12449_v63  ;;  %v12465_v9 = vld [vmem:[#allocation118_spill] sm:$0xff]  ;;  %v12467_v16 = vld [vmem:[#allocation45_spill] sm:$0xff] }
 0x299   : > { %v8667_v19 = vadd.f32 %v2605_v14, %v12451_v43  ;;  %v8670_v13 = vadd.f32 %v2606_v50, %v12453_v31  ;;  %v8673_v35 = vadd.f32 %v2607_v32, %v12455_v57  ;;  %v8676_v26 = vadd.f32 %v2608_v34, %v12457_v52  ;;  %v12469_v50 = vld [vmem:[#allocation44_spill] sm:$0xff]  ;;  %v12471_v34 = vld [vmem:[#allocation83_spill] sm:$0xff] }
 0x29a   : > { %12450 = vst [vmem:[#allocation155_spill] sm:$0xff] %v8664_v58  ;;  %v8679_v38 = vadd.f32 %v2609_v3, %v12459_v40  ;;  %v8682_v41 = vadd.f32 %v2610_v44, %v12461_v1  ;;  %v8685_v25 = vadd.f32 %v2611_v11, %v12463_v4  ;;  %v8688_v27 = vadd.f32 %v2612_v24, %v12465_v9  ;;  %v12473_v3 = vld [vmem:[#allocation86_spill] sm:$0xff]  ;;  %v12475_v44 = vld [vmem:[#allocation91_spill] sm:$0xff]  ;;  %v12477_v11 = vld [vmem:[#allocation92_spill] sm:$0xff] }
 0x29b   : > { %12452 = vst [vmem:[#allocation156_spill] sm:$0xff] %v8667_v19  ;;  %12454 = vst [vmem:[#allocation143_spill] sm:$0xff] %v8670_v13  ;;  %v8691_v14 = vadd.f32 %v2613_v59, %v12467_v16  ;;  %v8694_v32 = vadd.f32 %v2614_v28, %v12469_v50  ;;  %v8697_v63 = vadd.f32 %v2615_v55, %v12471_v34  ;;  %v12479_v24 = vld [vmem:[#allocation95_spill] sm:$0xff]  ;;  %v12481_v59 = vld [vmem:[#allocation98_spill] sm:$0xff]  ;;  %vm2734_vm5 = vcmp.lt.s32.totalorder %v12545_v45, 6 }
 0x29c   : > { %12456 = vst [vmem:[#allocation119_spill] sm:$0xff] %v8673_v35  ;;  %12458 = vst [vmem:[#allocation144_spill] sm:$0xff] %v8676_v26  ;;  %v8700_v43 = vadd.f32 %v2616_v49, %v12473_v3  ;;  %v8703_v31 = vadd.f32 %v2617_v56, %v12475_v44  ;;  %v8706_v57 = vadd.f32 %v2618_v29, %v12477_v11  ;;  %v12483_v28 = vld [vmem:[#allocation101_spill] sm:$0xff]  ;;  %v12485_v55 = vld [vmem:[#allocation104_spill] sm:$0xff] }
 0x29d   : > { %12460 = vst [vmem:[#allocation120_spill] sm:$0xff] %v8679_v38  ;;  %12462 = vst [vmem:[#allocation161_spill] sm:$0xff] %v8682_v41  ;;  %v8709_v52 = vadd.f32 %v2619_v53, %v12479_v24  ;;  %v8712_v40 = vadd.f32 %v2620_v30, %v12481_v59  ;;  %v8715_v1 = vadd.f32 %v2621_v17, %v12483_v28  ;;  %v12487_v49 = vld [vmem:[#allocation107_spill] sm:$0xff]  ;;  %v12489_v56 = vld [vmem:[#allocation110_spill] sm:$0xff] }
 0x29e   : > { %12464 = vst [vmem:[#allocation65_spill] sm:$0xff] %v8685_v25  ;;  %12466 = vst [vmem:[#allocation90_spill] sm:$0xff] %v8688_v27  ;;  %v8718_v4 = vadd.f32 %v2622_v47, %v12485_v55  ;;  %v8721_v9 = vadd.f32 %v2623_v37, %v12487_v49  ;;  %v8724_v16 = vadd.f32 %v2624_v21, %v12489_v56  ;;  %v12491_v29 = vld [vmem:[#allocation58_spill] sm:$0xff]  ;;  %v12495_v30 = vld [vmem:[#allocation105_spill] sm:$0xff]  ;;  %v2718_v56 = vrot.slane %v12540_v10, 2 }
 0x29f   : > { %12468 = vst [vmem:[#allocation157_spill] sm:$0xff] %v8691_v14  ;;  %12470 = vst [vmem:[#allocation145_spill] sm:$0xff] %v8694_v32  ;;  %v8727_v50 = vadd.f32 %v2625_v46, %v12491_v29  ;;  %v12493_v53 = vld [vmem:[#allocation66_spill] sm:$0xff]  ;;  %v8733_v3 = vadd.f32 %v2627_v62, %v12495_v30  ;;  %v12497_v17 = vld [vmem:[#allocation68_spill] sm:$0xff] }
 0x2a0   : > { %12472 = vst [vmem:[#allocation128_spill] sm:$0xff] %v8697_v63  ;;  %12474 = vst [vmem:[#allocation146_spill] sm:$0xff] %v8700_v43  ;;  %v8730_v34 = vadd.f32 %v2626_v60, %v12493_v53  ;;  %v12498_v11 = vld [vmem:[#allocation131_spill] sm:$0xff]  ;;  %v8754_v29 = vld [vmem:[#allocation2 + $0x50] sm:$0xff]  ;;  %v2720_v60 = vrot.slane %v12542_v36, 2  ;;  %v2729_v36 = vrot.slane %v12552_v5, 2 }
 0x2a1   : > { %12476 = vst [vmem:[#allocation151_spill] sm:$0xff] %v8703_v31  ;;  %12478 = vst [vmem:[#allocation129_spill] sm:$0xff] %v8706_v57  ;;  %v12525_v57 = vld [vmem:[#allocation116_spill] sm:$0xff]  ;;  %v12526_v31 = vld [vmem:[#allocation99_spill] sm:$0xff]  ;;  %v12559_v5 = vrot.slane %v8754_v29, 2 }
 0x2a2   : > { %12480 = vst [vmem:[#allocation137_spill] sm:$0xff] %v8709_v52  ;;  %12482 = vst [vmem:[#allocation158_spill] sm:$0xff] %v8712_v40  ;;  %v12524_v52 = vld [vmem:[#allocation69_spill] sm:$0xff]  ;;  %v12527_v43 = vld [vmem:[#allocation80_spill] sm:$0xff]  ;;  %v2721_v40 = vrot.slane %v12543_v54, 2 }
 0x2a3   : > { %12484 = vst [vmem:[#allocation111_spill] sm:$0xff] %v8715_v1  ;;  %12486 = vst [vmem:[#allocation130_spill] sm:$0xff] %v8718_v4  ;;  %v12522_v4 = vld [vmem:[#allocation57_spill] sm:$0xff]  ;;  %v12523_v1 = vld [vmem:[#allocation63_spill] sm:$0xff] }
 0x2a4   : > { %12488 = vst [vmem:[#allocation94_spill] sm:$0xff] %v8721_v9  ;;  %12490 = vst [vmem:[#allocation97_spill] sm:$0xff] %v8724_v16  ;;  %v12521_v16 = vld [vmem:[#allocation142_spill] sm:$0xff]  ;;  %v12529_v32 = vld [vmem:[#allocation52_spill] sm:$0xff]  ;;  %v2719_v9 = vrot.slane %v12541_v7, 2 }
 0x2a5   : > { %12492 = vst [vmem:[#allocation100_spill] sm:$0xff] %v8727_v50  ;;  %12494 = vst [vmem:[#allocation103_spill] sm:$0xff] %v8730_v34  ;;  %v12519_v34 = vld [vmem:[#allocation138_spill] sm:$0xff]  ;;  %v12520_v50 = vld [vmem:[#allocation139_spill] sm:$0xff] }
 0x2a6   : > { %12496 = vst [vmem:[#allocation106_spill] sm:$0xff] %v8733_v3  ;;  %12514 = vst [vmem:[#allocation112_spill] sm:$0xff] %v8754_v29  ;;  %v12517_v3 = vld [vmem:[#allocation136_spill] sm:$0xff]  ;;  %v12528_v63 = vld [vmem:[#allocation122_spill] sm:$0xff] }
 0x2a7   : > { %v12530_v14 = vld [vmem:[#allocation64_spill] sm:$0xff]  ;;  %v12531_v27 = vld [vmem:[#allocation123_spill] sm:$0xff]  ;;  %v12538_v19 = vld [vmem:[#allocation73_spill] sm:$0xff] }
 0x2a8   : > { %v12532_v25 = vld [vmem:[#allocation67_spill] sm:$0xff]  ;;  %v12533_v41 = vld [vmem:[#allocation36_spill] sm:$0xff]  ;;  %v2716_v28 = vrot.slane %v12538_v19, 2  ;;  %v12539_v58 = vld [vmem:[#allocation141_spill] sm:$0xff]  ;;  %v2725_v19 = vrot.slane %v12548_v15, 2 }
 0x2a9   : > { %v12534_v38 = vld [vmem:[#allocation124_spill] sm:$0xff]  ;;  %v12537_v13 = vld [vmem:[#allocation127_spill] sm:$0xff]  ;;  %v2717_v21 = vrot.slane %v12539_v58, 2  ;;  %v2726_v58 = vrot.slane %v12549_v23, 2  ;;  %v12551_v53 = vld [vmem:[#allocation37_spill] sm:$0xff]  ;;  %v12558_v23 = vrot.slane %v8751_v51, 2 }
 0x2aa   : > { %v2712_v30 = vrot.slane %v12534_v38, 2  ;;  %v12535_v26 = vld [vmem:[#allocation76_spill] sm:$0xff]  ;;  %v2715_v59 = vrot.slane %v12537_v13, 2  ;;  %v2722_v38 = vrot.slane %v12544_v18, 2  ;;  %v2724_v13 = vrot.slane %v12547_v42, 2  ;;  %v12550_v62 = vld [vmem:[#allocation75_spill] sm:$0xff] }
 0x2ab   : > { %v2713_v44 = vrot.slane %v12535_v26, 2  ;;  %v12536_v35 = vld [vmem:[#allocation88_spill] sm:$0xff]  ;;  %v12546_v26 = vld [vmem:[#allocation59_spill] sm:$0xff]  ;;  %v2727_v10 = vrot.slane %v12550_v62, 2  ;;  %v2728_v7 = vrot.slane %v12551_v53, 2  ;;  %v12554_v49 = vld [vmem:[#allocation70_spill] sm:$0xff] }
 0x2ac   : > { %v2714_v47 = vrot.slane %v12536_v35, 2  ;;  %v2723_v35 = vrot.slane %v12546_v26, 2  ;;  %v12553_v46 = vld [vmem:[#allocation39_spill] sm:$0xff]  ;;  %v2731_v18 = vrot.slane %v12554_v49, 2  ;;  %v12555_v55 = vld [vmem:[#allocation40_spill] sm:$0xff]  ;;  %v12557_v42 = vrot.slane %v12512_v39, 2 }
 0x2ad   : > { %v2730_v54 = vrot.slane %v12553_v46, 2  ;;  %v2732_v37 = vrot.slane %v12555_v55, 2  ;;  %v12556_v24 = vld [vmem:[#allocation147_spill] sm:$0xff]  ;;  %v2736_v53 = vsel %vm2734_vm5, %v12558_v23, %v2713_v44  ;;  %v12560_v55 = vrot.slane %v12515_v8, 2 }
 0x2ae   : > { %v2733_v26 = vrot.slane %v12556_v24, 2  ;;  %v8803_v15 = vsel %vm2734_vm5, %v12557_v42, %v2712_v30  ;;  %v2737_v49 = vsel %vm2734_vm5, %v12559_v5, %v2714_v47  ;;  %v12561_v46 = vrot.slane %v12516_v12, 2 }
 0x2af   : > { %v2738_v24 = vsel %vm2734_vm5, %v12560_v55, %v2715_v59  ;;  %v12562_v30 = vrot.slane %v12517_v3, 2  ;;  %v12563_v42 = vrot.slane %v12518_v22, 2  ;;  %v12564_v23 = vrot.slane %v12519_v34, 2 }
 0x2b0   : > { %v2739_v62 = vsel %vm2734_vm5, %v12561_v46, %v2716_v28  ;;  %v12565_v5 = vrot.slane %v12520_v50, 2  ;;  %v12566_v55 = vrot.slane %v12521_v16, 2  ;;  %v12567_v46 = vrot.slane %v12522_v4, 2 }
 0x2b1   : > { %v2740_v44 = vsel %vm2734_vm5, %v12562_v30, %v2717_v21  ;;  %v2741_v47 = vsel %vm2734_vm5, %v12563_v42, %v2718_v56  ;;  %v2742_v59 = vsel %vm2734_vm5, %v12564_v23, %v2719_v9  ;;  %v12568_v30 = vrot.slane %v12523_v1, 2 }
 0x2b2   : > { %v2743_v28 = vsel %vm2734_vm5, %v12565_v5, %v2720_v60  ;;  %v2744_v21 = vsel %vm2734_vm5, %v12566_v55, %v2721_v40  ;;  %v2745_v56 = vsel %vm2734_vm5, %v12567_v46, %v2722_v38  ;;  %v12569_v42 = vrot.slane %v12524_v52, 2 }
 0x2b3   : > { %v2746_v9 = vsel %vm2734_vm5, %v12568_v30, %v2723_v35  ;;  %v12570_v23 = vrot.slane %v12525_v57, 2  ;;  %v12571_v5 = vrot.slane %v12526_v31, 2  ;;  %v12572_v55 = vrot.slane %v12527_v43, 2 }
 0x2b4   : > { %v2747_v60 = vsel %vm2734_vm5, %v12569_v42, %v2724_v13  ;;  %v12573_v46 = vrot.slane %v12528_v63, 2  ;;  %v12574_v30 = vrot.slane %v12529_v32, 2  ;;  %v12575_v42 = vrot.slane %v12530_v14, 2 }
 0x2b5   : > { %v2748_v40 = vsel %vm2734_vm5, %v12570_v23, %v2725_v19  ;;  %v2749_v38 = vsel %vm2734_vm5, %v12571_v5, %v2726_v58  ;;  %v2750_v35 = vsel %vm2734_vm5, %v12572_v55, %v2727_v10  ;;  %v12576_v23 = vrot.slane %v12531_v27, 2 }
 0x2b6   : > { %v2751_v13 = vsel %vm2734_vm5, %v12573_v46, %v2728_v7  ;;  %v2752_v19 = vsel %vm2734_vm5, %v12574_v30, %v2729_v36  ;;  %v2753_v58 = vsel %vm2734_vm5, %v12575_v42, %v2730_v54  ;;  %v12577_v5 = vrot.slane %v12532_v25, 2 }
 0x2b7   : > { %v2754_v10 = vsel %vm2734_vm5, %v12576_v23, %v2731_v18  ;;  %v12578_v55 = vrot.slane %v12533_v41, 2  ;;  %v12580_v46 = vrot.slane %v12512_v39, 2  ;;  %v12581_v54 = vrot.slane %v12438_v20, 2 }
 0x2b8   : > { %v2755_v7 = vsel %vm2734_vm5, %v12577_v5, %v2732_v37  ;;  %v12582_v18 = vrot.slane %v8751_v51, 2  ;;  %v12583_v42 = vrot.slane %v12439_v2, 2  ;;  %v12584_v23 = vrot.slane %v8754_v29, 2 }
 0x2b9   : > { %v8889_v36 = vsel %vm2734_vm5, %v12578_v55, %v2733_v26  ;;  %v2757_v30 = vsel %vm2734_vm5, %v12581_v54, %v12580_v46  ;;  %v12585_v5 = vrot.slane %v12440_v33, 2  ;;  %v12586_v39 = vrot.slane %v12515_v8, 2 }
 0x2ba   : > { %12579 = vst [vmem:[#allocation115_spill] sm:$0xff] %v8889_v36  ;;  %v2758_v37 = vsel %vm2734_vm5, %v12583_v42, %v12582_v18  ;;  %v12587_v20 = vrot.slane %v12442_v0, 2  ;;  %v12588_v46 = vrot.slane %v12516_v12, 2  ;;  %v12589_v2 = vrot.slane %v12443_v6, 2 }
 0x2bb   : > { %v2759_v26 = vsel %vm2734_vm5, %v12585_v5, %v12584_v23  ;;  %v12590_v18 = vrot.slane %v12517_v3, 2  ;;  %v12591_v33 = vrot.slane %v12445_v61, 2  ;;  %v12592_v8 = vrot.slane %v12518_v22, 2 }
 0x2bc   : > { %v2760_v55 = vsel %vm2734_vm5, %v12587_v20, %v12586_v39  ;;  %v2761_v54 = vsel %vm2734_vm5, %v12589_v2, %v12588_v46  ;;  %v12593_v0 = vrot.slane %v12446_v48, 2  ;;  %v12594_v12 = vrot.slane %v12519_v34, 2  ;;  %v12599_v48 = vld [vmem:[#allocation114_spill] sm:$0xff] }
 0x2bd   : > { %v2762_v42 = vsel %vm2734_vm5, %v12591_v33, %v12590_v18  ;;  %v12595_v6 = vrot.slane %v12497_v17, 2  ;;  %v12596_v3 = vrot.slane %v12520_v50, 2  ;;  %v12597_v61 = vrot.slane %v12498_v11, 2  ;;  %v12602_v17 = vld [vmem:[#allocation132_spill] sm:$0xff] }
 0x2be   : > { %v2763_v23 = vsel %vm2734_vm5, %v12593_v0, %v12592_v8  ;;  %v12598_v22 = vrot.slane %v12521_v16, 2  ;;  %v12600_v20 = vrot.slane %v12599_v48, 2  ;;  %v12601_v34 = vrot.slane %v12522_v4, 2  ;;  %v12605_v11 = vld [vmem:[#allocation72_spill] sm:$0xff]  ;;  %v12608_v0 = vld [vmem:[#allocation133_spill] sm:$0xff]  ;;  %v12614_v48 = vld [vmem:[#allocation134_spill] sm:$0xff] }
 0x2bf   : > { %v2764_v5 = vsel %vm2734_vm5, %v12595_v6, %v12594_v12  ;;  %v2765_v39 = vsel %vm2734_vm5, %v12597_v61, %v12596_v3  ;;  %v12603_v2 = vrot.slane %v12602_v17, 2  ;;  %v12604_v50 = vrot.slane %v12523_v1, 2  ;;  %v12611_v3 = vld [vmem:[#allocation121_spill] sm:$0xff]  ;;  %v12617_v17 = vld [vmem:[#allocation47_spill] sm:$0xff] }
 0x2c0   : > { %v2766_v46 = vsel %vm2734_vm5, %v12600_v20, %v12598_v22  ;;  %v12606_v33 = vrot.slane %v12605_v11, 2  ;;  %v12607_v16 = vrot.slane %v12524_v52, 2  ;;  %v12609_v12 = vrot.slane %v12608_v0, 2  ;;  %v12620_v11 = vld [vmem:[#allocation41_spill] sm:$0xff]  ;;  %v12623_v0 = vld [vmem:[#allocation102_spill] sm:$0xff] }
 0x2c1   : > { %v2767_v18 = vsel %vm2734_vm5, %v12603_v2, %v12601_v34  ;;  %v12610_v4 = vrot.slane %v12525_v57, 2  ;;  %v12612_v61 = vrot.slane %v12611_v3, 2  ;;  %v12613_v1 = vrot.slane %v12526_v31, 2  ;;  %v12626_v3 = vld [vmem:[#allocation79_spill] sm:$0xff] }
 0x2c2   : > { %v2768_v8 = vsel %vm2734_vm5, %v12606_v33, %v12604_v50  ;;  %v2769_v6 = vsel %vm2734_vm5, %v12609_v12, %v12607_v16  ;;  %v12615_v20 = vrot.slane %v12614_v48, 2  ;;  %v12616_v52 = vrot.slane %v12527_v43, 2  ;;  %v12629_v48 = vld [vmem:[#allocation71_spill] sm:$0xff] }
 0x2c3   : > { %v2770_v22 = vsel %vm2734_vm5, %v12612_v61, %v12610_v4  ;;  %v12618_v2 = vrot.slane %v12617_v17, 2  ;;  %v12619_v57 = vrot.slane %v12528_v63, 2  ;;  %v12621_v33 = vrot.slane %v12620_v11, 2  ;;  %v12632_v17 = vld [vmem:[#allocation82_spill] sm:$0xff]  ;;  %v12635_v11 = vld [vmem:[#allocation85_spill] sm:$0xff] }
 0x2c4   : > { %v2771_v34 = vsel %vm2734_vm5, %v12615_v20, %v12613_v1  ;;  %v12622_v31 = vrot.slane %v12529_v32, 2  ;;  %v12624_v12 = vrot.slane %v12623_v0, 2  ;;  %v12625_v43 = vrot.slane %v12530_v14, 2 }
 0x2c5   : > { %v2772_v50 = vsel %vm2734_vm5, %v12618_v2, %v12616_v52  ;;  %v2773_v16 = vsel %vm2734_vm5, %v12621_v33, %v12619_v57  ;;  %v12627_v61 = vrot.slane %v12626_v3, 2  ;;  %v12628_v63 = vrot.slane %v12531_v27, 2 }
 0x2c6   : > { %v2774_v4 = vsel %vm2734_vm5, %v12624_v12, %v12622_v31  ;;  %v12630_v20 = vrot.slane %v12629_v48, 2  ;;  %v12631_v32 = vrot.slane %v12532_v25, 2  ;;  %v12633_v2 = vrot.slane %v12632_v17, 2 }
 0x2c7   : > { %v2775_v1 = vsel %vm2734_vm5, %v12627_v61, %v12625_v43  ;;  %v12634_v14 = vrot.slane %v12533_v41, 2  ;;  %v12636_v33 = vrot.slane %v12635_v11, 2  ;;  %v2779_v27 = vpack.c.bf16 %v8803_v15, %v2757_v30 }
 0x2c8   : > { %v2776_v52 = vsel %vm2734_vm5, %v12630_v20, %v12628_v63  ;;  %v2777_v57 = vsel %vm2734_vm5, %v12633_v2, %v12631_v32  ;;  %v2780_v0 = vpack.c.bf16 %v2736_v53, %v2758_v37  ;;  %v9026_v12 = vpack.c.bf16 %v2737_v49, %v2759_v26  ;;  %v12638_v53 = vld [vmem:[#allocation148_spill] sm:$0xff]  ;;  %v12654_v26 = vld [vmem:[#allocation89_spill] sm:$0xff] }
 0x2c9   : > { %v9023_v31 = vsel %vm2734_vm5, %v12636_v33, %v12634_v14  ;;  %v9028_v43 = vpack.c.bf16 %v2738_v24, %v2760_v55  ;;  %v9030_v25 = vpack.c.bf16 %v2739_v62, %v2761_v54  ;;  %v9032_v3 = vpack.c.bf16 %v2740_v44, %v2762_v42  ;;  %v12639_v49 = vld [vmem:[#allocation56_spill] sm:$0xff] }
 0x2ca   : > { %12637 = vst [vmem:[#allocation118_spill] sm:$0xff] %v9023_v31  ;;  %v9034_v61 = vpack.c.bf16 %v2741_v47, %v2763_v23  ;;  %v9036_v41 = vpack.c.bf16 %v2742_v59, %v2764_v5  ;;  %v9038_v63 = vpack.c.bf16 %v2743_v28, %v2765_v39  ;;  %v9040_v48 = vpack.c.bf16 %v2744_v21, %v2766_v46 }
 0x2cb   : > { %v9042_v20 = vpack.c.bf16 %v2745_v56, %v2767_v18  ;;  %v9044_v15 = vpack.c.bf16 %v2746_v9, %v2768_v8  ;;  %v9048_v24 = vrot.slane %v12639_v49, %v12638_v53  ;;  %v9050_v62 = vpack.c.bf16 %v2747_v60, %v2769_v6 }
 0x2cc   : > { %v9052_v44 = vpack.c.bf16 %v2748_v40, %v2770_v22  ;;  %v9054_v47 = vpack.c.bf16 %v2749_v38, %v2771_v34  ;;  %v9056_v59 = vpack.c.bf16 %v2750_v35, %v2772_v50  ;;  %v9058_v28 = vpack.c.bf16 %v2751_v13, %v2773_v16  ;;  %v12649_v40 = vld [vmem:[#allocation78_spill] sm:$0xff]  ;;  %v12650_v38 = vld [vmem:[#allocation81_spill] sm:$0xff] }
 0x2cd   : > { %12640 = vst [vmem:[#allocation45_spill] sm:$0xff] %v9050_v62  ;;  %v9060_v21 = vpack.c.bf16 %v2752_v19, %v2774_v4  ;;  %v9062_v56 = vpack.c.bf16 %v2753_v58, %v2775_v1  ;;  %v9064_v9 = vpack.c.bf16 %v2754_v10, %v2776_v52  ;;  %v9066_v30 = vpack.c.bf16 %v2755_v7, %v2777_v57  ;;  %v12651_v19 = vld [vmem:[#allocation84_spill] sm:$0xff]  ;;  %v12652_v10 = vld [vmem:[#allocation87_spill] sm:$0xff] }
 0x2ce   : > { %12641 = vst [vmem:[#allocation44_spill] sm:$0xff] %v9052_v44  ;;  %12642 = vst [vmem:[#allocation83_spill] sm:$0xff] %v9054_v47  ;;  %v2824_v37 = vrot.slane %v12649_v40, %v12638_v53  ;;  %v9074_v35 = vrot.slane %v12650_v38, %v12638_v53  ;;  %v2805_v13 = vmul.bf16 %v9048_v24, %v2779_v27 }
 0x2cf   : > { %12643 = vst [vmem:[#allocation86_spill] sm:$0xff] %v9056_v59  ;;  %12644 = vst [vmem:[#allocation91_spill] sm:$0xff] %v9058_v28  ;;  %v9079_v58 = vrot.slane %v12651_v19, %v12638_v53  ;;  %v9083_v7 = vrot.slane %v12652_v10, %v12638_v53  ;;  %v9087_v55 = vrot.slane %v12654_v26, %v12638_v53 }
 0x2d0   : > { %12645 = vst [vmem:[#allocation92_spill] sm:$0xff] %v9060_v21  ;;  %12646 = vst [vmem:[#allocation95_spill] sm:$0xff] %v9062_v56  ;;  %v2806_v54 = vmul.bf16 %v9048_v24, %v2780_v0  ;;  %v2807_v42 = vmul.bf16 %v9048_v24, %v9026_v12  ;;  %v2808_v23 = vmul.bf16 %v9048_v24, %v9028_v43 }
 0x2d1   : > { %12647 = vst [vmem:[#allocation98_spill] sm:$0xff] %v9064_v9  ;;  %12648 = vst [vmem:[#allocation101_spill] sm:$0xff] %v9066_v30  ;;  %v2809_v5 = vmul.bf16 %v9048_v24, %v9030_v25  ;;  %v2810_v39 = vmul.bf16 %v9048_v24, %v9032_v3  ;;  %v2811_v46 = vmul.bf16 %v9048_v24, %v9034_v61 }
 0x2d2   : > { %12653 = vst [vmem:[#allocation104_spill] sm:$0xff] %v9083_v7  ;;  %12655 = vst [vmem:[#allocation107_spill] sm:$0xff] %v9087_v55  ;;  %v2812_v18 = vmul.bf16 %v9048_v24, %v9036_v41  ;;  %v2813_v8 = vmul.bf16 %v9048_v24, %v9038_v63  ;;  %v2814_v6 = vmul.bf16 %v9048_v24, %v9040_v48 }
 0x2d3   : > { %v2815_v22 = vmul.bf16 %v9048_v24, %v9042_v20  ;;  %v2816_v34 = vmul.bf16 %v9048_v24, %v9044_v15  ;;  %v2817_v50 = vmul.bf16 %v9048_v24, %v9050_v62  ;;  %v2818_v16 = vmul.bf16 %v9048_v24, %v9052_v44 }
 0x2d4   : > { %v2819_v4 = vmul.bf16 %v9048_v24, %v9054_v47  ;;  %v2820_v1 = vmul.bf16 %v9048_v24, %v9056_v59  ;;  %v2825_v52 = vmul.bf16 %v2824_v37, %v2780_v0  ;;  %v2826_v32 = vmul.bf16 %v2824_v37, %v9026_v12 }
 0x2d5   : > { %v2827_v17 = vmul.bf16 %v2824_v37, %v9028_v43  ;;  %v2828_v2 = vmul.bf16 %v2824_v37, %v9030_v25  ;;  %v2829_v57 = vmul.bf16 %v2824_v37, %v9032_v3  ;;  %v2830_v14 = vmul.bf16 %v2824_v37, %v9034_v61 }
 0x2d6   : > { %v2831_v11 = vmul.bf16 %v2824_v37, %v9036_v41  ;;  %v2832_v33 = vmul.bf16 %v2824_v37, %v9038_v63  ;;  %v2833_v27 = vmul.bf16 %v2824_v37, %v9040_v48  ;;  %v2834_v49 = vmul.bf16 %v2824_v37, %v9042_v20 }
 0x2d7   : > { %v2835_v0 = vmul.bf16 %v2824_v37, %v9044_v15  ;;  %v2839_v24 = vmul.bf16 %v2824_v37, %v9056_v59  ;;  %v2840_v40 = vmul.bf16 %v2824_v37, %v9058_v28  ;;  %v2836_v38 = vmul.bf16 %v2824_v37, %v9050_v62 }
 0x2d8   : > { %v2837_v19 = vmul.bf16 %v2824_v37, %v9052_v44  ;;  %v2838_v10 = vmul.bf16 %v2824_v37, %v9054_v47  ;;  %v2841_v26 = vadd.bf16 %v2825_v52, %v2805_v13  ;;  %v2842_v60 = vadd.bf16 %v2826_v32, %v2806_v54 }
 0x2d9   : > { %v2843_v45 = vadd.bf16 %v2827_v17, %v2807_v42  ;;  %v2844_v29 = vadd.bf16 %v2828_v2, %v2808_v23  ;;  %v2845_v51 = vadd.bf16 %v2829_v57, %v2809_v5  ;;  %v2846_v31 = vadd.bf16 %v2830_v14, %v2810_v39 }
 0x2da   : > { %v2847_v36 = vadd.bf16 %v2831_v11, %v2811_v46  ;;  %v2848_v53 = vadd.bf16 %v2832_v33, %v2812_v18  ;;  %v2849_v30 = vadd.bf16 %v2833_v27, %v2813_v8  ;;  %v2855_v55 = vadd.bf16 %v2839_v24, %v2819_v4  ;;  %v12660_v24 = vld [vmem:[#allocation98_spill] sm:$0xff] }
 0x2db   : > { %v2856_v9 = vadd.bf16 %v2840_v40, %v2820_v1  ;;  %v2875_v7 = vmul.bf16 %v9074_v35, %v9058_v28  ;;  %v2876_v59 = vmul.bf16 %v9074_v35, %v9060_v21  ;;  %v2850_v44 = vadd.bf16 %v2834_v49, %v2814_v6  ;;  %v12656_v1 = vld [vmem:[#allocation45_spill] sm:$0xff]  ;;  %v12659_v49 = vld [vmem:[#allocation104_spill] sm:$0xff] }
 0x2dc   : > { %v2851_v62 = vadd.bf16 %v2835_v0, %v2815_v22  ;;  %v2852_v37 = vadd.bf16 %v2836_v38, %v2816_v34  ;;  %v2853_v13 = vadd.bf16 %v2837_v19, %v2817_v50  ;;  %v2854_v54 = vadd.bf16 %v2838_v10, %v2818_v16 }
 0x2dd   : > { %v2861_v42 = vmul.bf16 %v9074_v35, %v9026_v12  ;;  %v2862_v23 = vmul.bf16 %v9074_v35, %v9028_v43  ;;  %v2863_v5 = vmul.bf16 %v9074_v35, %v9030_v25  ;;  %v2864_v39 = vmul.bf16 %v9074_v35, %v9032_v3 }
 0x2de   : > { %v2865_v46 = vmul.bf16 %v9074_v35, %v9034_v61  ;;  %v2866_v18 = vmul.bf16 %v9074_v35, %v9036_v41  ;;  %v2867_v8 = vmul.bf16 %v9074_v35, %v9038_v63  ;;  %v2891_v6 = vadd.bf16 %v2875_v7, %v2855_v55  ;;  %v12657_v7 = vld [vmem:[#allocation44_spill] sm:$0xff]  ;;  %v12658_v55 = vld [vmem:[#allocation86_spill] sm:$0xff] }
 0x2df   : > { %v2892_v12 = vadd.bf16 %v2876_v59, %v2856_v9  ;;  %v2911_v22 = vmul.bf16 %v9079_v58, %v9060_v21  ;;  %v2912_v34 = vmul.bf16 %v9079_v58, %v9062_v56  ;;  %v2868_v50 = vmul.bf16 %v9074_v35, %v9040_v48 }
 0x2e0   : > { %v2869_v16 = vmul.bf16 %v9074_v35, %v9042_v20  ;;  %v2870_v4 = vmul.bf16 %v9074_v35, %v9044_v15  ;;  %v2871_v52 = vmul.bf16 %v9074_v35, %v12656_v1  ;;  %v2872_v59 = vmul.bf16 %v9074_v35, %v12657_v7 }
 0x2e1   : > { %v2873_v9 = vmul.bf16 %v9074_v35, %v9054_v47  ;;  %v2874_v32 = vmul.bf16 %v9074_v35, %v12658_v55  ;;  %v2877_v17 = vadd.bf16 %v2861_v42, %v2841_v26  ;;  %v2878_v2 = vadd.bf16 %v2862_v23, %v2842_v60 }
 0x2e2   : > { %v2879_v57 = vadd.bf16 %v2863_v5, %v2843_v45  ;;  %v2880_v14 = vadd.bf16 %v2864_v39, %v2844_v29  ;;  %v2881_v11 = vadd.bf16 %v2865_v46, %v2845_v51  ;;  %v2927_v33 = vadd.bf16 %v2911_v22, %v2891_v6  ;;  %v12663_v39 = vld [vmem:[#allocation148_spill] sm:$0xff]  ;;  %v12664_v46 = vld [vmem:[#allocation93_spill] sm:$0xff]  ;;  %v12666_v6 = vld [vmem:[#allocation83_spill] sm:$0xff] }
 0x2e3   : > { %v2928_v27 = vadd.bf16 %v2912_v34, %v2892_v12  ;;  %v2947_v0 = vmul.bf16 %v12659_v49, %v9062_v56  ;;  %v2948_v40 = vmul.bf16 %v12659_v49, %v12660_v24  ;;  %v2882_v38 = vadd.bf16 %v2866_v18, %v2846_v31  ;;  %v12667_v34 = vld [vmem:[#allocation91_spill] sm:$0xff] }
 0x2e4   : > { %v2883_v19 = vadd.bf16 %v2867_v8, %v2847_v36  ;;  %v2884_v10 = vadd.bf16 %v2868_v50, %v2848_v53  ;;  %v2885_v21 = vadd.bf16 %v2869_v16, %v2849_v30  ;;  %v2886_v28 = vadd.bf16 %v2870_v4, %v2850_v44  ;;  %v12661_v36 = vld [vmem:[#allocation107_spill] sm:$0xff]  ;;  %v12662_v53 = vld [vmem:[#allocation101_spill] sm:$0xff] }
 0x2e5   : > { %v2887_v47 = vadd.bf16 %v2871_v52, %v2851_v62  ;;  %v2888_v35 = vadd.bf16 %v2872_v59, %v2852_v37  ;;  %v2889_v26 = vadd.bf16 %v2873_v9, %v2853_v13  ;;  %v2890_v60 = vadd.bf16 %v2874_v32, %v2854_v54  ;;  %v12668_v59 = vld [vmem:[#allocation115_spill] sm:$0xff]  ;;  %v12669_v9 = vld [vmem:[#allocation118_spill] sm:$0xff] }
 0x2e6   : > { %v2897_v51 = vmul.bf16 %v9079_v58, %v9028_v43  ;;  %v2898_v45 = vmul.bf16 %v9079_v58, %v9030_v25  ;;  %v2899_v29 = vmul.bf16 %v9079_v58, %v9032_v3  ;;  %v2963_v42 = vadd.bf16 %v2947_v0, %v2927_v33 }
 0x2e7   : > { %v2964_v23 = vadd.bf16 %v2948_v40, %v2928_v27  ;;  %v2983_v31 = vmul.bf16 %v12661_v36, %v12660_v24  ;;  %v2984_v62 = vmul.bf16 %v12661_v36, %v12662_v53  ;;  %v2900_v44 = vmul.bf16 %v9079_v58, %v9034_v61 }
 0x2e8   : > { %v2901_v43 = vmul.bf16 %v9079_v58, %v9036_v41  ;;  %v2902_v30 = vmul.bf16 %v9079_v58, %v9038_v63  ;;  %v2903_v37 = vmul.bf16 %v9079_v58, %v9040_v48  ;;  %v2904_v13 = vmul.bf16 %v9079_v58, %v9042_v20 }
 0x2e9   : > { %v2905_v54 = vmul.bf16 %v9079_v58, %v9044_v15  ;;  %v2906_v5 = vmul.bf16 %v9079_v58, %v12656_v1  ;;  %v9199_v18 = vrot.slane %v12664_v46, %v12663_v39  ;;  %v2907_v8 = vmul.bf16 %v9079_v58, %v12657_v7 }
 0x2ea   : > { %v2908_v12 = vmul.bf16 %v9079_v58, %v12666_v6  ;;  %v2909_v22 = vmul.bf16 %v9079_v58, %v12658_v55  ;;  %v2910_v50 = vmul.bf16 %v9079_v58, %v12667_v34  ;;  %v2999_v16 = vadd.bf16 %v2983_v31, %v2963_v42 }
 0x2eb   : > { %12665 = vst [vmem:[#allocation110_spill] sm:$0xff] %v9199_v18  ;;  %v3000_v4 = vadd.bf16 %v2984_v62, %v2964_v23  ;;  %v3019_v52 = vmul.bf16 %v9199_v18, %v12662_v53  ;;  %v12670_v32 = vpack.c.bf16 %v12668_v59, %v12669_v9  ;;  %v2913_v27 = vadd.bf16 %v2897_v51, %v2877_v17 }
 0x2ec   : > { %v2914_v0 = vadd.bf16 %v2898_v45, %v2878_v2  ;;  %v2915_v40 = vadd.bf16 %v2899_v29, %v2879_v57  ;;  %v2916_v39 = vadd.bf16 %v2900_v44, %v2880_v14  ;;  %v2917_v46 = vadd.bf16 %v2901_v43, %v2881_v11  ;;  %v12672_v45 = vld [vmem:[#allocation91_spill] sm:$0xff]  ;;  %v12673_v44 = vld [vmem:[#allocation92_spill] sm:$0xff] }
 0x2ed   : > { %v3020_v33 = vmul.bf16 %v9199_v18, %v12670_v32  ;;  %v2918_v24 = vadd.bf16 %v2902_v30, %v2882_v38  ;;  %v2919_v56 = vadd.bf16 %v2903_v37, %v2883_v19  ;;  %v2920_v36 = vadd.bf16 %v2904_v13, %v2884_v10  ;;  %v12671_v19 = vld [vmem:[#allocation86_spill] sm:$0xff]  ;;  %v12678_v32 = vld [vmem:[#allocation160_spill] sm:$0xff] }
 0x2ee   : > { %v2921_v55 = vadd.bf16 %v2905_v54, %v2885_v21  ;;  %v2922_v58 = vadd.bf16 %v2906_v5, %v2886_v28  ;;  %v2923_v42 = vadd.bf16 %v2907_v8, %v2887_v47  ;;  %v2924_v23 = vadd.bf16 %v2908_v12, %v2888_v35 }
 0x2ef   : > { %v2925_v31 = vadd.bf16 %v2909_v22, %v2889_v26  ;;  %v2926_v62 = vadd.bf16 %v2910_v50, %v2890_v60  ;;  %v3035_v53 = vadd.bf16 %v3019_v52, %v2999_v16  ;;  %v3036_v34 = vadd.bf16 %v3020_v33, %v3000_v4  ;;  %v12674_v4 = vld [vmem:[#allocation152_spill] sm:$0xff] }
 0x2f0   : > { %v2933_v59 = vmul.bf16 %v12659_v49, %v9030_v25  ;;  %v2934_v17 = vmul.bf16 %v12659_v49, %v9032_v3  ;;  %v2935_v2 = vmul.bf16 %v12659_v49, %v9034_v61  ;;  %v2936_v57 = vmul.bf16 %v12659_v49, %v9036_v41 }
 0x2f1   : > { %v2937_v47 = vmul.bf16 %v12659_v49, %v9038_v63  ;;  %v2938_v28 = vmul.bf16 %v12659_v49, %v9040_v48  ;;  %v2939_v21 = vmul.bf16 %v12659_v49, %v9042_v20  ;;  %v2940_v25 = vmul.bf16 %v12659_v49, %v9044_v15 }
 0x2f2   : > { %v2941_v14 = vmul.bf16 %v12659_v49, %v12656_v1  ;;  %v2942_v11 = vmul.bf16 %v12659_v49, %v12657_v7  ;;  %v2943_v38 = vmul.bf16 %v12659_v49, %v12666_v6  ;;  %v2944_v10 = vmul.bf16 %v12659_v49, %v12671_v19 }
 0x2f3   : > { %v3065_v35 = vunpack.c.l.bf16 %v3035_v53  ;;  %v3066_v26 = vunpack.c.h.bf16 %v3035_v53  ;;  %v3067_v60 = vunpack.c.l.bf16 %v3036_v34  ;;  %v3068_v51 = vunpack.c.h.bf16 %v3036_v34  ;;  %v12676_v34 = vld [vmem:[#allocation154_spill] sm:$0xff] }
 0x2f4   : > { %v2945_v29 = vmul.bf16 %v12659_v49, %v12672_v45  ;;  %v2946_v43 = vmul.bf16 %v12659_v49, %v12673_v44  ;;  %v2949_v30 = vadd.bf16 %v2933_v59, %v2913_v27  ;;  %v2950_v37 = vadd.bf16 %v2934_v17, %v2914_v0  ;;  %v12680_v49 = vld [vmem:[#allocation159_spill] sm:$0xff] }
 0x2f5   : > { %v2951_v13 = vadd.bf16 %v2935_v2, %v2915_v40  ;;  %v2952_v54 = vadd.bf16 %v2936_v57, %v2916_v39  ;;  %v2953_v5 = vadd.bf16 %v2937_v47, %v2917_v46  ;;  %v2954_v8 = vadd.bf16 %v2938_v28, %v2918_v24  ;;  %v12683_v57 = vld [vmem:[#allocation125_spill] sm:$0xff]  ;;  %v12684_v47 = vld [vmem:[#allocation150_spill] sm:$0xff] }
 0x2f6   : > { %v2955_v12 = vadd.bf16 %v2939_v21, %v2919_v56  ;;  %v2956_v22 = vadd.bf16 %v2940_v25, %v2920_v36  ;;  %v2957_v50 = vadd.bf16 %v2941_v14, %v2921_v55  ;;  %v2958_v16 = vadd.bf16 %v2942_v11, %v2922_v58  ;;  %v12682_v56 = vld [vmem:[#allocation107_spill] sm:$0xff] }
 0x2f7   : > { %v9244_v52 = vadd.f32 %v3065_v35, %v12674_v4  ;;  %v9247_v9 = vadd.f32 %v3066_v26, %v12676_v34  ;;  %v9250_v33 = vadd.f32 %v3067_v60, %v12678_v32  ;;  %v9253_v27 = vadd.f32 %v3068_v51, %v12680_v49  ;;  %v12687_v14 = vld [vmem:[#allocation95_spill] sm:$0xff] }
 0x2f8   : > { %v2959_v0 = vadd.bf16 %v2943_v38, %v2923_v42  ;;  %v2960_v40 = vadd.bf16 %v2944_v10, %v2924_v23  ;;  %v2961_v39 = vadd.bf16 %v2945_v29, %v2925_v31  ;;  %v2969_v24 = vmul.bf16 %v12682_v56, %v9032_v3 }
 0x2f9   : > { %12675 = vst [vmem:[#allocation58_spill] sm:$0xff] %v9244_v52  ;;  %12677 = vst [vmem:[#allocation66_spill] sm:$0xff] %v9247_v9  ;;  %v2970_v55 = vmul.bf16 %v12682_v56, %v9034_v61  ;;  %v2971_v36 = vmul.bf16 %v12682_v56, %v9036_v41  ;;  %v2972_v46 = vmul.bf16 %v12682_v56, %v9038_v63  ;;  %v12685_v28 = vunpack.c.l.bf16 %v12684_v47  ;;  %v4933_v9 = vld [vmem:[#allocation2 + $0xd8] sm:$0xff] }
 0x2fa   : > { %12679 = vst [vmem:[#allocation105_spill] sm:$0xff] %v9250_v33  ;;  %12681 = vst [vmem:[#allocation68_spill] sm:$0xff] %v9253_v27  ;;  %v2973_v58 = vmul.bf16 %v12682_v56, %v9040_v48  ;;  %v2974_v42 = vmul.bf16 %v12682_v56, %v9042_v20  ;;  %v2975_v23 = vmul.bf16 %v12682_v56, %v9044_v15  ;;  %v3151_v52 = vrot.slane %v4933_v9, 3 }
 0x2fb   : > { %v2976_v3 = vmul.bf16 %v12682_v56, %v12656_v1  ;;  %v2977_v31 = vmul.bf16 %v12682_v56, %v12657_v7  ;;  %v2978_v53 = vmul.bf16 %v12682_v56, %v12666_v6  ;;  %v2979_v59 = vmul.bf16 %v12682_v56, %v12671_v19 }
 0x2fc   : > { %v2980_v17 = vmul.bf16 %v12682_v56, %v12672_v45  ;;  %v2981_v2 = vmul.bf16 %v12682_v56, %v12673_v44  ;;  %v9284_v21 = vadd.f32 %v12685_v28, %v12683_v57  ;;  %v2962_v25 = vadd.bf16 %v2946_v43, %v2926_v62  ;;  %v9292_v43 = vld [vmem:[#allocation2 + $0x8] sm:$0xff] }
 0x2fd   : > { %v2982_v11 = vmul.bf16 %v12682_v56, %v12687_v14  ;;  %v2985_v38 = vadd.bf16 %v2969_v24, %v2949_v30  ;;  %v2986_v10 = vadd.bf16 %v2970_v55, %v2950_v37  ;;  %v2987_v35 = vadd.bf16 %v2971_v36, %v2951_v13  ;;  %v9295_v37 = vld [vmem:[#allocation2 + $0x28] sm:$0xff]  ;;  %v9464_v13 = vld [vmem:[#allocation2 + $0xd0] sm:$0xff] }
 0x2fe   : > { %12686 = vst [vmem:[#allocation131_spill] sm:$0xff] %v9284_v21  ;;  %v2988_v26 = vadd.bf16 %v2972_v46, %v2952_v54  ;;  %v2989_v60 = vadd.bf16 %v2973_v58, %v2953_v5  ;;  %v2990_v51 = vadd.bf16 %v2974_v42, %v2954_v8  ;;  %v2991_v29 = vadd.bf16 %v2975_v23, %v2955_v12  ;;  %v9302_v8 = vld [vmem:[#allocation2 + $0x48] sm:$0xff]  ;;  %v9461_v12 = vld [vmem:[#allocation2 + $0xb0] sm:$0xff] }
 0x2ff   : > { %v2992_v4 = vadd.bf16 %v2976_v3, %v2956_v22  ;;  %v2993_v34 = vadd.bf16 %v2977_v31, %v2957_v50  ;;  %v2994_v32 = vadd.bf16 %v2978_v53, %v2958_v16  ;;  %v2995_v49 = vadd.bf16 %v2979_v59, %v2959_v0  ;;  %v9305_v22 = vld [vmem:[#allocation2 + $0x68] sm:$0xff]  ;;  %v9473_v21 = vld [vmem:[#allocation2 + $0x130] sm:$0xff] }
 0x300   : > { %v2996_v27 = vadd.bf16 %v2980_v17, %v2960_v40  ;;  %v2997_v33 = vadd.bf16 %v2981_v2, %v2961_v39  ;;  %v9288_v47 = vadd.bf16 %v2982_v11, %v2962_v25  ;;  %v3005_v62 = vmul.bf16 %v9199_v18, %v9034_v61  ;;  %v9314_v0 = vld [vmem:[#allocation2 + $0x88] sm:$0xff]  ;;  %v9458_v61 = vld [vmem:[#allocation2 + $0x90] sm:$0xff] }
 0x301   : > { %v3006_v54 = vmul.bf16 %v9199_v18, %v9036_v41  ;;  %v3007_v5 = vmul.bf16 %v9199_v18, %v9038_v63  ;;  %v3008_v50 = vmul.bf16 %v9199_v18, %v9040_v48  ;;  %v3009_v16 = vmul.bf16 %v9199_v18, %v9042_v20  ;;  %v9331_v46 = vld [vmem:[#allocation2 + $0xa8] sm:$0xff]  ;;  %v9455_v63 = vld [vmem:[#allocation2 + $0x70] sm:$0xff] }
 0x302   : > { %12688 = vst [vmem:[#allocation48_spill] sm:$0xff] %v9288_v47  ;;  %v3010_v41 = vmul.bf16 %v9199_v18, %v9044_v15  ;;  %v3011_v40 = vmul.bf16 %v9199_v18, %v12656_v1  ;;  %v3012_v39 = vmul.bf16 %v9199_v18, %v12657_v7  ;;  %v3013_v56 = vmul.bf16 %v9199_v18, %v12666_v6  ;;  %v9334_v6 = vld [vmem:[#allocation2 + $0xc8] sm:$0xff]  ;;  %v9479_v58 = vld [vmem:[#allocation2 + $0x170] sm:$0xff] }
 0x303   : > { %v3014_v48 = vmul.bf16 %v9199_v18, %v12671_v19  ;;  %v3015_v20 = vmul.bf16 %v9199_v18, %v12672_v45  ;;  %v3016_v15 = vmul.bf16 %v9199_v18, %v12673_v44  ;;  %v3017_v24 = vmul.bf16 %v9199_v18, %v12687_v14  ;;  %v9432_v45 = vld [vmem:[#allocation2 + $0x208] sm:$0xff]  ;;  %v9470_v19 = vld [vmem:[#allocation2 + $0x110] sm:$0xff] }
 0x304   : > { %v3021_v55 = vadd.bf16 %v3005_v62, %v2985_v38  ;;  %v3022_v1 = vadd.bf16 %v3006_v54, %v2986_v10  ;;  %v3023_v36 = vadd.bf16 %v3007_v5, %v2987_v35  ;;  %v3024_v42 = vadd.bf16 %v3008_v50, %v2988_v26  ;;  %12737 = vst [vmem:[#allocation117_spill] sm:$0xff] %v9432_v45  ;;  %v9435_v5 = vld [vmem:[#allocation2 + $0x228] sm:$0xff]  ;;  %v9482_v18 = vld [vmem:[#allocation2 + $0x190] sm:$0xff]  ;;  %v4942_v45 = vld [vmem:[#allocation2 + $0x1f8] sm:$0xff] }
 0x305   : > { %v3025_v23 = vadd.bf16 %v3009_v16, %v2989_v60  ;;  %v3026_v44 = vadd.bf16 %v3010_v41, %v2990_v51  ;;  %v3027_v3 = vadd.bf16 %v3011_v40, %v2991_v29  ;;  %v3028_v31 = vadd.bf16 %v3012_v39, %v2992_v4  ;;  %v12694_v41 = vld [vmem:[#allocation155_spill] sm:$0xff]  ;;  %v12696_v39 = vld [vmem:[#allocation156_spill] sm:$0xff]  ;;  %12738 = vst [vmem:[#allocation59_spill] sm:$0xff] %v9435_v5  ;;  %v9485_v47 = vld [vmem:[#allocation2 + $0x1b0] sm:$0xff] }
 0x306   : > { %v3029_v53 = vadd.bf16 %v3013_v56, %v2993_v34  ;;  %v9339_v59 = vadd.bf16 %v3014_v48, %v2994_v32  ;;  %v9341_v17 = vadd.bf16 %v3015_v20, %v2995_v49  ;;  %v9343_v2 = vadd.bf16 %v3016_v15, %v2996_v27  ;;  %v12698_v48 = vld [vmem:[#allocation143_spill] sm:$0xff]  ;;  %v12744_v7 = vld [vmem:[#allocation112_spill] sm:$0xff]  ;;  %v4941_v5 = vld [vmem:[#allocation2 + $0x1d8] sm:$0xff] }
 0x307   : > { %v9345_v57 = vadd.bf16 %v3017_v24, %v2997_v33  ;;  %v3037_v28 = vunpack.c.l.bf16 %v3021_v55  ;;  %v3038_v25 = vunpack.c.h.bf16 %v3021_v55  ;;  %v3039_v14 = vunpack.c.l.bf16 %v3022_v1  ;;  %v12700_v15 = vld [vmem:[#allocation119_spill] sm:$0xff]  ;;  %v12702_v55 = vld [vmem:[#allocation144_spill] sm:$0xff]  ;;  %v9467_v33 = vld [vmem:[#allocation2 + $0xf0] sm:$0xff] }
 0x308   : > { %12690 = vst [vmem:[#allocation135_spill] sm:$0xff] %v9339_v59  ;;  %12691 = vst [vmem:[#allocation60_spill] sm:$0xff] %v9341_v17  ;;  %v3040_v11 = vunpack.c.h.bf16 %v3022_v1  ;;  %v3041_v38 = vunpack.c.l.bf16 %v3023_v36  ;;  %v3042_v10 = vunpack.c.h.bf16 %v3023_v36  ;;  %v3043_v35 = vunpack.c.l.bf16 %v3024_v42  ;;  %v12704_v36 = vld [vmem:[#allocation120_spill] sm:$0xff]  ;;  %v9491_v17 = vld [vmem:[#allocation2 + $0x1f0] sm:$0xff] }
 0x309   : > { %12692 = vst [vmem:[#allocation136_spill] sm:$0xff] %v9343_v2  ;;  %12693 = vst [vmem:[#allocation140_spill] sm:$0xff] %v9345_v57  ;;  %v3044_v26 = vunpack.c.h.bf16 %v3024_v42  ;;  %v3045_v60 = vunpack.c.l.bf16 %v3025_v23  ;;  %v3046_v51 = vunpack.c.h.bf16 %v3025_v23  ;;  %v3047_v29 = vunpack.c.l.bf16 %v3026_v44  ;;  %v12706_v23 = vld [vmem:[#allocation161_spill] sm:$0xff] }
 0x30a   : > { %v3048_v4 = vunpack.c.h.bf16 %v3026_v44  ;;  %v3049_v34 = vunpack.c.l.bf16 %v3027_v3  ;;  %v3050_v32 = vunpack.c.h.bf16 %v3027_v3  ;;  %v3051_v49 = vunpack.c.l.bf16 %v3028_v31  ;;  %v12708_v3 = vld [vmem:[#allocation65_spill] sm:$0xff] }
 0x30b   : > { %v3052_v62 = vunpack.c.h.bf16 %v3028_v31  ;;  %v3053_v27 = vunpack.c.l.bf16 %v3029_v53  ;;  %v3054_v54 = vunpack.c.h.bf16 %v3029_v53  ;;  %v9352_v40 = vadd.f32 %v3037_v28, %v12694_v41  ;;  %v12710_v53 = vld [vmem:[#allocation90_spill] sm:$0xff]  ;;  %v9476_v57 = vld [vmem:[#allocation2 + $0x150] sm:$0xff] }
 0x30c   : > { %v9355_v56 = vadd.f32 %v3038_v25, %v12696_v39  ;;  %v9358_v20 = vadd.f32 %v3039_v14, %v12698_v48  ;;  %v9361_v24 = vadd.f32 %v3040_v11, %v12700_v15  ;;  %v9364_v1 = vadd.f32 %v3041_v38, %v12702_v55  ;;  %v12712_v25 = vld [vmem:[#allocation157_spill] sm:$0xff]  ;;  %v12716_v38 = vld [vmem:[#allocation128_spill] sm:$0xff] }
 0x30d   : > { %12695 = vst [vmem:[#allocation138_spill] sm:$0xff] %v9352_v40  ;;  %v9367_v42 = vadd.f32 %v3042_v10, %v12704_v36  ;;  %v9370_v44 = vadd.f32 %v3043_v35, %v12706_v23  ;;  %v9373_v31 = vadd.f32 %v3044_v26, %v12708_v3  ;;  %v9376_v28 = vadd.f32 %v3045_v60, %v12710_v53  ;;  %v12714_v11 = vld [vmem:[#allocation145_spill] sm:$0xff]  ;;  %v12718_v10 = vld [vmem:[#allocation146_spill] sm:$0xff]  ;;  %v12720_v35 = vld [vmem:[#allocation151_spill] sm:$0xff] }
 0x30e   : > { %12697 = vst [vmem:[#allocation139_spill] sm:$0xff] %v9355_v56  ;;  %12699 = vst [vmem:[#allocation142_spill] sm:$0xff] %v9358_v20  ;;  %v9379_v14 = vadd.f32 %v3046_v51, %v12712_v25  ;;  %v9382_v41 = vadd.f32 %v3047_v29, %v12714_v11  ;;  %v9385_v39 = vadd.f32 %v3048_v4, %v12716_v38  ;;  %v12722_v26 = vld [vmem:[#allocation129_spill] sm:$0xff]  ;;  %v12726_v51 = vld [vmem:[#allocation158_spill] sm:$0xff]  ;;  %v3160_v9 = vrot.slane %v4942_v45, 3 }
 0x30f   : > { %12701 = vst [vmem:[#allocation57_spill] sm:$0xff] %v9361_v24  ;;  %12703 = vst [vmem:[#allocation63_spill] sm:$0xff] %v9364_v1  ;;  %v9388_v48 = vadd.f32 %v3049_v34, %v12718_v10  ;;  %v9391_v15 = vadd.f32 %v3050_v32, %v12720_v35  ;;  %v9394_v55 = vadd.f32 %v3051_v49, %v12722_v26  ;;  %v12724_v60 = vld [vmem:[#allocation137_spill] sm:$0xff]  ;;  %v12728_v29 = vld [vmem:[#allocation111_spill] sm:$0xff] }
 0x310   : > { %12705 = vst [vmem:[#allocation69_spill] sm:$0xff] %v9367_v42  ;;  %12707 = vst [vmem:[#allocation116_spill] sm:$0xff] %v9370_v44  ;;  %v9397_v36 = vadd.f32 %v3052_v62, %v12724_v60  ;;  %v9400_v23 = vadd.f32 %v3053_v27, %v12726_v51  ;;  %v9403_v3 = vadd.f32 %v3054_v54, %v12728_v29  ;;  %v9405_v4 = vld [vmem:[#allocation2 + $0xe8] sm:$0xff]  ;;  %v9450_v32 = vld [vmem:[#allocation2 + $0x10] sm:$0xff] }
 0x311   : > { %12709 = vst [vmem:[#allocation99_spill] sm:$0xff] %v9373_v31  ;;  %12711 = vst [vmem:[#allocation80_spill] sm:$0xff] %v9376_v28  ;;  %v9408_v53 = vld [vmem:[#allocation2 + $0x108] sm:$0xff]  ;;  %v12743_v34 = vld [vmem:[#allocation109_spill] sm:$0xff] }
 0x312   : > { %12713 = vst [vmem:[#allocation122_spill] sm:$0xff] %v9379_v14  ;;  %12715 = vst [vmem:[#allocation52_spill] sm:$0xff] %v9382_v41  ;;  %v9411_v25 = vld [vmem:[#allocation2 + $0x128] sm:$0xff]  ;;  %v9494_v2 = vld [vmem:[#allocation2 + $0x210] sm:$0xff]  ;;  %v12747_v45 = vrot.slane %v12743_v34, 3 }
 0x313   : > { %12717 = vst [vmem:[#allocation64_spill] sm:$0xff] %v9385_v39  ;;  %12719 = vst [vmem:[#allocation123_spill] sm:$0xff] %v9388_v48  ;;  %v9414_v62 = vld [vmem:[#allocation2 + $0x148] sm:$0xff]  ;;  %v9503_v59 = vld [vmem:[#allocation2 + $0x270] sm:$0xff] }
 0x314   : > { %12721 = vst [vmem:[#allocation67_spill] sm:$0xff] %v9391_v15  ;;  %12723 = vst [vmem:[#allocation36_spill] sm:$0xff] %v9394_v55  ;;  %v9417_v11 = vld [vmem:[#allocation2 + $0x168] sm:$0xff]  ;;  %v9506_v55 = vld [vmem:[#allocation2 + $0x290] sm:$0xff] }
 0x315   : > { %12725 = vst [vmem:[#allocation124_spill] sm:$0xff] %v9397_v36  ;;  %12727 = vst [vmem:[#allocation76_spill] sm:$0xff] %v9400_v23  ;;  %v9420_v38 = vld [vmem:[#allocation2 + $0x188] sm:$0xff]  ;;  %v9497_v23 = vld [vmem:[#allocation2 + $0x230] sm:$0xff] }
 0x316   : > { %12729 = vst [vmem:[#allocation88_spill] sm:$0xff] %v9403_v3  ;;  %12730 = vst [vmem:[#allocation127_spill] sm:$0xff] %v9411_v25  ;;  %v9423_v35 = vld [vmem:[#allocation2 + $0x1a8] sm:$0xff]  ;;  %v9488_v3 = vld [vmem:[#allocation2 + $0x1d0] sm:$0xff] }
 0x317   : > { %12731 = vst [vmem:[#allocation73_spill] sm:$0xff] %v9414_v62  ;;  %12732 = vst [vmem:[#allocation141_spill] sm:$0xff] %v9417_v11  ;;  %v9426_v60 = vld [vmem:[#allocation2 + $0x1c8] sm:$0xff]  ;;  %v9500_v36 = vld [vmem:[#allocation2 + $0x250] sm:$0xff] }
 0x318   : > { %12733 = vst [vmem:[#allocation51_spill] sm:$0xff] %v9420_v38  ;;  %12734 = vst [vmem:[#allocation113_spill] sm:$0xff] %v9423_v35  ;;  %v9429_v29 = vld [vmem:[#allocation2 + $0x1e8] sm:$0xff]  ;;  %v9509_v15 = vld [vmem:[#allocation2 + $0x2b0] sm:$0xff] }
 0x319   : > { %12735 = vst [vmem:[#allocation108_spill] sm:$0xff] %v9426_v60  ;;  %12736 = vst [vmem:[#allocation96_spill] sm:$0xff] %v9429_v29  ;;  %v9438_v10 = vld [vmem:[#allocation2 + $0x248] sm:$0xff]  ;;  %v4927_v48 = vld [vmem:[#allocation2 + $0x18] sm:$0xff] }
 0x31a   : > { %12739 = vst [vmem:[#allocation74_spill] sm:$0xff] %v9438_v10  ;;  %v9441_v54 = vld [vmem:[#allocation2 + $0x268] sm:$0xff]  ;;  %v3145_v39 = vrot.slane %v4927_v48, 3  ;;  %v4928_v41 = vld [vmem:[#allocation2 + $0x38] sm:$0xff] }
 0x31b   : > { %12740 = vst [vmem:[#allocation77_spill] sm:$0xff] %v9441_v54  ;;  %v9444_v27 = vld [vmem:[#allocation2 + $0x288] sm:$0xff]  ;;  %v3146_v26 = vrot.slane %v4928_v41, 3  ;;  %v4929_v14 = vld [vmem:[#allocation2 + $0x58] sm:$0xff] }
 0x31c   : > { %12741 = vst [vmem:[#allocation61_spill] sm:$0xff] %v9444_v27  ;;  %v9447_v49 = vld [vmem:[#allocation2 + $0x2a8] sm:$0xff]  ;;  %v3147_v28 = vrot.slane %v4929_v14, 3  ;;  %v4930_v31 = vld [vmem:[#allocation2 + $0x78] sm:$0xff]  ;;  %v12745_v27 = vld [vmem:[#allocation35_spill] sm:$0xff] }
 0x31d   : > { %12742 = vst [vmem:[#allocation75_spill] sm:$0xff] %v9447_v49  ;;  %v3148_v51 = vrot.slane %v4930_v31, 3  ;;  %v4931_v44 = vld [vmem:[#allocation2 + $0x98] sm:$0xff]  ;;  %vm3167_vm6 = vcmp.lt.s32.totalorder %v12745_v27, 5 }
 0x31e   : > { %v3149_v42 = vrot.slane %v4931_v44, 3  ;;  %v4932_v1 = vld [vmem:[#allocation2 + $0xb8] sm:$0xff] }
 0x31f   : > { %v3150_v16 = vrot.slane %v4932_v1, 3  ;;  %v4934_v24 = vld [vmem:[#allocation2 + $0xf8] sm:$0xff]  ;;  %v3159_v1 = vrot.slane %v4941_v5, 3  ;;  %v3169_v5 = vsel %vm3167_vm6, %v12747_v45, %v3146_v26  ;;  %v12753_v45 = vrot.slane %v9467_v33, 3 }
 0x320   : > { %v3152_v50 = vrot.slane %v4934_v24, 3  ;;  %v4935_v20 = vld [vmem:[#allocation2 + $0x118] sm:$0xff] }
 0x321   : > { %v3153_v56 = vrot.slane %v4935_v20, 3  ;;  %v4936_v40 = vld [vmem:[#allocation2 + $0x138] sm:$0xff] }
 0x322   : > { %v3154_v30 = vrot.slane %v4936_v40, 3  ;;  %v4937_v49 = vld [vmem:[#allocation2 + $0x158] sm:$0xff] }
 0x323   : > { %v3155_v48 = vrot.slane %v4937_v49, 3  ;;  %v4938_v41 = vld [vmem:[#allocation2 + $0x178] sm:$0xff] }
 0x324   : > { %v3156_v14 = vrot.slane %v4938_v41, 3  ;;  %v4939_v54 = vld [vmem:[#allocation2 + $0x198] sm:$0xff] }
 0x325   : > { %v3157_v31 = vrot.slane %v4939_v54, 3  ;;  %v4940_v10 = vld [vmem:[#allocation2 + $0x1b8] sm:$0xff]  ;;  %v12746_v54 = vrot.slane %v9450_v32, 3 }
 0x326   : > { %v3158_v44 = vrot.slane %v4940_v10, 3  ;;  %v4943_v29 = vld [vmem:[#allocation2 + $0x218] sm:$0xff] }
 0x327   : > { %v3161_v24 = vrot.slane %v4943_v29, 3  ;;  %v4944_v60 = vld [vmem:[#allocation2 + $0x238] sm:$0xff]  ;;  %v9517_v10 = vsel %vm3167_vm6, %v12746_v54, %v3145_v39  ;;  %v12751_v29 = vrot.slane %v9461_v12, 3  ;;  %v12752_v54 = vrot.slane %v9464_v13, 3 }
 0x328   : > { %v3162_v20 = vrot.slane %v4944_v60, 3  ;;  %v4945_v35 = vld [vmem:[#allocation2 + $0x258] sm:$0xff]  ;;  %v12748_v60 = vrot.slane %v12744_v7, 3 }
 0x329   : > { %v3163_v40 = vrot.slane %v4945_v35, 3  ;;  %v4946_v38 = vld [vmem:[#allocation2 + $0x278] sm:$0xff]  ;;  %v12750_v35 = vrot.slane %v9458_v61, 3  ;;  %v3173_v26 = vsel %vm3167_vm6, %v12751_v29, %v3150_v16  ;;  %v12757_v29 = vrot.slane %v9479_v58, 3 }
 0x32a   : > { %v3164_v49 = vrot.slane %v4946_v38, 3  ;;  %v4947_v11 = vld [vmem:[#allocation2 + $0x298] sm:$0xff]  ;;  %v3170_v38 = vsel %vm3167_vm6, %v12748_v60, %v3147_v28  ;;  %v3174_v28 = vsel %vm3167_vm6, %v12752_v54, %v3151_v52  ;;  %v12754_v60 = vrot.slane %v9470_v19, 3 }
 0x32b   : > { %v3165_v62 = vrot.slane %v4947_v11, 3  ;;  %v4948_v25 = vld [vmem:[#allocation2 + $0x2b8] sm:$0xff]  ;;  %v12749_v11 = vrot.slane %v9455_v63, 3  ;;  %v3172_v39 = vsel %vm3167_vm6, %v12750_v35, %v3149_v42  ;;  %v12756_v35 = vrot.slane %v9476_v57, 3 }
 0x32c   : > { %v3166_v41 = vrot.slane %v4948_v25, 3  ;;  %v3176_v42 = vsel %vm3167_vm6, %v12754_v60, %v3153_v56  ;;  %v12758_v54 = vrot.slane %v9482_v18, 3  ;;  %v12760_v60 = vrot.slane %v9488_v3, 3 }
 0x32d   : > { %v3171_v25 = vsel %vm3167_vm6, %v12749_v11, %v3148_v51  ;;  %v3175_v51 = vsel %vm3167_vm6, %v12753_v45, %v3152_v50  ;;  %v12755_v11 = vrot.slane %v9473_v21, 3  ;;  %v3178_v52 = vsel %vm3167_vm6, %v12756_v35, %v3155_v48 }
 0x32e   : > { %v3179_v50 = vsel %vm3167_vm6, %v12757_v29, %v3156_v14  ;;  %v3180_v56 = vsel %vm3167_vm6, %v12758_v54, %v3157_v31  ;;  %v12759_v45 = vrot.slane %v9485_v47, 3  ;;  %v3182_v48 = vsel %vm3167_vm6, %v12760_v60, %v3159_v1 }
 0x32f   : > { %v3177_v16 = vsel %vm3167_vm6, %v12755_v11, %v3154_v30  ;;  %v12761_v11 = vrot.slane %v9491_v17, 3  ;;  %v12762_v35 = vrot.slane %v9494_v2, 3  ;;  %v12763_v29 = vrot.slane %v9497_v23, 3 }
 0x330   : > { %v3181_v30 = vsel %vm3167_vm6, %v12759_v45, %v3158_v44  ;;  %v12764_v54 = vrot.slane %v9500_v36, 3  ;;  %v12765_v45 = vrot.slane %v9503_v59, 3  ;;  %v12766_v60 = vrot.slane %v9506_v55, 3 }
 0x331   : > { %v3183_v14 = vsel %vm3167_vm6, %v12761_v11, %v3160_v9  ;;  %v3184_v31 = vsel %vm3167_vm6, %v12762_v35, %v3161_v24  ;;  %v3185_v44 = vsel %vm3167_vm6, %v12763_v29, %v3162_v20  ;;  %v12767_v11 = vrot.slane %v9509_v15, 3 }
 0x332   : > { %v3186_v1 = vsel %vm3167_vm6, %v12764_v54, %v3163_v40  ;;  %v3187_v9 = vsel %vm3167_vm6, %v12765_v45, %v3164_v49  ;;  %v3188_v24 = vsel %vm3167_vm6, %v12766_v60, %v3165_v62  ;;  %v12769_v35 = vrot.slane %v9450_v32, 3 }
 0x333   : > { %v9603_v20 = vsel %vm3167_vm6, %v12767_v11, %v3166_v41  ;;  %v12770_v40 = vrot.slane %v9292_v43, 3  ;;  %v12771_v49 = vrot.slane %v12743_v34, 3  ;;  %v12772_v54 = vrot.slane %v9295_v37, 3 }
 0x334   : > { %12768 = vst [vmem:[#allocation37_spill] sm:$0xff] %v9603_v20  ;;  %v12773_v45 = vrot.slane %v12744_v7, 3  ;;  %v12774_v60 = vrot.slane %v9302_v8, 3  ;;  %v12775_v32 = vrot.slane %v9455_v63, 3  ;;  %v12776_v43 = vrot.slane %v9305_v22, 3 }
 0x335   : > { %v3190_v29 = vsel %vm3167_vm6, %v12770_v40, %v12769_v35  ;;  %v3191_v62 = vsel %vm3167_vm6, %v12772_v54, %v12771_v49  ;;  %v12777_v34 = vrot.slane %v9458_v61, 3  ;;  %v12778_v37 = vrot.slane %v9314_v0, 3 }
 0x336   : > { %v3192_v41 = vsel %vm3167_vm6, %v12774_v60, %v12773_v45  ;;  %v3193_v11 = vsel %vm3167_vm6, %v12776_v43, %v12775_v32  ;;  %v12779_v7 = vrot.slane %v9461_v12, 3  ;;  %v12780_v8 = vrot.slane %v9331_v46, 3 }
 0x337   : > { %v3194_v35 = vsel %vm3167_vm6, %v12778_v37, %v12777_v34  ;;  %v12781_v63 = vrot.slane %v9464_v13, 3  ;;  %v12782_v22 = vrot.slane %v9334_v6, 3  ;;  %v12783_v61 = vrot.slane %v9467_v33, 3  ;;  %v12788_v6 = vld [vmem:[#allocation127_spill] sm:$0xff] }
 0x338   : > { %v3195_v40 = vsel %vm3167_vm6, %v12780_v8, %v12779_v7  ;;  %v12784_v0 = vrot.slane %v9405_v4, 3  ;;  %v12785_v12 = vrot.slane %v9470_v19, 3  ;;  %v12786_v46 = vrot.slane %v9408_v53, 3  ;;  %v12791_v4 = vld [vmem:[#allocation73_spill] sm:$0xff]  ;;  %v12797_v8 = vld [vmem:[#allocation51_spill] sm:$0xff] }
 0x339   : > { %v3196_v49 = vsel %vm3167_vm6, %v12782_v22, %v12781_v63  ;;  %v12787_v13 = vrot.slane %v9473_v21, 3  ;;  %v12789_v60 = vrot.slane %v12788_v6, 3  ;;  %v12790_v33 = vrot.slane %v9476_v57, 3  ;;  %v12794_v53 = vld [vmem:[#allocation141_spill] sm:$0xff] }
 0x33a   : > { %v3197_v54 = vsel %vm3167_vm6, %v12784_v0, %v12783_v61  ;;  %v3198_v45 = vsel %vm3167_vm6, %v12786_v46, %v12785_v12  ;;  %v12792_v43 = vrot.slane %v12791_v4, 3  ;;  %v12793_v19 = vrot.slane %v9479_v58, 3  ;;  %v12800_v61 = vld [vmem:[#allocation113_spill] sm:$0xff]  ;;  %v12803_v46 = vld [vmem:[#allocation108_spill] sm:$0xff] }
 0x33b   : > { %v3199_v32 = vsel %vm3167_vm6, %v12789_v60, %v12787_v13  ;;  %v12795_v37 = vrot.slane %v12794_v53, 3  ;;  %v12796_v21 = vrot.slane %v9482_v18, 3  ;;  %v12798_v63 = vrot.slane %v12797_v8, 3  ;;  %v12806_v60 = vld [vmem:[#allocation96_spill] sm:$0xff] }
 0x33c   : > { %v3200_v34 = vsel %vm3167_vm6, %v12792_v43, %v12790_v33  ;;  %v12799_v57 = vrot.slane %v9485_v47, 3  ;;  %v12801_v0 = vrot.slane %v12800_v61, 3  ;;  %v12802_v58 = vrot.slane %v9488_v3, 3  ;;  %v12809_v43 = vld [vmem:[#allocation117_spill] sm:$0xff] }
 0x33d   : > { %v3201_v7 = vsel %vm3167_vm6, %v12795_v37, %v12793_v19  ;;  %v3202_v22 = vsel %vm3167_vm6, %v12798_v63, %v12796_v21  ;;  %v12804_v13 = vrot.slane %v12803_v46, 3  ;;  %v12805_v18 = vrot.slane %v9491_v17, 3  ;;  %v12812_v37 = vld [vmem:[#allocation59_spill] sm:$0xff]  ;;  %v12815_v63 = vld [vmem:[#allocation74_spill] sm:$0xff] }
 0x33e   : > { %v3203_v12 = vsel %vm3167_vm6, %v12801_v0, %v12799_v57  ;;  %v12807_v33 = vrot.slane %v12806_v60, 3  ;;  %v12808_v47 = vrot.slane %v9494_v2, 3  ;;  %v12810_v19 = vrot.slane %v12809_v43, 3  ;;  %v12818_v0 = vld [vmem:[#allocation77_spill] sm:$0xff] }
 0x33f   : > { %v3204_v6 = vsel %vm3167_vm6, %v12804_v13, %v12802_v58  ;;  %v12811_v3 = vrot.slane %v9497_v23, 3  ;;  %v12813_v21 = vrot.slane %v12812_v37, 3  ;;  %v12814_v17 = vrot.slane %v9500_v36, 3  ;;  %v12821_v13 = vld [vmem:[#allocation61_spill] sm:$0xff] }
 0x340   : > { %v3205_v4 = vsel %vm3167_vm6, %v12807_v33, %v12805_v18  ;;  %v3206_v53 = vsel %vm3167_vm6, %v12810_v19, %v12808_v47  ;;  %v12816_v57 = vrot.slane %v12815_v63, 3  ;;  %v12817_v2 = vrot.slane %v9503_v59, 3  ;;  %v12824_v33 = vld [vmem:[#allocation75_spill] sm:$0xff] }
 0x341   : > { %v3207_v8 = vsel %vm3167_vm6, %v12813_v21, %v12811_v3  ;;  %v12819_v58 = vrot.slane %v12818_v0, 3  ;;  %v12820_v23 = vrot.slane %v9506_v55, 3  ;;  %v12822_v18 = vrot.slane %v12821_v13, 3 }
 0x342   : > { %v3208_v61 = vsel %vm3167_vm6, %v12816_v57, %v12814_v17  ;;  %v12823_v36 = vrot.slane %v9509_v15, 3  ;;  %v12825_v47 = vrot.slane %v12824_v33, 3  ;;  %v3236_v59 = vsub.s32 3, %v12745_v27 }
 0x343   : > { %v3209_v46 = vsel %vm3167_vm6, %v12819_v58, %v12817_v2  ;;  %v3210_v60 = vsel %vm3167_vm6, %v12822_v18, %v12820_v23  ;;  %v3212_v19 = vpack.c.bf16 %v9517_v10, %v3190_v29  ;;  %v3213_v3 = vpack.c.bf16 %v3169_v5, %v3191_v62  ;;  %v12833_v29 = vld [vmem:[#allocation49_spill] sm:$0xff] }
 0x344   : > { %v9737_v43 = vsel %vm3167_vm6, %v12825_v47, %v12823_v36  ;;  %v9741_v37 = vpack.c.bf16 %v3170_v38, %v3192_v41  ;;  %v9743_v55 = vpack.c.bf16 %v3171_v25, %v3193_v11  ;;  %v9745_v21 = vpack.c.bf16 %v3172_v39, %v3194_v35  ;;  %v12828_v39 = vld [vmem:[#allocation42_spill] sm:$0xff] }
 0x345   : > { %12826 = vst [vmem:[#allocation38_spill] sm:$0xff] %v9737_v43  ;;  %v9747_v17 = vpack.c.bf16 %v3173_v26, %v3195_v40  ;;  %v9749_v15 = vpack.c.bf16 %v3174_v28, %v3196_v49  ;;  %v9751_v63 = vpack.c.bf16 %v3175_v51, %v3197_v54  ;;  %v9753_v57 = vpack.c.bf16 %v3176_v42, %v3198_v45  ;;  %v12839_v40 = vld [vmem:[#allocation55_spill] sm:$0xff] }
 0x346   : > { %v9755_v2 = vpack.c.bf16 %v3177_v16, %v3199_v32  ;;  %v9757_v27 = vpack.c.bf16 %v3178_v52, %v3200_v34  ;;  %v9759_v10 = vpack.c.bf16 %v3179_v50, %v3201_v7  ;;  %v9761_v5 = vpack.c.bf16 %v3180_v56, %v3202_v22 }
 0x347   : > { %v9763_v38 = vpack.c.bf16 %v3181_v30, %v3203_v12  ;;  %v9765_v25 = vpack.c.bf16 %v3182_v48, %v3204_v6  ;;  %v9768_v26 = vrot.slane %v12828_v39, %v3236_v59  ;;  %v9770_v28 = vpack.c.bf16 %v3183_v14, %v3205_v4  ;;  %v12832_v30 = vld [vmem:[#allocation46_spill] sm:$0xff] }
 0x348   : > { %v9772_v51 = vpack.c.bf16 %v3184_v31, %v3206_v53  ;;  %v9774_v42 = vpack.c.bf16 %v3185_v44, %v3207_v8  ;;  %v9776_v16 = vpack.c.bf16 %v3186_v1, %v3208_v61  ;;  %v9778_v52 = vpack.c.bf16 %v3187_v9, %v3209_v46  ;;  %v12834_v14 = vld [vmem:[#allocation50_spill] sm:$0xff]  ;;  %v12835_v31 = vld [vmem:[#allocation53_spill] sm:$0xff] }
 0x349   : > { %12827 = vst [vmem:[#allocation39_spill] sm:$0xff] %v9765_v25  ;;  %v9780_v50 = vpack.c.bf16 %v3188_v24, %v3210_v60  ;;  %v3257_v48 = vrot.slane %v12832_v30, %v3236_v59  ;;  %v9786_v62 = vrot.slane %v12833_v29, %v3236_v59  ;;  %v9789_v41 = vrot.slane %v12834_v14, %v3236_v59  ;;  %v12837_v1 = vld [vmem:[#allocation54_spill] sm:$0xff] }
 0x34a   : > { %12829 = vst [vmem:[#allocation70_spill] sm:$0xff] %v9776_v16  ;;  %12830 = vst [vmem:[#allocation40_spill] sm:$0xff] %v9778_v52  ;;  %v9792_v44 = vrot.slane %v12835_v31, %v3236_v59  ;;  %v9795_v11 = vrot.slane %v12837_v1, %v3236_v59  ;;  %v3238_v9 = vmul.bf16 %v9768_v26, %v3212_v19 }
 0x34b   : > { %12831 = vst [vmem:[#allocation147_spill] sm:$0xff] %v9780_v50  ;;  %v3239_v24 = vmul.bf16 %v9768_v26, %v3213_v3  ;;  %v3240_v35 = vmul.bf16 %v9768_v26, %v9741_v37  ;;  %v9802_v49 = vrot.slane %v12839_v40, %v3236_v59  ;;  %v3241_v54 = vmul.bf16 %v9768_v26, %v9743_v55 }
 0x34c   : > { %12836 = vst [vmem:[#allocation114_spill] sm:$0xff] %v9792_v44  ;;  %12838 = vst [vmem:[#allocation132_spill] sm:$0xff] %v9795_v11  ;;  %v3242_v45 = vmul.bf16 %v9768_v26, %v9745_v21  ;;  %v3243_v32 = vmul.bf16 %v9768_v26, %v9747_v17  ;;  %v3244_v34 = vmul.bf16 %v9768_v26, %v9749_v15 }
 0x34d   : > { %12840 = vst [vmem:[#allocation72_spill] sm:$0xff] %v9802_v49  ;;  %v3245_v7 = vmul.bf16 %v9768_v26, %v9751_v63  ;;  %v3246_v22 = vmul.bf16 %v9768_v26, %v9753_v57  ;;  %v3247_v12 = vmul.bf16 %v9768_v26, %v9755_v2  ;;  %v3248_v6 = vmul.bf16 %v9768_v26, %v9757_v27 }
 0x34e   : > { %v3249_v4 = vmul.bf16 %v9768_v26, %v9759_v10  ;;  %v3250_v53 = vmul.bf16 %v9768_v26, %v9761_v5  ;;  %v3251_v8 = vmul.bf16 %v9768_v26, %v9763_v38  ;;  %v3252_v61 = vmul.bf16 %v9768_v26, %v9765_v25 }
 0x34f   : > { %v3253_v0 = vmul.bf16 %v9768_v26, %v9770_v28  ;;  %v3258_v58 = vmul.bf16 %v3257_v48, %v3213_v3  ;;  %v3259_v46 = vmul.bf16 %v3257_v48, %v9741_v37  ;;  %v3260_v23 = vmul.bf16 %v3257_v48, %v9743_v55 }
 0x350   : > { %v3261_v13 = vmul.bf16 %v3257_v48, %v9745_v21  ;;  %v3262_v18 = vmul.bf16 %v3257_v48, %v9747_v17  ;;  %v3263_v60 = vmul.bf16 %v3257_v48, %v9749_v15  ;;  %v3264_v36 = vmul.bf16 %v3257_v48, %v9751_v63 }
 0x351   : > { %v3265_v33 = vmul.bf16 %v3257_v48, %v9753_v57  ;;  %v3266_v47 = vmul.bf16 %v3257_v48, %v9755_v2  ;;  %v3267_v59 = vmul.bf16 %v3257_v48, %v9757_v27  ;;  %v3268_v19 = vmul.bf16 %v3257_v48, %v9759_v10 }
 0x352   : > { %v3269_v3 = vmul.bf16 %v3257_v48, %v9761_v5  ;;  %v3270_v39 = vmul.bf16 %v3257_v48, %v9763_v38  ;;  %v3271_v26 = vmul.bf16 %v3257_v48, %v9765_v25  ;;  %v3272_v30 = vmul.bf16 %v3257_v48, %v9770_v28 }
 0x353   : > { %v3273_v29 = vmul.bf16 %v3257_v48, %v9772_v51  ;;  %v3274_v14 = vadd.bf16 %v3258_v58, %v3238_v9  ;;  %v3275_v31 = vadd.bf16 %v3259_v46, %v3239_v24  ;;  %v3276_v1 = vadd.bf16 %v3260_v23, %v3240_v35  ;;  %v12841_v23 = vld [vmem:[#allocation39_spill] sm:$0xff] }
 0x354   : > { %v3277_v40 = vadd.bf16 %v3261_v13, %v3241_v54  ;;  %v3278_v56 = vadd.bf16 %v3262_v18, %v3242_v45  ;;  %v3279_v43 = vadd.bf16 %v3263_v60, %v3243_v32  ;;  %v3280_v20 = vadd.bf16 %v3264_v36, %v3244_v34 }
 0x355   : > { %v3281_v49 = vadd.bf16 %v3265_v33, %v3245_v7  ;;  %v3282_v50 = vadd.bf16 %v3266_v47, %v3246_v22  ;;  %v3283_v11 = vadd.bf16 %v3267_v59, %v3247_v12  ;;  %v3284_v52 = vadd.bf16 %v3268_v19, %v3248_v6  ;;  %v12842_v59 = vld [vmem:[#allocation70_spill] sm:$0xff] }
 0x356   : > { %v3285_v44 = vadd.bf16 %v3269_v3, %v3249_v4  ;;  %v9845_v16 = vadd.bf16 %v3270_v39, %v3250_v53  ;;  %v3294_v25 = vmul.bf16 %v9786_v62, %v9741_v37  ;;  %v3295_v48 = vmul.bf16 %v9786_v62, %v9743_v55 }
 0x357   : > { %v9851_v9 = vadd.bf16 %v3271_v26, %v3251_v8  ;;  %v3288_v24 = vadd.bf16 %v3272_v30, %v3252_v61  ;;  %v3289_v35 = vadd.bf16 %v3273_v29, %v3253_v0  ;;  %v3296_v54 = vmul.bf16 %v9786_v62, %v9745_v21  ;;  %v12843_v26 = vld [vmem:[#allocation114_spill] sm:$0xff] }
 0x358   : > { %v3297_v45 = vmul.bf16 %v9786_v62, %v9747_v17  ;;  %v3298_v32 = vmul.bf16 %v9786_v62, %v9749_v15  ;;  %v3299_v34 = vmul.bf16 %v9786_v62, %v9751_v63  ;;  %v3308_v37 = vmul.bf16 %v9786_v62, %v9772_v51 }
 0x359   : > { %v3300_v7 = vmul.bf16 %v9786_v62, %v9753_v57  ;;  %v3301_v22 = vmul.bf16 %v9786_v62, %v9755_v2  ;;  %v3302_v12 = vmul.bf16 %v9786_v62, %v9757_v27  ;;  %v3309_v6 = vmul.bf16 %v9786_v62, %v9774_v42 }
 0x35a   : > { %v3310_v4 = vadd.bf16 %v3294_v25, %v3274_v14  ;;  %v3311_v53 = vadd.bf16 %v3295_v48, %v3275_v31  ;;  %v3330_v8 = vmul.bf16 %v9789_v41, %v9743_v55  ;;  %v3331_v61 = vmul.bf16 %v9789_v41, %v9745_v21 }
 0x35b   : > { %v3303_v0 = vmul.bf16 %v9786_v62, %v9759_v10  ;;  %v3304_v58 = vmul.bf16 %v9786_v62, %v9761_v5  ;;  %v3305_v46 = vmul.bf16 %v9786_v62, %v9763_v38  ;;  %v3306_v13 = vmul.bf16 %v9786_v62, %v12841_v23 }
 0x35c   : > { %v3312_v25 = vadd.bf16 %v3296_v54, %v3276_v1  ;;  %v3324_v18 = vadd.bf16 %v3308_v37, %v3288_v24  ;;  %v3332_v55 = vmul.bf16 %v9789_v41, %v9747_v17  ;;  %v3344_v60 = vmul.bf16 %v9789_v41, %v9774_v42  ;;  %v12844_v37 = vld [vmem:[#allocation40_spill] sm:$0xff] }
 0x35d   : > { %v3307_v36 = vmul.bf16 %v9786_v62, %v9770_v28  ;;  %v3313_v33 = vadd.bf16 %v3297_v45, %v3277_v40  ;;  %v3325_v47 = vadd.bf16 %v3309_v6, %v3289_v35  ;;  %v3345_v19 = vmul.bf16 %v9789_v41, %v12842_v59 }
 0x35e   : > { %v3346_v3 = vadd.bf16 %v3330_v8, %v3310_v4  ;;  %v3347_v39 = vadd.bf16 %v3331_v61, %v3311_v53  ;;  %v3366_v30 = vmul.bf16 %v12843_v26, %v9745_v21  ;;  %v3367_v29 = vmul.bf16 %v12843_v26, %v9747_v17 }
 0x35f   : > { %v3314_v14 = vadd.bf16 %v3298_v32, %v3278_v56  ;;  %v3315_v31 = vadd.bf16 %v3299_v34, %v3279_v43  ;;  %v3316_v1 = vadd.bf16 %v3300_v7, %v3280_v20  ;;  %v3333_v48 = vmul.bf16 %v9789_v41, %v9749_v15  ;;  %v12845_v32 = vld [vmem:[#allocation132_spill] sm:$0xff] }
 0x360   : > { %v3348_v62 = vadd.bf16 %v3332_v55, %v3312_v25  ;;  %v3360_v40 = vadd.bf16 %v3344_v60, %v3324_v18  ;;  %v3368_v24 = vmul.bf16 %v12843_v26, %v9749_v15  ;;  %v3380_v35 = vmul.bf16 %v12843_v26, %v12842_v59 }
 0x361   : > { %v3317_v54 = vadd.bf16 %v3301_v22, %v3281_v49  ;;  %v9901_v45 = vadd.bf16 %v3302_v12, %v3282_v50  ;;  %v3361_v21 = vadd.bf16 %v3345_v19, %v3325_v47  ;;  %v3381_v56 = vmul.bf16 %v12843_v26, %v12844_v37 }
 0x362   : > { %v3382_v43 = vadd.bf16 %v3366_v30, %v3346_v3  ;;  %v3383_v20 = vadd.bf16 %v3367_v29, %v3347_v39  ;;  %v3402_v34 = vmul.bf16 %v12845_v32, %v9747_v17  ;;  %v3403_v7 = vmul.bf16 %v12845_v32, %v9749_v15  ;;  %v12848_v30 = vld [vmem:[#allocation37_spill] sm:$0xff]  ;;  %v12849_v29 = vld [vmem:[#allocation38_spill] sm:$0xff] }
 0x363   : > { %v9909_v6 = vadd.bf16 %v3303_v0, %v3283_v11  ;;  %v9911_v4 = vadd.bf16 %v3304_v58, %v3284_v52  ;;  %v9913_v53 = vadd.bf16 %v3305_v46, %v3285_v44  ;;  %v3334_v50 = vmul.bf16 %v9789_v41, %v9751_v63  ;;  %v12846_v52 = vld [vmem:[#allocation147_spill] sm:$0xff]  ;;  %v12847_v46 = vld [vmem:[#allocation72_spill] sm:$0xff] }
 0x364   : > { %v3349_v49 = vadd.bf16 %v3333_v48, %v3313_v33  ;;  %v3369_v22 = vmul.bf16 %v12843_v26, %v9751_v63  ;;  %v3384_v12 = vadd.bf16 %v3368_v24, %v3348_v62  ;;  %v3396_v8 = vadd.bf16 %v3380_v35, %v3360_v40 }
 0x365   : > { %v3397_v61 = vadd.bf16 %v3381_v56, %v3361_v21  ;;  %v3404_v17 = vmul.bf16 %v12845_v32, %v9751_v63  ;;  %v3416_v11 = vmul.bf16 %v12845_v32, %v12844_v37  ;;  %v3417_v44 = vmul.bf16 %v12845_v32, %v12846_v52 }
 0x366   : > { %v3418_v0 = vadd.bf16 %v3402_v34, %v3382_v43  ;;  %v3419_v58 = vadd.bf16 %v3403_v7, %v3383_v20  ;;  %v3438_v25 = vmul.bf16 %v12847_v46, %v9749_v15  ;;  %v3439_v18 = vmul.bf16 %v12847_v46, %v9751_v63 }
 0x367   : > { %v9930_v55 = vadd.bf16 %v3306_v13, %v9845_v16  ;;  %v3335_v60 = vmul.bf16 %v9789_v41, %v9753_v57  ;;  %v3336_v33 = vmul.bf16 %v9789_v41, %v9755_v2  ;;  %v3337_v47 = vmul.bf16 %v9789_v41, %v9757_v27 }
 0x368   : > { %v3350_v19 = vadd.bf16 %v3334_v50, %v3314_v14  ;;  %v3370_v3 = vmul.bf16 %v12843_v26, %v9753_v57  ;;  %v3385_v15 = vadd.bf16 %v3369_v22, %v3349_v49  ;;  %v3405_v63 = vmul.bf16 %v12845_v32, %v9753_v57 }
 0x369   : > { %v3432_v39 = vadd.bf16 %v3416_v11, %v3396_v8  ;;  %v3433_v16 = vadd.bf16 %v3417_v44, %v3397_v61  ;;  %v3452_v13 = vmul.bf16 %v12847_v46, %v12846_v52  ;;  %v12850_v48 = vpack.c.bf16 %v12848_v30, %v12849_v29 }
 0x36a   : > { %v3420_v40 = vadd.bf16 %v3404_v17, %v3384_v12  ;;  %v3440_v14 = vmul.bf16 %v12847_v46, %v9753_v57  ;;  %v3454_v24 = vadd.bf16 %v3438_v25, %v3418_v0  ;;  %v3455_v35 = vadd.bf16 %v3439_v18, %v3419_v58 }
 0x36b   : > { %v3453_v62 = vmul.bf16 %v12847_v46, %v12850_v48  ;;  %v9951_v21 = vadd.bf16 %v3307_v36, %v9851_v9  ;;  %v3338_v56 = vmul.bf16 %v9789_v41, %v9759_v10  ;;  %v3351_v43 = vadd.bf16 %v3335_v60, %v3315_v31 }
 0x36c   : > { %v3371_v20 = vmul.bf16 %v12843_v26, %v9755_v2  ;;  %v3386_v34 = vadd.bf16 %v3370_v3, %v3350_v19  ;;  %v3406_v7 = vmul.bf16 %v12845_v32, %v9755_v2  ;;  %v3421_v50 = vadd.bf16 %v3405_v63, %v3385_v15  ;;  %v12852_v3 = vld [vmem:[#allocation139_spill] sm:$0xff]  ;;  %v12853_v63 = vld [vmem:[#allocation142_spill] sm:$0xff] }
 0x36d   : > { %v3441_v57 = vmul.bf16 %v12847_v46, %v9755_v2  ;;  %v3352_v49 = vadd.bf16 %v3336_v33, %v3316_v1  ;;  %v3353_v22 = vadd.bf16 %v3337_v47, %v3317_v54  ;;  %v3468_v12 = vadd.bf16 %v3452_v13, %v3432_v39  ;;  %v12851_v47 = vld [vmem:[#allocation138_spill] sm:$0xff] }
 0x36e   : > { %v3469_v9 = vadd.bf16 %v3453_v62, %v3433_v16  ;;  %v3456_v36 = vadd.bf16 %v3440_v14, %v3420_v40  ;;  %v3470_v8 = vunpack.c.l.bf16 %v3454_v24  ;;  %v3471_v61 = vunpack.c.h.bf16 %v3454_v24  ;;  %v12854_v40 = vld [vmem:[#allocation57_spill] sm:$0xff]  ;;  %v12855_v24 = vld [vmem:[#allocation58_spill] sm:$0xff] }
 0x36f   : > { %v3472_v17 = vunpack.c.l.bf16 %v3455_v35  ;;  %v3372_v31 = vmul.bf16 %v12843_v26, %v9757_v27  ;;  %v3373_v11 = vmul.bf16 %v12843_v26, %v9759_v10  ;;  %v3387_v52 = vadd.bf16 %v3371_v20, %v3351_v43  ;;  %v12856_v43 = vld [vmem:[#allocation66_spill] sm:$0xff] }
 0x370   : > { %v3407_v44 = vmul.bf16 %v12845_v32, %v9757_v27  ;;  %v3422_v0 = vadd.bf16 %v3406_v7, %v3386_v34  ;;  %v3442_v2 = vmul.bf16 %v12847_v46, %v9757_v27  ;;  %v3457_v1 = vadd.bf16 %v3441_v57, %v3421_v50  ;;  %v12857_v34 = vld [vmem:[#allocation105_spill] sm:$0xff]  ;;  %v12858_v50 = vld [vmem:[#allocation68_spill] sm:$0xff] }
 0x371   : > { %v3473_v54 = vunpack.c.h.bf16 %v3455_v35  ;;  %v3498_v58 = vunpack.c.l.bf16 %v3468_v12  ;;  %v3499_v25 = vunpack.c.h.bf16 %v3468_v12  ;;  %v3500_v18 = vunpack.c.l.bf16 %v3469_v9 }
 0x372   : > { %v3501_v60 = vunpack.c.h.bf16 %v3469_v9  ;;  %v3474_v33 = vunpack.c.l.bf16 %v3456_v36  ;;  %v9970_v19 = vadd.f32 %v3470_v8, %v12851_v47  ;;  %v9973_v15 = vadd.f32 %v3471_v61, %v12852_v3 }
 0x373   : > { %v9976_v39 = vadd.f32 %v3472_v17, %v12853_v63  ;;  %v3388_v16 = vadd.bf16 %v3372_v31, %v3352_v49  ;;  %v3408_v27 = vmul.bf16 %v12845_v32, %v9759_v10  ;;  %v3423_v13 = vadd.bf16 %v3407_v44, %v3387_v52  ;;  %v12859_v49 = vld [vmem:[#allocation63_spill] sm:$0xff] }
 0x374   : > { %v3443_v30 = vmul.bf16 %v12847_v46, %v9759_v10  ;;  %v3458_v29 = vadd.bf16 %v3442_v2, %v3422_v0  ;;  %v3475_v48 = vunpack.c.h.bf16 %v3456_v36  ;;  %v3476_v62 = vunpack.c.l.bf16 %v3457_v1  ;;  %v12860_v0 = vld [vmem:[#allocation69_spill] sm:$0xff] }
 0x375   : > { %v9983_v14 = vadd.f32 %v3473_v54, %v12854_v40  ;;  %v9986_v35 = vadd.f32 %v3498_v58, %v12855_v24  ;;  %v9989_v20 = vadd.f32 %v3499_v25, %v12856_v43  ;;  %v9992_v7 = vadd.f32 %v3500_v18, %v12857_v34  ;;  %v12863_v34 = vld [vmem:[#allocation80_spill] sm:$0xff] }
 0x376   : > { %v9995_v57 = vadd.f32 %v3501_v60, %v12858_v50  ;;  %v9998_v10 = vadd.f32 %v3474_v33, %v12859_v49  ;;  %v3534_v12 = vsel %vm370_vm0, %v9970_v19, 0.0  ;;  %v3535_v9 = vsel %vm370_vm0, %v9973_v15, 0.0  ;;  %v12861_v33 = vld [vmem:[#allocation116_spill] sm:$0xff] }
 0x377   : > { %v3537_v36 = vsel %vm370_vm0, %v9976_v39, 0.0  ;;  %v3339_v8 = vmul.bf16 %v9789_v41, %v9761_v5  ;;  %v3354_v61 = vadd.bf16 %v3338_v56, %v9901_v45  ;;  %v3374_v17 = vmul.bf16 %v12843_v26, %v9761_v5 }
 0x378   : > { %v3536_v31 = vadd.f32 %v3535_v9, %v3534_v12  ;;  %v3389_v52 = vadd.bf16 %v3373_v11, %v3353_v22  ;;  %v3477_v44 = vunpack.c.h.bf16 %v3457_v1  ;;  %v10012_v2 = vadd.f32 %v3475_v48, %v12860_v0 }
 0x379   : > { %v3539_v54 = vsel %vm370_vm0, %v9983_v14, 0.0  ;;  %v3409_v58 = vmul.bf16 %v12845_v32, %v9761_v5  ;;  %v3424_v25 = vadd.bf16 %v3408_v27, %v3388_v16  ;;  %v3444_v18 = vmul.bf16 %v12847_v46, %v9761_v5  ;;  %v12862_v27 = vld [vmem:[#allocation99_spill] sm:$0xff] }
 0x37a   : > { %v3538_v45 = vadd.f32 %v3537_v36, %v3536_v31  ;;  %v3459_v56 = vadd.bf16 %v3443_v30, %v3423_v13  ;;  %v3478_v60 = vunpack.c.l.bf16 %v3458_v29  ;;  %v10021_v47 = vadd.f32 %v3476_v62, %v12861_v33 }
 0x37b   : > { %v3541_v22 = vsel %vm370_vm0, %v9998_v10, 0.0  ;;  %v3340_v11 = vmul.bf16 %v9789_v41, %v9763_v38  ;;  %v3355_v1 = vadd.bf16 %v3339_v8, %v9909_v6  ;;  %v3375_v3 = vmul.bf16 %v12843_v26, %v9763_v38 }
 0x37c   : > { %v3540_v63 = vadd.f32 %v3539_v54, %v3538_v45  ;;  %v3390_v16 = vadd.bf16 %v3374_v17, %v3354_v61  ;;  %v3479_v5 = vunpack.c.h.bf16 %v3458_v29  ;;  %v10031_v13 = vadd.f32 %v3477_v44, %v12862_v27  ;;  %v12864_v61 = vld [vmem:[#allocation122_spill] sm:$0xff] }
 0x37d   : > { %v3543_v30 = vsel %vm370_vm0, %v10012_v2, 0.0  ;;  %v3410_v48 = vmul.bf16 %v12845_v32, %v9763_v38  ;;  %v3425_v62 = vadd.bf16 %v3409_v58, %v3389_v52  ;;  %v3445_v40 = vmul.bf16 %v12847_v46, %v9763_v38 }
 0x37e   : > { %v3542_v6 = vadd.f32 %v3541_v22, %v3540_v63  ;;  %v3460_v24 = vadd.bf16 %v3444_v18, %v3424_v25  ;;  %v3480_v43 = vunpack.c.l.bf16 %v3459_v56  ;;  %v10040_v50 = vadd.f32 %v3478_v60, %v12863_v34  ;;  %v12865_v25 = vld [vmem:[#allocation52_spill] sm:$0xff] }
 0x37f   : > { %v3545_v29 = vsel %vm370_vm0, %v10021_v47, 0.0  ;;  %v3341_v49 = vmul.bf16 %v9789_v41, %v12841_v23  ;;  %v3356_v12 = vadd.bf16 %v3340_v11, %v9911_v4  ;;  %v3376_v9 = vmul.bf16 %v12843_v26, %v12841_v23 }
 0x380   : > { %v3544_v36 = vadd.f32 %v3543_v30, %v3542_v6  ;;  %v3391_v8 = vadd.bf16 %v3375_v3, %v3355_v1  ;;  %v3481_v38 = vunpack.c.h.bf16 %v3459_v56  ;;  %v10050_v17 = vadd.f32 %v3479_v5, %v12864_v61  ;;  %v12866_v1 = vld [vmem:[#allocation64_spill] sm:$0xff] }
 0x381   : > { %v3547_v31 = vsel %vm370_vm0, %v10031_v13, 0.0  ;;  %v3411_v52 = vmul.bf16 %v12845_v32, %v12841_v23  ;;  %v3426_v44 = vadd.bf16 %v3410_v48, %v3390_v16  ;;  %v3446_v0 = vmul.bf16 %v12847_v46, %v12841_v23 }
 0x382   : > { %v3546_v4 = vadd.f32 %v3545_v29, %v3544_v36  ;;  %v3461_v54 = vadd.bf16 %v3445_v40, %v3425_v62  ;;  %v3482_v58 = vunpack.c.l.bf16 %v3460_v24  ;;  %v10059_v18 = vadd.f32 %v3480_v43, %v12865_v25  ;;  %v12867_v62 = vld [vmem:[#allocation123_spill] sm:$0xff] }
 0x383   : > { %v3549_v45 = vsel %vm370_vm0, %v10040_v50, 0.0  ;;  %v3342_v56 = vmul.bf16 %v9789_v41, %v9770_v28  ;;  %v3357_v60 = vadd.bf16 %v3341_v49, %v9913_v53  ;;  %v3377_v33 = vmul.bf16 %v12843_v26, %v9770_v28 }
 0x384   : > { %v3548_v22 = vadd.f32 %v3547_v31, %v3546_v4  ;;  %v3392_v11 = vadd.bf16 %v3376_v9, %v3356_v12  ;;  %v3483_v23 = vunpack.c.h.bf16 %v3460_v24  ;;  %v10069_v3 = vadd.f32 %v3481_v38, %v12866_v1  ;;  %v12868_v12 = vld [vmem:[#allocation67_spill] sm:$0xff]  ;;  %v12870_v4 = vld [vmem:[#allocation130_spill] sm:$0xff] }
 0x385   : > { %v3551_v63 = vsel %vm370_vm0, %v10050_v17, 0.0  ;;  %v3412_v16 = vmul.bf16 %v12845_v32, %v9770_v28  ;;  %v3427_v5 = vadd.bf16 %v3411_v52, %v3391_v8  ;;  %v3447_v27 = vmul.bf16 %v12847_v46, %v9770_v28  ;;  %v12869_v52 = vld [vmem:[#allocation36_spill] sm:$0xff] }
 0x386   : > { %v3550_v53 = vadd.f32 %v3549_v45, %v3548_v22  ;;  %v3462_v30 = vadd.bf16 %v3446_v0, %v3426_v44  ;;  %v3484_v48 = vunpack.c.l.bf16 %v3461_v54  ;;  %v10078_v40 = vadd.f32 %v3482_v58, %v12867_v62  ;;  %v12873_v22 = vld [vmem:[#allocation124_spill] sm:$0xff] }
 0x387   : > { %v3553_v6 = vsel %vm370_vm0, %v10059_v18, 0.0  ;;  %v3343_v24 = vmul.bf16 %v9789_v41, %v9772_v51  ;;  %v3358_v43 = vadd.bf16 %v3342_v56, %v9930_v55  ;;  %v3378_v34 = vmul.bf16 %v12843_v26, %v9772_v51 }
 0x388   : > { %v3552_v29 = vadd.f32 %v3551_v63, %v3550_v53  ;;  %v3393_v49 = vadd.bf16 %v3377_v33, %v3357_v60  ;;  %v3485_v28 = vunpack.c.h.bf16 %v3461_v54  ;;  %v10088_v9 = vadd.f32 %v3483_v23, %v12868_v12  ;;  %v12871_v54 = vld [vmem:[#allocation135_spill] sm:$0xff] }
 0x389   : > { %v3555_v36 = vsel %vm370_vm0, %v10069_v3, 0.0  ;;  %v3413_v8 = vmul.bf16 %v12845_v32, %v9772_v51  ;;  %v3428_v38 = vadd.bf16 %v3412_v16, %v3392_v11  ;;  %v3448_v41 = vmul.bf16 %v12847_v46, %v9772_v51 }
 0x38a   : > { %v3554_v55 = vadd.f32 %v3553_v6, %v3552_v29  ;;  %v3463_v61 = vadd.bf16 %v3447_v27, %v3427_v5  ;;  %v3486_v31 = vunpack.c.l.bf16 %v3462_v30  ;;  %v10097_v44 = vadd.f32 %v3484_v48, %v12869_v52  ;;  %v12875_v48 = vld [vmem:[#allocation136_spill] sm:$0xff]  ;;  %v12876_v6 = vld [vmem:[#allocation94_spill] sm:$0xff] }
 0x38b   : > { %v3557_v0 = vsel %vm370_vm0, %v10078_v40, 0.0  ;;  %v12872_v58 = vunpack.c.l.bf16 %v12871_v54  ;;  %v3359_v45 = vadd.bf16 %v3343_v24, %v9951_v21  ;;  %v3379_v56 = vmul.bf16 %v12843_v26, %v9774_v42  ;;  %v12874_v26 = vld [vmem:[#allocation76_spill] sm:$0xff] }
 0x38c   : > { %v3556_v60 = vadd.f32 %v3555_v36, %v3554_v55  ;;  %v3394_v51 = vadd.bf16 %v3378_v34, %v3358_v43  ;;  %v3487_v33 = vunpack.c.h.bf16 %v3462_v30  ;;  %v10108_v11 = vadd.f32 %v3485_v28, %v12873_v22  ;;  %v12878_v34 = vld [vmem:[#allocation97_spill] sm:$0xff]  ;;  %v12879_v29 = vld [vmem:[#allocation60_spill] sm:$0xff] }
 0x38d   : > { %v3087_v25 = vadd.f32 %v12872_v58, %v12870_v4  ;;  %v3559_v23 = vsel %vm370_vm0, %v10088_v9, 0.0  ;;  %v3414_v1 = vmul.bf16 %v12845_v32, %v9774_v42  ;;  %v3429_v63 = vadd.bf16 %v3413_v8, %v3393_v49  ;;  %v12881_v8 = vld [vmem:[#allocation88_spill] sm:$0xff] }
 0x38e   : > { %v3449_v16 = vmul.bf16 %v12847_v46, %v9774_v42  ;;  %v3558_v21 = vadd.f32 %v3557_v0, %v3556_v60  ;;  %v3464_v5 = vadd.bf16 %v3448_v41, %v3428_v38  ;;  %v3488_v27 = vunpack.c.l.bf16 %v3463_v61  ;;  %v12884_v60 = vld [vmem:[#allocation98_spill] sm:$0xff] }
 0x38f   : > { %v10117_v53 = vadd.f32 %v3486_v31, %v12874_v26  ;;  %v3561_v30 = vsel %vm370_vm0, %v10097_v44, 0.0  ;;  %v3059_v62 = vunpack.c.l.bf16 %v12875_v48  ;;  %v12877_v24 = vunpack.c.h.bf16 %v12871_v54  ;;  %v12889_v26 = vld [vmem:[#allocation103_spill] sm:$0xff] }
 0x390   : > { %v12880_v49 = vunpack.c.l.bf16 %v12879_v29  ;;  %v3560_v42 = vadd.f32 %v3559_v23, %v3558_v21  ;;  %v3395_v12 = vadd.bf16 %v3379_v56, %v3359_v45  ;;  %v3489_v36 = vunpack.c.h.bf16 %v3463_v61  ;;  %v12882_v45 = vld [vmem:[#allocation48_spill] sm:$0xff]  ;;  %v12883_v56 = vld [vmem:[#allocation110_spill] sm:$0xff] }
 0x391   : > { %v3088_v43 = vadd.f32 %v12877_v24, %v12876_v6  ;;  %v10129_v38 = vadd.f32 %v3487_v33, %v12881_v8  ;;  %v3563_v41 = vsel %vm370_vm0, %v10108_v11, 0.0  ;;  %v3415_v55 = vmul.bf16 %v12845_v32, %v12842_v59  ;;  %v12886_v32 = vld [vmem:[#allocation140_spill] sm:$0xff]  ;;  %v12892_v8 = vld [vmem:[#allocation150_spill] sm:$0xff] }
 0x392   : > { %v3089_v28 = vadd.f32 %v12880_v49, %v12878_v34  ;;  %v3430_v31 = vadd.bf16 %v3414_v1, %v3394_v51  ;;  %v3450_v52 = vmul.bf16 %v12847_v46, %v12842_v59  ;;  %v3562_v0 = vadd.f32 %v3561_v30, %v3560_v42  ;;  %v12887_v21 = vld [vmem:[#allocation100_spill] sm:$0xff] }
 0x393   : > { %v3465_v4 = vadd.bf16 %v3449_v16, %v3429_v63  ;;  %v3490_v54 = vunpack.c.l.bf16 %v3464_v5  ;;  %v10137_v58 = vadd.f32 %v3488_v27, %v3087_v25  ;;  %v3565_v61 = vsel %vm370_vm0, %v10117_v53, 0.0 }
 0x394   : > { %v12885_v33 = vmul.bf16 %v12883_v56, %v12884_v60  ;;  %v3060_v23 = vunpack.c.h.bf16 %v12875_v48  ;;  %v3061_v51 = vunpack.c.l.bf16 %v12886_v32  ;;  %v3564_v1 = vadd.f32 %v3563_v41, %v3562_v0  ;;  %v12897_v56 = vld [vmem:[#allocation131_spill] sm:$0xff] }
 0x395   : > { %v12888_v59 = vunpack.c.h.bf16 %v12879_v29  ;;  %v3491_v16 = vunpack.c.h.bf16 %v3464_v5  ;;  %v10150_v25 = vadd.f32 %v3489_v36, %v3088_v43  ;;  %v3567_v27 = vsel %vm370_vm0, %v10129_v38, 0.0  ;;  %v12890_v5 = vld [vmem:[#allocation153_spill] sm:$0xff]  ;;  %v12891_v36 = vld [vmem:[#allocation62_spill] sm:$0xff] }
 0x396   : > { %v3034_v22 = vadd.bf16 %v12885_v33, %v12882_v45  ;;  %v3091_v30 = vadd.f32 %v3059_v62, %v12889_v26  ;;  %v3431_v6 = vadd.bf16 %v3415_v55, %v3395_v12  ;;  %v3451_v24 = vmul.bf16 %v12847_v46, %v12844_v37  ;;  %v12894_v55 = vld [vmem:[#allocation106_spill] sm:$0xff] }
 0x397   : > { %v3090_v63 = vadd.f32 %v12888_v59, %v12887_v21  ;;  %v3566_v48 = vadd.f32 %v3565_v61, %v3564_v1  ;;  %v3466_v34 = vadd.bf16 %v3450_v52, %v3430_v31  ;;  %v3492_v49 = vunpack.c.l.bf16 %v3465_v4  ;;  %v12895_v31 = vld [vmem:[#allocation126_spill] sm:$0xff] }
 0x398   : > { %v10157_v42 = vadd.f32 %v3490_v54, %v3089_v28  ;;  %v3569_v29 = vsel %vm370_vm0, %v10137_v58, 0.0  ;;  %v2631_v43 = vunpack.c.h.bf16 %v12890_v5  ;;  %v12893_v41 = vunpack.c.h.bf16 %v12892_v8 }
 0x399   : > { %v3062_v62 = vunpack.c.h.bf16 %v12886_v32  ;;  %v3568_v12 = vadd.f32 %v3567_v27, %v3566_v48  ;;  %v3092_v45 = vadd.f32 %v3060_v23, %v12894_v55  ;;  %v3493_v37 = vunpack.c.h.bf16 %v3465_v4  ;;  %v12898_v23 = vld [vmem:[#allocation149_spill] sm:$0xff] }
 0x39a   : > { %v2661_v0 = vadd.f32 %v12893_v41, %v12891_v36  ;;  %v10167_v46 = vadd.f32 %v3491_v16, %v3090_v63  ;;  %v3571_v28 = vsel %vm370_vm0, %v10150_v25, 0.0  ;;  %v12896_v52 = vunpack.c.l.bf16 %v12890_v5 }
 0x39b   : > { %v3063_v61 = vunpack.c.l.bf16 %v3034_v22  ;;  %v3093_v60 = vadd.f32 %v3061_v51, %v12897_v56  ;;  %v3570_v33 = vadd.f32 %v3569_v29, %v3568_v12  ;;  %v3467_v1 = vadd.bf16 %v3451_v24, %v3431_v6 }
 0x39c   : > { %v2662_v54 = vadd.f32 %v12896_v52, %v12895_v31  ;;  %v3494_v21 = vunpack.c.l.bf16 %v3466_v34  ;;  %v10175_v32 = vadd.f32 %v3492_v49, %v3091_v30  ;;  %v3573_v4 = vsel %vm370_vm0, %v10157_v42, 0.0 }
 0x39d   : > { %v2663_v59 = vadd.f32 %v2631_v43, %v12898_v23  ;;  %v3064_v63 = vunpack.c.h.bf16 %v3034_v22  ;;  %v3572_v16 = vadd.f32 %v3571_v28, %v3570_v33  ;;  %v3094_v27 = vadd.f32 %v3062_v62, %v2661_v0 }
 0x39e   : > { %v3495_v26 = vunpack.c.h.bf16 %v3466_v34  ;;  %v10180_v48 = vadd.f32 %v3493_v37, %v3092_v45  ;;  %v3575_v5 = vsel %vm370_vm0, %v10167_v46, 0.0  ;;  %v3095_v29 = vadd.f32 %v3063_v61, %v2662_v54 }
 0x39f   : > { %v3574_v51 = vadd.f32 %v3573_v4, %v3572_v16  ;;  %v3496_v6 = vunpack.c.l.bf16 %v3467_v1  ;;  %v10184_v24 = vadd.f32 %v3494_v21, %v3093_v60  ;;  %v3577_v30 = vsel %vm370_vm0, %v10175_v32, 0.0 }
 0x3a0   : > { %v3096_v36 = vadd.f32 %v3064_v63, %v2663_v59  ;;  %v3497_v43 = vunpack.c.h.bf16 %v3467_v1  ;;  %v10188_v22 = vadd.f32 %v3495_v26, %v3094_v27  ;;  %v3579_v34 = vsel %vm370_vm0, %v10180_v48, 0.0 }
 0x3a1   : > { %v3576_v49 = vadd.f32 %v3575_v5, %v3574_v51  ;;  %v10192_v41 = vadd.f32 %v3496_v6, %v3095_v29  ;;  %v3581_v0 = vsel %vm370_vm0, %v10184_v24, 0.0  ;;  %v3589_v54 = vsel %vm370_vm0, %v9986_v35, 0.0 }
 0x3a2   : > { %v10196_v12 = vadd.f32 %v3497_v43, %v3096_v36  ;;  %v3583_v55 = vsel %vm370_vm0, %v10188_v22, 0.0  ;;  %v3591_v56 = vsel %vm370_vm0, %v9989_v20, 0.0  ;;  %v3593_v33 = vsel %vm370_vm0, %v9992_v7, 0.0 }
 0x3a3   : > { %v3578_v8 = vadd.f32 %v3577_v30, %v3576_v49  ;;  %v3585_v37 = vsel %vm370_vm0, %v10192_v41, 0.0  ;;  %v3595_v21 = vsel %vm370_vm0, %v9995_v57, 0.0 }
 0x3a4   : > { %v3587_v31 = vsel %vm370_vm0, %v10196_v12, 0.0 }
 0x3a5   : > { %v3580_v62 = vadd.f32 %v3579_v34, %v3578_v8 }
 0x3a7   : > { %v3582_v45 = vadd.f32 %v3581_v0, %v3580_v62 }
 0x3a9   : > { %v3584_v28 = vadd.f32 %v3583_v55, %v3582_v45 }
 0x3ab   : > { %v3586_v52 = vadd.f32 %v3585_v37, %v3584_v28 }
 0x3ad   : > { %v3588_v61 = vadd.f32 %v3587_v31, %v3586_v52 }
 0x3af   : > { %v3590_v60 = vadd.f32 %v3589_v54, %v3588_v61 }
 0x3b1   : > { %v3592_v1 = vadd.f32 %v3591_v56, %v3590_v60 }
 0x3b3   : > { %v3594_v4 = vadd.f32 %v3593_v33, %v3592_v1 }
 0x3b5   : > { %v3596_v23 = vadd.f32 %v3595_v21, %v3594_v4 }
 0x3b7   : > { %3597 = vadd.xlane.f32.xlu0 %v3596_v23 }
 0x440   : > { %v3598_v59 = vpop.xlane.xlu0 %3597 }
 0x441   : > { %v3599_v63 = vrot.slane %v3598_v59, 4 }
 0x443   : > { %v3600_v16 = vadd.f32 %v3599_v63, %v3598_v59 }
 0x445   : > { %v3601_v27 = vrot.slane %v3600_v16, 2 }
 0x447   : > { %v3602_v26 = vadd.f32 %v3601_v27, %v3600_v16 }
 0x449   : > { %v3603_v5 = vrot.slane %v3602_v26, 1 }
 0x44b   : > { %v3604_v51 = vadd.f32 %v3603_v5, %v3602_v26 }
 0x44d   : > { %4723 = vpush %v3604_v51 }
 0x47e   : > { %s4724_s14 = spop %4723 }
 0x47f   : > { %s3606_s15 = smul.f32 0.0009765625, %s4724_s14 }
 0x481   : > { %v10212_v29 = vstv %s3606_s15 }
 0x482   : > { %v10216_v6 = vsub.f32 %v9970_v19, %v10212_v29  ;;  %v10220_v30 = vsub.f32 %v9973_v15, %v10212_v29  ;;  %v10224_v49 = vsub.f32 %v9976_v39, %v10212_v29  ;;  %v10228_v36 = vsub.f32 %v9983_v14, %v10212_v29 }
 0x483   : > { %v10236_v19 = vsub.f32 %v9998_v10, %v10212_v29  ;;  %v10242_v39 = vsub.f32 %v10012_v2, %v10212_v29  ;;  %v10250_v55 = vsub.f32 %v10021_v47, %v10212_v29  ;;  %v10257_v2 = vsub.f32 %v10031_v13, %v10212_v29 }
 0x484   : > { %v3640_v43 = vmul.f32 %v10216_v6, %v10216_v6  ;;  %v3641_v34 = vmul.f32 %v10220_v30, %v10220_v30  ;;  %v3642_v15 = vmul.f32 %v10224_v49, %v10224_v49  ;;  %v3643_v14 = vmul.f32 %v10228_v36, %v10228_v36 }
 0x485   : > { %v3644_v10 = vmul.f32 %v10236_v19, %v10236_v19  ;;  %v3645_v28 = vmul.f32 %v10242_v39, %v10242_v39  ;;  %v10264_v47 = vsub.f32 %v10040_v50, %v10212_v29  ;;  %v3646_v54 = vmul.f32 %v10250_v55, %v10250_v55 }
 0x486   : > { %v3672_v8 = vsel %vm370_vm0, %v3640_v43, 0.0  ;;  %v3673_v0 = vsel %vm370_vm0, %v3641_v34, 0.0  ;;  %v3675_v45 = vsel %vm370_vm0, %v3642_v15, 0.0  ;;  %v3677_v31 = vsel %vm370_vm0, %v3643_v14, 0.0 }
 0x487   : > { %v3674_v62 = vadd.f32 %v3673_v0, %v3672_v8  ;;  %v3679_v61 = vsel %vm370_vm0, %v3644_v10, 0.0  ;;  %v10271_v13 = vsub.f32 %v10050_v17, %v10212_v29  ;;  %v3647_v60 = vmul.f32 %v10257_v2, %v10257_v2 }
 0x488   : > { %v3681_v33 = vsel %vm370_vm0, %v3645_v28, 0.0  ;;  %v10278_v50 = vsub.f32 %v10059_v18, %v10212_v29  ;;  %v3648_v21 = vmul.f32 %v10264_v47, %v10264_v47  ;;  %v3683_v4 = vsel %vm370_vm0, %v3646_v54, 0.0 }
 0x489   : > { %v3676_v37 = vadd.f32 %v3675_v45, %v3674_v62  ;;  %v10285_v17 = vsub.f32 %v10069_v3, %v10212_v29  ;;  %v3649_v59 = vmul.f32 %v10271_v13, %v10271_v13  ;;  %v3685_v63 = vsel %vm370_vm0, %v3647_v60, 0.0 }
 0x48a   : > { %v10292_v18 = vsub.f32 %v10078_v40, %v10212_v29  ;;  %v3650_v27 = vmul.f32 %v10278_v50, %v10278_v50  ;;  %v3687_v26 = vsel %vm370_vm0, %v3648_v21, 0.0  ;;  %v10299_v3 = vsub.f32 %v10088_v9, %v10212_v29 }
 0x48b   : > { %v3678_v52 = vadd.f32 %v3677_v31, %v3676_v37  ;;  %v3651_v51 = vmul.f32 %v10285_v17, %v10285_v17  ;;  %v3689_v43 = vsel %vm370_vm0, %v3649_v59, 0.0  ;;  %v10306_v40 = vsub.f32 %v10097_v44, %v10212_v29 }
 0x48c   : > { %v3652_v15 = vmul.f32 %v10292_v18, %v10292_v18  ;;  %v3691_v14 = vsel %vm370_vm0, %v3650_v27, 0.0  ;;  %v10313_v9 = vsub.f32 %v10108_v11, %v10212_v29  ;;  %v3653_v0 = vmul.f32 %v10299_v3, %v10299_v3 }
 0x48d   : > { %v3680_v56 = vadd.f32 %v3679_v61, %v3678_v52  ;;  %v3693_v62 = vsel %vm370_vm0, %v3651_v51, 0.0  ;;  %v10320_v44 = vsub.f32 %v10117_v53, %v10212_v29  ;;  %v3654_v45 = vmul.f32 %v10306_v40, %v10306_v40 }
 0x48e   : > { %v3695_v37 = vsel %vm370_vm0, %v3652_v15, 0.0  ;;  %v10327_v11 = vsub.f32 %v10129_v38, %v10212_v29  ;;  %v3655_v31 = vmul.f32 %v10313_v9, %v10313_v9  ;;  %v3697_v52 = vsel %vm370_vm0, %v3653_v0, 0.0 }
 0x48f   : > { %v3682_v1 = vadd.f32 %v3681_v33, %v3680_v56  ;;  %v10334_v53 = vsub.f32 %v10137_v58, %v10212_v29  ;;  %v3656_v61 = vmul.f32 %v10320_v44, %v10320_v44  ;;  %v3699_v56 = vsel %vm370_vm0, %v3654_v45, 0.0 }
 0x490   : > { %v10341_v38 = vsub.f32 %v10150_v25, %v10212_v29  ;;  %v3657_v33 = vmul.f32 %v10327_v11, %v10327_v11  ;;  %v10348_v58 = vsub.f32 %v10157_v42, %v10212_v29  ;;  %v10355_v25 = vsub.f32 %v10167_v46, %v10212_v29 }
 0x491   : > { %v3684_v23 = vadd.f32 %v3683_v4, %v3682_v1  ;;  %v3701_v1 = vsel %vm370_vm0, %v3655_v31, 0.0  ;;  %v3658_v4 = vmul.f32 %v10334_v53, %v10334_v53  ;;  %v10362_v42 = vsub.f32 %v10175_v32, %v10212_v29 }
 0x492   : > { %v10369_v46 = vsub.f32 %v10180_v48, %v10212_v29  ;;  %v10376_v32 = vsub.f32 %v10184_v24, %v10212_v29  ;;  %v10383_v48 = vsub.f32 %v10188_v22, %v10212_v29  ;;  %v10390_v24 = vsub.f32 %v10192_v41, %v10212_v29 }
 0x493   : > { %v3686_v16 = vadd.f32 %v3685_v63, %v3684_v23  ;;  %v3703_v23 = vsel %vm370_vm0, %v3656_v61, 0.0  ;;  %v3659_v63 = vmul.f32 %v10341_v38, %v10341_v38  ;;  %v10397_v22 = vsub.f32 %v10196_v12, %v10212_v29 }
 0x494   : > { %v10404_v41 = vsub.f32 %v9986_v35, %v10212_v29  ;;  %v10411_v12 = vsub.f32 %v9989_v20, %v10212_v29  ;;  %v10418_v35 = vsub.f32 %v9992_v7, %v10212_v29  ;;  %v10425_v20 = vsub.f32 %v9995_v57, %v10212_v29 }
 0x495   : > { %v3688_v5 = vadd.f32 %v3687_v26, %v3686_v16  ;;  %v3705_v16 = vsel %vm370_vm0, %v3657_v33, 0.0  ;;  %v3660_v26 = vmul.f32 %v10348_v58, %v10348_v58 }
 0x496   : > { %v3670_v7 = vmul.f32 %v10418_v35, %v10418_v35 }
 0x497   : > { %v3690_v34 = vadd.f32 %v3689_v43, %v3688_v5  ;;  %v3707_v5 = vsel %vm370_vm0, %v3658_v4, 0.0  ;;  %v3661_v43 = vmul.f32 %v10355_v25, %v10355_v25 }
 0x498   : > { %v3731_v57 = vsel %vm370_vm0, %v3670_v7, 0.0 }
 0x499   : > { %v3692_v8 = vadd.f32 %v3691_v14, %v3690_v34  ;;  %v3709_v34 = vsel %vm370_vm0, %v3659_v63, 0.0  ;;  %v3662_v14 = vmul.f32 %v10362_v42, %v10362_v42 }
 0x49b   : > { %v3694_v10 = vadd.f32 %v3693_v62, %v3692_v8  ;;  %v3711_v8 = vsel %vm370_vm0, %v3660_v26, 0.0  ;;  %v3663_v62 = vmul.f32 %v10369_v46, %v10369_v46 }
 0x49d   : > { %v3696_v28 = vadd.f32 %v3695_v37, %v3694_v10  ;;  %v3713_v10 = vsel %vm370_vm0, %v3661_v43, 0.0  ;;  %v3664_v37 = vmul.f32 %v10376_v32, %v10376_v32  ;;  %v3671_v43 = vmul.f32 %v10425_v20, %v10425_v20 }
 0x49f   : > { %v3698_v54 = vadd.f32 %v3697_v52, %v3696_v28  ;;  %v3715_v28 = vsel %vm370_vm0, %v3662_v14, 0.0  ;;  %v3665_v52 = vmul.f32 %v10383_v48, %v10383_v48  ;;  %v3733_v14 = vsel %vm370_vm0, %v3671_v43, 0.0 }
 0x4a1   : > { %v3700_v60 = vadd.f32 %v3699_v56, %v3698_v54  ;;  %v3717_v54 = vsel %vm370_vm0, %v3663_v62, 0.0  ;;  %v3666_v56 = vmul.f32 %v10390_v24, %v10390_v24 }
 0x4a3   : > { %v3702_v21 = vadd.f32 %v3701_v1, %v3700_v60  ;;  %v3719_v60 = vsel %vm370_vm0, %v3664_v37, 0.0  ;;  %v3667_v1 = vmul.f32 %v10397_v22, %v10397_v22 }
 0x4a5   : > { %v3704_v59 = vadd.f32 %v3703_v23, %v3702_v21  ;;  %v3721_v21 = vsel %vm370_vm0, %v3665_v52, 0.0  ;;  %v3668_v23 = vmul.f32 %v10404_v41, %v10404_v41  ;;  %v3829_v52 = vld [vmem:[%s10873_s5] sm:$0x3] }
 0x4a6   : > { %4722 = vmatprep.subr.msk.bf16.mxu0 %vm3904_vm7, %v3829_v52 }
 0x4a7   : > { %v3706_v27 = vadd.f32 %v3705_v16, %v3704_v59  ;;  %v3723_v59 = vsel %vm370_vm0, %v3666_v56, 0.0  ;;  %v3669_v16 = vmul.f32 %v10411_v12, %v10411_v12 }
 0x4a9   : > { %v3708_v51 = vadd.f32 %v3707_v5, %v3706_v27  ;;  %v3725_v27 = vsel %vm370_vm0, %v3667_v1, 0.0  ;;  %v3727_v5 = vsel %vm370_vm0, %v3668_v23, 0.0  ;;  %v10450_v23 = vld [vmem:[%s10872_s4] ss:$0 sm:$0xff] }
 0x4ab   : > { %v3710_v15 = vadd.f32 %v3709_v34, %v3708_v51  ;;  %v3729_v34 = vsel %vm370_vm0, %v3669_v16, 0.0 }
 0x4ad   : > { %v3712_v0 = vadd.f32 %v3711_v8, %v3710_v15 }
 0x4af   : > { %v3714_v45 = vadd.f32 %v3713_v10, %v3712_v0 }
 0x4b1   : > { %v3716_v31 = vadd.f32 %v3715_v28, %v3714_v45 }
 0x4b3   : > { %v3718_v61 = vadd.f32 %v3717_v54, %v3716_v31  ;;  %v3906_v54 = vsel %vm3904_vm7, %v3829_v52, 0 }
 0x4b4   : > { %4655 = vmatpush3.bf16.msra.mxu0 %v3906_v54 }
 0x4b5   : > { %v3720_v33 = vadd.f32 %v3719_v60, %v3718_v61  ;;  %v3749_v60 = vld [vmem:[%s10871_s3] sm:$0x1] }
 0x4b7   : > { %v3722_v4 = vadd.f32 %v3721_v21, %v3720_v33  ;;  %v12899_v21 = vld [vmem:[#allocation43_spill] sm:$0xff] }
 0x4b9   : > { %v3724_v63 = vadd.f32 %v3723_v59, %v3722_v4 }
 0x4bb   : > { %v3726_v26 = vadd.f32 %v3725_v27, %v3724_v63 }
 0x4bd   : > { %v3728_v51 = vadd.f32 %v3727_v5, %v3726_v26 }
 0x4bf   : > { %v3730_v15 = vadd.f32 %v3729_v34, %v3728_v51 }
 0x4c1   : > { %v3732_v29 = vadd.f32 %v3731_v57, %v3730_v15 }
 0x4c3   : > { %v3734_v8 = vadd.f32 %v3733_v14, %v3732_v29 }
 0x4c5   : > { %3735 = vadd.xlane.f32.xlu0 %v3734_v8 }
 0x54e   : > { %v3736_v0 = vpop.xlane.xlu0 %3735 }
 0x54f   : > { %v3737_v62 = vrot.slane %v3736_v0, 4 }
 0x551   : > { %v3738_v10 = vadd.f32 %v3737_v62, %v3736_v0 }
 0x553   : > { %v3739_v45 = vrot.slane %v3738_v10, 2 }
 0x555   : > { %v3740_v37 = vadd.f32 %v3739_v45, %v3738_v10 }
 0x557   : > { %v3741_v28 = vrot.slane %v3740_v37, 1 }
 0x559   : > { %v3742_v31 = vadd.f32 %v3741_v28, %v3740_v37 }
 0x55b   : > { %4725 = vpush %v3742_v31 }
 0x58c   : > { %s4726_s18 = spop %4725 }
 0x58d   : > { %s3744_s19 = smul.f32 0.0009765625, %s4726_s18 }
 0x58f   : > { %s3745_s20 = sadd.f32 1e-06, %s3744_s19 }
 0x591   : > { %v3746_v61 = vstv %s3745_s20 }
 0x592   : > { %4739 = vrsqrt.f32 %v3746_v61 }
 0x59f   : > { %v4740_v56 = vpop.eup %4739 }
 0x5a0   : > { %4727 = vpush %v4740_v56 }
 0x5d1   : > { %s4728_s23 = spop %4727 }
 0x5d2   : > { %v3750_v33 = vstv %s4728_s23 }
 0x5d3   : > { %v3751_v1 = vmul.f32 %v3750_v33, %v3749_v60 }
 0x5d5   : > { %v10445_v4 = vrot.slane %v3751_v1, %v12899_v21 }
 0x5d7   : > { %v3758_v59 = vmul.f32 %v10445_v4, %v10216_v6  ;;  %v3759_v63 = vmul.f32 %v10445_v4, %v10220_v30  ;;  %v3760_v16 = vmul.f32 %v10445_v4, %v10224_v49  ;;  %v3761_v27 = vmul.f32 %v10445_v4, %v10228_v36 }
 0x5d8   : > { %v3762_v26 = vmul.f32 %v10445_v4, %v10236_v19  ;;  %v3763_v5 = vmul.f32 %v10445_v4, %v10242_v39  ;;  %v3764_v19 = vmul.f32 %v10445_v4, %v10250_v55  ;;  %v3765_v15 = vmul.f32 %v10445_v4, %v10257_v2 }
 0x5d9   : > { %v3797_v7 = vadd.f32 %v10450_v23, %v3758_v59  ;;  %v3798_v51 = vadd.f32 %v10450_v23, %v3759_v63  ;;  %v3799_v6 = vadd.f32 %v10450_v23, %v3760_v16  ;;  %v3800_v30 = vadd.f32 %v10450_v23, %v3761_v27 }
 0x5da   : > { %v3801_v43 = vadd.f32 %v10450_v23, %v3762_v26  ;;  %v3802_v49 = vadd.f32 %v10450_v23, %v3763_v5  ;;  %v3766_v57 = vmul.f32 %v10445_v4, %v10264_v47  ;;  %v3767_v29 = vmul.f32 %v10445_v4, %v10271_v13 }
 0x5db   : > { %v3834_v34 = vpack.c.bf16 %v3798_v51, %v3797_v7  ;;  %v3835_v36 = vpack.c.bf16 %v3800_v30, %v3799_v6  ;;  %v3803_v14 = vadd.f32 %v10450_v23, %v3764_v19  ;;  %v3804_v55 = vadd.f32 %v10450_v23, %v3765_v15 }
 0x5dc   : > { %v3836_v39 = vpack.c.bf16 %v3802_v49, %v3801_v43  ;;  %v3805_v8 = vadd.f32 %v10450_v23, %v3766_v57  ;;  %v3806_v2 = vadd.f32 %v10450_v23, %v3767_v29  ;;  %v3768_v62 = vmul.f32 %v10445_v4, %v10278_v50 }
 0x5dd   : > { %4656 = vmatprep.mubr.msk.bf16.mxu0 %vm370_vm0, %v3834_v34  ;;  %v3837_v0 = vpack.c.bf16 %v3804_v55, %v3803_v14  ;;  %v3769_v47 = vmul.f32 %v10445_v4, %v10285_v17  ;;  %v3770_v10 = vmul.f32 %v10445_v4, %v10292_v18  ;;  %v3771_v45 = vmul.f32 %v10445_v4, %v10299_v3 }
 0x5de   : > { %4657 = vmatmul.mubr.msk.bf16.vlgmr.msra.gmra.mxu0 %vm370_vm0, %v3835_v36  ;;  %v3838_v13 = vpack.c.bf16 %v3806_v2, %v3805_v8  ;;  %v3807_v37 = vadd.f32 %v10450_v23, %v3768_v62  ;;  %v3772_v52 = vmul.f32 %v10445_v4, %v10306_v40  ;;  %v3773_v18 = vmul.f32 %v10445_v4, %v10313_v9 }
 0x5df   : > { %4660 = vmatprep.mubr.msk.bf16.mxu0 %vm370_vm0, %v3836_v39  ;;  %v3808_v28 = vadd.f32 %v10450_v23, %v3769_v47  ;;  %v3809_v50 = vadd.f32 %v10450_v23, %v3770_v10  ;;  %v3810_v31 = vadd.f32 %v10450_v23, %v3771_v45  ;;  %v3774_v54 = vmul.f32 %v10445_v4, %v10320_v44 }
 0x5e0   : > { %v3775_v61 = vmul.f32 %v10445_v4, %v10327_v11  ;;  %v3811_v56 = vadd.f32 %v10450_v23, %v3772_v52  ;;  %v3812_v60 = vadd.f32 %v10450_v23, %v3773_v18  ;;  %v3776_v1 = vmul.f32 %v10445_v4, %v10334_v53 }
 0x5e1   : > { %v3839_v17 = vpack.c.bf16 %v3808_v28, %v3807_v37  ;;  %v3840_v3 = vpack.c.bf16 %v3810_v31, %v3809_v50  ;;  %v3813_v40 = vadd.f32 %v10450_v23, %v3774_v54  ;;  %v3777_v44 = vmul.f32 %v10445_v4, %v10341_v38 }
 0x5e2   : > { %v3814_v33 = vadd.f32 %v10450_v23, %v3775_v61  ;;  %v3841_v9 = vpack.c.bf16 %v3812_v60, %v3811_v56  ;;  %v3778_v21 = vmul.f32 %v10445_v4, %v10348_v58  ;;  %v3779_v59 = vmul.f32 %v10445_v4, %v10355_v25 }
 0x5e3   : > { %v3815_v63 = vadd.f32 %v10450_v23, %v3776_v1  ;;  %v3816_v16 = vadd.f32 %v10450_v23, %v3777_v44  ;;  %v3780_v26 = vmul.f32 %v10445_v4, %v10362_v42  ;;  %v3781_v58 = vmul.f32 %v10445_v4, %v10369_v46 }
 0x5e4   : > { %v3842_v11 = vpack.c.bf16 %v3814_v33, %v3813_v40  ;;  %v3817_v53 = vadd.f32 %v10450_v23, %v3778_v21  ;;  %v3818_v27 = vadd.f32 %v10450_v23, %v3779_v59  ;;  %v3782_v7 = vmul.f32 %v10445_v4, %v10376_v32 }
 0x5e5   : > { %v3843_v38 = vpack.c.bf16 %v3816_v16, %v3815_v63  ;;  %v3783_v5 = vmul.f32 %v10445_v4, %v10383_v48  ;;  %v3819_v51 = vadd.f32 %v10450_v23, %v3780_v26  ;;  %v3820_v6 = vadd.f32 %v10450_v23, %v3781_v58 }
 0x5e6   : > { %4661 = vmatmul.mubr.msk.bf16.gmra.mxu0 %vm370_vm0, %v3837_v0  ;;  %v3844_v25 = vpack.c.bf16 %v3818_v27, %v3817_v53  ;;  %v3821_v42 = vadd.f32 %v10450_v23, %v3782_v7  ;;  %v3784_v43 = vmul.f32 %v10445_v4, %v10390_v24  ;;  %v3785_v32 = vmul.f32 %v10445_v4, %v10397_v22 }
 0x5e7   : > { %4664 = vmatprep.mubr.msk.bf16.mxu0 %vm370_vm0, %v3838_v13  ;;  %v3822_v30 = vadd.f32 %v10450_v23, %v3783_v5  ;;  %v3845_v46 = vpack.c.bf16 %v3820_v6, %v3819_v51  ;;  %v3787_v48 = vmul.f32 %v10445_v4, %v10411_v12  ;;  %v3786_v34 = vmul.f32 %v10445_v4, %v10404_v41 }
 0x5e8   : > { %v3823_v36 = vadd.f32 %v10450_v23, %v3784_v43  ;;  %v3824_v19 = vadd.f32 %v10450_v23, %v3785_v32  ;;  %v3788_v22 = vmul.f32 %v10445_v4, %v10418_v35  ;;  %v3789_v12 = vmul.f32 %v10445_v4, %v10425_v20  ;;  %v4738_v35 = vld [vmem:[%s10875_s7] sm:$0xff]  }
 0x5e9   : > { %v3846_v49 = vpack.c.bf16 %v3822_v30, %v3821_v42  ;;  %v3825_v24 = vadd.f32 %v10450_v23, %v3786_v34  ;;  %v3826_v15 = vadd.f32 %v10450_v23, %v3787_v48  ;;  %4688 = vmatprep.subr.bf16.mxu1 %v4738_v35  ;;  %v10570_v4 = vld [vmem:[%s10874_s6] ss:$0 sm:$0xff] }
 0x5ea   : > { %v3847_v39 = vpack.c.bf16 %v3824_v19, %v3823_v36  ;;  %v3828_v57 = vadd.f32 %v10450_v23, %v3789_v12  ;;  %v3827_v29 = vadd.f32 %v10450_v23, %v3788_v22  ;;  %4689 = vmatpush3.bf16.msra.mxu1 %v4738_v35 }
 0x5eb   : > { %v3848_v41 = vpack.c.bf16 %v3826_v15, %v3825_v24 }
 0x5ec   : > { %v3849_v14 = vpack.c.bf16 %v3828_v57, %v3827_v29 }
 0x5ee   : > { %4665 = vmatmul.mubr.msk.bf16.gmra.mxu0 %vm370_vm0, %v3839_v17 }
 0x5ef   : > { %4668 = vmatprep.mubr.msk.bf16.mxu0 %vm370_vm0, %v3840_v3 }
 0x5f6   : > { %4669 = vmatmul.mubr.msk.bf16.gmra.mxu0 %vm370_vm0, %v3841_v9 }
 0x5f7   : > { %4672 = vmatprep.mubr.msk.bf16.mxu0 %vm370_vm0, %v3842_v11 }
 0x5fe   : > { %4673 = vmatmul.mubr.msk.bf16.gmra.mxu0 %vm370_vm0, %v3843_v38 }
 0x5ff   : > { %4676 = vmatprep.mubr.msk.bf16.mxu0 %vm370_vm0, %v3844_v25 }
 0x606   : > { %4677 = vmatmul.mubr.msk.bf16.gmra.mxu0 %vm370_vm0, %v3845_v46 }
 0x607   : > { %4680 = vmatprep.mubr.msk.bf16.mxu0 %vm370_vm0, %v3846_v49 }
 0x60e   : > { %4681 = vmatmul.mubr.msk.bf16.gmra.mxu0 %vm370_vm0, %v3847_v39 }
 0x60f   : > { %4684 = vmatprep.mubr.msk.bf16.mxu0 %vm370_vm0, %v3848_v41 }
 0x616   : > { %4685 = vmatmul.mubr.msk.bf16.gmra.mxu0 %vm370_vm0, %v3849_v14 }
 0x69e   : > { %v4658_v20 = vpop.f32.mrf.mxu0 }
 0x69f   : > { %v3951_v2 = vadd.f32 %v4658_v20, %v10570_v4 }
 0x6a0   : > { %v3942_v55 = vpop.f32.mrf.mxu0 }
 0x6a1   : > { %v3943_v62 = vadd.f32 %v10570_v4, %v3942_v55 }
 0x6a2   : > { %v4659_v8 = vpop.f32.mrf.mxu0 }
 0x6a3   : > { %v3954_v23 = vadd.f32 %v4659_v8, %v10570_v4 }
 0x6a4   : > { %v3945_v0 = vpop.f32.mrf.mxu0 }
 0x6a5   : > { %v10575_v47 = vpack.c.bf16 %v3954_v23, %v3951_v2  ;;  %v3946_v13 = vadd.f32 %v10570_v4, %v3945_v0 }
 0x6a6   : > { %v4662_v10 = vpop.f32.mrf.mxu0 }
 0x6a7   : > { %v4086_v45 = vmul.bf16 %v10575_v47, %v10575_v47  ;;  %v10580_v37 = vpack.c.bf16 %v3946_v13, %v3943_v62  ;;  %v3967_v3 = vadd.f32 %v4662_v10, %v10570_v4 }
 0x6a8   : > { %v3958_v28 = vpop.f32.mrf.mxu0 }
 0x6a9   : > { %v4102_v50 = vmul.bf16 %v4086_v45, %v10575_v47  ;;  %v4085_v31 = vmul.bf16 %v10580_v37, %v10580_v37  ;;  %v3959_v61 = vadd.f32 %v10570_v4, %v3958_v28 }
 0x6aa   : > { %v4663_v17 = vpop.f32.mrf.mxu0 }
 0x6ab   : > { %v4118_v52 = vmul.bf16 1027030327, %v4102_v50  ;;  %v4101_v18 = vmul.bf16 %v4085_v31, %v10580_v37  ;;  %v3970_v54 = vadd.f32 %v4663_v17, %v10570_v4 }
 0x6ac   : > { %v3961_v56 = vpop.f32.mrf.mxu0 }
 0x6ad   : > { %v4134_v60 = vadd.bf16 %v4118_v52, %v10575_v47  ;;  %v10590_v40 = vpack.c.bf16 %v3970_v54, %v3967_v3  ;;  %v3962_v33 = vadd.f32 %v10570_v4, %v3961_v56  ;;  %v4117_v9 = vmul.bf16 1027030327, %v4101_v18 }
 0x6ae   : > { %v4666_v1 = vpop.f32.mrf.mxu0 }
 0x6af   : > { %v4150_v44 = vmul.bf16 1061961548, %v4134_v60  ;;  %v4088_v11 = vmul.bf16 %v10590_v40, %v10590_v40  ;;  %v10595_v21 = vpack.c.bf16 %v3962_v33, %v3959_v61  ;;  %v4133_v63 = vadd.bf16 %v4117_v9, %v10580_v37 }
 0x6b0   : > { %v3974_v59 = vpop.f32.mrf.mxu0  ;;  %v3983_v25 = vadd.f32 %v4666_v1, %v10570_v4 }
 0x6b1   : > { %4741 = vtanh.bf16 %v4150_v44  ;;  %v4104_v16 = vmul.bf16 %v4088_v11, %v10590_v40  ;;  %v4087_v53 = vmul.bf16 %v10595_v21, %v10595_v21  ;;  %v4149_v38 = vmul.bf16 1061961548, %v4133_v63 }
 0x6b2   : > { %v4667_v27 = vpop.f32.mrf.mxu0  ;;  %v3975_v5 = vadd.f32 %v10570_v4, %v3974_v59 }
 0x6b3   : > { %v4120_v26 = vmul.bf16 1027030327, %v4104_v16  ;;  %v4103_v58 = vmul.bf16 %v4087_v53, %v10595_v21  ;;  %v3986_v7 = vadd.f32 %v4667_v27, %v10570_v4  ;;  %4743 = vtanh.bf16 %v4149_v38 }
 0x6b4   : > { %v3977_v51 = vpop.f32.mrf.mxu0 }
 0x6b5   : > { %v4136_v6 = vadd.bf16 %v4120_v26, %v10590_v40  ;;  %v4119_v42 = vmul.bf16 1027030327, %v4103_v58  ;;  %v10606_v30 = vpack.c.bf16 %v3986_v7, %v3983_v25  ;;  %v3978_v46 = vadd.f32 %v10570_v4, %v3977_v51 }
 0x6b6   : > { %v4670_v43 = vpop.f32.mrf.mxu0 }
 0x6b7   : > { %v4152_v32 = vmul.bf16 1061961548, %v4136_v6  ;;  %v4135_v48 = vadd.bf16 %v4119_v42, %v10595_v21  ;;  %v4090_v49 = vmul.bf16 %v10606_v30, %v10606_v30  ;;  %v10612_v34 = vpack.c.bf16 %v3978_v46, %v3975_v5 }
 0x6b8   : > { %v3990_v36 = vpop.f32.mrf.mxu0  ;;  %v3999_v22 = vadd.f32 %v4670_v43, %v10570_v4 }
 0x6b9   : > { %4745 = vtanh.bf16 %v4152_v32  ;;  %v4151_v19 = vmul.bf16 1061961548, %v4135_v48  ;;  %v4106_v24 = vmul.bf16 %v4090_v49, %v10606_v30  ;;  %v4089_v15 = vmul.bf16 %v10612_v34, %v10612_v34 }
 0x6ba   : > { %v4671_v12 = vpop.f32.mrf.mxu0  ;;  %v3991_v29 = vadd.f32 %v10570_v4, %v3990_v36 }
 0x6bb   : > { %4747 = vtanh.bf16 %v4151_v19  ;;  %v4122_v39 = vmul.bf16 1027030327, %v4106_v24  ;;  %v4105_v41 = vmul.bf16 %v4089_v15, %v10612_v34  ;;  %v4002_v57 = vadd.f32 %v4671_v12, %v10570_v4 }
 0x6bc   : > { %v3993_v14 = vpop.f32.mrf.mxu0 }
 0x6bd   : > { %v4138_v35 = vadd.bf16 %v4122_v39, %v10606_v30  ;;  %v4121_v20 = vmul.bf16 1027030327, %v4105_v41  ;;  %v10622_v55 = vpack.c.bf16 %v4002_v57, %v3999_v22  ;;  %v3994_v8 = vadd.f32 %v10570_v4, %v3993_v14 }
 0x6be   : > { %v4674_v2 = vpop.f32.mrf.mxu0 }
 0x6bf   : > { %v4742_v23 = vpop.eup %4741  ;;  %v4154_v0 = vmul.bf16 1061961548, %v4138_v35  ;;  %v4137_v62 = vadd.bf16 %v4121_v20, %v10612_v34  ;;  %v4092_v13 = vmul.bf16 %v10622_v55, %v10622_v55  ;;  %v10628_v10 = vpack.c.bf16 %v3994_v8, %v3991_v29 }
 0x6c0   : > { %v4006_v45 = vpop.f32.mrf.mxu0  ;;  %v4182_v28 = vadd.bf16 1065369472, %v4742_v23  ;;  %v4015_v18 = vadd.f32 %v4674_v2, %v10570_v4 }
 0x6c1   : > { %4749 = vtanh.bf16 %v4154_v0  ;;  %v4153_v50 = vmul.bf16 1061961548, %v4137_v62  ;;  %v4108_v31 = vmul.bf16 %v4092_v13, %v10622_v55  ;;  %v4091_v17 = vmul.bf16 %v10628_v10, %v10628_v10  ;;  %v4744_v52 = vpop.eup %4743 }
 0x6c2   : > { %v4675_v3 = vpop.f32.mrf.mxu0  ;;  %v4007_v60 = vadd.f32 %v10570_v4, %v4006_v45  ;;  %v4181_v9 = vadd.bf16 1065369472, %v4744_v52  ;;  %v4198_v1 = vmul.bf16 1056980736, %v4182_v28 }
 0x6c3   : > { %4751 = vtanh.bf16 %v4153_v50  ;;  %v4124_v54 = vmul.bf16 1027030327, %v4108_v31  ;;  %v4107_v61 = vmul.bf16 %v4091_v17, %v10628_v10  ;;  %v4018_v56 = vadd.f32 %v4675_v3, %v10570_v4 }
 0x6c4   : > { %v4009_v33 = vpop.f32.mrf.mxu0  ;;  %v4197_v53 = vmul.bf16 1056980736, %v4181_v9  ;;  %v4214_v51 = vmul.bf16 %v4198_v1, %v10575_v47 }
 0x6c5   : > { %v4140_v44 = vadd.bf16 %v4124_v54, %v10622_v55  ;;  %v4123_v11 = vmul.bf16 1027030327, %v4107_v61  ;;  %v10638_v59 = vpack.c.bf16 %v4018_v56, %v4015_v18  ;;  %v4010_v63 = vadd.f32 %v10570_v4, %v4009_v33 }
 0x6c6   : > { %v4678_v16 = vpop.f32.mrf.mxu0  ;;  %v4213_v5 = vmul.bf16 %v4197_v53, %v10580_v37 }
 0x6c7   : > { %v4746_v27 = vpop.eup %4745  ;;  %v4156_v38 = vmul.bf16 1061961548, %v4140_v44  ;;  %v4139_v26 = vadd.bf16 %v4123_v11, %v10628_v10  ;;  %v4094_v58 = vmul.bf16 %v10638_v59, %v10638_v59  ;;  %v10644_v25 = vpack.c.bf16 %v4010_v63, %v4007_v60 }
 0x6c8   : > { %v4022_v7 = vpop.f32.mrf.mxu0  ;;  %v4184_v6 = vadd.bf16 1065369472, %v4746_v27  ;;  %v4031_v48 = vadd.f32 %v4678_v16, %v10570_v4  ;;  %4690 = vmatprep.mubr.msk.bf16.mxu1 %vm4241_vm8, %v4213_v5 }
 0x6c9   : > { %v4748_v42 = vpop.eup %4747  ;;  %4753 = vtanh.bf16 %v4156_v38  ;;  %v4155_v46 = vmul.bf16 1061961548, %v4139_v26  ;;  %v4110_v43 = vmul.bf16 %v4094_v58, %v10638_v59  ;;  %v4093_v32 = vmul.bf16 %v10644_v25, %v10644_v25  ;;  %4691 = vmatmul.mubr.msk.bf16.vlgmr.msra.gmra.mxu1 %vm4241_vm8, %v4214_v51 }
 0x6ca   : > { %v4679_v49 = vpop.f32.mrf.mxu0  ;;  %v4183_v36 = vadd.bf16 1065369472, %v4748_v42  ;;  %v4023_v24 = vadd.f32 %v10570_v4, %v4022_v7  ;;  %v4200_v12 = vmul.bf16 1056980736, %v4184_v6 }
 0x6cb   : > { %4755 = vtanh.bf16 %v4155_v46  ;;  %v4126_v19 = vmul.bf16 1027030327, %v4110_v43  ;;  %v4109_v37 = vmul.bf16 %v4093_v32, %v10644_v25  ;;  %v4034_v47 = vadd.f32 %v4679_v49, %v10570_v4 }
 0x6cc   : > { %v4025_v15 = vpop.f32.mrf.mxu0  ;;  %v4199_v22 = vmul.bf16 1056980736, %v4183_v36  ;;  %v4216_v13 = vmul.bf16 %v4200_v12, %v10590_v40 }
 0x6cd   : > { %v4142_v39 = vadd.bf16 %v4126_v19, %v10638_v59  ;;  %v4125_v41 = vmul.bf16 1027030327, %v4109_v37  ;;  %v10658_v57 = vpack.c.bf16 %v4034_v47, %v4031_v48  ;;  %v4026_v29 = vadd.f32 %v10570_v4, %v4025_v15 }
 0x6ce   : > { %v4682_v14 = vpop.f32.mrf.mxu0  ;;  %v4215_v35 = vmul.bf16 %v4199_v22, %v10595_v21 }
 0x6cf   : > { %v4750_v20 = vpop.eup %4749  ;;  %v4158_v8 = vmul.bf16 1061961548, %v4142_v39  ;;  %v4141_v2 = vadd.bf16 %v4125_v41, %v10644_v25  ;;  %v4096_v23 = vmul.bf16 %v10658_v57, %v10658_v57  ;;  %v10665_v0 = vpack.c.bf16 %v4026_v29, %v4023_v24 }
 0x6d0   : > { %v4038_v62 = vpop.f32.mrf.mxu0  ;;  %4694 = vmatprep.mubr.msk.bf16.mxu1 %vm4241_vm8, %v4215_v35  ;;  %v4186_v45 = vadd.bf16 1065369472, %v4750_v20  ;;  %v4047_v17 = vadd.f32 %v4682_v14, %v10570_v4 }
 0x6d1   : > { %v4752_v28 = vpop.eup %4751  ;;  %4757 = vtanh.bf16 %v4158_v8  ;;  %v4157_v50 = vmul.bf16 1061961548, %v4141_v2  ;;  %v4112_v21 = vmul.bf16 %v4096_v23, %v10658_v57  ;;  %v4095_v31 = vmul.bf16 %v10665_v0, %v10665_v0  ;;  %4695 = vmatmul.mubr.msk.bf16.gmra.mxu1 %vm4241_vm8, %v4216_v13 }
 0x6d2   : > { %v4683_v52 = vpop.f32.mrf.mxu0  ;;  %v4185_v18 = vadd.bf16 1065369472, %v4752_v28  ;;  %v4039_v61 = vadd.f32 %v10570_v4, %v4038_v62  ;;  %v4202_v33 = vmul.bf16 1056980736, %v4186_v45 }
 0x6d3   : > { %4759 = vtanh.bf16 %v4157_v50  ;;  %v4128_v3 = vmul.bf16 1027030327, %v4112_v21  ;;  %v4111_v54 = vmul.bf16 %v4095_v31, %v10665_v0  ;;  %v4050_v40 = vadd.f32 %v4683_v52, %v10570_v4 }
 0x6d4   : > { %v4041_v56 = vpop.f32.mrf.mxu0  ;;  %v4201_v60 = vmul.bf16 1056980736, %v4185_v18  ;;  %v4218_v5 = vmul.bf16 %v4202_v33, %v10606_v30 }
 0x6d5   : > { %v4144_v9 = vadd.bf16 %v4128_v3, %v10658_v57  ;;  %v4127_v1 = vmul.bf16 1027030327, %v4111_v54  ;;  %v10678_v44 = vpack.c.bf16 %v4050_v40, %v4047_v17  ;;  %v4042_v11 = vadd.f32 %v10570_v4, %v4041_v56 }
 0x6d6   : > { %v4686_v63 = vpop.f32.mrf.mxu0  ;;  %v4217_v16 = vmul.bf16 %v4201_v60, %v10612_v34 }
 0x6d7   : > { %v4754_v53 = vpop.eup %4753  ;;  %v4160_v27 = vmul.bf16 1061961548, %v4144_v9  ;;  %v4143_v38 = vadd.bf16 %v4127_v1, %v10665_v0  ;;  %v4098_v26 = vmul.bf16 %v10678_v44, %v10678_v44  ;;  %v10685_v58 = vpack.c.bf16 %v4042_v11, %v4039_v61 }
 0x6d8   : > { %v4054_v7 = vpop.f32.mrf.mxu0  ;;  %4698 = vmatprep.mubr.msk.bf16.mxu1 %vm4241_vm8, %v4217_v16  ;;  %v4188_v51 = vadd.bf16 1065369472, %v4754_v53  ;;  %v4063_v43 = vadd.f32 %v4686_v63, %v10570_v4 }
 0x6d9   : > { %v4756_v6 = vpop.eup %4755  ;;  %4761 = vtanh.bf16 %v4160_v27  ;;  %v4159_v42 = vmul.bf16 1061961548, %v4143_v38  ;;  %v4114_v34 = vmul.bf16 %v4098_v26, %v10678_v44  ;;  %v4097_v46 = vmul.bf16 %v10685_v58, %v10685_v58  ;;  %4699 = vmatmul.mubr.msk.bf16.gmra.mxu1 %vm4241_vm8, %v4218_v5 }
 0x6da   : > { %v4687_v32 = vpop.f32.mrf.mxu0  ;;  %v4187_v48 = vadd.bf16 1065369472, %v4756_v6  ;;  %v4055_v19 = vadd.f32 %v10570_v4, %v4054_v7  ;;  %v4204_v24 = vmul.bf16 1056980736, %v4188_v51 }
 0x6db   : > { %4763 = vtanh.bf16 %v4159_v42  ;;  %v4130_v49 = vmul.bf16 1027030327, %v4114_v34  ;;  %v4113_v36 = vmul.bf16 %v4097_v46, %v10685_v58  ;;  %v4066_v30 = vadd.f32 %v4687_v32, %v10570_v4 }
 0x6dc   : > { %v4057_v37 = vpop.f32.mrf.mxu0  ;;  %v4203_v47 = vmul.bf16 1056980736, %v4187_v48  ;;  %v4220_v2 = vmul.bf16 %v4204_v24, %v10622_v55  ;;  %v12900_v48 = vld [vmem:[#allocation5_spill] sm:$0xff] }
 0x6dd   : > { %v4146_v15 = vadd.bf16 %v4130_v49, %v10678_v44  ;;  %v4129_v22 = vmul.bf16 1027030327, %v4113_v36  ;;  %v10698_v12 = vpack.c.bf16 %v4066_v30, %v4063_v43  ;;  %v4058_v39 = vadd.f32 %v10570_v4, %v4057_v37 }
 0x6de   : > { %v4219_v41 = vmul.bf16 %v4203_v47, %v10628_v10 }
 0x6df   : > { %v4758_v29 = vpop.eup %4757  ;;  %v4162_v14 = vmul.bf16 1061961548, %v4146_v15  ;;  %v4145_v35 = vadd.bf16 %v4129_v22, %v10685_v58  ;;  %v4100_v20 = vmul.bf16 %v10698_v12, %v10698_v12  ;;  %v4083_v8 = vpack.c.bf16 %v4058_v39, %v4055_v19  ;;  %v12901_v19 = vld [vmem:[#allocation3_spill] sm:$0xff]  ;;  %v12902_v15 = vld [vmem:[#allocation6_spill] sm:$0xff] }
 0x6e0   : > { %4702 = vmatprep.mubr.msk.bf16.mxu1 %vm4241_vm8, %v4219_v41  ;;  %v4190_v23 = vadd.bf16 1065369472, %v4758_v29  ;;  %v12903_v41 = vld [vmem:[#allocation4_spill] sm:$0xff] }
 0x6e1   : > { %v4760_v62 = vpop.eup %4759  ;;  %4765 = vtanh.bf16 %v4162_v14  ;;  %v4161_v13 = vmul.bf16 1061961548, %v4145_v35  ;;  %v4116_v4 = vmul.bf16 %v4100_v20, %v10698_v12  ;;  %v4099_v45 = vmul.bf16 %v4083_v8, %v4083_v8  ;;  %4703 = vmatmul.mubr.msk.bf16.gmra.mxu1 %vm4241_vm8, %v4220_v2  ;;  %v12904_v20 = vld [vmem:[#allocation9_spill] sm:$0xff] }
 0x6e2   : > { %v4189_v10 = vadd.bf16 1065369472, %v4760_v62  ;;  %v4206_v52 = vmul.bf16 1056980736, %v4190_v23  ;;  %v12905_v62 = vld [vmem:[#allocation7_spill] sm:$0xff] }
 0x6e3   : > { %4767 = vtanh.bf16 %v4161_v13  ;;  %v4132_v28 = vmul.bf16 1027030327, %v4116_v4  ;;  %v4115_v50 = vmul.bf16 %v4099_v45, %v4083_v8 }
 0x6e4   : > { %v4205_v21 = vmul.bf16 1056980736, %v4189_v10  ;;  %v4222_v56 = vmul.bf16 %v4206_v52, %v10638_v59  ;;  %v12906_v10 = vld [vmem:[#allocation10_spill] sm:$0xff] }
 0x6e5   : > { %v4148_v31 = vadd.bf16 %v4132_v28, %v10698_v12  ;;  %v4131_v17 = vmul.bf16 1027030327, %v4115_v50 }
 0x6e6   : > { %v4221_v55 = vmul.bf16 %v4205_v21, %v10644_v25 }
 0x6e7   : > { %v4762_v18 = vpop.eup %4761  ;;  %v4164_v3 = vmul.bf16 1061961548, %v4148_v31  ;;  %v4147_v54 = vadd.bf16 %v4131_v17, %v4083_v8  ;;  %v12907_v31 = vld [vmem:[#allocation8_spill] sm:$0xff] }
 0x6e8   : > { %4706 = vmatprep.mubr.msk.bf16.mxu1 %vm4241_vm8, %v4221_v55  ;;  %v4192_v60 = vadd.bf16 1065369472, %v4762_v18  ;;  %v12908_v18 = vld [vmem:[#allocation13_spill] sm:$0xff] }
 0x6e9   : > { %v4764_v40 = vpop.eup %4763  ;;  %4769 = vtanh.bf16 %v4164_v3  ;;  %v4163_v61 = vmul.bf16 1061961548, %v4147_v54  ;;  %4707 = vmatmul.mubr.msk.bf16.gmra.mxu1 %vm4241_vm8, %v4222_v56 }
 0x6ea   : > { %v4191_v33 = vadd.bf16 1065369472, %v4764_v40  ;;  %v4208_v1 = vmul.bf16 1056980736, %v4192_v60 }
 0x6eb   : > { %4771 = vtanh.bf16 %v4163_v61  ;;  %v12909_v61 = vld [vmem:[#allocation11_spill] sm:$0xff] }
 0x6ec   : > { %v4207_v9 = vmul.bf16 1056980736, %v4191_v33  ;;  %v4224_v16 = vmul.bf16 %v4208_v1, %v10658_v57 }
 0x6ee   : > { %v4223_v11 = vmul.bf16 %v4207_v9, %v10665_v0  ;;  %v12910_v9 = vld [vmem:[#allocation14_spill] sm:$0xff] }
 0x6ef   : > { %v4766_v25 = vpop.eup %4765 }
 0x6f0   : > { %4710 = vmatprep.mubr.msk.bf16.mxu1 %vm4241_vm8, %v4223_v11  ;;  %v4194_v53 = vadd.bf16 1065369472, %v4766_v25 }
 0x6f1   : > { %v4768_v63 = vpop.eup %4767  ;;  %4711 = vmatmul.mubr.msk.bf16.gmra.mxu1 %vm4241_vm8, %v4224_v16 }
 0x6f2   : > { %v4193_v27 = vadd.bf16 1065369472, %v4768_v63  ;;  %v4210_v38 = vmul.bf16 1056980736, %v4194_v53  ;;  %v12911_v63 = vld [vmem:[#allocation12_spill] sm:$0xff] }
 0x6f4   : > { %v4209_v59 = vmul.bf16 1056980736, %v4193_v27  ;;  %v4226_v0 = vmul.bf16 %v4210_v38, %v10678_v44 }
 0x6f6   : > { %v4225_v26 = vmul.bf16 %v4209_v59, %v10685_v58  ;;  %v10728_v58 = vld [vmem:[%s10876_s8] ss:$0 sm:$0xff]  ;;  %v12912_v59 = vld [vmem:[#allocation17_spill] sm:$0xff] }
 0x6f7   : > { %v4770_v7 = vpop.eup %4769 }
 0x6f8   : > { %4714 = vmatprep.mubr.msk.bf16.mxu1 %vm4241_vm8, %v4225_v26  ;;  %v4196_v51 = vadd.bf16 1065369472, %v4770_v7 }
 0x6f9   : > { %v4772_v5 = vpop.eup %4771  ;;  %4715 = vmatmul.mubr.msk.bf16.gmra.mxu1 %vm4241_vm8, %v4226_v0 }
 0x6fa   : > { %v4195_v6 = vadd.bf16 1065369472, %v4772_v5  ;;  %v4212_v42 = vmul.bf16 1056980736, %v4196_v51  ;;  %v12913_v5 = vld [vmem:[#allocation15_spill] sm:$0xff] }
 0x6fc   : > { %v4211_v57 = vmul.bf16 1056980736, %v4195_v6  ;;  %v4228_v46 = vmul.bf16 %v4212_v42, %v10698_v12 }
 0x6fe   : > { %v4227_v34 = vmul.bf16 %v4211_v57, %v4083_v8  ;;  %v12914_v57 = vld [vmem:[#allocation18_spill] sm:$0xff] }
 0x700   : > { %4718 = vmatprep.mubr.msk.bf16.mxu1 %vm4241_vm8, %v4227_v34 }
 0x701   : > { %4719 = vmatmul.mubr.msk.bf16.gmra.mxu1 %vm4241_vm8, %v4228_v46 }
 0x789   : > { %v4692_v43 = vpop.f32.mrf.mxu1 }
 0x78a   : > { %v4333_v44 = vadd.f32 %v4692_v43, %v10728_v58  ;;  %v12915_v43 = vld [vmem:[#allocation16_spill] sm:$0xff] }
 0x78b   : > { %v4324_v32 = vpop.f32.mrf.mxu1 }
 0x78c   : > { %v4453_v49 = vadd.f32 %v4333_v44, %v12900_v48  ;;  %v4325_v36 = vadd.f32 %v10728_v58, %v4324_v32 }
 0x78d   : > { %v4693_v30 = vpop.f32.mrf.mxu1 }
 0x78e   : > { %4485 = vst.msk [vmem:[%s10736_s16 + $0x10] sm:$0xff] %vm370_vm0, %v4453_v49  ;;  %v4451_v37 = vadd.f32 %v4325_v36, %v12901_v19  ;;  %v4336_v47 = vadd.f32 %v4693_v30, %v10728_v58  ;;  %v12916_v49 = vld [vmem:[#allocation21_spill] sm:$0xff] }
 0x78f   : > { %v4327_v24 = vpop.f32.mrf.mxu1 }
 0x790   : > { %4483 = vst.msk [vmem:[%s10736_s16] sm:$0xff] %vm370_vm0, %v4451_v37  ;;  %v4454_v22 = vadd.f32 %v4336_v47, %v12902_v15  ;;  %v4328_v12 = vadd.f32 %v10728_v58, %v4327_v24  ;;  %v12917_v37 = vld [vmem:[#allocation19_spill] sm:$0xff] }
 0x791   : > { %v4696_v39 = vpop.f32.mrf.mxu1 }
 0x792   : > { %4486 = vst.msk [vmem:[%s10736_s16 + $0x18] sm:$0xff] %vm370_vm0, %v4454_v22  ;;  %v4452_v29 = vadd.f32 %v4328_v12, %v12903_v41  ;;  %v4349_v14 = vadd.f32 %v4696_v39, %v10728_v58  ;;  %v12918_v22 = vld [vmem:[#allocation22_spill] sm:$0xff] }
 0x793   : > { %v4340_v35 = vpop.f32.mrf.mxu1 }
 0x794   : > { %4484 = vst.msk [vmem:[%s10736_s16 + $0x8] sm:$0xff] %vm370_vm0, %v4452_v29  ;;  %v4457_v8 = vadd.f32 %v4349_v14, %v12904_v20  ;;  %v4341_v2 = vadd.f32 %v10728_v58, %v4340_v35  ;;  %v12919_v29 = vld [vmem:[#allocation20_spill] sm:$0xff] }
 0x795   : > { %v4697_v23 = vpop.f32.mrf.mxu1 }
 0x796   : > { %4489 = vst.msk [vmem:[%s10736_s16 + $0x30] sm:$0xff] %vm370_vm0, %v4457_v8  ;;  %v4455_v13 = vadd.f32 %v4341_v2, %v12905_v62  ;;  %v4352_v4 = vadd.f32 %v4697_v23, %v10728_v58  ;;  %v12920_v8 = vld [vmem:[#allocation25_spill] sm:$0xff] }
 0x797   : > { %v4343_v45 = vpop.f32.mrf.mxu1 }
 0x798   : > { %4487 = vst.msk [vmem:[%s10736_s16 + $0x20] sm:$0xff] %vm370_vm0, %v4455_v13  ;;  %v4458_v28 = vadd.f32 %v4352_v4, %v12906_v10  ;;  %v4344_v50 = vadd.f32 %v10728_v58, %v4343_v45  ;;  %v12921_v13 = vld [vmem:[#allocation23_spill] sm:$0xff] }
 0x799   : > { %v4700_v21 = vpop.f32.mrf.mxu1 }
 0x79a   : > { %4490 = vst.msk [vmem:[%s10736_s16 + $0x38] sm:$0xff] %vm370_vm0, %v4458_v28  ;;  %v4456_v17 = vadd.f32 %v4344_v50, %v12907_v31  ;;  %v4365_v52 = vadd.f32 %v4700_v21, %v10728_v58  ;;  %v12922_v28 = vld [vmem:[#allocation26_spill] sm:$0xff] }
 0x79b   : > { %v4356_v55 = vpop.f32.mrf.mxu1 }
 0x79c   : > { %4488 = vst.msk [vmem:[%s10736_s16 + $0x28] sm:$0xff] %vm370_vm0, %v4456_v17  ;;  %v4461_v3 = vadd.f32 %v4365_v52, %v12908_v18  ;;  %v4357_v54 = vadd.f32 %v10728_v58, %v4356_v55  ;;  %v12923_v17 = vld [vmem:[#allocation24_spill] sm:$0xff] }
 0x79d   : > { %v4701_v40 = vpop.f32.mrf.mxu1 }
 0x79e   : > { %4493 = vst.msk [vmem:[%s10736_s16 + $0x50] sm:$0xff] %vm370_vm0, %v4461_v3  ;;  %v4459_v56 = vadd.f32 %v4357_v54, %v12909_v61  ;;  %v4368_v60 = vadd.f32 %v4701_v40, %v10728_v58  ;;  %v12924_v3 = vld [vmem:[#allocation29_spill] sm:$0xff] }
 0x79f   : > { %v4359_v33 = vpop.f32.mrf.mxu1 }
 0x7a0   : > { %4491 = vst.msk [vmem:[%s10736_s16 + $0x40] sm:$0xff] %vm370_vm0, %v4459_v56  ;;  %v4462_v1 = vadd.f32 %v4368_v60, %v12910_v9  ;;  %v4360_v11 = vadd.f32 %v10728_v58, %v4359_v33  ;;  %v12925_v56 = vld [vmem:[#allocation27_spill] sm:$0xff] }
 0x7a1   : > { %v4704_v25 = vpop.f32.mrf.mxu1 }
 0x7a2   : > { %4494 = vst.msk [vmem:[%s10736_s16 + $0x58] sm:$0xff] %vm370_vm0, %v4462_v1  ;;  %v4460_v16 = vadd.f32 %v4360_v11, %v12911_v63  ;;  %v4381_v53 = vadd.f32 %v4704_v25, %v10728_v58  ;;  %v12926_v1 = vld [vmem:[#allocation30_spill] sm:$0xff] }
 0x7a3   : > { %v4372_v27 = vpop.f32.mrf.mxu1 }
 0x7a4   : > { %4492 = vst.msk [vmem:[%s10736_s16 + $0x48] sm:$0xff] %vm370_vm0, %v4460_v16  ;;  %v4465_v38 = vadd.f32 %v4381_v53, %v12912_v59  ;;  %v4373_v26 = vadd.f32 %v10728_v58, %v4372_v27  ;;  %v12927_v16 = vld [vmem:[#allocation28_spill] sm:$0xff] }
 0x7a5   : > { %v4705_v7 = vpop.f32.mrf.mxu1 }
 0x7a6   : > { %4497 = vst.msk [vmem:[%s10736_s16 + $0x70] sm:$0xff] %vm370_vm0, %v4465_v38  ;;  %v4463_v0 = vadd.f32 %v4373_v26, %v12913_v5  ;;  %v4384_v51 = vadd.f32 %v4705_v7, %v10728_v58  ;;  %v12928_v38 = vld [vmem:[#allocation33_spill] sm:$0xff] }
 0x7a7   : > { %v4375_v6 = vpop.f32.mrf.mxu1 }
 0x7a8   : > { %4495 = vst.msk [vmem:[%s10736_s16 + $0x60] sm:$0xff] %vm370_vm0, %v4463_v0  ;;  %v4466_v42 = vadd.f32 %v4384_v51, %v12914_v57  ;;  %v4376_v34 = vadd.f32 %v10728_v58, %v4375_v6  ;;  %v12929_v0 = vld [vmem:[#allocation31_spill] sm:$0xff] }
 0x7a9   : > { %v4708_v46 = vpop.f32.mrf.mxu1 }
 0x7aa   : > { %4498 = vst.msk [vmem:[%s10736_s16 + $0x78] sm:$0xff] %vm370_vm0, %v4466_v42  ;;  %v4464_v44 = vadd.f32 %v4376_v34, %v12915_v43  ;;  %v4397_v32 = vadd.f32 %v4708_v46, %v10728_v58  ;;  %v12930_v42 = vld [vmem:[#allocation34_spill] sm:$0xff]  ;;  %v12931_v43 = vld [vmem:[#allocation32_spill] sm:$0xff] }
 0x7ab   : > { %v4388_v48 = vpop.f32.mrf.mxu1 }
 0x7ac   : > { %4496 = vst.msk [vmem:[%s10736_s16 + $0x68] sm:$0xff] %vm370_vm0, %v4464_v44  ;;  %v4469_v36 = vadd.f32 %v4397_v32, %v12916_v49  ;;  %v4389_v30 = vadd.f32 %v10728_v58, %v4388_v48 }
 0x7ad   : > { %v4709_v19 = vpop.f32.mrf.mxu1 }
 0x7ae   : > { %4501 = vst.msk [vmem:[%s10736_s16 + $0x90] sm:$0xff] %vm370_vm0, %v4469_v36  ;;  %v4467_v47 = vadd.f32 %v4389_v30, %v12917_v37  ;;  %v4400_v24 = vadd.f32 %v4709_v19, %v10728_v58 }
 0x7af   : > { %v4391_v15 = vpop.f32.mrf.mxu1 }
 0x7b0   : > { %4499 = vst.msk [vmem:[%s10736_s16 + $0x80] sm:$0xff] %vm370_vm0, %v4467_v47  ;;  %v4470_v12 = vadd.f32 %v4400_v24, %v12918_v22  ;;  %v4392_v39 = vadd.f32 %v10728_v58, %v4391_v15 }
 0x7b1   : > { %v4712_v41 = vpop.f32.mrf.mxu1 }
 0x7b2   : > { %4502 = vst.msk [vmem:[%s10736_s16 + $0x98] sm:$0xff] %vm370_vm0, %v4470_v12  ;;  %v4468_v14 = vadd.f32 %v4392_v39, %v12919_v29  ;;  %v4413_v35 = vadd.f32 %v4712_v41, %v10728_v58 }
 0x7b3   : > { %v4404_v20 = vpop.f32.mrf.mxu1 }
 0x7b4   : > { %4500 = vst.msk [vmem:[%s10736_s16 + $0x88] sm:$0xff] %vm370_vm0, %v4468_v14  ;;  %v4473_v2 = vadd.f32 %v4413_v35, %v12920_v8  ;;  %v4405_v23 = vadd.f32 %v10728_v58, %v4404_v20 }
 0x7b5   : > { %v4713_v62 = vpop.f32.mrf.mxu1 }
 0x7b6   : > { %4505 = vst.msk [vmem:[%s10736_s16 + $0xb0] sm:$0xff] %vm370_vm0, %v4473_v2  ;;  %v4471_v4 = vadd.f32 %v4405_v23, %v12921_v13  ;;  %v4416_v45 = vadd.f32 %v4713_v62, %v10728_v58 }
 0x7b7   : > { %v4407_v10 = vpop.f32.mrf.mxu1 }
 0x7b8   : > { %4503 = vst.msk [vmem:[%s10736_s16 + $0xa0] sm:$0xff] %vm370_vm0, %v4471_v4  ;;  %v4474_v50 = vadd.f32 %v4416_v45, %v12922_v28  ;;  %v4408_v21 = vadd.f32 %v10728_v58, %v4407_v10 }
 0x7b9   : > { %v4716_v31 = vpop.f32.mrf.mxu1 }
 0x7ba   : > { %4506 = vst.msk [vmem:[%s10736_s16 + $0xb8] sm:$0xff] %vm370_vm0, %v4474_v50  ;;  %v4472_v52 = vadd.f32 %v4408_v21, %v12923_v17  ;;  %v4429_v55 = vadd.f32 %v4716_v31, %v10728_v58 }
 0x7bb   : > { %v4420_v18 = vpop.f32.mrf.mxu1 }
 0x7bc   : > { %4504 = vst.msk [vmem:[%s10736_s16 + $0xa8] sm:$0xff] %vm370_vm0, %v4472_v52  ;;  %v4477_v54 = vadd.f32 %v4429_v55, %v12924_v3  ;;  %v4421_v40 = vadd.f32 %v10728_v58, %v4420_v18 }
 0x7bd   : > { %v4717_v61 = vpop.f32.mrf.mxu1 }
 0x7be   : > { %4509 = vst.msk [vmem:[%s10736_s16 + $0xd0] sm:$0xff] %vm370_vm0, %v4477_v54  ;;  %v4475_v60 = vadd.f32 %v4421_v40, %v12925_v56  ;;  %v4432_v33 = vadd.f32 %v4717_v61, %v10728_v58 }
 0x7bf   : > { %v4423_v9 = vpop.f32.mrf.mxu1 }
 0x7c0   : > { %4507 = vst.msk [vmem:[%s10736_s16 + $0xc0] sm:$0xff] %vm370_vm0, %v4475_v60  ;;  %v4478_v11 = vadd.f32 %v4432_v33, %v12926_v1  ;;  %v4424_v25 = vadd.f32 %v10728_v58, %v4423_v9 }
 0x7c1   : > { %v4720_v63 = vpop.f32.mrf.mxu1 }
 0x7c2   : > { %4510 = vst.msk [vmem:[%s10736_s16 + $0xd8] sm:$0xff] %vm370_vm0, %v4478_v11  ;;  %v4476_v53 = vadd.f32 %v4424_v25, %v12927_v16  ;;  %v4445_v27 = vadd.f32 %v4720_v63, %v10728_v58 }
 0x7c3   : > { %v4436_v59 = vpop.f32.mrf.mxu1 }
 0x7c4   : > { %4508 = vst.msk [vmem:[%s10736_s16 + $0xc8] sm:$0xff] %vm370_vm0, %v4476_v53  ;;  %v4481_v26 = vadd.f32 %v4445_v27, %v12928_v38  ;;  %v4437_v7 = vadd.f32 %v10728_v58, %v4436_v59 }
 0x7c5   : > { %v4721_v5 = vpop.f32.mrf.mxu1 }
 0x7c6   : > { %4513 = vst.msk [vmem:[%s10736_s16 + $0xf0] sm:$0xff] %vm370_vm0, %v4481_v26  ;;  %v4479_v51 = vadd.f32 %v4437_v7, %v12929_v0  ;;  %v4448_v6 = vadd.f32 %v4721_v5, %v10728_v58 }
 0x7c7   : > { %v4439_v57 = vpop.f32.mrf.mxu1 }
 0x7c8   : > { %4511 = vst.msk [vmem:[%s10736_s16 + $0xe0] sm:$0xff] %vm370_vm0, %v4479_v51  ;;  %v4482_v34 = vadd.f32 %v4448_v6, %v12930_v42  ;;  %v4440_v46 = vadd.f32 %v10728_v58, %v4439_v57 }
 0x7ca   : > { %4514 = vst.msk [vmem:[%s10736_s16 + $0xf8] sm:$0xff] %vm370_vm0, %v4482_v34  ;;  %v4480_v44 = vadd.f32 %v4440_v46, %v12931_v43 }
 0x7cc   : > { %4512 = vst.msk [vmem:[%s10736_s16 + $0xe8] sm:$0xff] %vm370_vm0, %v4480_v44 }
 0x7cd PF: > { %s19_s30 = sadd.s32 1, %s4955_s30  }
 0x7ce   : > { %p16_p4 = scmp.ge.s32.totalorder %s19_s30, 4  }
 0x7d0   :  { %18 = sbr.rel (!%p16_p4) target bundleno = 1 (0x1), region = 88 }

</bundles_post_ra>
